<compile_context>
chip_gen: v6e
topology: v6e:2x2x1
jax: 0.10.0
libtpu: 0.0.40
codegen_flags: <defaults>
</compile_context>

<pallas_src>
import functools

import jax
import jax.numpy as jnp
from jax import lax
from jax.experimental import pallas as pl
from jax.experimental.pallas import tpu as pltpu

EPS = 1e-5  # nn.InstanceNorm2d default eps


# ---------------------------------------------------------------------------
# In-kernel helpers
# ---------------------------------------------------------------------------
def _conv3x3_refl(x3, w_ref, is_w0, is_wl, compute_dtype, early_cast):
    """Reflection-padded (pad=1) 3x3 conv, no bias.

    x3:     (H, W, C) f32 activation.
    w_ref:  (3, 3*C, C) weight ref; w_ref[dy] rows [kx*C:(kx+1)*C] hold the
            HWIO weight [dy, kx, :, :], matching the [left|center|right] concat.
    is_w0 / is_wl: (H*W, 1) bool masks for column w == 0 / w == W-1.
    Returns the f32 accumulator of shape (H*W, C).
    """
    H, W, C = x3.shape
    HW = H * W

    if early_cast:
        x3 = x3.astype(compute_dtype)   # single cast per conv

    # Reflection pad along H only: row x[1] on top, row x[H-2] on bottom.
    # Leading-dim concat = aligned full-plane copies (no sublane relayout).
    hp = jnp.concatenate([x3[1:2], x3, x3[H - 2:H - 1]], axis=0)   # (H+2, W, C)
    hpf = hp.reshape((H + 2) * W, C)

    acc = None
    for dy in range(3):
        lo = dy * W                          # aligned sublane slice start
        c_tap = hpf[lo:lo + HW]              # value from (h-1+dy, w)
        # Per-dy XLU sublane rotations; the wrapped rows (slice ends) are
        # overwritten by the reflection selects below, so the wrap is harmless.
        m_tap = pltpu.roll(c_tap, 1, 0)          # value from (h-1+dy, w-1)
        p_tap = pltpu.roll(c_tap, HW - 1, 0)     # value from (h-1+dy, w+1)
        left = jnp.where(is_w0, p_tap, m_tap)    # reflect at w == 0
        right = jnp.where(is_wl, m_tap, p_tap)   # reflect at w == W-1
        taps = jnp.concatenate([left, c_tap, right], axis=-1)      # (HW, 3C)
        if not early_cast:
            taps = taps.astype(compute_dtype)
        d = jnp.dot(taps, w_ref[dy], preferred_element_type=jnp.float32)
        acc = d if acc is None else acc + d
    return acc


def _instance_norm(y, inv_n, relu):
    """InstanceNorm2d (affine=False) on (H*W, C) f32, centered variance."""
    mean = jnp.sum(y, axis=0, keepdims=True) * inv_n
    d = y - mean
    var = jnp.sum(d * d, axis=0, keepdims=True) * inv_n
    out = d * lax.rsqrt(var + EPS)
    if relu:
        out = jnp.maximum(out, 0.0)
    return out


# ---------------------------------------------------------------------------
# Pallas kernel: one batch element per grid step, fully fused residual block
# ---------------------------------------------------------------------------
def _residual_block_kernel(x_ref, w1_ref, w2_ref, o_ref, *,
                           compute_dtype, early_cast):
    x3 = x_ref[0]                       # (H, W, C) NHWC tile for this batch elem
    H, W, C = x3.shape
    HW = H * W
    inv_n = jnp.float32(1.0 / HW)

    # (HW, 1) column-index masks for the W-axis reflection fix-up; they
    # lane-broadcast inside the selects (no full-width mask temporaries).
    col = lax.broadcasted_iota(jnp.int32, (H, W, 1), 1).reshape(HW, 1)
    is_w0 = col == 0
    is_wl = col == W - 1

    y = _conv3x3_refl(x3, w1_ref, is_w0, is_wl, compute_dtype, early_cast)
    y = _instance_norm(y, inv_n, relu=True)                        # IN + ReLU
    z = _conv3x3_refl(y.reshape(H, W, C), w2_ref, is_w0, is_wl,
                      compute_dtype, early_cast)                   # conv2
    z = _instance_norm(z, inv_n, relu=False)                       # IN

    out = x3.reshape(HW, C).astype(jnp.float32) + z                # residual
    o_ref[0] = out.reshape(H, W, C).astype(o_ref.dtype)


# ---------------------------------------------------------------------------
# Wrapper
# ---------------------------------------------------------------------------
def residual_block(x_nhwc, w1_hwio, w2_hwio, *, use_bf16=True):
    """x_nhwc: (N, H, W, C); w*_hwio: (3, 3, C, C).

    Conv biases are intentionally omitted: InstanceNorm2d(affine=False)
    subtracts the per-channel mean, so a per-channel bias cancels exactly.
    """
    N, H, W, C = x_nhwc.shape
    if H < 2 or W < 2:
        raise ValueError("ReflectionPad2d(1) requires H >= 2 and W >= 2")
    if W % 8 != 0:
        raise ValueError("W must be a multiple of 8 (TPU sublane alignment)")

    compute_dtype = jnp.bfloat16 if use_bf16 else jnp.float32
    # bf16 sublane packing: the flatten / dy-slices are layout no-ops only when
    # W % 16 == 0; otherwise keep pad/roll/select in f32 and cast the fused tap
    # block just before each MXU matmul (3 casts per conv instead of 1).
    early_cast = (jnp.dtype(compute_dtype).itemsize >= 4) or (W % 16 == 0)

    # Lane-dense channels: zero-pad C up to a multiple of 128.  The padded
    # channels stay exactly zero through the whole block and are sliced away.
    cp = max(128, -(-C // 128) * 128)
    if cp != C:
        x_in = jnp.pad(x_nhwc, ((0, 0), (0, 0), (0, 0), (0, cp - C)))
        w1 = jnp.pad(w1_hwio, ((0, 0), (0, 0), (0, cp - C), (0, cp - C)))
        w2 = jnp.pad(w2_hwio, ((0, 0), (0, 0), (0, cp - C), (0, cp - C)))
    else:
        x_in, w1, w2 = x_nhwc, w1_hwio, w2_hwio
    # Tap-fused weight layout: (3, 3, ci, co) -> (3, 3*ci, co) so w_ref[dy] is a
    # single (3C, C) MXU operand matching the [left|center|right] lane concat.
    w1 = w1.astype(compute_dtype).reshape(3, 3 * cp, cp)
    w2 = w2.astype(compute_dtype).reshape(3, 3 * cp, cp)

    # Rough per-grid-step VMEM estimate: double-buffered in/out tiles,
    # single-buffered weights, and in-kernel temporaries.
    act_isize = jnp.dtype(x_nhwc.dtype).itemsize
    w_isize = jnp.dtype(compute_dtype).itemsize
    vmem_est = (4 * H * W * cp * act_isize
                + 2 * 9 * cp * cp * w_isize
                + 7 * H * W * cp * 4)
    try:
        vmem_cap = int(pltpu.get_tpu_info().vmem_capacity_bytes)
    except Exception:
        vmem_cap = 64 * 1024 * 1024
    vmem_budget = (vmem_cap * 7) // 8          # leave compiler-scratch headroom
    vmem_limit = None
    if vmem_est > 16 * 1024 * 1024:
        vmem_limit = int(min(vmem_est * 5 // 4, vmem_budget))
    # TODO(synk): for v7x (2 TensorCores, 64 MiB VMEM) with N == 1 or planes
    # larger than ~32 MiB, add an H-tiled "parallel" grid axis with a 1-row
    # halo and split InstanceNorm into accumulate-stats / normalize phases.

    flops = N * 2 * (2 * 9 * H * W * cp * cp)                # two convs
    bytes_accessed = (2 * N * H * W * cp * act_isize         # x in + out
                      + 2 * 9 * cp * cp * w_isize)           # both weights
    cost = pl.CostEstimate(flops=flops, transcendentals=2 * N * cp,
                           bytes_accessed=bytes_accessed)

    kernel = functools.partial(_residual_block_kernel,
                               compute_dtype=compute_dtype,
                               early_cast=early_cast)

    def build(single_buffer_weights):
        if single_buffer_weights:
            # Constant block index across the grid -> double buffering buys
            # nothing; single-buffer to save VMEM.
            w_spec = pl.BlockSpec((3, 3 * cp, cp), lambda n: (0, 0, 0),
                                  pipeline_mode=pl.Buffered(1))
        else:
            w_spec = pl.BlockSpec((3, 3 * cp, cp), lambda n: (0, 0, 0))
        return pl.pallas_call(
            kernel,
            out_shape=jax.ShapeDtypeStruct((N, H, W, cp), x_nhwc.dtype),
            grid_spec=pltpu.PrefetchScalarGridSpec(
                num_scalar_prefetch=0,
                grid=(N,),
                in_specs=[
                    pl.BlockSpec((1, H, W, cp), lambda n: (n, 0, 0, 0)),
                    w_spec,
                    w_spec,
                ],
                out_specs=pl.BlockSpec((1, H, W, cp), lambda n: (n, 0, 0, 0)),
            ),
            compiler_params=pltpu.CompilerParams(
                dimension_semantics=("parallel",),
                vmem_limit_bytes=vmem_limit),
            cost_estimate=cost,
        )

    try:
        out = build(True)(x_in, w1, w2)       # weights single-buffered
    except Exception:
        out = build(False)(x_in, w1, w2)      # fallback: default pipelining
    return out[..., :C] if cp != C else out


# ---------------------------------------------------------------------------
# Pure-JAX reference (NCHW, mirrors the PyTorch module, WITH conv biases)
# ---------------------------------------------------------------------------
def residual_block_ref(x_nchw, w1_oihw, b1, w2_oihw, b2):
    def conv(x, w, b):
        xp = jnp.pad(x, ((0, 0), (0, 0), (1, 1), (1, 1)), mode="reflect")
        y = lax.conv_general_dilated(
            xp, w, window_strides=(1, 1), padding="VALID",
            dimension_numbers=("NCHW", "OIHW", "NCHW"))
        return y + b[None, :, None, None]

    def inorm(y):
        m = jnp.mean(y, axis=(2, 3), keepdims=True)
        v = jnp.mean((y - m) ** 2, axis=(2, 3), keepdims=True)
        return (y - m) / jnp.sqrt(v + EPS)

    y = jnp.maximum(inorm(conv(x_nchw, w1_oihw, b1)), 0.0)
    y = inorm(conv(y, w2_oihw, b2))
    return x_nchw + y


# ---------------------------------------------------------------------------
if __name__ == "__main__":
    N, C, H, W = 2, 4, 16, 16          # NCHW, matches nn.Conv2d(C, C, 3)
    key = jax.random.PRNGKey(0)
    kx, kw1, kb1, kw2, kb2 = jax.random.split(key, 5)

    x_nchw = jax.random.normal(kx, (N, C, H, W), jnp.float32)

    fan_in = C * 3 * 3
    bound = 1.0 / jnp.sqrt(fan_in)
    w1_oihw = jax.random.uniform(kw1, (C, C, 3, 3), jnp.float32, -bound, bound)
    b1 = jax.random.uniform(kb1, (C,), jnp.float32, -bound, bound)
    w2_oihw = jax.random.uniform(kw2, (C, C, 3, 3), jnp.float32, -bound, bound)
    b2 = jax.random.uniform(kb2, (C,), jnp.float32, -bound, bound)

    # Glue: NCHW -> NHWC; OIHW -> HWIO.  Biases are NOT given to the kernel:
    # they are exactly cancelled by InstanceNorm(affine=False) — verified
    # below against the biased reference.
    x_nhwc = jnp.transpose(x_nchw, (0, 2, 3, 1))
    w1_hwio = jnp.transpose(w1_oihw, (2, 3, 1, 0))
    w2_hwio = jnp.transpose(w2_oihw, (2, 3, 1, 0))

    ref = residual_block_ref(x_nchw, w1_oihw, b1, w2_oihw, b2)

    # 1) f32 MXU operands: must match the f32 reference tightly (validates the
    #    roll-based reflection padding, tap-fused matmul, fused IN stats,
    #    bias drop, and C-padding).
    out_f32 = jax.block_until_ready(
        residual_block(x_nhwc, w1_hwio, w2_hwio, use_bf16=False))
    out_f32 = jnp.transpose(out_f32, (0, 3, 1, 2))
    assert out_f32.shape == (N, C, H, W)
    assert jnp.allclose(out_f32, ref, rtol=1e-3, atol=1e-3), (
        float(jnp.max(jnp.abs(out_f32 - ref))))

    # 2) Default bf16 MXU operands (f32 accumulate): ~1e-2 deviation from the
    #    pure-f32 reference is expected.
    out_bf16 = jax.block_until_ready(residual_block(x_nhwc, w1_hwio, w2_hwio))
    out_bf16 = jnp.transpose(out_bf16, (0, 3, 1, 2))
    assert out_bf16.shape == (N, C, H, W)
    assert jnp.allclose(out_bf16, ref, rtol=2e-2, atol=2e-2), (
        float(jnp.max(jnp.abs(out_bf16 - ref))))

    print("KERNEL_OK")
</pallas_src>

<mosaic_0001>
module attributes {stable_mosaic.version = 11 : i64} {
  func.func @_residual_block_kernel(%arg0: i32, %arg1: memref<1x16x16x128xf32, #tpu.memory_space<vmem>>, %arg2: memref<3x384x128xf32, #tpu.memory_space<vmem>>, %arg3: memref<3x384x128xf32, #tpu.memory_space<vmem>>, %arg4: memref<1x16x16x128xf32, #tpu.memory_space<vmem>>) attributes {dimension_semantics = [#tpu.dimension_semantics<parallel>], iteration_bounds = array<i64: 2>, scalar_prefetch = 0 : i64, scratch_operands = 0 : i64, tpu.core_type = #tpu.core_type<tc>, window_params = [{transform_indices = @transform_0, window_bounds = array<i64: 1, 16, 16, 128>}, {pipeline_mode = #tpu.pipeline_mode<synchronous>, transform_indices = @transform_1, window_bounds = array<i64: 3, 384, 128>}, {pipeline_mode = #tpu.pipeline_mode<synchronous>, transform_indices = @transform_2, window_bounds = array<i64: 3, 384, 128>}, {transform_indices = @transform_3, window_bounds = array<i64: 1, 16, 16, 128>}]} {
    %c0 = arith.constant 0 : index
    %c0_0 = arith.constant 0 : index
    %c0_1 = arith.constant 0 : index
    %c0_2 = arith.constant 0 : index
    %0 = vector.load %arg1[%c0, %c0_0, %c0_1, %c0_2] : memref<1x16x16x128xf32, #tpu.memory_space<vmem>>, vector<1x16x16x128xf32>
    %1 = vector.shape_cast %0 : vector<1x16x16x128xf32> to vector<16x16x128xf32>
    %2 = tpu.iota {dimensions = array<i32: 1>} : vector<16x16x1xi32>
    %3 = vector.shape_cast %2 : vector<16x16x1xi32> to vector<256x1xi32>
    %c0_i32 = arith.constant 0 : i32
    %4 = vector.broadcast %c0_i32 : i32 to vector<256x1xi32>
    %5 = arith.cmpi eq, %3, %4 : vector<256x1xi32>
    %c15_i32 = arith.constant 15 : i32
    %6 = vector.broadcast %c15_i32 : i32 to vector<256x1xi32>
    %7 = arith.cmpi eq, %3, %6 : vector<256x1xi32>
    %8 = vector.extract_strided_slice %1 {offsets = [1, 0, 0], sizes = [1, 16, 128], strides = [1, 1, 1]} : vector<16x16x128xf32> to vector<1x16x128xf32>
    %9 = vector.extract_strided_slice %1 {offsets = [14, 0, 0], sizes = [1, 16, 128], strides = [1, 1, 1]} : vector<16x16x128xf32> to vector<1x16x128xf32>
    %10 = tpu.concatenate %8, %1, %9 in 0 : vector<1x16x128xf32>, vector<16x16x128xf32>, vector<1x16x128xf32> -> vector<18x16x128xf32>
    %11 = vector.shape_cast %10 : vector<18x16x128xf32> to vector<288x128xf32>
    %12 = vector.extract_strided_slice %11 {offsets = [0, 0], sizes = [256, 128], strides = [1, 1]} : vector<288x128xf32> to vector<256x128xf32>
    %c1_i32 = arith.constant 1 : i32
    %13 = tpu.dynamic_rotate %12 by %c1_i32 dim 0 : vector<256x128xf32>, i32 -> vector<256x128xf32>
    %c255_i32 = arith.constant 255 : i32
    %14 = tpu.dynamic_rotate %12 by %c255_i32 dim 0 : vector<256x128xf32>, i32 -> vector<256x128xf32>
    %15 = vector.shape_cast %5 : vector<256x1xi1> to vector<256x1xi1>
    %16 = vector.broadcast %15 : vector<256x1xi1> to vector<256x128xi1>
    %17 = arith.select %16, %14, %13 : vector<256x128xi1>, vector<256x128xf32>
    %18 = vector.shape_cast %7 : vector<256x1xi1> to vector<256x1xi1>
    %19 = vector.broadcast %18 : vector<256x1xi1> to vector<256x128xi1>
    %20 = arith.select %19, %13, %14 : vector<256x128xi1>, vector<256x128xf32>
    %21 = tpu.concatenate %17, %12, %20 in 1 : vector<256x128xf32>, vector<256x128xf32>, vector<256x128xf32> -> vector<256x384xf32>
    %c0_3 = arith.constant 0 : index
    %c0_4 = arith.constant 0 : index
    %c0_5 = arith.constant 0 : index
    %22 = vector.load %arg2[%c0_3, %c0_4, %c0_5] : memref<3x384x128xf32, #tpu.memory_space<vmem>>, vector<1x384x128xf32>
    %23 = vector.shape_cast %22 : vector<1x384x128xf32> to vector<384x128xf32>
    %cst = arith.constant dense<0.000000e+00> : vector<256x128xf32>
    %24 = tpu.matmul %21, %23, %cst {dimension_numbers = #tpu.dot_dimension_numbers<[1], [0], [0], [1], [0, 0, 1, 1], [], []>} : vector<256x384xf32>, vector<384x128xf32>, vector<256x128xf32> -> vector<256x128xf32>
    %25 = vector.extract_strided_slice %11 {offsets = [16, 0], sizes = [256, 128], strides = [1, 1]} : vector<288x128xf32> to vector<256x128xf32>
    %c1_i32_6 = arith.constant 1 : i32
    %26 = tpu.dynamic_rotate %25 by %c1_i32_6 dim 0 : vector<256x128xf32>, i32 -> vector<256x128xf32>
    %c255_i32_7 = arith.constant 255 : i32
    %27 = tpu.dynamic_rotate %25 by %c255_i32_7 dim 0 : vector<256x128xf32>, i32 -> vector<256x128xf32>
    %28 = vector.shape_cast %5 : vector<256x1xi1> to vector<256x1xi1>
    %29 = vector.broadcast %28 : vector<256x1xi1> to vector<256x128xi1>
    %30 = arith.select %29, %27, %26 : vector<256x128xi1>, vector<256x128xf32>
    %31 = vector.shape_cast %7 : vector<256x1xi1> to vector<256x1xi1>
    %32 = vector.broadcast %31 : vector<256x1xi1> to vector<256x128xi1>
    %33 = arith.select %32, %26, %27 : vector<256x128xi1>, vector<256x128xf32>
    %34 = tpu.concatenate %30, %25, %33 in 1 : vector<256x128xf32>, vector<256x128xf32>, vector<256x128xf32> -> vector<256x384xf32>
    %c1 = arith.constant 1 : index
    %c0_8 = arith.constant 0 : index
    %c0_9 = arith.constant 0 : index
    %35 = vector.load %arg2[%c1, %c0_8, %c0_9] : memref<3x384x128xf32, #tpu.memory_space<vmem>>, vector<1x384x128xf32>
    %36 = vector.shape_cast %35 : vector<1x384x128xf32> to vector<384x128xf32>
    %cst_10 = arith.constant dense<0.000000e+00> : vector<256x128xf32>
    %37 = tpu.matmul %34, %36, %cst_10 {dimension_numbers = #tpu.dot_dimension_numbers<[1], [0], [0], [1], [0, 0, 1, 1], [], []>} : vector<256x384xf32>, vector<384x128xf32>, vector<256x128xf32> -> vector<256x128xf32>
    %38 = arith.addf %24, %37 : vector<256x128xf32>
    %39 = vector.extract_strided_slice %11 {offsets = [32, 0], sizes = [256, 128], strides = [1, 1]} : vector<288x128xf32> to vector<256x128xf32>
    %c1_i32_11 = arith.constant 1 : i32
    %40 = tpu.dynamic_rotate %39 by %c1_i32_11 dim 0 : vector<256x128xf32>, i32 -> vector<256x128xf32>
    %c255_i32_12 = arith.constant 255 : i32
    %41 = tpu.dynamic_rotate %39 by %c255_i32_12 dim 0 : vector<256x128xf32>, i32 -> vector<256x128xf32>
    %42 = vector.shape_cast %5 : vector<256x1xi1> to vector<256x1xi1>
    %43 = vector.broadcast %42 : vector<256x1xi1> to vector<256x128xi1>
    %44 = arith.select %43, %41, %40 : vector<256x128xi1>, vector<256x128xf32>
    %45 = vector.shape_cast %7 : vector<256x1xi1> to vector<256x1xi1>
    %46 = vector.broadcast %45 : vector<256x1xi1> to vector<256x128xi1>
    %47 = arith.select %46, %40, %41 : vector<256x128xi1>, vector<256x128xf32>
    %48 = tpu.concatenate %44, %39, %47 in 1 : vector<256x128xf32>, vector<256x128xf32>, vector<256x128xf32> -> vector<256x384xf32>
    %c2 = arith.constant 2 : index
    %c0_13 = arith.constant 0 : index
    %c0_14 = arith.constant 0 : index
    %49 = vector.load %arg2[%c2, %c0_13, %c0_14] : memref<3x384x128xf32, #tpu.memory_space<vmem>>, vector<1x384x128xf32>
    %50 = vector.shape_cast %49 : vector<1x384x128xf32> to vector<384x128xf32>
    %cst_15 = arith.constant dense<0.000000e+00> : vector<256x128xf32>
    %51 = tpu.matmul %48, %50, %cst_15 {dimension_numbers = #tpu.dot_dimension_numbers<[1], [0], [0], [1], [0, 0, 1, 1], [], []>} : vector<256x384xf32>, vector<384x128xf32>, vector<256x128xf32> -> vector<256x128xf32>
    %52 = arith.addf %38, %51 : vector<256x128xf32>
    %cst_16 = arith.constant dense<0.000000e+00> : vector<128xf32>
    %53 = vector.multi_reduction <add>, %52, %cst_16 [0] : vector<256x128xf32> to vector<128xf32>
    %54 = vector.shape_cast %53 : vector<128xf32> to vector<1x128xf32>
    %cst_17 = arith.constant 3.906250e-03 : f32
    %55 = vector.broadcast %cst_17 : f32 to vector<1x128xf32>
    %56 = arith.mulf %54, %55 : vector<1x128xf32>
    %57 = vector.broadcast %56 : vector<1x128xf32> to vector<256x128xf32>
    %58 = arith.subf %52, %57 : vector<256x128xf32>
    %59 = arith.mulf %58, %58 : vector<256x128xf32>
    %cst_18 = arith.constant dense<0.000000e+00> : vector<128xf32>
    %60 = vector.multi_reduction <add>, %59, %cst_18 [0] : vector<256x128xf32> to vector<128xf32>
    %61 = vector.shape_cast %60 : vector<128xf32> to vector<1x128xf32>
    %cst_19 = arith.constant 3.906250e-03 : f32
    %62 = vector.broadcast %cst_19 : f32 to vector<1x128xf32>
    %63 = arith.mulf %61, %62 : vector<1x128xf32>
    %cst_20 = arith.constant 9.99999974E-6 : f32
    %64 = vector.broadcast %cst_20 : f32 to vector<1x128xf32>
    %65 = arith.addf %63, %64 : vector<1x128xf32>
    %66 = math.rsqrt %65 : vector<1x128xf32>
    %67 = vector.broadcast %66 : vector<1x128xf32> to vector<256x128xf32>
    %68 = arith.mulf %58, %67 : vector<256x128xf32>
    %cst_21 = arith.constant 0.000000e+00 : f32
    %69 = vector.broadcast %cst_21 : f32 to vector<256x128xf32>
    %70 = arith.maximumf %68, %69 : vector<256x128xf32>
    %71 = vector.shape_cast %70 : vector<256x128xf32> to vector<16x16x128xf32>
    %72 = vector.extract_strided_slice %71 {offsets = [1, 0, 0], sizes = [1, 16, 128], strides = [1, 1, 1]} : vector<16x16x128xf32> to vector<1x16x128xf32>
    %73 = vector.extract_strided_slice %71 {offsets = [14, 0, 0], sizes = [1, 16, 128], strides = [1, 1, 1]} : vector<16x16x128xf32> to vector<1x16x128xf32>
    %74 = tpu.concatenate %72, %71, %73 in 0 : vector<1x16x128xf32>, vector<16x16x128xf32>, vector<1x16x128xf32> -> vector<18x16x128xf32>
    %75 = vector.shape_cast %74 : vector<18x16x128xf32> to vector<288x128xf32>
    %76 = vector.extract_strided_slice %75 {offsets = [0, 0], sizes = [256, 128], strides = [1, 1]} : vector<288x128xf32> to vector<256x128xf32>
    %c1_i32_22 = arith.constant 1 : i32
    %77 = tpu.dynamic_rotate %76 by %c1_i32_22 dim 0 : vector<256x128xf32>, i32 -> vector<256x128xf32>
    %c255_i32_23 = arith.constant 255 : i32
    %78 = tpu.dynamic_rotate %76 by %c255_i32_23 dim 0 : vector<256x128xf32>, i32 -> vector<256x128xf32>
    %79 = vector.shape_cast %5 : vector<256x1xi1> to vector<256x1xi1>
    %80 = vector.broadcast %79 : vector<256x1xi1> to vector<256x128xi1>
    %81 = arith.select %80, %78, %77 : vector<256x128xi1>, vector<256x128xf32>
    %82 = vector.shape_cast %7 : vector<256x1xi1> to vector<256x1xi1>
    %83 = vector.broadcast %82 : vector<256x1xi1> to vector<256x128xi1>
    %84 = arith.select %83, %77, %78 : vector<256x128xi1>, vector<256x128xf32>
    %85 = tpu.concatenate %81, %76, %84 in 1 : vector<256x128xf32>, vector<256x128xf32>, vector<256x128xf32> -> vector<256x384xf32>
    %c0_24 = arith.constant 0 : index
    %c0_25 = arith.constant 0 : index
    %c0_26 = arith.constant 0 : index
    %86 = vector.load %arg3[%c0_24, %c0_25, %c0_26] : memref<3x384x128xf32, #tpu.memory_space<vmem>>, vector<1x384x128xf32>
    %87 = vector.shape_cast %86 : vector<1x384x128xf32> to vector<384x128xf32>
    %cst_27 = arith.constant dense<0.000000e+00> : vector<256x128xf32>
    %88 = tpu.matmul %85, %87, %cst_27 {dimension_numbers = #tpu.dot_dimension_numbers<[1], [0], [0], [1], [0, 0, 1, 1], [], []>} : vector<256x384xf32>, vector<384x128xf32>, vector<256x128xf32> -> vector<256x128xf32>
    %89 = vector.extract_strided_slice %75 {offsets = [16, 0], sizes = [256, 128], strides = [1, 1]} : vector<288x128xf32> to vector<256x128xf32>
    %c1_i32_28 = arith.constant 1 : i32
    %90 = tpu.dynamic_rotate %89 by %c1_i32_28 dim 0 : vector<256x128xf32>, i32 -> vector<256x128xf32>
    %c255_i32_29 = arith.constant 255 : i32
    %91 = tpu.dynamic_rotate %89 by %c255_i32_29 dim 0 : vector<256x128xf32>, i32 -> vector<256x128xf32>
    %92 = vector.shape_cast %5 : vector<256x1xi1> to vector<256x1xi1>
    %93 = vector.broadcast %92 : vector<256x1xi1> to vector<256x128xi1>
    %94 = arith.select %93, %91, %90 : vector<256x128xi1>, vector<256x128xf32>
    %95 = vector.shape_cast %7 : vector<256x1xi1> to vector<256x1xi1>
    %96 = vector.broadcast %95 : vector<256x1xi1> to vector<256x128xi1>
    %97 = arith.select %96, %90, %91 : vector<256x128xi1>, vector<256x128xf32>
    %98 = tpu.concatenate %94, %89, %97 in 1 : vector<256x128xf32>, vector<256x128xf32>, vector<256x128xf32> -> vector<256x384xf32>
    %c1_30 = arith.constant 1 : index
    %c0_31 = arith.constant 0 : index
    %c0_32 = arith.constant 0 : index
    %99 = vector.load %arg3[%c1_30, %c0_31, %c0_32] : memref<3x384x128xf32, #tpu.memory_space<vmem>>, vector<1x384x128xf32>
    %100 = vector.shape_cast %99 : vector<1x384x128xf32> to vector<384x128xf32>
    %cst_33 = arith.constant dense<0.000000e+00> : vector<256x128xf32>
    %101 = tpu.matmul %98, %100, %cst_33 {dimension_numbers = #tpu.dot_dimension_numbers<[1], [0], [0], [1], [0, 0, 1, 1], [], []>} : vector<256x384xf32>, vector<384x128xf32>, vector<256x128xf32> -> vector<256x128xf32>
    %102 = arith.addf %88, %101 : vector<256x128xf32>
    %103 = vector.extract_strided_slice %75 {offsets = [32, 0], sizes = [256, 128], strides = [1, 1]} : vector<288x128xf32> to vector<256x128xf32>
    %c1_i32_34 = arith.constant 1 : i32
    %104 = tpu.dynamic_rotate %103 by %c1_i32_34 dim 0 : vector<256x128xf32>, i32 -> vector<256x128xf32>
    %c255_i32_35 = arith.constant 255 : i32
    %105 = tpu.dynamic_rotate %103 by %c255_i32_35 dim 0 : vector<256x128xf32>, i32 -> vector<256x128xf32>
    %106 = vector.shape_cast %5 : vector<256x1xi1> to vector<256x1xi1>
    %107 = vector.broadcast %106 : vector<256x1xi1> to vector<256x128xi1>
    %108 = arith.select %107, %105, %104 : vector<256x128xi1>, vector<256x128xf32>
    %109 = vector.shape_cast %7 : vector<256x1xi1> to vector<256x1xi1>
    %110 = vector.broadcast %109 : vector<256x1xi1> to vector<256x128xi1>
    %111 = arith.select %110, %104, %105 : vector<256x128xi1>, vector<256x128xf32>
    %112 = tpu.concatenate %108, %103, %111 in 1 : vector<256x128xf32>, vector<256x128xf32>, vector<256x128xf32> -> vector<256x384xf32>
    %c2_36 = arith.constant 2 : index
    %c0_37 = arith.constant 0 : index
    %c0_38 = arith.constant 0 : index
    %113 = vector.load %arg3[%c2_36, %c0_37, %c0_38] : memref<3x384x128xf32, #tpu.memory_space<vmem>>, vector<1x384x128xf32>
    %114 = vector.shape_cast %113 : vector<1x384x128xf32> to vector<384x128xf32>
    %cst_39 = arith.constant dense<0.000000e+00> : vector<256x128xf32>
    %115 = tpu.matmul %112, %114, %cst_39 {dimension_numbers = #tpu.dot_dimension_numbers<[1], [0], [0], [1], [0, 0, 1, 1], [], []>} : vector<256x384xf32>, vector<384x128xf32>, vector<256x128xf32> -> vector<256x128xf32>
    %116 = arith.addf %102, %115 : vector<256x128xf32>
    %cst_40 = arith.constant dense<0.000000e+00> : vector<128xf32>
    %117 = vector.multi_reduction <add>, %116, %cst_40 [0] : vector<256x128xf32> to vector<128xf32>
    %118 = vector.shape_cast %117 : vector<128xf32> to vector<1x128xf32>
    %cst_41 = arith.constant 3.906250e-03 : f32
    %119 = vector.broadcast %cst_41 : f32 to vector<1x128xf32>
    %120 = arith.mulf %118, %119 : vector<1x128xf32>
    %121 = vector.broadcast %120 : vector<1x128xf32> to vector<256x128xf32>
    %122 = arith.subf %116, %121 : vector<256x128xf32>
    %123 = arith.mulf %122, %122 : vector<256x128xf32>
    %cst_42 = arith.constant dense<0.000000e+00> : vector<128xf32>
    %124 = vector.multi_reduction <add>, %123, %cst_42 [0] : vector<256x128xf32> to vector<128xf32>
    %125 = vector.shape_cast %124 : vector<128xf32> to vector<1x128xf32>
    %cst_43 = arith.constant 3.906250e-03 : f32
    %126 = vector.broadcast %cst_43 : f32 to vector<1x128xf32>
    %127 = arith.mulf %125, %126 : vector<1x128xf32>
    %cst_44 = arith.constant 9.99999974E-6 : f32
    %128 = vector.broadcast %cst_44 : f32 to vector<1x128xf32>
    %129 = arith.addf %127, %128 : vector<1x128xf32>
    %130 = math.rsqrt %129 : vector<1x128xf32>
    %131 = vector.broadcast %130 : vector<1x128xf32> to vector<256x128xf32>
    %132 = arith.mulf %122, %131 : vector<256x128xf32>
    %133 = vector.shape_cast %1 : vector<16x16x128xf32> to vector<256x128xf32>
    %134 = arith.addf %133, %132 : vector<256x128xf32>
    %135 = vector.shape_cast %134 : vector<256x128xf32> to vector<16x16x128xf32>
    %c0_45 = arith.constant 0 : index
    %c0_46 = arith.constant 0 : index
    %c0_47 = arith.constant 0 : index
    %c0_48 = arith.constant 0 : index
    %136 = vector.load %arg4[%c0_45, %c0_46, %c0_47, %c0_48] : memref<1x16x16x128xf32, #tpu.memory_space<vmem>>, vector<1x16x16x128xf32>
    %137 = vector.shape_cast %136 : vector<1x16x16x128xf32> to vector<16x16x128xf32>
    %138 = vector.shape_cast %135 : vector<16x16x128xf32> to vector<1x16x16x128xf32>
    tpu.vector_store %arg4[%c0_45, %c0_46, %c0_47, %c0_48], %138 {strides = array<i32>} : memref<1x16x16x128xf32, #tpu.memory_space<vmem>>, vector<1x16x16x128xf32>,
    return
  }
  func.func @transform_0(%arg0: i32) -> (i32, i32, i32, i32) {
    %c0_i32 = arith.constant 0 : i32
    %c0_i32_0 = arith.constant 0 : i32
    %c0_i32_1 = arith.constant 0 : i32
    %c0_i32_2 = arith.constant 0 : i32
    return %arg0, %c0_i32, %c0_i32_0, %c0_i32_1 : i32, i32, i32, i32
  }
  func.func @transform_1(%arg0: i32) -> (i32, i32, i32) {
    %c0_i32 = arith.constant 0 : i32
    %c0_i32_0 = arith.constant 0 : i32
    %c0_i32_1 = arith.constant 0 : i32
    %c0_i32_2 = arith.constant 0 : i32
    return %c0_i32, %c0_i32_0, %c0_i32_1 : i32, i32, i32
  }
  func.func @transform_2(%arg0: i32) -> (i32, i32, i32) {
    %c0_i32 = arith.constant 0 : i32
    %c0_i32_0 = arith.constant 0 : i32
    %c0_i32_1 = arith.constant 0 : i32
    %c0_i32_2 = arith.constant 0 : i32
    return %c0_i32, %c0_i32_0, %c0_i32_1 : i32, i32, i32
  }
  func.func @transform_3(%arg0: i32) -> (i32, i32, i32, i32) {
    %c0_i32 = arith.constant 0 : i32
    %c0_i32_0 = arith.constant 0 : i32
    %c0_i32_1 = arith.constant 0 : i32
    %c0_i32_2 = arith.constant 0 : i32
    return %arg0, %c0_i32, %c0_i32_0, %c0_i32_1 : i32, i32, i32, i32
  }
}

module attributes {stable_mosaic.version = 11 : i64} {
  func.func @_residual_block_kernel(%arg0: i32, %arg1: memref<1x16x16x128xf32, #tpu.memory_space<vmem>>, %arg2: memref<3x384x128xf32, #tpu.memory_space<vmem>>, %arg3: memref<3x384x128xf32, #tpu.memory_space<vmem>>, %arg4: memref<1x16x16x128xf32, #tpu.memory_space<vmem>>) attributes {dimension_semantics = [#tpu.dimension_semantics<parallel>], iteration_bounds = array<i64: 2>, scalar_prefetch = 0 : i64, scratch_operands = 0 : i64, tpu.core_type = #tpu.core_type<tc>, window_params = [{transform_indices = @transform_0, window_bounds = array<i64: 1, 16, 16, 128>}, {pipeline_mode = #tpu.pipeline_mode<synchronous>, transform_indices = @transform_1, window_bounds = array<i64: 3, 384, 128>}, {pipeline_mode = #tpu.pipeline_mode<synchronous>, transform_indices = @transform_2, window_bounds = array<i64: 3, 384, 128>}, {transform_indices = @transform_3, window_bounds = array<i64: 1, 16, 16, 128>}]} {
    %c0 = arith.constant 0 : index
    %c0_0 = arith.constant 0 : index
    %c0_1 = arith.constant 0 : index
    %c0_2 = arith.constant 0 : index
    %0 = vector.load %arg1[%c0, %c0_0, %c0_1, %c0_2] : memref<1x16x16x128xf32, #tpu.memory_space<vmem>>, vector<1x16x16x128xf32>
    %1 = vector.shape_cast %0 : vector<1x16x16x128xf32> to vector<16x16x128xf32>
    %2 = tpu.iota {dimensions = array<i32: 1>} : vector<16x16x1xi32>
    %3 = vector.shape_cast %2 : vector<16x16x1xi32> to vector<256x1xi32>
    %c0_i32 = arith.constant 0 : i32
    %4 = vector.broadcast %c0_i32 : i32 to vector<256x1xi32>
    %5 = arith.cmpi eq, %3, %4 : vector<256x1xi32>
    %c15_i32 = arith.constant 15 : i32
    %6 = vector.broadcast %c15_i32 : i32 to vector<256x1xi32>
    %7 = arith.cmpi eq, %3, %6 : vector<256x1xi32>
    %8 = vector.extract_strided_slice %1 {offsets = [1, 0, 0], sizes = [1, 16, 128], strides = [1, 1, 1]} : vector<16x16x128xf32> to vector<1x16x128xf32>
    %9 = vector.extract_strided_slice %1 {offsets = [14, 0, 0], sizes = [1, 16, 128], strides = [1, 1, 1]} : vector<16x16x128xf32> to vector<1x16x128xf32>
    %10 = tpu.concatenate %8, %1, %9 in 0 : vector<1x16x128xf32>, vector<16x16x128xf32>, vector<1x16x128xf32> -> vector<18x16x128xf32>
    %11 = vector.shape_cast %10 : vector<18x16x128xf32> to vector<288x128xf32>
    %12 = vector.extract_strided_slice %11 {offsets = [0, 0], sizes = [256, 128], strides = [1, 1]} : vector<288x128xf32> to vector<256x128xf32>
    %c1_i32 = arith.constant 1 : i32
    %13 = tpu.dynamic_rotate %12 by %c1_i32 dim 0 : vector<256x128xf32>, i32 -> vector<256x128xf32>
    %c255_i32 = arith.constant 255 : i32
    %14 = tpu.dynamic_rotate %12 by %c255_i32 dim 0 : vector<256x128xf32>, i32 -> vector<256x128xf32>
    %15 = vector.shape_cast %5 : vector<256x1xi1> to vector<256x1xi1>
    %16 = vector.broadcast %15 : vector<256x1xi1> to vector<256x128xi1>
    %17 = arith.select %16, %14, %13 : vector<256x128xi1>, vector<256x128xf32>
    %18 = vector.shape_cast %7 : vector<256x1xi1> to vector<256x1xi1>
    %19 = vector.broadcast %18 : vector<256x1xi1> to vector<256x128xi1>
    %20 = arith.select %19, %13, %14 : vector<256x128xi1>, vector<256x128xf32>
    %21 = tpu.concatenate %17, %12, %20 in 1 : vector<256x128xf32>, vector<256x128xf32>, vector<256x128xf32> -> vector<256x384xf32>
    %c0_3 = arith.constant 0 : index
    %c0_4 = arith.constant 0 : index
    %c0_5 = arith.constant 0 : index
    %22 = vector.load %arg2[%c0_3, %c0_4, %c0_5] : memref<3x384x128xf32, #tpu.memory_space<vmem>>, vector<1x384x128xf32>
    %23 = vector.shape_cast %22 : vector<1x384x128xf32> to vector<384x128xf32>
    %cst = arith.constant dense<0.000000e+00> : vector<256x128xf32>
    %24 = tpu.matmul %21, %23, %cst {dimension_numbers = #tpu.dot_dimension_numbers<[1], [0], [0], [1], [0, 0, 1, 1], [], []>} : vector<256x384xf32>, vector<384x128xf32>, vector<256x128xf32> -> vector<256x128xf32>
    %25 = vector.extract_strided_slice %11 {offsets = [16, 0], sizes = [256, 128], strides = [1, 1]} : vector<288x128xf32> to vector<256x128xf32>
    %c1_i32_6 = arith.constant 1 : i32
    %26 = tpu.dynamic_rotate %25 by %c1_i32_6 dim 0 : vector<256x128xf32>, i32 -> vector<256x128xf32>
    %c255_i32_7 = arith.constant 255 : i32
    %27 = tpu.dynamic_rotate %25 by %c255_i32_7 dim 0 : vector<256x128xf32>, i32 -> vector<256x128xf32>
    %28 = vector.shape_cast %5 : vector<256x1xi1> to vector<256x1xi1>
    %29 = vector.broadcast %28 : vector<256x1xi1> to vector<256x128xi1>
    %30 = arith.select %29, %27, %26 : vector<256x128xi1>, vector<256x128xf32>
    %31 = vector.shape_cast %7 : vector<256x1xi1> to vector<256x1xi1>
    %32 = vector.broadcast %31 : vector<256x1xi1> to vector<256x128xi1>
    %33 = arith.select %32, %26, %27 : vector<256x128xi1>, vector<256x128xf32>
    %34 = tpu.concatenate %30, %25, %33 in 1 : vector<256x128xf32>, vector<256x128xf32>, vector<256x128xf32> -> vector<256x384xf32>
    %c1 = arith.constant 1 : index
    %c0_8 = arith.constant 0 : index
    %c0_9 = arith.constant 0 : index
    %35 = vector.load %arg2[%c1, %c0_8, %c0_9] : memref<3x384x128xf32, #tpu.memory_space<vmem>>, vector<1x384x128xf32>
    %36 = vector.shape_cast %35 : vector<1x384x128xf32> to vector<384x128xf32>
    %cst_10 = arith.constant dense<0.000000e+00> : vector<256x128xf32>
    %37 = tpu.matmul %34, %36, %cst_10 {dimension_numbers = #tpu.dot_dimension_numbers<[1], [0], [0], [1], [0, 0, 1, 1], [], []>} : vector<256x384xf32>, vector<384x128xf32>, vector<256x128xf32> -> vector<256x128xf32>
    %38 = arith.addf %24, %37 : vector<256x128xf32>
    %39 = vector.extract_strided_slice %11 {offsets = [32, 0], sizes = [256, 128], strides = [1, 1]} : vector<288x128xf32> to vector<256x128xf32>
    %c1_i32_11 = arith.constant 1 : i32
    %40 = tpu.dynamic_rotate %39 by %c1_i32_11 dim 0 : vector<256x128xf32>, i32 -> vector<256x128xf32>
    %c255_i32_12 = arith.constant 255 : i32
    %41 = tpu.dynamic_rotate %39 by %c255_i32_12 dim 0 : vector<256x128xf32>, i32 -> vector<256x128xf32>
    %42 = vector.shape_cast %5 : vector<256x1xi1> to vector<256x1xi1>
    %43 = vector.broadcast %42 : vector<256x1xi1> to vector<256x128xi1>
    %44 = arith.select %43, %41, %40 : vector<256x128xi1>, vector<256x128xf32>
    %45 = vector.shape_cast %7 : vector<256x1xi1> to vector<256x1xi1>
    %46 = vector.broadcast %45 : vector<256x1xi1> to vector<256x128xi1>
    %47 = arith.select %46, %40, %41 : vector<256x128xi1>, vector<256x128xf32>
    %48 = tpu.concatenate %44, %39, %47 in 1 : vector<256x128xf32>, vector<256x128xf32>, vector<256x128xf32> -> vector<256x384xf32>
    %c2 = arith.constant 2 : index
    %c0_13 = arith.constant 0 : index
    %c0_14 = arith.constant 0 : index
    %49 = vector.load %arg2[%c2, %c0_13, %c0_14] : memref<3x384x128xf32, #tpu.memory_space<vmem>>, vector<1x384x128xf32>
    %50 = vector.shape_cast %49 : vector<1x384x128xf32> to vector<384x128xf32>
    %cst_15 = arith.constant dense<0.000000e+00> : vector<256x128xf32>
    %51 = tpu.matmul %48, %50, %cst_15 {dimension_numbers = #tpu.dot_dimension_numbers<[1], [0], [0], [1], [0, 0, 1, 1], [], []>} : vector<256x384xf32>, vector<384x128xf32>, vector<256x128xf32> -> vector<256x128xf32>
    %52 = arith.addf %38, %51 : vector<256x128xf32>
    %cst_16 = arith.constant dense<0.000000e+00> : vector<128xf32>
    %53 = vector.multi_reduction <add>, %52, %cst_16 [0] : vector<256x128xf32> to vector<128xf32>
    %54 = vector.shape_cast %53 : vector<128xf32> to vector<1x128xf32>
    %cst_17 = arith.constant 3.906250e-03 : f32
    %55 = vector.broadcast %cst_17 : f32 to vector<1x128xf32>
    %56 = arith.mulf %54, %55 : vector<1x128xf32>
    %57 = vector.broadcast %56 : vector<1x128xf32> to vector<256x128xf32>
    %58 = arith.subf %52, %57 : vector<256x128xf32>
    %59 = arith.mulf %58, %58 : vector<256x128xf32>
    %cst_18 = arith.constant dense<0.000000e+00> : vector<128xf32>
    %60 = vector.multi_reduction <add>, %59, %cst_18 [0] : vector<256x128xf32> to vector<128xf32>
    %61 = vector.shape_cast %60 : vector<128xf32> to vector<1x128xf32>
    %cst_19 = arith.constant 3.906250e-03 : f32
    %62 = vector.broadcast %cst_19 : f32 to vector<1x128xf32>
    %63 = arith.mulf %61, %62 : vector<1x128xf32>
    %cst_20 = arith.constant 9.99999974E-6 : f32
    %64 = vector.broadcast %cst_20 : f32 to vector<1x128xf32>
    %65 = arith.addf %63, %64 : vector<1x128xf32>
    %66 = math.rsqrt %65 : vector<1x128xf32>
    %67 = vector.broadcast %66 : vector<1x128xf32> to vector<256x128xf32>
    %68 = arith.mulf %58, %67 : vector<256x128xf32>
    %cst_21 = arith.constant 0.000000e+00 : f32
    %69 = vector.broadcast %cst_21 : f32 to vector<256x128xf32>
    %70 = arith.maximumf %68, %69 : vector<256x128xf32>
    %71 = vector.shape_cast %70 : vector<256x128xf32> to vector<16x16x128xf32>
    %72 = vector.extract_strided_slice %71 {offsets = [1, 0, 0], sizes = [1, 16, 128], strides = [1, 1, 1]} : vector<16x16x128xf32> to vector<1x16x128xf32>
    %73 = vector.extract_strided_slice %71 {offsets = [14, 0, 0], sizes = [1, 16, 128], strides = [1, 1, 1]} : vector<16x16x128xf32> to vector<1x16x128xf32>
    %74 = tpu.concatenate %72, %71, %73 in 0 : vector<1x16x128xf32>, vector<16x16x128xf32>, vector<1x16x128xf32> -> vector<18x16x128xf32>
    %75 = vector.shape_cast %74 : vector<18x16x128xf32> to vector<288x128xf32>
    %76 = vector.extract_strided_slice %75 {offsets = [0, 0], sizes = [256, 128], strides = [1, 1]} : vector<288x128xf32> to vector<256x128xf32>
    %c1_i32_22 = arith.constant 1 : i32
    %77 = tpu.dynamic_rotate %76 by %c1_i32_22 dim 0 : vector<256x128xf32>, i32 -> vector<256x128xf32>
    %c255_i32_23 = arith.constant 255 : i32
    %78 = tpu.dynamic_rotate %76 by %c255_i32_23 dim 0 : vector<256x128xf32>, i32 -> vector<256x128xf32>
    %79 = vector.shape_cast %5 : vector<256x1xi1> to vector<256x1xi1>
    %80 = vector.broadcast %79 : vector<256x1xi1> to vector<256x128xi1>
    %81 = arith.select %80, %78, %77 : vector<256x128xi1>, vector<256x128xf32>
    %82 = vector.shape_cast %7 : vector<256x1xi1> to vector<256x1xi1>
    %83 = vector.broadcast %82 : vector<256x1xi1> to vector<256x128xi1>
    %84 = arith.select %83, %77, %78 : vector<256x128xi1>, vector<256x128xf32>
    %85 = tpu.concatenate %81, %76, %84 in 1 : vector<256x128xf32>, vector<256x128xf32>, vector<256x128xf32> -> vector<256x384xf32>
    %c0_24 = arith.constant 0 : index
    %c0_25 = arith.constant 0 : index
    %c0_26 = arith.constant 0 : index
    %86 = vector.load %arg3[%c0_24, %c0_25, %c0_26] : memref<3x384x128xf32, #tpu.memory_space<vmem>>, vector<1x384x128xf32>
    %87 = vector.shape_cast %86 : vector<1x384x128xf32> to vector<384x128xf32>
    %cst_27 = arith.constant dense<0.000000e+00> : vector<256x128xf32>
    %88 = tpu.matmul %85, %87, %cst_27 {dimension_numbers = #tpu.dot_dimension_numbers<[1], [0], [0], [1], [0, 0, 1, 1], [], []>} : vector<256x384xf32>, vector<384x128xf32>, vector<256x128xf32> -> vector<256x128xf32>
    %89 = vector.extract_strided_slice %75 {offsets = [16, 0], sizes = [256, 128], strides = [1, 1]} : vector<288x128xf32> to vector<256x128xf32>
    %c1_i32_28 = arith.constant 1 : i32
    %90 = tpu.dynamic_rotate %89 by %c1_i32_28 dim 0 : vector<256x128xf32>, i32 -> vector<256x128xf32>
    %c255_i32_29 = arith.constant 255 : i32
    %91 = tpu.dynamic_rotate %89 by %c255_i32_29 dim 0 : vector<256x128xf32>, i32 -> vector<256x128xf32>
    %92 = vector.shape_cast %5 : vector<256x1xi1> to vector<256x1xi1>
    %93 = vector.broadcast %92 : vector<256x1xi1> to vector<256x128xi1>
    %94 = arith.select %93, %91, %90 : vector<256x128xi1>, vector<256x128xf32>
    %95 = vector.shape_cast %7 : vector<256x1xi1> to vector<256x1xi1>
    %96 = vector.broadcast %95 : vector<256x1xi1> to vector<256x128xi1>
    %97 = arith.select %96, %90, %91 : vector<256x128xi1>, vector<256x128xf32>
    %98 = tpu.concatenate %94, %89, %97 in 1 : vector<256x128xf32>, vector<256x128xf32>, vector<256x128xf32> -> vector<256x384xf32>
    %c1_30 = arith.constant 1 : index
    %c0_31 = arith.constant 0 : index
    %c0_32 = arith.constant 0 : index
    %99 = vector.load %arg3[%c1_30, %c0_31, %c0_32] : memref<3x384x128xf32, #tpu.memory_space<vmem>>, vector<1x384x128xf32>
    %100 = vector.shape_cast %99 : vector<1x384x128xf32> to vector<384x128xf32>
    %cst_33 = arith.constant dense<0.000000e+00> : vector<256x128xf32>
    %101 = tpu.matmul %98, %100, %cst_33 {dimension_numbers = #tpu.dot_dimension_numbers<[1], [0], [0], [1], [0, 0, 1, 1], [], []>} : vector<256x384xf32>, vector<384x128xf32>, vector<256x128xf32> -> vector<256x128xf32>
    %102 = arith.addf %88, %101 : vector<256x128xf32>
    %103 = vector.extract_strided_slice %75 {offsets = [32, 0], sizes = [256, 128], strides = [1, 1]} : vector<288x128xf32> to vector<256x128xf32>
    %c1_i32_34 = arith.constant 1 : i32
    %104 = tpu.dynamic_rotate %103 by %c1_i32_34 dim 0 : vector<256x128xf32>, i32 -> vector<256x128xf32>
    %c255_i32_35 = arith.constant 255 : i32
    %105 = tpu.dynamic_rotate %103 by %c255_i32_35 dim 0 : vector<256x128xf32>, i32 -> vector<256x128xf32>
    %106 = vector.shape_cast %5 : vector<256x1xi1> to vector<256x1xi1>
    %107 = vector.broadcast %106 : vector<256x1xi1> to vector<256x128xi1>
    %108 = arith.select %107, %105, %104 : vector<256x128xi1>, vector<256x128xf32>
    %109 = vector.shape_cast %7 : vector<256x1xi1> to vector<256x1xi1>
    %110 = vector.broadcast %109 : vector<256x1xi1> to vector<256x128xi1>
    %111 = arith.select %110, %104, %105 : vector<256x128xi1>, vector<256x128xf32>
    %112 = tpu.concatenate %108, %103, %111 in 1 : vector<256x128xf32>, vector<256x128xf32>, vector<256x128xf32> -> vector<256x384xf32>
    %c2_36 = arith.constant 2 : index
    %c0_37 = arith.constant 0 : index
    %c0_38 = arith.constant 0 : index
    %113 = vector.load %arg3[%c2_36, %c0_37, %c0_38] : memref<3x384x128xf32, #tpu.memory_space<vmem>>, vector<1x384x128xf32>
    %114 = vector.shape_cast %113 : vector<1x384x128xf32> to vector<384x128xf32>
    %cst_39 = arith.constant dense<0.000000e+00> : vector<256x128xf32>
    %115 = tpu.matmul %112, %114, %cst_39 {dimension_numbers = #tpu.dot_dimension_numbers<[1], [0], [0], [1], [0, 0, 1, 1], [], []>} : vector<256x384xf32>, vector<384x128xf32>, vector<256x128xf32> -> vector<256x128xf32>
    %116 = arith.addf %102, %115 : vector<256x128xf32>
    %cst_40 = arith.constant dense<0.000000e+00> : vector<128xf32>
    %117 = vector.multi_reduction <add>, %116, %cst_40 [0] : vector<256x128xf32> to vector<128xf32>
    %118 = vector.shape_cast %117 : vector<128xf32> to vector<1x128xf32>
    %cst_41 = arith.constant 3.906250e-03 : f32
    %119 = vector.broadcast %cst_41 : f32 to vector<1x128xf32>
    %120 = arith.mulf %118, %119 : vector<1x128xf32>
    %121 = vector.broadcast %120 : vector<1x128xf32> to vector<256x128xf32>
    %122 = arith.subf %116, %121 : vector<256x128xf32>
    %123 = arith.mulf %122, %122 : vector<256x128xf32>
    %cst_42 = arith.constant dense<0.000000e+00> : vector<128xf32>
    %124 = vector.multi_reduction <add>, %123, %cst_42 [0] : vector<256x128xf32> to vector<128xf32>
    %125 = vector.shape_cast %124 : vector<128xf32> to vector<1x128xf32>
    %cst_43 = arith.constant 3.906250e-03 : f32
    %126 = vector.broadcast %cst_43 : f32 to vector<1x128xf32>
    %127 = arith.mulf %125, %126 : vector<1x128xf32>
    %cst_44 = arith.constant 9.99999974E-6 : f32
    %128 = vector.broadcast %cst_44 : f32 to vector<1x128xf32>
    %129 = arith.addf %127, %128 : vector<1x128xf32>
    %130 = math.rsqrt %129 : vector<1x128xf32>
    %131 = vector.broadcast %130 : vector<1x128xf32> to vector<256x128xf32>
    %132 = arith.mulf %122, %131 : vector<256x128xf32>
    %133 = vector.shape_cast %1 : vector<16x16x128xf32> to vector<256x128xf32>
    %134 = arith.addf %133, %132 : vector<256x128xf32>
    %135 = vector.shape_cast %134 : vector<256x128xf32> to vector<16x16x128xf32>
    %c0_45 = arith.constant 0 : index
    %c0_46 = arith.constant 0 : index
    %c0_47 = arith.constant 0 : index
    %c0_48 = arith.constant 0 : index
    %136 = vector.load %arg4[%c0_45, %c0_46, %c0_47, %c0_48] : memref<1x16x16x128xf32, #tpu.memory_space<vmem>>, vector<1x16x16x128xf32>
    %137 = vector.shape_cast %136 : vector<1x16x16x128xf32> to vector<16x16x128xf32>
    %138 = vector.shape_cast %135 : vector<16x16x128xf32> to vector<1x16x16x128xf32>
    tpu.vector_store %arg4[%c0_45, %c0_46, %c0_47, %c0_48], %138 {strides = array<i32>} : memref<1x16x16x128xf32, #tpu.memory_space<vmem>>, vector<1x16x16x128xf32>,
    return
  }
  func.func @transform_0(%arg0: i32) -> (i32, i32, i32, i32) {
    %c0_i32 = arith.constant 0 : i32
    %c0_i32_0 = arith.constant 0 : i32
    %c0_i32_1 = arith.constant 0 : i32
    %c0_i32_2 = arith.constant 0 : i32
    return %arg0, %c0_i32, %c0_i32_0, %c0_i32_1 : i32, i32, i32, i32
  }
  func.func @transform_1(%arg0: i32) -> (i32, i32, i32) {
    %c0_i32 = arith.constant 0 : i32
    %c0_i32_0 = arith.constant 0 : i32
    %c0_i32_1 = arith.constant 0 : i32
    %c0_i32_2 = arith.constant 0 : i32
    return %c0_i32, %c0_i32_0, %c0_i32_1 : i32, i32, i32
  }
  func.func @transform_2(%arg0: i32) -> (i32, i32, i32) {
    %c0_i32 = arith.constant 0 : i32
    %c0_i32_0 = arith.constant 0 : i32
    %c0_i32_1 = arith.constant 0 : i32
    %c0_i32_2 = arith.constant 0 : i32
    return %c0_i32, %c0_i32_0, %c0_i32_1 : i32, i32, i32
  }
  func.func @transform_3(%arg0: i32) -> (i32, i32, i32, i32) {
    %c0_i32 = arith.constant 0 : i32
    %c0_i32_0 = arith.constant 0 : i32
    %c0_i32_1 = arith.constant 0 : i32
    %c0_i32_2 = arith.constant 0 : i32
    return %arg0, %c0_i32, %c0_i32_0, %c0_i32_1 : i32, i32, i32, i32
  }
}

</mosaic_0001>

<bundles_post_ra>
// kernel: tpu_custom_call.1
= control target key start
LH: loop header
LB: loop body
LE: loop exit
PB: predicated region body
PF: predicated region fallthrough
CT: control target
= control target key end

     0   :  { %8 = vsyncpa [#allocation3], 0  ;;  %s9179_s0 = inlined_call_operand.hbm [shape: f32[2,16,16,128], index: 0, kind: input, shape index: {}]   ;;  %s9180_s1 = inlined_call_operand.hbm [shape: f32[3,384,128], index: 1, kind: input, shape index: {}]   ;;  %s9181_s2 = inlined_call_operand.hbm [shape: f32[3,384,128], index: 2, kind: input, shape index: {}]   ;;  %s9182_s3 = inlined_call_operand.hbm [shape: f32[2,16,16,128], index: 3, kind: output, shape index: {}]  }
   0x1   :  { %10 = vsyncpa [#allocation3 + $0x1], 0 }
   0x2   :  { %11 = vsyncpa [#allocation6], 0 }
   0x3   :  { %12 = vsyncpa [#allocation4], 0 }
   0x4   :  { %14 = vsyncpa [#allocation4 + $0x1], 0  ;;  %s5398_s12 = smov 0   ;;  %s5400_s13 = smov 0  }
   0x5   :  { %s5402_s14 = smov 0   ;;  %s5404_s15 = smov 0  }
   0x6 LB: > { %s5419_s16 = sadd.s32 4294967295, %s5367_s15   ;;  %s4293_s17 = sadd.s32 4294967294, %s5367_s15   ;;  %s5367_s15 = sphi %s5404_s15, %s9834_s15   ;;  %s5363_s14 = sphi %s5402_s14, %s9833_s14   ;;  %s5359_s13 = sphi %s5400_s13, %s9832_s13   ;;  %s5355_s12 = sphi %s5398_s12, %s9831_s12  }
   0x7   : > { %p40_p0 = scmp.ne.s32.totalorder %s5359_s13, %s5355_s12  ;;  %p9183_p1 = scmp.eq.s32.totalorder %s5419_s16, 0 }
   0x8   : > { %p106_p2 = scmp.eq.s32.totalorder %s5419_s16, 1  ;;  %p112_p3 = scmp.eq.s32.totalorder %s4293_s17, 1 }
   0x9   : > { %p5428_p4 = por %p9183_p1, %p40_p0  ;;  %p4294_p5 = scmp.ge.s32.totalorder %s5367_s15, 1 }
   0xa   : > { %p5433_p6 = por %p112_p3, %p40_p0  ;;  %p119_p7 = scmp.lt.s32.totalorder %s5367_s15, 3 }
   0xb   : > { %s9420_s18 = scalar_select %p5428_p4, 1, 0 }
   0xc   : > { %s9421_s19 = scalar_select %p5433_p6, 1, 0 }
   0xd   : > { %p5438_p8 = pnand %p4294_p5, %p119_p7  ;;  %s5369_s21 = smov [#allocation5]  }
   0xe   : > { %s131_s22 = sshll.u32 %s5369_s21, 4  ;;  %s5370_s24 = smov [#allocation7]   ;;  %s132_s22 = int_to_ptr.vmem [resolvable:$true] %s131_s22 }
   0xf   : > { %s9422_s20 = scalar_select %p5438_p8, 1, 0 }
  0x10   : > { %p5093_p9 = pneg %p5438_p8  ;;  %s144_s25 = sshll.u32 %s5370_s24, 4  ;;  %s145_s25 = int_to_ptr.vmem [resolvable:$true] %s144_s25 }
  0x11   : > { %s5230_s26 = scalar_lea.vmem %s132_s22, 18432  ;;  %p5238_p5 = scmp.lt.s32.totalorder %s132_s22, %s132_s22 }
  0x12   : > { %p5447_p11 = pnand %p5093_p9, %p9183_p1  ;;  %p5231_p13 = scmp.ne.s32.totalorder %s132_s22, %s5230_s26 }
  0x13   : > { %p5239_p7 = scmp.lt.s32.totalorder %s5230_s26, %s5230_s26 }
  0x14   : > { %p5221_p12 = pneg %p5447_p11 }
  0x15   : > { %p5240_p10 = por %p5239_p7, %p5238_p5 }
  0x16   : > { %p5233_p0 = pnand %p5231_p13, %p5221_p12 }
  0x18   : > { %p5234_p3 = pneg %p5233_p0 }
  0x1a   : > { %p5241_p9 = pnand %p5240_p10, %p5234_p3 }
  0x1c   : > { %5244 = shalt.err (!%p5241_p9)
}
  0x1d   : > { %s5371_s27 = smov 128   ;;  %s5372_s28 = smov 8  }
  0x1e   : > { %5096 = dma.hbm_to_vmem [thread:$0]  (!%p5447_p11), %s9180_s1, 18432, %s132_s22, [#allocation6], %s5371_s27, %s5371_s27, %s5372_s28  }
  0x1f   : > { %s5256_s4 = scalar_lea.vmem %s145_s25, 18432  ;;  %p5264_p10 = scmp.lt.s32.totalorder %s145_s25, %s145_s25 }
  0x20   : > { %p5257_p13 = scmp.ne.s32.totalorder %s145_s25, %s5256_s4  ;;  %p5265_p3 = scmp.lt.s32.totalorder %s5256_s4, %s5256_s4 }
  0x22   : > { %p5259_p0 = pnand %p5257_p13, %p5221_p12  ;;  %p5266_p7 = por %p5265_p3, %p5264_p10 }
  0x24   : > { %p5260_p5 = pneg %p5259_p0 }
  0x26   : > { %p5267_p9 = pnand %p5266_p7, %p5260_p5 }
  0x28   : > { %5270 = shalt.err (!%p5267_p9)
}
  0x29   : > { %5099 = dma.hbm_to_vmem [thread:$0]  (!%p5447_p11), %s9181_s2, 18432, %s145_s25, [#allocation6], %s5371_s27, %s5371_s27, %s5372_s28  }
  0x2a   : > { %s5476_s7 = sadd.s32 1, %s5367_s15   ;;  %s27_s8 = sadd.s32 1, %s5363_s14 }
  0x2b   : > { %s24_s9 = ssub.s32 %s5367_s15, %s5476_s7  ;;  %p34_p12 = scmp.ne.s32.totalorder %s5363_s14, %s5359_s13 }
  0x2c   : > { %p25_p13 = scmp.eq.s32.totalorder %s24_s9, 0  ;;  %p35_p0 = scmp.eq.s32.totalorder %s5367_s15, 0 }
  0x2d   : > { %p5486_p5 = por %p106_p2, %p34_p12  ;;  %p5110_p10 = scmp.lt.s32.totalorder %s5367_s15, 2 }
  0x2e   : > { %s5492_s11 = scalar_select %p25_p13, %s5363_s14, %s27_s8  }
  0x2f   : > { %s9424_s10 = scalar_select %p5486_p5, 1, 0 }
  0x30   : > { %p36_p3 = por %p35_p0, %p34_p12  ;;  %s158_s17 = sand.u32 1, %s5363_s14  }
  0x31   : > { %s4298_s21 = sshll.u32 %s158_s17, 8  ;;  %s4311_s22 = sshll.u32 %s5367_s15, 12 }
  0x32   : > { %s5499_s25 = scalar_lea.hbm %s9179_s0, %s4311_s22  ;;  %s162_s26 = scalar_lea.vmem [#allocation2], %s4298_s21 }
  0x33   : > { %s169_s29 = sshll.u32 %s162_s26, 4  ;;  %p5503_p2 = pnand %p5110_p10, %p36_p3  ;;  %s5501_s29 = int_to_ptr.vmem [resolvable:$true] %s169_s29 }
  0x34   : > { %s5507_s4 = scalar_lea.sflag [#allocation3], %s158_s17  ;;  %s5271_s5 = scalar_lea.hbm %s5499_s25, 4096 }
  0x35   : > { %p5272_p11 = scmp.ne.s32.totalorder %s5499_s25, %s5271_s5  ;;  %p5273_p7 = pneg %p5503_p2 }
  0x36   : > { %s5276_s9 = scalar_lea.hbm %s9179_s0, 8192  ;;  %p5277_p13 = scmp.lt.s32.totalorder %s5499_s25, %s9179_s0 }
  0x37   : > { %p5274_p9 = pnand %p5273_p7, %p5272_p11  ;;  %p5278_p0 = scmp.lt.s32.totalorder %s5276_s9, %s5271_s5 }
  0x39   : > { %p5275_p12 = pneg %p5274_p9  ;;  %p5279_p10 = por %p5278_p0, %p5277_p13 }
  0x3b   : > { %p5280_p3 = pnand %p5279_p10, %p5275_p12 }
  0x3d   : > { %5283 = shalt.err (!%p5280_p3)
}
  0x3e   : > { %s5284_s17 = scalar_lea.vmem %s5501_s29, 4096  ;;  %s5373_s23 = smov [#allocation2]  }
  0x3f   : > { %p5285_p1 = scmp.ne.s32.totalorder %s5501_s29, %s5284_s17  ;;  %s5289_s24 = sshll.u32 %s5373_s23, 4  ;;  %s5290_s24 = int_to_ptr.vmem [resolvable:$false] %s5289_s24 }
  0x40   : > { %s5291_s26 = scalar_lea.vmem %s5290_s24, 8192  ;;  %p5292_p9 = scmp.lt.s32.totalorder %s5501_s29, %s5290_s24 }
  0x41   : > { %p5287_p6 = pnand %p5285_p1, %p5273_p7  ;;  %p5293_p5 = scmp.lt.s32.totalorder %s5291_s26, %s5284_s17 }
  0x43   : > { %p5288_p11 = pneg %p5287_p6  ;;  %p5294_p4 = por %p5293_p5, %p5292_p9 }
  0x45   : > { %p5295_p8 = pnand %p5294_p4, %p5288_p11 }
  0x47   : > { %5298 = shalt.err (!%p5295_p8)
}
  0x48   : > { %5103 = dma.hbm_to_vmem [thread:$0]  (!%p5503_p2), %s5499_s25, 4096, %s5501_s29, %s5507_s4, %s5371_s27, %s5371_s27, %s5372_s28  }
  0x49   : > { %p9426_p1 = scmp.ne.s32.totalorder %s9422_s20, 0 }
  0x4b   : > { %181 = sbr.rel (%p9426_p1) target bundleno = 1441 (0x5a1), region = 32 }
  0x50   : > { %s5534_s5 = sand.u32 1, %s5359_s13   ;;  %p9427_p4 = scmp.ne.s32.totalorder %s9420_s18, 0 }
  0x51   : > { %s4302_s6 = sshll.u32 %s5534_s5, 8  ;;  %s184_s8 = scalar_lea.sflag [#allocation3], %s5534_s5 }
  0x52   : > { %s5540_s30 = scalar_lea.vmem [#allocation2], %s4302_s6 }
  0x53   : > { %5342 = dma.done.wait (%p9427_p4), %s184_s8, 4096  }
  0x54   : > { %5344 = vsyncadd (%p9427_p4), %s184_s8, 4294963200  ;;  %p9428_p6 = scmp.eq.s32.totalorder %s5419_s16, 0 }
  0x56   : > { %5346 = dma.done.wait (%p9428_p6), [#allocation6], 36864   ;;  %p9429_p8 = pmov %p9428_p6 }
  0x57   : > { %v9203_v0 = vmov 0.0   ;;  %v535_v1 = vld [vmem:[#allocation5 + $0x1f8] sm:$0xff]  ;;  %v534_v3 = vld [vmem:[#allocation5 + $0x1f0] sm:$0xff]  ;;  %v533_v5 = vld [vmem:[#allocation5 + $0x1e8] sm:$0xff]  ;;  %v250_v19 = vlaneseq  ;;  %s9007_s18 = scalar_lea.vmem [#allocation8], %s4302_s6  ;;  %s4312_s20 = sshll.u32 %s5419_s16, 12 }
  0x58   : > { %5348 = vsyncadd (%p9429_p8), [#allocation6], 4294930432  ;;  %568 = vmatprep.subr.mxu0 %v9203_v0  ;;  %v567_v2 = vld [vmem:[#allocation5 + $0x2f8] sm:$0xff]  ;;  %v566_v4 = vld [vmem:[#allocation5 + $0x2f0] sm:$0xff]  ;;  %s4201_s27 = sshll.u32 %s9007_s18, 4  ;;  %s9112_s29 = scalar_lea.hbm %s9182_s3, %s4312_s20  ;;  %s9116_s27 = int_to_ptr.vmem [resolvable:$true] %s4201_s27 }
  0x59   : > { %569 = vmatpush1.msra.mxu0 %v535_v1  ;;  %4601 = vmatprep.subr.mxu1 %v567_v2  ;;  %v565_v6 = vld [vmem:[#allocation5 + $0x2e8] sm:$0xff]  ;;  %v532_v7 = vld [vmem:[#allocation5 + $0x1e0] sm:$0xff]  ;;  %v531_v9 = vld [vmem:[#allocation5 + $0x1d8] sm:$0xff]  ;;  %v5560_v24 = vshrl.u32 %v250_v19, 7  ;;  %s4188_s16 = scalar_lea.sflag [#allocation4], %s5534_s5  ;;  %s5299_s4 = scalar_lea.vmem %s9116_s27, 4096 }
  0x5a   : > { %570 = vmatprep.subr.mxu0 %v9203_v0  ;;  %4602 = vmatpush3.msra.mxu1 %v567_v2  ;;  %v564_v8 = vld [vmem:[#allocation5 + $0x2e0] sm:$0xff]  ;;  %v563_v10 = vld [vmem:[#allocation5 + $0x2d8] sm:$0xff]  ;;  %v530_v11 = vld [vmem:[#allocation5 + $0x1d0] sm:$0xff]  ;;  %p5300_p5 = scmp.ne.s32.totalorder %s9116_s27, %s5299_s4  ;;  %p9828_p2 = scmp.ne.s32.totalorder %s9424_s10, 0 }
  0x5b   : > { %571 = vmatpush1.msra.mxu0 %v534_v3  ;;  %4603 = vmatprep.subr.mxu1 %v566_v4  ;;  %v562_v12 = vld [vmem:[#allocation5 + $0x2d0] sm:$0xff]  ;;  %v529_v13 = vld [vmem:[#allocation5 + $0x1c8] sm:$0xff]  ;;  %v528_v15 = vld [vmem:[#allocation5 + $0x1c0] sm:$0xff]  ;;  %9430 = vst [vmem:[#allocation12_spill] sm:$0xff] %v5560_v24  ;;  %v5574_v32 = vadd.s32 8, %v5560_v24  ;;  %vm349_vm0 = vcmp.lt.s32.totalorder %v5560_v24, 7 }
  0x5c   : > { %572 = vmatprep.subr.mxu0 %v9203_v0  ;;  %4604 = vmatpush3.msra.mxu1 %v566_v4  ;;  %v561_v14 = vld [vmem:[#allocation5 + $0x2c8] sm:$0xff]  ;;  %v560_v16 = vld [vmem:[#allocation5 + $0x2c0] sm:$0xff]  ;;  %v527_v17 = vld [vmem:[#allocation5 + $0x1b8] sm:$0xff]  ;;  %vm287_vm1 = vcmp.lt.s32.totalorder %v5560_v24, 1  ;;  %vm253_vm3 = vcmp.eq.s32.totalorder %v5560_v24, 0  ;;  %p5301_p7 = pnand %p5300_p5, %p9828_p2  ;;  %s5375_s9 = smov [#allocation8]  }
  0x5d   : > { %573 = vmatpush1.msra.mxu0 %v533_v5  ;;  %4605 = vmatprep.subr.mxu1 %v565_v6  ;;  %v559_v18 = vld [vmem:[#allocation5 + $0x2b8] sm:$0xff]  ;;  %v526_v20 = vld [vmem:[#allocation5 + $0x1b0] sm:$0xff]  ;;  %v525_v22 = vld [vmem:[#allocation5 + $0x1a8] sm:$0xff]  ;;  %9431 = vst [vmem:[#allocation13_spill] sm:$0xff] %v5574_v32  ;;  %vm256_vm2 = vcmp.eq.s32.totalorder %v5574_v32, 15  ;;  %s5303_s21 = sshll.u32 %s5375_s9, 4  ;;  %s5304_s21 = int_to_ptr.vmem [resolvable:$false] %s5303_s21 }
  0x5e   : > { %574 = vmatprep.subr.mxu0 %v9203_v0  ;;  %4606 = vmatpush3.msra.mxu1 %v565_v6  ;;  %v558_v21 = vld [vmem:[#allocation5 + $0x2b0] sm:$0xff]  ;;  %v557_v23 = vld [vmem:[#allocation5 + $0x2a8] sm:$0xff]  ;;  %v524_v25 = vld [vmem:[#allocation5 + $0x1a0] sm:$0xff]  ;;  %p5302_p12 = pneg %p5301_p7  ;;  %s5305_s22 = scalar_lea.vmem %s5304_s21, 8192 }
  0x5f   : > { %575 = vmatpush1.msra.mxu0 %v532_v7  ;;  %4607 = vmatprep.subr.mxu1 %v564_v8  ;;  %v556_v26 = vld [vmem:[#allocation5 + $0x2a0] sm:$0xff]  ;;  %v5567_v28 = vld [vmem:[%s5540_s30 + $0x8] sm:$0xff]  ;;  %v5570_v29 = vld [vmem:[%s5540_s30 + $0x10] sm:$0xff]  ;;  %p5306_p13 = scmp.lt.s32.totalorder %s9116_s27, %s5304_s21  ;;  %p5307_p0 = scmp.lt.s32.totalorder %s5305_s22, %s5299_s4 }
  0x60   : > { %576 = vmatprep.subr.mxu0 %v9203_v0  ;;  %4608 = vmatpush3.msra.mxu1 %v564_v8  ;;  %v5564_v27 = vld [vmem:[%s5540_s30] sm:$0xff]  ;;  %v523_v30 = vld [vmem:[#allocation5 + $0x198] sm:$0xff]  ;;  %v522_v33 = vld [vmem:[#allocation5 + $0x190] sm:$0xff]  ;;  %v322_v35 = vrot.slane %v5567_v28, 1  ;;  %v9193_v37 = vrot.slane %v5567_v28, 7  ;;  %v5583_v38 = vrot.slane %v5570_v29, 1 }
  0x61   : > { %577 = vmatpush1.msra.mxu0 %v531_v9  ;;  %4609 = vmatprep.subr.mxu1 %v563_v10  ;;  %v555_v31 = vld [vmem:[#allocation5 + $0x298] sm:$0xff]  ;;  %v554_v34 = vld [vmem:[#allocation5 + $0x290] sm:$0xff]  ;;  %v5579_v36 = vrot.slane %v5564_v27, 7  ;;  %v521_v39 = vld [vmem:[#allocation5 + $0x188] sm:$0xff]  ;;  %v5589_v41 = vrot.slane %v5564_v27, 1  ;;  %v5613_v49 = vrot.slane %v5570_v29, 7  ;;  %p5308_p10 = por %p5307_p0, %p5306_p13 }
  0x62   : > { %578 = vmatprep.subr.mxu0 %v9203_v0  ;;  %4610 = vmatpush3.msra.mxu1 %v563_v10  ;;  %9432 = vst [vmem:[#allocation14_spill] sm:$0xff] %v5583_v38  ;;  %v553_v40 = vld [vmem:[#allocation5 + $0x288] sm:$0xff]  ;;  %v5592_v42 = vld [vmem:[%s5540_s30 + $0x18] sm:$0xff]  ;;  %v5595_v43 = vld [vmem:[%s5540_s30 + $0x20] sm:$0xff]  ;;  %v377_v47 = vsel %vm349_vm0, %v322_v35, %v5583_v38 }
  0x63   : > { %579 = vmatpush1.msra.mxu0 %v530_v11  ;;  %4611 = vmatprep.subr.mxu1 %v562_v12  ;;  %v520_v44 = vld [vmem:[#allocation5 + $0x180] sm:$0xff]  ;;  %v5604_v46 = vsel %vm287_vm1, %v5579_v36, %v9193_v37  ;;  %v5610_v48 = vrot.slane %v5592_v42, 1  ;;  %v5616_v50 = vrot.slane %v5592_v42, 7  ;;  %v323_v51 = vrot.slane %v5595_v43, 1  ;;  %v551_v53 = vld [vmem:[#allocation5 + $0x278] sm:$0xff]  ;;  %v5631_v55 = vld [vmem:[%s5540_s30 + $0x28] sm:$0xff]  ;;  %p5309_p3 = pnand %p5308_p10, %p5302_p12 }
  0x64   : > { %580 = vmatprep.subr.mxu0 %v9203_v0  ;;  %4612 = vmatpush3.msra.mxu1 %v562_v12  ;;  %v552_v45 = vld [vmem:[#allocation5 + $0x280] sm:$0xff]  ;;  %v5623_v52 = vsel %vm349_vm0, %v5589_v41, %v322_v35  ;;  %v5628_v54 = vsel %vm256_vm2, %v5604_v46, %v377_v47  ;;  %v5634_v56 = vld [vmem:[%s5540_s30 + $0x30] sm:$0xff]  ;;  %v468_v57 = vld [vmem:[#allocation5 + $0x78] sm:$0xff]  ;;  %v324_v62 = vrot.slane %v5631_v55, 1  ;;  %v9192_v63 = vrot.slane %v5595_v43, 7 }
  0x65   : > { %581 = vmatpush1.msra.mxu0 %v529_v13  ;;  %4613 = vmatprep.subr.mxu1 %v561_v14  ;;  %9433 = vst [vmem:[#allocation15_spill] sm:$0xff] %v5628_v54  ;;  %v550_v58 = vld [vmem:[#allocation5 + $0x270] sm:$0xff]  ;;  %v5642_v59 = vsel %vm349_vm0, %v5583_v38, %v5610_v48  ;;  %v5648_v60 = vsel %vm287_vm1, %v5613_v49, %v5616_v50  ;;  %v9190_v1 = vrot.slane %v5631_v55, 7  ;;  %v325_v2 = vrot.slane %v5634_v56, 1  ;;  %v5660_v3 = vld [vmem:[%s5540_s30 + $0x38] sm:$0xff]  ;;  %v549_v5 = vld [vmem:[#allocation5 + $0x268] sm:$0xff] }
  0x66   : > { %582 = vmatprep.subr.mxu0 %v9203_v0  ;;  %4614 = vmatpush3.msra.mxu1 %v561_v14  ;;  %v375_v61 = vsel %vm349_vm0, %v5610_v48, %v323_v51  ;;  %v467_v4 = vld [vmem:[#allocation5 + $0x70] sm:$0xff]  ;;  %v5664_v6 = vld [vmem:[%s5540_s30 + $0x40] sm:$0xff]  ;;  %v466_v8 = vld [vmem:[#allocation5 + $0x68] sm:$0xff]  ;;  %v326_v9 = vrot.slane %v5660_v3, 1  ;;  %v9191_v10 = vrot.slane %v5634_v56, 7  ;;  %v9188_v14 = vrot.slane %v5660_v3, 7 }
  0x67   : > { %583 = vmatpush1.msra.mxu0 %v528_v15  ;;  %4615 = vmatprep.subr.mxu1 %v560_v16  ;;  %v5670_v7 = vsel %vm256_vm2, %v5648_v60, %v375_v61  ;;  %v548_v11 = vld [vmem:[#allocation5 + $0x260] sm:$0xff]  ;;  %v5682_v12 = vsel %vm287_vm1, %v9192_v63, %v9190_v1  ;;  %v373_v13 = vsel %vm349_vm0, %v324_v62, %v325_v2  ;;  %v327_v15 = vrot.slane %v5664_v6, 1  ;;  %v547_v19 = vld [vmem:[#allocation5 + $0x258] sm:$0xff]  ;;  %v545_v47 = vld [vmem:[#allocation5 + $0x248] sm:$0xff] }
  0x68   : > { %584 = vmatprep.subr.mxu0 %v9203_v0  ;;  %4616 = vmatpush3.msra.mxu1 %v560_v16  ;;  %9434 = vst [vmem:[#allocation16_spill] sm:$0xff] %v5670_v7  ;;  %v5689_v16 = vld [vmem:[%s5540_s30 + $0x48] sm:$0xff]  ;;  %v5724_v35 = vld [vmem:[%s5540_s30 + $0x58] sm:$0xff]  ;;  %v5802_v1 = vsel %vm287_vm1, %v5616_v50, %v5579_v36  ;;  %v5810_v63 = vld [vmem:[%s5540_s30 + $0xc0] sm:$0xff] }
  0x69   : > { %585 = vmatpush1.msra.mxu0 %v527_v17  ;;  %4617 = vmatprep.subr.mxu1 %v559_v18  ;;  %v5695_v17 = vsel %vm349_vm0, %v323_v51, %v324_v62  ;;  %v5171_v24 = vld [vmem:[%s5540_s30 + $0x48] sm:$0xff] }
  0x6a   : > { %586 = vmatprep.subr.mxu0 %v9203_v0  ;;  %4618 = vmatpush3.msra.mxu1 %v559_v18  ;;  %9435 = vst [vmem:[#allocation17_spill] sm:$0xff] %v5695_v17  ;;  %v465_v18 = vld [vmem:[#allocation5 + $0x60] sm:$0xff] }
  0x6b   : > { %587 = vmatpush1.msra.mxu0 %v526_v20  ;;  %4619 = vmatprep.subr.mxu1 %v558_v21  ;;  %v5699_v20 = vld [vmem:[%s5540_s30 + $0x50] sm:$0xff] }
  0x6c   : > { %588 = vmatprep.subr.mxu0 %v9203_v0  ;;  %4620 = vmatpush3.msra.mxu1 %v558_v21  ;;  %v5705_v21 = vsel %vm256_vm2, %v5682_v12, %v373_v13  ;;  %v461_v13 = vld [vmem:[#allocation5 + $0x40] sm:$0xff] }
  0x6d   : > { %589 = vmatpush1.msra.mxu0 %v525_v22  ;;  %4621 = vmatprep.subr.mxu1 %v557_v23  ;;  %9436 = vst [vmem:[#allocation18_spill] sm:$0xff] %v5705_v21  ;;  %v328_v22 = vrot.slane %v5689_v16, 1 }
  0x6e   : > { %590 = vmatprep.subr.mxu0 %v9203_v0  ;;  %4622 = vmatpush3.msra.mxu1 %v557_v23  ;;  %v464_v23 = vld [vmem:[#allocation5 + $0x58] sm:$0xff] }
  0x6f   : > { %591 = vmatpush1.msra.mxu0 %v524_v25  ;;  %4623 = vmatprep.subr.mxu1 %v556_v26  ;;  %v5716_v25 = vsel %vm287_vm1, %v9191_v10, %v9188_v14  ;;  %v5750_v61 = vsel %vm349_vm0, %v327_v15, %v328_v22  ;;  %v5793_v14 = vld [vmem:[%s5540_s30 + $0xb0] sm:$0xff] }
  0x70   : > { %592 = vmatprep.subr.mxu0 %v9203_v0  ;;  %4624 = vmatpush3.msra.mxu1 %v556_v26  ;;  %v371_v26 = vsel %vm349_vm0, %v326_v9, %v327_v15  ;;  %v5777_v15 = vld [vmem:[%s5540_s30 + $0x80] sm:$0xff]  ;;  %9445 = vst [vmem:[#allocation27_spill] sm:$0xff] %v5793_v14  ;;  %v9454_v37 = vrot.slane %v5793_v14, 7 }
  0x71   : > { %593 = vmatpush1.msra.mxu0 %v523_v30  ;;  %4625 = vmatprep.subr.mxu1 %v555_v31  ;;  %v9189_v30 = vrot.slane %v5664_v6, 7  ;;  %v5742_v51 = vsel %vm256_vm2, %v5716_v25, %v371_v26  ;;  %v9195_v26 = vrot.slane %v5777_v15, 7 }
  0x72   : > { %594 = vmatprep.subr.mxu0 %v9203_v0  ;;  %4626 = vmatpush3.msra.mxu1 %v555_v31  ;;  %v9187_v31 = vrot.slane %v5689_v16, 7  ;;  %9439 = vst [vmem:[#allocation21_spill] sm:$0xff] %v5742_v51 }
  0x73   : > { %595 = vmatpush1.msra.mxu0 %v522_v33  ;;  %4627 = vmatprep.subr.mxu1 %v554_v34  ;;  %v546_v33 = vld [vmem:[#allocation5 + $0x250] sm:$0xff] }
  0x74   : > { %596 = vmatprep.subr.mxu0 %v9203_v0  ;;  %4628 = vmatpush3.msra.mxu1 %v554_v34  ;;  %v9194_v34 = vrot.slane %v5699_v20, 1  ;;  %v5758_v62 = vsel %vm287_vm1, %v9189_v30, %v9187_v31  ;;  %v5796_v30 = vld [vmem:[%s5540_s30 + $0xc8] sm:$0xff] }
  0x75   : > { %597 = vmatpush1.msra.mxu0 %v521_v39  ;;  %4629 = vmatprep.subr.mxu1 %v553_v40  ;;  %v5730_v39 = vsel %vm349_vm0, %v325_v2, %v326_v9  ;;  %9440 = vst [vmem:[#allocation22_spill] sm:$0xff] %v5758_v62  ;;  %v330_v2 = vrot.slane %v5724_v35, 1  ;;  %9446 = vst [vmem:[#allocation28_spill] sm:$0xff] %v5796_v30 }
  0x76   : > { %598 = vmatprep.subr.mxu0 %v9203_v0  ;;  %4630 = vmatpush3.msra.mxu1 %v553_v40  ;;  %v463_v40 = vld [vmem:[#allocation5 + $0x50] sm:$0xff]  ;;  %v369_v9 = vsel %vm349_vm0, %v328_v22, %v9194_v34  ;;  %v5789_v22 = vld [vmem:[%s5540_s30 + $0xa0] sm:$0xff] }
  0x77   : > { %599 = vmatpush1.msra.mxu0 %v520_v44  ;;  %4631 = vmatprep.subr.mxu1 %v552_v45  ;;  %v5733_v44 = vld [vmem:[%s5540_s30 + $0x60] sm:$0xff]  ;;  %9444 = vst [vmem:[#allocation26_spill] sm:$0xff] %v5789_v22  ;;  %v5816_v34 = vld [vmem:[%s5540_s30 + $0xd0] sm:$0xff] }
  0x78   : > { %600 = vmatprep.subr.mxu0 %v9203_v0  ;;  %4632 = vmatpush3.msra.mxu1 %v552_v45  ;;  %9437 = vst [vmem:[#allocation19_spill] sm:$0xff] %v5733_v44  ;;  %v5736_v45 = vld [vmem:[%s5540_s30 + $0x78] sm:$0xff] }
  0x79   : > { %4633 = vmatprep.mubr.f32.mxu1 %v5623_v52  ;;  %601 = vmatpush2.msra.mxu0 %v551_v53  ;;  %9438 = vst [vmem:[#allocation20_spill] sm:$0xff] %v5736_v45  ;;  %v462_v53 = vld [vmem:[#allocation5 + $0x48] sm:$0xff] }
  0x7a   : > { %4634 = vmatmul.mubr.f32.vlgmr.msra.gmra.mxu1 %v5628_v54  ;;  %1018 = vmatprep.subr.mxu1 %v9203_v0 }
  0x7b   : > { %602 = vmatprep.subr.mxu0 %v9203_v0  ;;  %1019 = vmatpush1.msra.mxu1 %v468_v57  ;;  %v5745_v57 = vld [vmem:[%s5540_s30 + $0x88] sm:$0xff] }
  0x7c   : > { %603 = vmatpush2.msra.mxu0 %v550_v58  ;;  %1020 = vmatprep.subr.mxu1 %v9203_v0  ;;  %v544_v58 = vld [vmem:[#allocation5 + $0x240] sm:$0xff] }
  0x7d   : > { %604 = vmatprep.subr.mxu0 %v9203_v0  ;;  %4636 = vmatprep.mubr.f32.mxu1 %v5642_v59 }
  0x7e   : > { %1021 = vmatpush1.msra.mxu1 %v467_v4  ;;  %605 = vmatpush2.msra.mxu0 %v549_v5  ;;  %v5763_v5 = vld [vmem:[%s5540_s30 + $0x98] sm:$0xff] }
  0x7f   : > { %4637 = vmatmul.mubr.f32.gmra.mxu1 %v5670_v7  ;;  %1022 = vmatprep.subr.mxu1 %v9203_v0  ;;  %9441 = vst [vmem:[#allocation23_spill] sm:$0xff] %v5763_v5  ;;  %v543_v4 = vld [vmem:[#allocation5 + $0x238] sm:$0xff]  ;;  %v9461_v7 = vrot.slane %v5699_v20, 7 }
  0x80   : > { %606 = vmatprep.subr.mxu0 %v9203_v0  ;;  %1023 = vmatpush1.msra.mxu1 %v466_v8  ;;  %v5766_v8 = vld [vmem:[%s5540_s30 + $0xa8] sm:$0xff] }
  0x81   : > { %607 = vmatpush2.msra.mxu0 %v548_v11  ;;  %1024 = vmatprep.subr.mxu1 %v9203_v0  ;;  %9442 = vst [vmem:[#allocation24_spill] sm:$0xff] %v5766_v8  ;;  %v5839_v11 = vsel %vm256_vm2, %v5758_v62, %v369_v9  ;;  %v460_v9 = vld [vmem:[#allocation5 + $0x38] sm:$0xff]  ;;  %v9455_v38 = vrot.slane %v5766_v8, 7 }
  0x82   : > { %608 = vmatprep.subr.mxu0 %v9203_v0  ;;  %4639 = vmatprep.mubr.f32.mxu1 %v5695_v17  ;;  %9449 = vst [vmem:[#allocation31_spill] sm:$0xff] %v5839_v11 }
  0x83   : > { %1025 = vmatpush1.msra.mxu1 %v465_v18  ;;  %609 = vmatpush2.msra.mxu0 %v547_v19  ;;  %v9196_v18 = vrot.slane %v5736_v45, 7  ;;  %v5781_v19 = vld [vmem:[%s5540_s30 + $0x90] sm:$0xff] }
  0x84   : > { %4640 = vmatmul.mubr.f32.gmra.mxu1 %v5705_v21  ;;  %1026 = vmatprep.subr.mxu1 %v9203_v0  ;;  %v9197_v31 = vrot.slane %v5781_v19, 7  ;;  %v9460_v21 = vrot.slane %v5724_v35, 7 }
  0x85   : > { %610 = vmatprep.subr.mxu0 %v9203_v0  ;;  %1027 = vmatpush1.msra.mxu1 %v464_v23  ;;  %v5784_v23 = vld [vmem:[%s5540_s30 + $0xb8] sm:$0xff]  ;;  %v5825_v10 = vsel %vm287_vm1, %v9196_v18, %v9195_v26  ;;  %v5845_v26 = vld [vmem:[%s5540_s30 + $0x70] sm:$0xff] }
  0x86   : > { %611 = vmatpush2.msra.mxu0 %v546_v33  ;;  %1028 = vmatprep.subr.mxu1 %v9203_v0  ;;  %9443 = vst [vmem:[#allocation25_spill] sm:$0xff] %v5784_v23  ;;  %v9198_v33 = vrot.slane %v5745_v57, 7  ;;  %9447 = vst [vmem:[#allocation29_spill] sm:$0xff] %v5825_v10  ;;  %v5887_v54 = vsel %vm287_vm1, %v9461_v7, %v9460_v21  ;;  %v9213_v21 = vrot.slane %v5733_v44, 7  ;;  %v5945_v10 = vld [vmem:[%s5540_s30 + $0xf0] sm:$0xff] }
  0x87   : > { %612 = vmatprep.subr.mxu0 %v9203_v0  ;;  %4642 = vmatprep.mubr.f32.mxu1 %v5730_v39  ;;  %9462 = vst [vmem:[#allocation36_spill] sm:$0xff] %v5887_v54 }
  0x88   : > { %1029 = vmatpush1.msra.mxu1 %v463_v40  ;;  %613 = vmatpush2.msra.mxu0 %v545_v47  ;;  %v9202_v47 = vrot.slane %v5789_v22, 7  ;;  %v5842_v40 = vld [vmem:[%s5540_s30 + $0x68] sm:$0xff] }
  0x89   : > { %4643 = vmatmul.mubr.f32.gmra.mxu1 %v5742_v51  ;;  %1030 = vmatprep.subr.mxu1 %v9203_v0  ;;  %9450 = vst [vmem:[#allocation32_spill] sm:$0xff] %v5842_v40  ;;  %v5871_v51 = vsel %vm287_vm1, %v9455_v38, %v9454_v37  ;;  %v9463_v37 = vrot.slane %v5733_v44, 1  ;;  %v332_v7 = vrot.slane %v5842_v40, 1 }
  0x8a   : > { %614 = vmatprep.subr.mxu0 %v9203_v0  ;;  %1031 = vmatpush1.msra.mxu1 %v462_v53  ;;  %v5833_v53 = vsel %vm287_vm1, %v9198_v33, %v9197_v31  ;;  %v9451_v31 = vrot.slane %v5763_v5, 7  ;;  %v9453_v33 = vrot.slane %v5699_v20, 1  ;;  %9456 = vst [vmem:[#allocation34_spill] sm:$0xff] %v5871_v51  ;;  %v9464_v51 = vrot.slane %v5816_v34, 7 }
  0x8b   : > { %9448 = vst [vmem:[#allocation30_spill] sm:$0xff] %v5833_v53  ;;  %615 = vmatpush2.msra.mxu0 %v544_v58  ;;  %1032 = vmatprep.subr.mxu1 %v9203_v0  ;;  %v367_v38 = vsel %vm349_vm0, %v330_v2, %v9463_v37  ;;  %v459_v37 = vld [vmem:[#allocation5 + $0x30] sm:$0xff]  ;;  %v539_v53 = vld [vmem:[#allocation5 + $0x218] sm:$0xff] }
  0x8c   : > { %v5855_v58 = vsel %vm287_vm1, %v9451_v31, %v9202_v47  ;;  %616 = vmatprep.subr.mxu0 %v9203_v0  ;;  %4645 = vmatprep.mubr.f32.mxu1 %v5750_v61  ;;  %v5863_v18 = vsel %vm349_vm0, %v9453_v33, %v330_v2  ;;  %v9457_v31 = vrot.slane %v5810_v63, 7  ;;  %v9458_v47 = vrot.slane %v5784_v23, 7  ;;  %v542_v33 = vld [vmem:[#allocation5 + $0x230] sm:$0xff] }
  0x8d   : > { %9452 = vst [vmem:[#allocation33_spill] sm:$0xff] %v5855_v58  ;;  %1033 = vmatpush1.msra.mxu1 %v461_v13  ;;  %617 = vmatpush2.msra.mxu0 %v543_v4  ;;  %v9467_v13 = vmov 0.0   ;;  %v333_v2 = vrot.slane %v5845_v26, 1  ;;  %v5941_v58 = vld [vmem:[%s5540_s30 + $0xf8] sm:$0xff] }
  0x8e   : > { %v5879_v0 = vsel %vm287_vm1, %v9458_v47, %v9457_v31  ;;  %v9465_v47 = vrot.slane %v5796_v30, 7  ;;  %4646 = vmatmul.mubr.f32.gmra.mxu1 %v5839_v11  ;;  %1034 = vmatprep.subr.mxu1 %v9467_v13  ;;  %v9212_v31 = vrot.slane %v5842_v40, 7  ;;  %v5927_v11 = vld [vmem:[%s5540_s30 + $0xe8] sm:$0xff]  ;;  %v5960_v40 = vrot.slane %v5941_v58, 7 }
  0x8f   : > { %9459 = vst [vmem:[#allocation35_spill] sm:$0xff] %v5879_v0  ;;  %618 = vmatprep.subr.mxu0 %v9467_v13  ;;  %1035 = vmatpush1.msra.mxu1 %v460_v9  ;;  %v541_v0 = vld [vmem:[#allocation5 + $0x228] sm:$0xff]  ;;  %v540_v9 = vld [vmem:[#allocation5 + $0x220] sm:$0xff]  ;;  %9470 = vst [vmem:[#allocation40_spill] sm:$0xff] %v5927_v11 }
  0x90   : > { %v5899_v4 = vsel %vm287_vm1, %v9465_v47, %v9464_v51  ;;  %619 = vmatpush2.msra.mxu0 %v542_v33  ;;  %1036 = vmatprep.subr.mxu1 %v9467_v13  ;;  %v5912_v51 = vsel %vm256_vm2, %v5887_v54, %v367_v38  ;;  %v458_v47 = vld [vmem:[#allocation5 + $0x28] sm:$0xff]  ;;  %v5922_v33 = vsel %vm287_vm1, %v9213_v21, %v9212_v31  ;;  %v335_v21 = vrot.slane %v5777_v15, 1 }
  0x91   : > { %9466 = vst [vmem:[#allocation37_spill] sm:$0xff] %v5899_v4  ;;  %9468 = vst [vmem:[#allocation38_spill] sm:$0xff] %v5912_v51  ;;  %620 = vmatprep.subr.mxu0 %v9467_v13  ;;  %4648 = vmatprep.mubr.f32.mxu1 %v5863_v18  ;;  %v365_v38 = vsel %vm349_vm0, %v332_v7, %v333_v2  ;;  %v334_v4 = vrot.slane %v5736_v45, 1  ;;  %v9475_v54 = vrot.slane %v5736_v45, 7  ;;  %v537_v45 = vld [vmem:[#allocation5 + $0x208] sm:$0xff] }
  0x92   : > { %1037 = vmatpush1.msra.mxu1 %v459_v37  ;;  %621 = vmatpush2.msra.mxu0 %v541_v0  ;;  %9469 = vst [vmem:[#allocation39_spill] sm:$0xff] %v5922_v33  ;;  %v9471_v0 = vrot.slane %v5733_v44, 1  ;;  %9474 = vst [vmem:[#allocation43_spill] sm:$0xff] %v5960_v40 }
  0x93   : > { %4649 = vmatmul.mubr.f32.gmra.mxu1 %v5912_v51  ;;  %1038 = vmatprep.subr.mxu1 %v9467_v13  ;;  %v457_v51 = vld [vmem:[#allocation5 + $0x20] sm:$0xff]  ;;  %v363_v31 = vsel %vm349_vm0, %v334_v4, %v335_v21 }
  0x94   : > { %v5935_v37 = vsel %vm349_vm0, %v9471_v0, %v332_v7  ;;  %622 = vmatprep.subr.mxu0 %v9467_v13  ;;  %1039 = vmatpush1.msra.mxu1 %v458_v47  ;;  %v5951_v7 = vsel %vm256_vm2, %v5922_v33, %v365_v38  ;;  %v5954_v0 = vrot.slane %v5927_v11, 7  ;;  %v456_v47 = vld [vmem:[#allocation5 + $0x18] sm:$0xff]  ;;  %v9476_v38 = vrot.slane %v5845_v26, 7 }
  0x95   : > { %9472 = vst [vmem:[#allocation41_spill] sm:$0xff] %v5935_v37  ;;  %623 = vmatpush2.msra.mxu0 %v540_v9  ;;  %1040 = vmatprep.subr.mxu1 %v9467_v13  ;;  %9473 = vst [vmem:[#allocation42_spill] sm:$0xff] %v5951_v7  ;;  %v538_v9 = vld [vmem:[#allocation5 + $0x210] sm:$0xff] }
  0x96   : > { %624 = vmatprep.subr.mxu0 %v9467_v13  ;;  %4651 = vmatprep.mubr.f32.mxu1 %v5935_v37  ;;  %v5968_v33 = vsel %vm287_vm1, %v9476_v38, %v9475_v54  ;;  %v9478_v37 = vrot.slane %v5945_v10, 7  ;;  %v336_v54 = vrot.slane %v5745_v57, 1  ;;  %v455_v38 = vld [vmem:[#allocation5 + $0x10] sm:$0xff] }
  0x97   : > { %1041 = vmatpush1.msra.mxu1 %v457_v51  ;;  %625 = vmatpush2.msra.mxu0 %v539_v53  ;;  %9477 = vst [vmem:[#allocation44_spill] sm:$0xff] %v5968_v33  ;;  %v5983_v53 = vsel %vm349_vm0, %v333_v2, %v334_v4  ;;  %v337_v51 = vrot.slane %v5781_v19, 1  ;;  %v505_v4 = vsel %vm287_vm1, %v5960_v40, %v5579_v36  ;;  %v454_v2 = vld [vmem:[#allocation5 + $0x8] sm:$0xff]  ;;  %v338_v36 = vrot.slane %v5763_v5, 1 }
  0x98   : > { %v5977_v44 = vsel %vm287_vm1, %v5954_v0, %v9478_v37  ;;  %4652 = vmatmul.mubr.f32.gmra.mxu1 %v5951_v7  ;;  %1042 = vmatprep.subr.mxu1 %v9467_v13  ;;  %v5992_v37 = vsel %vm256_vm2, %v5968_v33, %v363_v31  ;;  %v9482_v31 = vrot.slane %v5777_v15, 7  ;;  %v339_v33 = vrot.slane %v5789_v22, 1 }
  0x99   : > { %9479 = vst [vmem:[#allocation45_spill] sm:$0xff] %v5977_v44  ;;  %626 = vmatprep.subr.mxu0 %v9467_v13  ;;  %1043 = vmatpush1.msra.mxu1 %v456_v47  ;;  %9480 = vst [vmem:[#allocation46_spill] sm:$0xff] %v5992_v37  ;;  %v536_v47 = vld [vmem:[#allocation5 + $0x200] sm:$0xff]  ;;  %v361_v44 = vsel %vm349_vm0, %v336_v54, %v337_v51 }
  0x9a   : > { %627 = vmatpush2.msra.mxu0 %v538_v9  ;;  %1044 = vmatprep.subr.mxu1 %v9467_v13  ;;  %v9481_v9 = vrot.slane %v5745_v57, 7 }
  0x9b   : > { %628 = vmatprep.subr.mxu0 %v9467_v13  ;;  %4654 = vmatprep.mubr.f32.mxu1 %v5983_v53 }
  0x9c   : > { %1045 = vmatpush1.msra.mxu1 %v455_v38  ;;  %629 = vmatpush2.msra.mxu0 %v537_v45  ;;  %v6007_v7 = vsel %vm287_vm1, %v9482_v31, %v9481_v9  ;;  %v511_v45 = vsel %vm253_vm3, %v5623_v52, %v505_v4  ;;  %v6021_v38 = vsel %vm349_vm0, %v335_v21, %v336_v54  ;;  %v453_v9 = vld [vmem:[#allocation5] sm:$0xff]  ;;  %v484_v4 = vld [vmem:[#allocation5 + $0xf8] sm:$0xff]  ;;  %v9486_v21 = vrot.slane %v5781_v19, 7 }
  0x9d   : > { %9483 = vst [vmem:[#allocation47_spill] sm:$0xff] %v6007_v7  ;;  %4655 = vmatmul.mubr.f32.gmra.mxu1 %v5992_v37  ;;  %1046 = vmatprep.subr.mxu1 %v9467_v13  ;;  %v6027_v31 = vsel %vm256_vm2, %v6007_v7, %v361_v44  ;;  %v340_v37 = vrot.slane %v5766_v8, 1  ;;  %v341_v44 = vrot.slane %v5793_v14, 1  ;;  %v6046_v7 = vsel %vm349_vm0, %v5610_v48, %v5589_v41 }
  0x9e   : > { %630 = vmatprep.subr.mxu0 %v9467_v13  ;;  %1047 = vmatpush1.msra.mxu1 %v454_v2  ;;  %9484 = vst [vmem:[#allocation48_spill] sm:$0xff] %v6027_v31  ;;  %v9485_v2 = vrot.slane %v5763_v5, 7  ;;  %9487 = vst [vmem:[#allocation49_spill] sm:$0xff] %v6046_v7 }
  0x9f   : > { %631 = vmatpush2.msra.mxu0 %v536_v47  ;;  %632 = vmatprep.mubr.f32.mxu0 %v5564_v27  ;;  %v359_v47 = vsel %vm349_vm0, %v338_v36, %v339_v33 }
  0xa0   : > { %1048 = vmatprep.subr.mxu1 %v9467_v13  ;;  %633 = vmatmul.mubr.f32.vlgmr.msra.gmra.mxu0 %v511_v45  ;;  %v6037_v54 = vsel %vm287_vm1, %v9486_v21, %v9485_v2  ;;  %v6053_v45 = vsel %vm349_vm0, %v337_v51, %v338_v36  ;;  %v483_v2 = vld [vmem:[#allocation5 + $0xf0] sm:$0xff]  ;;  %v9488_v21 = vrot.slane %v5567_v28, 7  ;;  %v482_v51 = vld [vmem:[#allocation5 + $0xe8] sm:$0xff]  ;;  %v9490_v36 = vrot.slane %v5766_v8, 7 }
  0xa1   : > { %4657 = vmatprep.mubr.f32.mxu1 %v6021_v38  ;;  %1049 = vmatpush1.msra.mxu1 %v453_v9  ;;  %v6064_v48 = vsel %vm256_vm2, %v6037_v54, %v359_v47  ;;  %v9491_v9 = vrot.slane %v5789_v22, 7  ;;  %v343_v47 = vrot.slane %v5810_v63, 1  ;;  %v9496_v8 = vrot.slane %v5793_v14, 7  ;;  %v6117_v22 = vld [vmem:[%s5540_s30 + $0xe0] sm:$0xff] }
  0xa2   : > { %4658 = vmatmul.mubr.f32.gmra.mxu1 %v6027_v31  ;;  %1050 = vmatprep.subr.mxu1 %v9467_v13  ;;  %v315_v5 = vsel %vm287_vm1, %v9488_v21, %v5613_v49  ;;  %9489 = vst [vmem:[#allocation50_spill] sm:$0xff] %v6064_v48  ;;  %v342_v31 = vrot.slane %v5784_v23, 1  ;;  %9499 = vst [vmem:[#allocation56_spill] sm:$0xff] %v6117_v22 }
  0xa3   : > { %1051 = vmatpush2.msra.mxu1 %v484_v4  ;;  %637 = vmatprep.mubr.f32.mxu0 %v5567_v28  ;;  %v6074_v21 = vsel %vm287_vm1, %v9491_v9, %v9490_v36  ;;  %v357_v4 = vsel %vm349_vm0, %v340_v37, %v341_v44  ;;  %v6084_v7 = vsel %vm253_vm3, %v5642_v59, %v315_v5  ;;  %v481_v9 = vld [vmem:[#allocation5 + $0xe0] sm:$0xff]  ;;  %v480_v5 = vld [vmem:[#allocation5 + $0xd8] sm:$0xff] }
  0xa4   : > { %1052 = vmatprep.subr.mxu1 %v9467_v13  ;;  %638 = vmatmul.mubr.f32.gmra.mxu0 %v5604_v46  ;;  %9492 = vst [vmem:[#allocation51_spill] sm:$0xff] %v6074_v21  ;;  %v6090_v36 = vsel %vm349_vm0, %v339_v33, %v340_v37  ;;  %v355_v37 = vsel %vm349_vm0, %v342_v31, %v343_v47 }
  0xa5   : > { %4660 = vmatprep.mubr.f32.mxu1 %v6053_v45  ;;  %1053 = vmatpush2.msra.mxu1 %v483_v2  ;;  %9493 = vst [vmem:[#allocation52_spill] sm:$0xff] %v6090_v36  ;;  %v6096_v2 = vsel %vm256_vm2, %v6074_v21, %v357_v4  ;;  %v345_v4 = vrot.slane %v5816_v34, 1  ;;  %v6113_v21 = vld [vmem:[%s5540_s30 + $0xd8] sm:$0xff] }
  0xa6   : > { %4661 = vmatmul.mubr.f32.gmra.mxu1 %v6064_v48  ;;  %1054 = vmatprep.subr.mxu1 %v9467_v13  ;;  %9494 = vst [vmem:[#allocation53_spill] sm:$0xff] %v6096_v2  ;;  %v9495_v48 = vrot.slane %v5784_v23, 7  ;;  %9498 = vst [vmem:[#allocation55_spill] sm:$0xff] %v6113_v21  ;;  %v9500_v23 = vrot.slane %v5595_v43, 7 }
  0xa7   : > { %1055 = vmatpush2.msra.mxu1 %v482_v51  ;;  %642 = vmatprep.mubr.f32.mxu0 %v5570_v29  ;;  %v344_v51 = vrot.slane %v5796_v30, 1 }
  0xa8   : > { %1056 = vmatprep.subr.mxu1 %v9467_v13  ;;  %643 = vmatmul.mubr.f32.gmra.mxu0 %v6084_v7  ;;  %v6106_v33 = vsel %vm287_vm1, %v9496_v8, %v9495_v48  ;;  %v6123_v8 = vsel %vm349_vm0, %v341_v44, %v342_v31  ;;  %v479_v48 = vld [vmem:[#allocation5 + $0xd0] sm:$0xff]  ;;  %v313_v14 = vsel %vm287_vm1, %v5616_v50, %v9500_v23  ;;  %v478_v31 = vld [vmem:[#allocation5 + $0xc8] sm:$0xff]  ;;  %v9502_v44 = vrot.slane %v5796_v30, 7 }
  0xa9   : > { %9497 = vst [vmem:[#allocation54_spill] sm:$0xff] %v6106_v33  ;;  %4663 = vmatprep.mubr.f32.mxu1 %v6090_v36  ;;  %1057 = vmatpush2.msra.mxu1 %v481_v9  ;;  %v6134_v9 = vsel %vm256_vm2, %v6106_v33, %v355_v37  ;;  %v9503_v36 = vrot.slane %v5810_v63, 7  ;;  %v353_v23 = vsel %vm349_vm0, %v344_v51, %v345_v4  ;;  %v6151_v37 = vrot.slane %v6117_v22, 1 }
  0xaa   : > { %4664 = vmatmul.mubr.f32.gmra.mxu1 %v6096_v2  ;;  %1058 = vmatprep.subr.mxu1 %v9467_v13  ;;  %9501 = vst [vmem:[#allocation57_spill] sm:$0xff] %v6134_v9  ;;  %v346_v2 = vrot.slane %v6113_v21, 1  ;;  %v6157_v30 = vsel %vm253_vm3, %v5695_v17, %v313_v14  ;;  %v6172_v14 = vrot.slane %v5927_v11, 1  ;;  %v506_v17 = vrot.slane %v5945_v10, 1 }
  0xab   : > { %1059 = vmatpush2.msra.mxu1 %v480_v5  ;;  %647 = vmatprep.mubr.f32.mxu0 %v5592_v42  ;;  %v6145_v50 = vsel %vm287_vm1, %v9503_v36, %v9502_v44  ;;  %9505 = vst [vmem:[#allocation59_spill] sm:$0xff] %v6151_v37  ;;  %v6163_v36 = vsel %vm349_vm0, %v343_v47, %v344_v51  ;;  %v477_v44 = vld [vmem:[#allocation5 + $0xc0] sm:$0xff]  ;;  %v476_v5 = vld [vmem:[#allocation5 + $0xb8] sm:$0xff]  ;;  %v9508_v47 = vrot.slane %v6113_v21, 7  ;;  %v9509_v51 = vrot.slane %v5816_v34, 7 }
  0xac   : > { %1060 = vmatprep.subr.mxu1 %v9467_v13  ;;  %648 = vmatmul.mubr.f32.gmra.mxu0 %v5648_v60  ;;  %9504 = vst [vmem:[#allocation58_spill] sm:$0xff] %v6145_v50  ;;  %9507 = vst [vmem:[#allocation61_spill] sm:$0xff] %v6172_v14  ;;  %v9512_v11 = vrot.slane %v5634_v56, 7  ;;  %v9513_v21 = vrot.slane %v5631_v55, 7 }
  0xad   : > { %4666 = vmatprep.mubr.f32.mxu1 %v6123_v8  ;;  %1061 = vmatpush2.msra.mxu1 %v479_v48  ;;  %v6169_v48 = vsel %vm256_vm2, %v6145_v50, %v353_v23  ;;  %v351_v23 = vsel %vm349_vm0, %v346_v2, %v6151_v37 }
  0xae   : > { %4667 = vmatmul.mubr.f32.gmra.mxu1 %v6134_v9  ;;  %1062 = vmatprep.subr.mxu1 %v9467_v13  ;;  %9506 = vst [vmem:[#allocation60_spill] sm:$0xff] %v6169_v48  ;;  %v6188_v9 = vrot.slane %v6117_v22, 7  ;;  %v311_v22 = vsel %vm287_vm1, %v9513_v21, %v9512_v11  ;;  %v509_v11 = vsel %vm349_vm0, %v6172_v14, %v506_v17  ;;  %v6222_v21 = vrot.slane %v5941_v58, 1 }
  0xaf   : > { %1063 = vmatpush2.msra.mxu1 %v478_v31  ;;  %652 = vmatprep.mubr.f32.mxu0 %v5595_v43  ;;  %v6182_v31 = vsel %vm287_vm1, %v9509_v51, %v9508_v47  ;;  %v6196_v47 = vsel %vm349_vm0, %v345_v4, %v346_v2  ;;  %v475_v51 = vld [vmem:[#allocation5 + $0xb0] sm:$0xff]  ;;  %v474_v2 = vld [vmem:[#allocation5 + $0xa8] sm:$0xff] }
  0xb0   : > { %1064 = vmatprep.subr.mxu1 %v9467_v13  ;;  %653 = vmatmul.mubr.f32.gmra.mxu0 %v6157_v30  ;;  %9510 = vst [vmem:[#allocation62_spill] sm:$0xff] %v6182_v31  ;;  %9511 = vst [vmem:[#allocation63_spill] sm:$0xff] %v6188_v9  ;;  %v6216_v4 = vsel %vm287_vm1, %v6188_v9, %v5954_v0 }
  0xb1   : > { %4669 = vmatprep.mubr.f32.mxu1 %v6163_v36  ;;  %1065 = vmatpush2.msra.mxu1 %v477_v44  ;;  %v6208_v44 = vsel %vm256_vm2, %v6182_v31, %v351_v23  ;;  %9515 = vst [vmem:[#allocation65_spill] sm:$0xff] %v6216_v4  ;;  %9516 = vst [vmem:[#allocation66_spill] sm:$0xff] %v6222_v21  ;;  %v6236_v23 = vsel %vm349_vm0, %v6151_v37, %v6172_v14  ;;  %v471_v14 = vld [vmem:[#allocation5 + $0x90] sm:$0xff] }
  0xb2   : > { %4670 = vmatmul.mubr.f32.gmra.mxu1 %v6169_v48  ;;  %1066 = vmatprep.subr.mxu1 %v9467_v13  ;;  %9514 = vst [vmem:[#allocation64_spill] sm:$0xff] %v6208_v44  ;;  %9517 = vst [vmem:[#allocation67_spill] sm:$0xff] %v6236_v23  ;;  %v473_v48 = vld [vmem:[#allocation5 + $0xa0] sm:$0xff] }
  0xb3   : > { %1067 = vmatpush2.msra.mxu1 %v476_v5  ;;  %657 = vmatprep.mubr.f32.mxu0 %v5631_v55  ;;  %v6228_v5 = vsel %vm253_vm3, %v5730_v39, %v311_v22  ;;  %v472_v22 = vld [vmem:[#allocation5 + $0x98] sm:$0xff] }
  0xb4   : > { %1068 = vmatprep.subr.mxu1 %v9467_v13  ;;  %658 = vmatmul.mubr.f32.gmra.mxu0 %v5682_v12 }
  0xb5   : > { %4672 = vmatprep.mubr.f32.mxu1 %v6196_v47  ;;  %1069 = vmatpush2.msra.mxu1 %v475_v51  ;;  %v6242_v51 = vsel %vm256_vm2, %v6216_v4, %v509_v11  ;;  %v6263_v11 = vsel %vm349_vm0, %v506_v17, %v6222_v21  ;;  %v500_v17 = vld [vmem:[#allocation5 + $0x178] sm:$0xff] }
  0xb6   : > { %4673 = vmatmul.mubr.f32.gmra.mxu1 %v6208_v44  ;;  %1070 = vmatprep.subr.mxu1 %v9467_v13  ;;  %9518 = vst [vmem:[#allocation68_spill] sm:$0xff] %v6242_v51  ;;  %v9519_v44 = vrot.slane %v5945_v10, 7  ;;  %9521 = vst [vmem:[#allocation70_spill] sm:$0xff] %v6263_v11 }
  0xb7   : > { %1071 = vmatpush2.msra.mxu1 %v474_v2  ;;  %662 = vmatprep.mubr.f32.mxu0 %v5634_v56  ;;  %v510_v2 = vsel %vm349_vm0, %v6222_v21, %v5589_v41  ;;  %v1486_v21 = vld [vmem:[#allocation5 + $0x358] sm:$0xff] }
  0xb8   : > { %1072 = vmatprep.subr.mxu1 %v9467_v13  ;;  %663 = vmatmul.mubr.f32.gmra.mxu0 %v6228_v5  ;;  %v6251_v37 = vsel %vm287_vm1, %v9519_v44, %v5960_v40  ;;  %v9522_v44 = vrot.slane %v5664_v6, 7 }
  0xb9   : > { %9520 = vst [vmem:[#allocation69_spill] sm:$0xff] %v6251_v37  ;;  %4675 = vmatprep.mubr.f32.mxu1 %v6236_v23  ;;  %1073 = vmatpush2.msra.mxu1 %v473_v48  ;;  %v518_v41 = vsel %vm256_vm2, %v6251_v37, %v510_v2  ;;  %v9523_v48 = vrot.slane %v5660_v3, 7 }
  0xba   : > { %4676 = vmatmul.mubr.f32.gmra.mxu1 %v6242_v51  ;;  %1074 = vmatprep.subr.mxu1 %v9467_v13  ;;  %v470_v51 = vld [vmem:[#allocation5 + $0x88] sm:$0xff] }
  0xbb   : > { %1075 = vmatpush2.msra.mxu1 %v472_v22  ;;  %667 = vmatprep.mubr.f32.mxu0 %v5660_v3  ;;  %v309_v40 = vsel %vm287_vm1, %v9523_v48, %v9522_v44  ;;  %v318_v22 = vsel %vm287_vm1, %v5954_v0, %v5613_v49  ;;  %v469_v44 = vld [vmem:[#allocation5 + $0x80] sm:$0xff]  ;;  %v1490_v49 = vld [vmem:[#allocation5 + $0x378] sm:$0xff]  ;;  %v9525_v0 = vrot.slane %v5699_v20, 7  ;;  %v1489_v48 = vld [vmem:[#allocation5 + $0x370] sm:$0xff] }
  0xbc   : > { %1076 = vmatprep.subr.mxu1 %v9467_v13  ;;  %668 = vmatmul.mubr.f32.gmra.mxu0 %v5716_v25  ;;  %v6286_v2 = vsel %vm253_vm3, %v5750_v61, %v309_v40  ;;  %v499_v40 = vld [vmem:[#allocation5 + $0x170] sm:$0xff] }
  0xbd   : > { %4678 = vmatprep.mubr.f32.mxu1 %v6263_v11  ;;  %1077 = vmatpush2.msra.mxu1 %v471_v14  ;;  %9524 = vst [vmem:[#allocation71_spill] sm:$0xff] %v6286_v2  ;;  %v6292_v14 = vsel %vm253_vm3, %v5642_v59, %v318_v22  ;;  %v387_v22 = vsel %vm253_vm3, %v5623_v52, %v5802_v1 }
  0xbe   : > { %4679 = vmatmul.mubr.f32.gmra.mxu1 %v518_v41  ;;  %1078 = vmatprep.subr.mxu1 %v9467_v13 }
  0xbf   : > { %4681 = vmatprep.subr.mxu0 %v500_v17  ;;  %1079 = vmatpush2.msra.mxu1 %v470_v51  ;;  %v9526_v51 = vrot.slane %v5689_v16, 7 }
  0xc0   : > { %4682 = vmatpush3.msra.mxu0 %v500_v17  ;;  %672 = vmatprep.mubr.f32.mxu0 %v5664_v6 }
  0xc1   : > { %1080 = vmatprep.subr.mxu1 %v9467_v13  ;;  %673 = vmatmul.mubr.f32.gmra.mxu0 %v6286_v2  ;;  %v307_v41 = vsel %vm287_vm1, %v9526_v51, %v9525_v0  ;;  %v9527_v0 = vld [vmem:[#allocation19_spill] sm:$0xff] }
  0xc2   : > { %1081 = vmatpush2.msra.mxu1 %v469_v44  ;;  %1082 = vmatprep.mubr.f32.mxu1 %v5570_v29  ;;  %v6312_v17 = vsel %vm253_vm3, %v5863_v18, %v307_v41  ;;  %v498_v44 = vld [vmem:[#allocation5 + $0x168] sm:$0xff]  ;;  %v9528_v51 = vrot.slane %v9527_v0, 7  ;;  %v9529_v41 = vrot.slane %v5724_v35, 7 }
  0xc3   : > { %1083 = vmatmul.mubr.f32.vlgmr.msra.gmra.mxu1 %v6292_v14  ;;  %1523 = vmatprep.subr.mxu1 %v9467_v13 }
  0xc4   : > { %1524 = vmatpush1.msra.mxu1 %v1490_v49  ;;  %677 = vmatprep.mubr.f32.mxu0 %v5689_v16  ;;  %v1488_v49 = vld [vmem:[#allocation5 + $0x368] sm:$0xff]  ;;  %v305_v1 = vsel %vm287_vm1, %v9529_v41, %v9528_v51  ;;  %v497_v51 = vld [vmem:[#allocation5 + $0x160] sm:$0xff] }
  0xc5   : > { %678 = vmatmul.mubr.f32.gmra.mxu0 %v5758_v62  ;;  %1087 = vmatprep.mubr.f32.mxu1 %v5592_v42  ;;  %v1484_v41 = vld [vmem:[#allocation5 + $0x348] sm:$0xff] }
  0xc6   : > { %4683 = vmatprep.subr.mxu0 %v499_v40  ;;  %1525 = vmatprep.subr.mxu1 %v9467_v13 }
  0xc7   : > { %1088 = vmatmul.mubr.f32.gmra.mxu1 %v5648_v60  ;;  %4684 = vmatpush3.msra.mxu0 %v499_v40  ;;  %v1487_v40 = vld [vmem:[#allocation5 + $0x360] sm:$0xff] }
  0xc8   : > { %1526 = vmatpush1.msra.mxu1 %v1489_v48  ;;  %682 = vmatprep.mubr.f32.mxu0 %v5699_v20  ;;  %v9530_v48 = vld [vmem:[#allocation36_spill] sm:$0xff] }
  0xc9   : > { %683 = vmatmul.mubr.f32.gmra.mxu0 %v6312_v17  ;;  %1092 = vmatprep.mubr.f32.mxu1 %v5564_v27  ;;  %v9531_v27 = vld [vmem:[#allocation41_spill] sm:$0xff] }
  0xca   : > { %1527 = vmatprep.subr.mxu1 %v9467_v13  ;;  %687 = vmatprep.mubr.f32.mxu0 %v5724_v35 }
  0xcb   : > { %1093 = vmatmul.mubr.f32.gmra.mxu1 %v387_v22  ;;  %4685 = vmatprep.subr.mxu0 %v498_v44  ;;  %v6336_v22 = vsel %vm253_vm3, %v9531_v27, %v305_v1  ;;  %v1483_v1 = vld [vmem:[#allocation5 + $0x340] sm:$0xff] }
  0xcc   : > { %1528 = vmatpush1.msra.mxu1 %v1488_v49  ;;  %1097 = vmatprep.mubr.f32.mxu1 %v5567_v28  ;;  %v9532_v28 = vld [vmem:[#allocation32_spill] sm:$0xff] }
  0xcd   : > { %688 = vmatmul.mubr.f32.gmra.mxu0 %v9530_v48  ;;  %1529 = vmatprep.subr.mxu1 %v9467_v13  ;;  %v9534_v49 = vrot.slane %v9532_v28, 7 }
  0xce   : > { %4686 = vmatpush3.msra.mxu0 %v498_v44  ;;  %1530 = vmatpush1.msra.mxu1 %v1487_v40  ;;  %v1485_v44 = vld [vmem:[#allocation5 + $0x350] sm:$0xff]  ;;  %v496_v40 = vld [vmem:[#allocation5 + $0x158] sm:$0xff] }
  0xcf   : > { %1098 = vmatmul.mubr.f32.gmra.mxu1 %v5604_v46  ;;  %692 = vmatprep.mubr.f32.mxu0 %v9527_v0  ;;  %v9533_v46 = vrot.slane %v5845_v26, 7 }
  0xd0   : > { %1102 = vmatprep.mubr.f32.mxu1 %v5570_v29  ;;  %1531 = vmatprep.subr.mxu1 %v9467_v13 }
  0xd1   : > { %693 = vmatmul.mubr.f32.gmra.mxu0 %v6336_v22  ;;  %1532 = vmatpush1.msra.mxu1 %v1486_v21  ;;  %v303_v29 = vsel %vm287_vm1, %v9534_v49, %v9533_v46  ;;  %v9535_v21 = vld [vmem:[#allocation39_spill] sm:$0xff]  ;;  %v9537_v46 = vld [vmem:[#allocation44_spill] sm:$0xff] }
  0xd2   : > { %697 = vmatprep.mubr.f32.mxu0 %v9532_v28  ;;  %4687 = vmatprep.subr.mxu0 %v497_v51 }
  0xd3   : > { %1103 = vmatmul.mubr.f32.gmra.mxu1 %v6084_v7  ;;  %1533 = vmatprep.subr.mxu1 %v9467_v13  ;;  %v6358_v7 = vsel %vm253_vm3, %v5983_v53, %v303_v29  ;;  %v1481_v29 = vld [vmem:[#allocation5 + $0x330] sm:$0xff] }
  0xd4   : > { %1107 = vmatprep.mubr.f32.mxu1 %v5592_v42  ;;  %4688 = vmatpush3.msra.mxu0 %v497_v51  ;;  %v495_v42 = vld [vmem:[#allocation5 + $0x150] sm:$0xff]  ;;  %v9536_v51 = vld [vmem:[#allocation20_spill] sm:$0xff] }
  0xd5   : > { %698 = vmatmul.mubr.f32.gmra.mxu0 %v9535_v21  ;;  %1534 = vmatpush1.msra.mxu1 %v1485_v44  ;;  %v1482_v44 = vld [vmem:[#allocation5 + $0x338] sm:$0xff] }
  0xd6   : > { %702 = vmatprep.mubr.f32.mxu0 %v5845_v26  ;;  %1535 = vmatprep.subr.mxu1 %v9467_v13 }
  0xd7   : > { %1108 = vmatmul.mubr.f32.gmra.mxu1 %v5648_v60  ;;  %4689 = vmatprep.subr.mxu0 %v496_v40 }
  0xd8   : > { %1112 = vmatprep.mubr.f32.mxu1 %v5595_v43  ;;  %1536 = vmatpush1.msra.mxu1 %v1484_v41  ;;  %v9538_v43 = vld [vmem:[#allocation29_spill] sm:$0xff]  ;;  %v493_v41 = vld [vmem:[#allocation5 + $0x140] sm:$0xff] }
  0xd9   : > { %703 = vmatmul.mubr.f32.gmra.mxu0 %v6358_v7  ;;  %1537 = vmatprep.subr.mxu1 %v9467_v13  ;;  %v6375_v49 = vsel %vm253_vm3, %v6021_v38, %v9538_v43  ;;  %v1478_v43 = vld [vmem:[#allocation5 + $0x318] sm:$0xff] }
  0xda   : > { %707 = vmatprep.mubr.f32.mxu0 %v9536_v51  ;;  %4690 = vmatpush3.msra.mxu0 %v496_v40  ;;  %v1480_v40 = vld [vmem:[#allocation5 + $0x328] sm:$0xff] }
  0xdb   : > { %1113 = vmatmul.mubr.f32.gmra.mxu1 %v6157_v30  ;;  %4691 = vmatprep.subr.mxu0 %v495_v42 }
  0xdc   : > { %1117 = vmatprep.mubr.f32.mxu1 %v5631_v55  ;;  %1538 = vmatpush1.msra.mxu1 %v1483_v1  ;;  %v494_v55 = vld [vmem:[#allocation5 + $0x148] sm:$0xff]  ;;  %v9539_v1 = vld [vmem:[#allocation47_spill] sm:$0xff] }
  0xdd   : > { %708 = vmatmul.mubr.f32.gmra.mxu0 %v9537_v46  ;;  %1539 = vmatprep.subr.mxu1 %v9467_v13 }
  0xde   : > { %712 = vmatprep.mubr.f32.mxu0 %v5777_v15  ;;  %1540 = vmatpush1.msra.mxu1 %v1482_v44 }
  0xdf   : > { %1118 = vmatmul.mubr.f32.gmra.mxu1 %v5682_v12  ;;  %1541 = vmatprep.subr.mxu1 %v9467_v13 }
  0xe0   : > { %1122 = vmatprep.mubr.f32.mxu1 %v5634_v56  ;;  %4692 = vmatpush3.msra.mxu0 %v495_v42  ;;  %v1479_v56 = vld [vmem:[#allocation5 + $0x320] sm:$0xff]  ;;  %v9540_v42 = vld [vmem:[#allocation30_spill] sm:$0xff] }
  0xe1   : > { %713 = vmatmul.mubr.f32.gmra.mxu0 %v6375_v49  ;;  %1542 = vmatpush1.msra.mxu1 %v1481_v29  ;;  %v6392_v44 = vsel %vm253_vm3, %v6053_v45, %v9540_v42  ;;  %v1477_v29 = vld [vmem:[#allocation5 + $0x310] sm:$0xff]  ;;  %v9544_v42 = vld [vmem:[#allocation52_spill] sm:$0xff] }
  0xe2   : > { %717 = vmatprep.mubr.f32.mxu0 %v5745_v57  ;;  %1543 = vmatprep.subr.mxu1 %v9467_v13 }
  0xe3   : > { %1123 = vmatmul.mubr.f32.gmra.mxu1 %v6228_v5  ;;  %4693 = vmatprep.subr.mxu0 %v494_v55 }
  0xe4   : > { %1127 = vmatprep.mubr.f32.mxu1 %v5660_v3  ;;  %1544 = vmatpush1.msra.mxu1 %v1480_v40  ;;  %v9541_v3 = vld [vmem:[#allocation23_spill] sm:$0xff]  ;;  %v9542_v40 = vld [vmem:[#allocation26_spill] sm:$0xff] }
  0xe5   : > { %718 = vmatmul.mubr.f32.gmra.mxu0 %v9539_v1  ;;  %1545 = vmatprep.subr.mxu1 %v9467_v13 }
  0xe6   : > { %722 = vmatprep.mubr.f32.mxu0 %v5781_v19  ;;  %4694 = vmatpush3.msra.mxu0 %v494_v55  ;;  %v492_v55 = vld [vmem:[#allocation5 + $0x138] sm:$0xff] }
  0xe7   : > { %1128 = vmatmul.mubr.f32.gmra.mxu1 %v5716_v25  ;;  %4695 = vmatprep.subr.mxu0 %v493_v41 }
  0xe8   : > { %1132 = vmatprep.mubr.f32.mxu1 %v5664_v6  ;;  %1546 = vmatpush1.msra.mxu1 %v1479_v56  ;;  %v1476_v6 = vld [vmem:[#allocation5 + $0x308] sm:$0xff] }
  0xe9   : > { %723 = vmatmul.mubr.f32.gmra.mxu0 %v6392_v44  ;;  %1547 = vmatprep.subr.mxu1 %v9467_v13  ;;  %v9543_v56 = vld [vmem:[#allocation33_spill] sm:$0xff] }
  0xea   : > { %727 = vmatprep.mubr.f32.mxu0 %v9541_v3  ;;  %1548 = vmatpush1.msra.mxu1 %v1478_v43  ;;  %v6408_v43 = vsel %vm253_vm3, %v9544_v42, %v9543_v56  ;;  %v1506_v56 = vld [vmem:[#allocation5 + $0x3f8] sm:$0xff] }
  0xeb   : > { %1133 = vmatmul.mubr.f32.gmra.mxu1 %v6286_v2  ;;  %1549 = vmatprep.subr.mxu1 %v9467_v13 }
  0xec   : > { %1137 = vmatprep.mubr.f32.mxu1 %v5689_v16  ;;  %4696 = vmatpush3.msra.mxu0 %v493_v41  ;;  %v491_v16 = vld [vmem:[#allocation5 + $0x130] sm:$0xff]  ;;  %v1475_v41 = vld [vmem:[#allocation5 + $0x300] sm:$0xff] }
  0xed   : > { %728 = vmatmul.mubr.f32.gmra.mxu0 %v6037_v54  ;;  %1550 = vmatpush1.msra.mxu1 %v1477_v29  ;;  %v9545_v29 = vld [vmem:[#allocation24_spill] sm:$0xff] }
  0xee   : > { %732 = vmatprep.mubr.f32.mxu0 %v9542_v40  ;;  %1551 = vmatprep.subr.mxu1 %v9467_v13 }
  0xef   : > { %1138 = vmatmul.mubr.f32.gmra.mxu1 %v5758_v62  ;;  %4697 = vmatprep.subr.mxu0 %v492_v55  ;;  %v9546_v62 = vld [vmem:[#allocation51_spill] sm:$0xff] }
  0xf0   : > { %1142 = vmatprep.mubr.f32.mxu1 %v5699_v20  ;;  %1552 = vmatpush1.msra.mxu1 %v1476_v6  ;;  %v9547_v20 = vld [vmem:[#allocation27_spill] sm:$0xff]  ;;  %v9548_v6 = vld [vmem:[#allocation34_spill] sm:$0xff] }
  0xf1   : > { %733 = vmatmul.mubr.f32.gmra.mxu0 %v6408_v43  ;;  %1553 = vmatprep.subr.mxu1 %v9467_v13  ;;  %v6425_v2 = vsel %vm253_vm3, %v6123_v8, %v9548_v6  ;;  %v1502_v6 = vld [vmem:[#allocation5 + $0x3d8] sm:$0xff] }
  0xf2   : > { %737 = vmatprep.mubr.f32.mxu0 %v9545_v29  ;;  %4698 = vmatpush3.msra.mxu0 %v492_v55  ;;  %9549 = vst [vmem:[#allocation19_spill] sm:$0xff] %v6425_v2  ;;  %v1505_v55 = vld [vmem:[#allocation5 + $0x3f0] sm:$0xff]  ;;  %v9550_v29 = vld [vmem:[#allocation25_spill] sm:$0xff] }
  0xf3   : > { %1143 = vmatmul.mubr.f32.gmra.mxu1 %v6312_v17  ;;  %4699 = vmatprep.subr.mxu0 %v491_v16 }
  0xf4   : > { %1147 = vmatprep.mubr.f32.mxu1 %v5724_v35  ;;  %1554 = vmatpush1.msra.mxu1 %v1475_v41  ;;  %v490_v35 = vld [vmem:[#allocation5 + $0x128] sm:$0xff] }
  0xf5   : > { %738 = vmatmul.mubr.f32.gmra.mxu0 %v9546_v62  ;;  %1555 = vmatprep.subr.mxu1 %v9467_v13  ;;  %v1504_v41 = vld [vmem:[#allocation5 + $0x3e8] sm:$0xff] }
  0xf6   : > { %742 = vmatprep.mubr.f32.mxu0 %v9547_v20  ;;  %1556 = vmatpush2.msra.mxu1 %v1506_v56  ;;  %v489_v56 = vld [vmem:[#allocation5 + $0x120] sm:$0xff] }
  0xf7   : > { %1148 = vmatmul.mubr.f32.gmra.mxu1 %v9530_v48  ;;  %1557 = vmatprep.subr.mxu1 %v9467_v13 }
  0xf8   : > { %1152 = vmatprep.mubr.f32.mxu1 %v9527_v0  ;;  %4700 = vmatpush3.msra.mxu0 %v491_v16  ;;  %v1503_v0 = vld [vmem:[#allocation5 + $0x3e0] sm:$0xff]  ;;  %v9551_v16 = vld [vmem:[#allocation35_spill] sm:$0xff] }
  0xf9   : > { %743 = vmatmul.mubr.f32.gmra.mxu0 %v6425_v2  ;;  %1558 = vmatpush2.msra.mxu1 %v1505_v55  ;;  %v6442_v20 = vsel %vm253_vm3, %v6163_v36, %v9551_v16  ;;  %v488_v55 = vld [vmem:[#allocation5 + $0x118] sm:$0xff]  ;;  %v1499_v16 = vld [vmem:[#allocation5 + $0x3c0] sm:$0xff] }
  0xfa   : > { %747 = vmatprep.mubr.f32.mxu0 %v9550_v29  ;;  %1559 = vmatprep.subr.mxu1 %v9467_v13  ;;  %9552 = vst [vmem:[#allocation36_spill] sm:$0xff] %v6442_v20  ;;  %v1500_v29 = vld [vmem:[#allocation5 + $0x3c8] sm:$0xff] }
  0xfb   : > { %1153 = vmatmul.mubr.f32.gmra.mxu1 %v6336_v22  ;;  %4701 = vmatprep.subr.mxu0 %v490_v35 }
  0xfc   : > { %1157 = vmatprep.mubr.f32.mxu1 %v9532_v28  ;;  %1560 = vmatpush2.msra.mxu1 %v1504_v41  ;;  %v9553_v28 = vld [vmem:[#allocation28_spill] sm:$0xff]  ;;  %v487_v41 = vld [vmem:[#allocation5 + $0x110] sm:$0xff] }
  0xfd   : > { %748 = vmatmul.mubr.f32.gmra.mxu0 %v6106_v33  ;;  %1561 = vmatprep.subr.mxu1 %v9467_v13 }
  0xfe   : > { %752 = vmatprep.mubr.f32.mxu0 %v5810_v63  ;;  %4702 = vmatpush3.msra.mxu0 %v490_v35  ;;  %v1501_v63 = vld [vmem:[#allocation5 + $0x3d0] sm:$0xff] }
  0xff   : > { %1158 = vmatmul.mubr.f32.gmra.mxu1 %v9535_v21  ;;  %4703 = vmatprep.subr.mxu0 %v489_v56 }
 0x100   : > { %1162 = vmatprep.mubr.f32.mxu1 %v5845_v26  ;;  %1562 = vmatpush2.msra.mxu1 %v1503_v0  ;;  %v9554_v26 = vld [vmem:[#allocation37_spill] sm:$0xff] }
 0x101   : > { %753 = vmatmul.mubr.f32.gmra.mxu0 %v6442_v20  ;;  %1563 = vmatprep.subr.mxu1 %v9467_v13  ;;  %v6458_v35 = vsel %vm253_vm3, %v6196_v47, %v9554_v26  ;;  %v1497_v26 = vld [vmem:[#allocation5 + $0x3b0] sm:$0xff] }
 0x102   : > { %757 = vmatprep.mubr.f32.mxu0 %v9553_v28  ;;  %1564 = vmatpush2.msra.mxu1 %v1502_v6  ;;  %9555 = vst [vmem:[#allocation41_spill] sm:$0xff] %v6458_v35  ;;  %v9558_v6 = vld [vmem:[#allocation56_spill] sm:$0xff] }
 0x103   : > { %1163 = vmatmul.mubr.f32.gmra.mxu1 %v6358_v7  ;;  %1565 = vmatprep.subr.mxu1 %v9467_v13 }
 0x104   : > { %1167 = vmatprep.mubr.f32.mxu1 %v9536_v51  ;;  %4704 = vmatpush3.msra.mxu0 %v489_v56  ;;  %v9556_v51 = vld [vmem:[#allocation55_spill] sm:$0xff] }
 0x105   : > { %758 = vmatmul.mubr.f32.gmra.mxu0 %v6145_v50  ;;  %1566 = vmatpush2.msra.mxu1 %v1501_v63  ;;  %v9557_v56 = vrot.slane %v9556_v51, 7  ;;  %v1498_v63 = vld [vmem:[#allocation5 + $0x3b8] sm:$0xff] }
 0x106   : > { %762 = vmatprep.mubr.f32.mxu0 %v5816_v34  ;;  %4705 = vmatprep.subr.mxu0 %v488_v55  ;;  %v486_v34 = vld [vmem:[#allocation5 + $0x108] sm:$0xff] }
 0x107   : > { %1168 = vmatmul.mubr.f32.gmra.mxu1 %v9537_v46  ;;  %4706 = vmatpush3.msra.mxu0 %v488_v55  ;;  %v289_v0 = vsel %vm287_vm1, %v9557_v56, %v6188_v9  ;;  %v9560_v55 = vld [vmem:[#allocation40_spill] sm:$0xff]  ;;  %v6505_v56 = vld [vmem:[%s5540_s30 + $0xa8] sm:$0xff]  ;;  %v9574_v9 = vld [vmem:[#allocation38_spill] sm:$0xff] }
 0x108   : > { %1172 = vmatprep.mubr.f32.mxu1 %v5777_v15  ;;  %1567 = vmatprep.subr.mxu1 %v9467_v13  ;;  %v485_v15 = vld [vmem:[#allocation5 + $0x100] sm:$0xff]  ;;  %v6478_v28 = vsel %vm253_vm3, %v6236_v23, %v289_v0 }
 0x109   : > { %763 = vmatmul.mubr.f32.gmra.mxu0 %v6458_v35  ;;  %4707 = vmatprep.subr.mxu0 %v487_v41  ;;  %9559 = vst [vmem:[#allocation32_spill] sm:$0xff] %v6478_v28 }
 0x10a   : > { %767 = vmatprep.mubr.f32.mxu0 %v9556_v51  ;;  %1568 = vmatpush2.msra.mxu1 %v1500_v29 }
 0x10b   : > { %1173 = vmatmul.mubr.f32.gmra.mxu1 %v6375_v49  ;;  %4708 = vmatpush3.msra.mxu0 %v487_v41  ;;  %v9561_v41 = vld [vmem:[#allocation45_spill] sm:$0xff] }
 0x10c   : > { %1177 = vmatprep.mubr.f32.mxu1 %v5745_v57  ;;  %4709 = vmatprep.subr.mxu0 %v486_v34  ;;  %v1522_v57 = vld [vmem:[#allocation5 + $0x478] sm:$0xff]  ;;  %v6494_v29 = vsel %vm253_vm3, %v6263_v11, %v9561_v41  ;;  %v1519_v41 = vld [vmem:[#allocation5 + $0x460] sm:$0xff] }
 0x10d   : > { %768 = vmatmul.mubr.f32.gmra.mxu0 %v6182_v31  ;;  %1569 = vmatprep.subr.mxu1 %v9467_v13  ;;  %9562 = vst [vmem:[#allocation39_spill] sm:$0xff] %v6494_v29  ;;  %v5170_v11 = vld [vmem:[%s5540_s30 + $0x40] sm:$0xff] }
 0x10e   : > { %772 = vmatprep.mubr.f32.mxu0 %v9558_v6  ;;  %4710 = vmatpush3.msra.mxu0 %v486_v34  ;;  %v1493_v34 = vld [vmem:[#allocation5 + $0x390] sm:$0xff] }
 0x10f   : > { %1178 = vmatmul.mubr.f32.gmra.mxu1 %v9539_v1  ;;  %4711 = vmatprep.subr.mxu0 %v485_v15 }
 0x110   : > { %1182 = vmatprep.mubr.f32.mxu1 %v5781_v19  ;;  %1570 = vmatpush2.msra.mxu1 %v1499_v16  ;;  %v1496_v19 = vld [vmem:[#allocation5 + $0x3a8] sm:$0xff]  ;;  %v6518_v16 = vld [vmem:[%s5540_s30 + $0xb0] sm:$0xff] }
 0x111   : > { %773 = vmatmul.mubr.f32.gmra.mxu0 %v6478_v28  ;;  %1571 = vmatprep.subr.mxu1 %v9467_v13 }
 0x112   : > { %777 = vmatprep.mubr.f32.mxu0 %v9560_v55  ;;  %4712 = vmatpush3.msra.mxu0 %v485_v15  ;;  %v1491_v15 = vld [vmem:[#allocation5 + $0x380] sm:$0xff]  ;;  %v6525_v55 = vld [vmem:[%s5540_s30 + $0xb8] sm:$0xff] }
 0x113   : > { %1183 = vmatmul.mubr.f32.gmra.mxu1 %v6392_v44  ;;  %4761 = vmatprep.subr.mxu0 %v1522_v57  ;;  %9564 = vst [vmem:[#allocation20_spill] sm:$0xff] %v6525_v55 }
 0x114   : > { %1187 = vmatprep.mubr.f32.mxu1 %v9541_v3  ;;  %1572 = vmatpush2.msra.mxu1 %v1498_v63  ;;  %v1495_v3 = vld [vmem:[#allocation5 + $0x3a0] sm:$0xff]  ;;  %v1521_v63 = vld [vmem:[#allocation5 + $0x470] sm:$0xff] }
 0x115   : > { %778 = vmatmul.mubr.f32.gmra.mxu0 %v6216_v4  ;;  %1573 = vmatprep.subr.mxu1 %v9467_v13 }
 0x116   : > { %782 = vmatprep.mubr.f32.mxu0 %v5945_v10  ;;  %1574 = vmatpush2.msra.mxu1 %v1497_v26  ;;  %v1494_v10 = vld [vmem:[#allocation5 + $0x398] sm:$0xff]  ;;  %v1520_v26 = vld [vmem:[#allocation5 + $0x468] sm:$0xff] }
 0x117   : > { %1188 = vmatmul.mubr.f32.gmra.mxu1 %v6037_v54  ;;  %1575 = vmatprep.subr.mxu1 %v9467_v13 }
 0x118   : > { %1192 = vmatprep.mubr.f32.mxu1 %v9542_v40  ;;  %1576 = vmatpush2.msra.mxu1 %v1496_v19  ;;  %v1492_v40 = vld [vmem:[#allocation5 + $0x388] sm:$0xff]  ;;  %v9565_v19 = vld [vmem:[#allocation15_spill] sm:$0xff] }
 0x119   : > { %783 = vmatmul.mubr.f32.gmra.mxu0 %v6494_v29  ;;  %1577 = vmatprep.subr.mxu1 %v9467_v13  ;;  %v9576_v29 = vld [vmem:[#allocation42_spill] sm:$0xff] }
 0x11a   : > { %787 = vmatprep.mubr.f32.mxu0 %v5941_v58  ;;  %1578 = vmatpush2.msra.mxu1 %v1495_v3  ;;  %v9563_v58 = vld [vmem:[#allocation49_spill] sm:$0xff]  ;;  %v9567_v3 = vld [vmem:[#allocation16_spill] sm:$0xff] }
 0x11b   : > { %1193 = vmatmul.mubr.f32.gmra.mxu1 %v6408_v43  ;;  %1579 = vmatprep.subr.mxu1 %v9467_v13  ;;  %v422_v0 = vsel %vm256_vm2, %v5648_v60, %v9563_v58  ;;  %v1516_v58 = vld [vmem:[#allocation5 + $0x448] sm:$0xff] }
 0x11c   : > { %1197 = vmatprep.mubr.f32.mxu1 %v6505_v56  ;;  %1580 = vmatpush2.msra.mxu1 %v1494_v10  ;;  %v9568_v10 = vld [vmem:[#allocation17_spill] sm:$0xff] }
 0x11d   : > { %788 = vmatmul.mubr.f32.gmra.mxu0 %v6251_v37  ;;  %1581 = vmatprep.subr.mxu1 %v9467_v13 }
 0x11e   : > { %4713 = vmatprep.mubr.f32.mxu0 %v5642_v59  ;;  %1582 = vmatpush2.msra.mxu1 %v1493_v34  ;;  %v1517_v34 = vld [vmem:[#allocation5 + $0x450] sm:$0xff] }
 0x11f   : > { %1198 = vmatmul.mubr.f32.gmra.mxu1 %v9546_v62  ;;  %1583 = vmatprep.subr.mxu1 %v9467_v13 }
 0x120   : > { %1202 = vmatprep.mubr.f32.mxu1 %v6518_v16  ;;  %1584 = vmatpush2.msra.mxu1 %v1492_v40  ;;  %v6539_v40 = vld [vmem:[%s5540_s30 + $0xc8] sm:$0xff] }
 0x121   : > { %4714 = vmatmul.mubr.f32.vlgmr.msra.gmra.mxu0 %v422_v0  ;;  %1585 = vmatprep.subr.mxu1 %v9467_v13  ;;  %9569 = vst [vmem:[#allocation29_spill] sm:$0xff] %v6539_v40  ;;  %v9570_v0 = vld [vmem:[#allocation18_spill] sm:$0xff] }
 0x122   : > { %4716 = vmatprep.mubr.f32.mxu0 %v5623_v52  ;;  %1586 = vmatpush2.msra.mxu1 %v1491_v15  ;;  %v6532_v52 = vld [vmem:[%s5540_s30 + $0xc0] sm:$0xff] }
 0x123   : > { %1203 = vmatmul.mubr.f32.gmra.mxu1 %v6425_v2  ;;  %4762 = vmatpush3.msra.mxu0 %v1522_v57  ;;  %9566 = vst [vmem:[#allocation44_spill] sm:$0xff] %v6532_v52  ;;  %v1518_v57 = vld [vmem:[#allocation5 + $0x458] sm:$0xff]  ;;  %v1515_v15 = vld [vmem:[#allocation5 + $0x440] sm:$0xff] }
 0x124   : > { %1207 = vmatprep.mubr.f32.mxu1 %v6525_v55  ;;  %4763 = vmatprep.subr.mxu0 %v1521_v63  ;;  %v9586_v55 = vld [vmem:[#allocation64_spill] sm:$0xff]  ;;  %v9587_v2 = vld [vmem:[#allocation71_spill] sm:$0xff] }
 0x125   : > { %4717 = vmatmul.mubr.f32.gmra.mxu0 %v9565_v19  ;;  %v9572_v19 = vld [vmem:[#allocation21_spill] sm:$0xff] }
 0x126   : > { %4719 = vmatprep.mubr.f32.mxu0 %v5642_v59  ;;  %4764 = vmatpush3.msra.mxu0 %v1521_v63  ;;  %v6546_v63 = vld [vmem:[%s5540_s30 + $0xd0] sm:$0xff] }
 0x127   : > { %1208 = vmatmul.mubr.f32.gmra.mxu1 %v6106_v33  ;;  %4765 = vmatprep.subr.mxu0 %v1520_v26  ;;  %9571 = vst [vmem:[#allocation47_spill] sm:$0xff] %v6546_v63 }
 0x128   : > { %1212 = vmatprep.mubr.f32.mxu1 %v6532_v52  ;;  %4766 = vmatpush3.msra.mxu0 %v1520_v26  ;;  %v1514_v26 = vld [vmem:[#allocation5 + $0x438] sm:$0xff]  ;;  %v9582_v52 = vld [vmem:[#allocation60_spill] sm:$0xff] }
 0x129   : > { %4720 = vmatmul.mubr.f32.gmra.mxu0 %v9567_v3  ;;  %4767 = vmatprep.subr.mxu0 %v1519_v41 }
 0x12a   : > { %4722 = vmatprep.mubr.f32.mxu0 %v9568_v10  ;;  %4768 = vmatpush3.msra.mxu0 %v1519_v41  ;;  %v1513_v41 = vld [vmem:[#allocation5 + $0x430] sm:$0xff] }
 0x12b   : > { %1213 = vmatmul.mubr.f32.gmra.mxu1 %v6442_v20  ;;  %4769 = vmatprep.subr.mxu0 %v1518_v57  ;;  %v9581_v20 = vld [vmem:[#allocation57_spill] sm:$0xff] }
 0x12c   : > { %1217 = vmatprep.mubr.f32.mxu1 %v6539_v40  ;;  %4770 = vmatpush3.msra.mxu0 %v1518_v57  ;;  %v1512_v57 = vld [vmem:[#allocation5 + $0x428] sm:$0xff] }
 0x12d   : > { %4723 = vmatmul.mubr.f32.gmra.mxu0 %v9570_v0  ;;  %4771 = vmatprep.subr.mxu0 %v1517_v34 }
 0x12e   : > { %4725 = vmatprep.mubr.f32.mxu0 %v5730_v39  ;;  %4772 = vmatpush3.msra.mxu0 %v1517_v34  ;;  %v9573_v34 = vld [vmem:[#allocation31_spill] sm:$0xff] }
 0x12f   : > { %1218 = vmatmul.mubr.f32.gmra.mxu1 %v6145_v50  ;;  %4773 = vmatprep.subr.mxu0 %v1516_v58  ;;  %v9580_v50 = vld [vmem:[#allocation53_spill] sm:$0xff] }
 0x130   : > { %1222 = vmatprep.mubr.f32.mxu1 %v6546_v63  ;;  %4774 = vmatpush3.msra.mxu0 %v1516_v58  ;;  %v1511_v58 = vld [vmem:[#allocation5 + $0x420] sm:$0xff] }
 0x131   : > { %4726 = vmatmul.mubr.f32.gmra.mxu0 %v9572_v19  ;;  %4775 = vmatprep.subr.mxu0 %v1515_v15  ;;  %v5166_v63 = vld [vmem:[%s5540_s30 + $0x20] sm:$0xff] }
 0x132   : > { %4728 = vmatprep.mubr.f32.mxu0 %v5750_v61  ;;  %4776 = vmatpush3.msra.mxu0 %v1515_v15  ;;  %v1510_v15 = vld [vmem:[#allocation5 + $0x418] sm:$0xff] }
 0x133   : > { %1223 = vmatmul.mubr.f32.gmra.mxu1 %v6458_v35  ;;  %4777 = vmatprep.subr.mxu0 %v1514_v26 }
 0x134   : > { %1227 = vmatprep.mubr.f32.mxu1 %v9556_v51  ;;  %4778 = vmatpush3.msra.mxu0 %v1514_v26  ;;  %v1509_v26 = vld [vmem:[#allocation5 + $0x410] sm:$0xff] }
 0x135   : > { %4729 = vmatmul.mubr.f32.gmra.mxu0 %v9573_v34  ;;  %4779 = vmatprep.subr.mxu0 %v1513_v41 }
 0x136   : > { %4731 = vmatprep.mubr.f32.mxu0 %v5863_v18  ;;  %4780 = vmatpush3.msra.mxu0 %v1513_v41  ;;  %v6563_v41 = vld [vmem:[%s5540_s30 + $0xe8] sm:$0xff] }
 0x137   : > { %1228 = vmatmul.mubr.f32.gmra.mxu1 %v6182_v31  ;;  %4781 = vmatprep.subr.mxu0 %v1512_v57  ;;  %9575 = vst [vmem:[#allocation30_spill] sm:$0xff] %v6563_v41  ;;  %v5164_v31 = vld [vmem:[%s5540_s30 + $0x10] sm:$0xff] }
 0x138   : > { %1232 = vmatprep.mubr.f32.mxu1 %v9558_v6  ;;  %4782 = vmatpush3.msra.mxu0 %v1512_v57  ;;  %v1508_v57 = vld [vmem:[#allocation5 + $0x408] sm:$0xff] }
 0x139   : > { %4732 = vmatmul.mubr.f32.gmra.mxu0 %v9574_v9  ;;  %4783 = vmatprep.subr.mxu0 %v1511_v58 }
 0x13a   : > { %4734 = vmatprep.mubr.f32.mxu0 %v9531_v27  ;;  %v6559_v51 = vpop.f32.mrf.mxu1  ;;  %4784 = vmatpush3.msra.mxu0 %v1511_v58  ;;  %v1507_v58 = vld [vmem:[#allocation5 + $0x400] sm:$0xff] }
 0x13b   : > { %1233 = vmatmul.mubr.f32.gmra.mxu1 %v6478_v28  ;;  %4785 = vmatprep.subr.mxu0 %v1510_v15 }
 0x13c   : > { %1237 = vmatprep.mubr.f32.mxu1 %v6563_v41  ;;  %v6566_v6 = vpop.f32.mrf.mxu1  ;;  %4786 = vmatpush3.msra.mxu0 %v1510_v15  ;;  %v9577_v41 = vld [vmem:[#allocation46_spill] sm:$0xff] }
 0x13d   : > { %4735 = vmatmul.mubr.f32.gmra.mxu0 %v9576_v29  ;;  %4787 = vmatprep.subr.mxu0 %v1509_v26 }
 0x13e   : > { %4737 = vmatprep.mubr.f32.mxu0 %v5983_v53  ;;  %4788 = vmatpush3.msra.mxu0 %v1509_v26  ;;  %v5165_v26 = vld [vmem:[%s5540_s30 + $0x18] sm:$0xff] }
 0x13f   : > { %1238 = vmatmul.mubr.f32.gmra.mxu1 %v6216_v4  ;;  %v6571_v28 = vpop.f32.mrf.mxu1  ;;  %4789 = vmatprep.subr.mxu0 %v1508_v57 }
 0x140   : > { %1587 = vmatprep.mubr.f32.mxu1 %v5164_v31  ;;  %4790 = vmatpush3.msra.mxu0 %v1508_v57  ;;  %v9578_v31 = vld [vmem:[#allocation48_spill] sm:$0xff] }
 0x141   : > { %4738 = vmatmul.mubr.f32.gmra.mxu0 %v9577_v41  ;;  %v6575_v15 = vpop.f32.mrf.mxu1  ;;  %4791 = vmatprep.subr.mxu0 %v1507_v58 }
 0x142   : > { %4740 = vmatprep.mubr.f32.mxu0 %v6021_v38  ;;  %4792 = vmatpush3.msra.mxu0 %v1507_v58  ;;  %v9579_v58 = vld [vmem:[#allocation50_spill] sm:$0xff] }
 0x143   : > { %1588 = vmatmul.mubr.f32.vlgmr.msra.gmra.mxu1 %v6292_v14  ;;  %2512 = vmatprep.subr.mxu0 %v9467_v13  ;;  %v5167_v13 = vld [vmem:[%s5540_s30 + $0x28] sm:$0xff] }
 0x144   : > { %1592 = vmatprep.mubr.f32.mxu1 %v5165_v26  ;;  %v6581_v35 = vpop.f32.mrf.mxu1 }
 0x145   : > { %4741 = vmatmul.mubr.f32.gmra.mxu0 %v9578_v31 }
 0x146   : > { %4743 = vmatprep.mubr.f32.mxu0 %v6053_v45  ;;  %v6585_v57 = vpop.f32.mrf.mxu1 }
 0x147   : > { %1593 = vmatmul.mubr.f32.gmra.mxu1 %v5648_v60 }
 0x148   : > { %1597 = vmatprep.mubr.f32.mxu1 %v5166_v63  ;;  %v5168_v63 = vld [vmem:[%s5540_s30 + $0x30] sm:$0xff] }
 0x149   : > { %4744 = vmatmul.mubr.f32.gmra.mxu0 %v9579_v58  ;;  %v6590_v14 = vpop.f32.mrf.mxu1 }
 0x14a   : > { %4746 = vmatprep.mubr.f32.mxu0 %v9544_v42 }
 0x14b   : > { %1598 = vmatmul.mubr.f32.gmra.mxu1 %v6157_v30  ;;  %v6594_v26 = vpop.f32.mrf.mxu1 }
 0x14c   : > { %1602 = vmatprep.mubr.f32.mxu1 %v5167_v13  ;;  %v5169_v13 = vld [vmem:[%s5540_s30 + $0x38] sm:$0xff] }
 0x14d   : > { %4747 = vmatmul.mubr.f32.gmra.mxu0 %v9580_v50 }
 0x14e   : > { %4749 = vmatprep.mubr.f32.mxu0 %v6123_v8  ;;  %v6599_v60 = vpop.f32.mrf.mxu1 }
 0x14f   : > { %1603 = vmatmul.mubr.f32.gmra.mxu1 %v5682_v12  ;;  %v9583_v12 = vld [vmem:[#allocation14_spill] sm:$0xff] }
 0x150   : > { %1607 = vmatprep.mubr.f32.mxu1 %v5168_v63  ;;  %v6603_v40 = vpop.f32.mrf.mxu1  ;;  %v9584_v63 = vld [vmem:[#allocation61_spill] sm:$0xff] }
 0x151   : > { %4750 = vmatmul.mubr.f32.gmra.mxu0 %v9581_v20  ;;  %v380_v37 = vsel %vm349_vm0, %v9584_v63, %v9583_v12  ;;  %v9588_v12 = vld [vmem:[#allocation22_spill] sm:$0xff] }
 0x152   : > { %4752 = vmatprep.mubr.f32.mxu0 %v6163_v36 }
 0x153   : > { %1608 = vmatmul.mubr.f32.gmra.mxu1 %v6228_v5  ;;  %v6608_v30 = vpop.f32.mrf.mxu1 }
 0x154   : > { %1612 = vmatprep.mubr.f32.mxu1 %v5169_v13 }
 0x155   : > { %4753 = vmatmul.mubr.f32.gmra.mxu0 %v9582_v52  ;;  %v6612_v33 = vpop.f32.mrf.mxu1 }
 0x156   : > { %4755 = vmatprep.mubr.f32.mxu0 %v6196_v47 }
 0x157   : > { %1613 = vmatmul.mubr.f32.gmra.mxu1 %v5716_v25  ;;  %v6630_v25 = vsel %vm256_vm2, %v6216_v4, %v380_v37  ;;  %v5173_v4 = vld [vmem:[%s5540_s30 + $0x58] sm:$0xff] }
 0x158   : > { %1617 = vmatprep.mubr.f32.mxu1 %v5170_v11  ;;  %v6621_v5 = vpop.f32.mrf.mxu1 }
 0x159   : > { %9585 = vst [vmem:[#allocation23_spill] sm:$0xff] %v6621_v5  ;;  %4756 = vmatmul.mubr.f32.gmra.mxu0 %v9586_v55 }
 0x15a   : > { %v6624_v13 = vpop.f32.mrf.mxu1  ;;  %4758 = vmatprep.mubr.f32.mxu0 %v6236_v23  ;;  %v5172_v23 = vld [vmem:[%s5540_s30 + $0x50] sm:$0xff] }
 0x15b   : > { %1618 = vmatmul.mubr.f32.gmra.mxu1 %v9587_v2 }
 0x15c   : > { %1622 = vmatprep.mubr.f32.mxu1 %v5171_v24 }
 0x15d   : > { %4759 = vmatmul.mubr.f32.gmra.mxu0 %v6630_v25  ;;  %v6635_v11 = vpop.f32.mrf.mxu1 }
 0x15e   : > { %4793 = vmatprep.mubr.f32.mxu0 %v5642_v59 }
 0x15f   : > { %1623 = vmatmul.mubr.f32.gmra.mxu1 %v9588_v12  ;;  %v6639_v63 = vpop.f32.mrf.mxu1 }
 0x160   : > { %v634_v5 = vpop.f32.mrf.mxu0  ;;  %1627 = vmatprep.mubr.f32.mxu1 %v5172_v23 }
 0x161   : > { %v6643_v37 = vadd.f32 %v6566_v6, %v634_v5  ;;  %4794 = vmatmul.mubr.f32.vlgmr.msra.gmra.mxu0 %v9567_v3  ;;  %v5174_v5 = vld [vmem:[%s5540_s30 + $0x60] sm:$0xff] }
 0x162   : > { %v6646_v24 = vpop.f32.mrf.mxu1  ;;  %v636_v2 = vpop.f32.mrf.mxu0  ;;  %4796 = vmatprep.mubr.f32.mxu0 %v9568_v10 }
 0x163   : > { %1628 = vmatmul.mubr.f32.gmra.mxu1 %v6312_v17  ;;  %v5175_v2 = vld [vmem:[%s5540_s30 + $0x68] sm:$0xff] }
 0x164   : > { %v6650_v59 = vpop.f32.mrf.mxu1  ;;  %v639_v12 = vpop.f32.mrf.mxu0  ;;  %1632 = vmatprep.mubr.f32.mxu1 %v5173_v4 }
 0x165   : > { %v6654_v23 = vadd.f32 %v6559_v51, %v639_v12  ;;  %4797 = vmatmul.mubr.f32.gmra.mxu0 %v9570_v0 }
 0x166   : > { %v6657_v6 = vpop.f32.mrf.mxu1  ;;  %v641_v3 = vpop.f32.mrf.mxu0  ;;  %4799 = vmatprep.mubr.f32.mxu0 %v5730_v39 }
 0x167   : > { %1633 = vmatmul.mubr.f32.gmra.mxu1 %v9530_v48  ;;  %v5176_v3 = vld [vmem:[%s5540_s30 + $0x70] sm:$0xff] }
 0x168   : > { %v6661_v10 = vpop.f32.mrf.mxu1  ;;  %v644_v17 = vpop.f32.mrf.mxu0  ;;  %1637 = vmatprep.mubr.f32.mxu1 %v5174_v5  ;;  %v5177_v5 = vld [vmem:[%s5540_s30 + $0x78] sm:$0xff] }
 0x169   : > { %v6665_v4 = vadd.f32 %v6575_v15, %v644_v17  ;;  %4800 = vmatmul.mubr.f32.gmra.mxu0 %v9572_v19 }
 0x16a   : > { %v6668_v51 = vpop.f32.mrf.mxu1  ;;  %v646_v0 = vpop.f32.mrf.mxu0  ;;  %4802 = vmatprep.mubr.f32.mxu0 %v5750_v61 }
 0x16b   : > { %1638 = vmatmul.mubr.f32.gmra.mxu1 %v6336_v22 }
 0x16c   : > { %v6672_v39 = vpop.f32.mrf.mxu1  ;;  %v649_v48 = vpop.f32.mrf.mxu0  ;;  %1642 = vmatprep.mubr.f32.mxu1 %v5175_v2 }
 0x16d   : > { %v6676_v12 = vadd.f32 %v6571_v28, %v649_v48  ;;  %4803 = vmatmul.mubr.f32.gmra.mxu0 %v9573_v34  ;;  %v5178_v48 = vld [vmem:[%s5540_s30 + $0x80] sm:$0xff] }
 0x16e   : > { %v6679_v15 = vpop.f32.mrf.mxu1  ;;  %v651_v19 = vpop.f32.mrf.mxu0  ;;  %4805 = vmatprep.mubr.f32.mxu0 %v5863_v18 }
 0x16f   : > { %1643 = vmatmul.mubr.f32.gmra.mxu1 %v9535_v21  ;;  %v5179_v19 = vld [vmem:[%s5540_s30 + $0x88] sm:$0xff] }
 0x170   : > { %v6683_v61 = vpop.f32.mrf.mxu1  ;;  %v654_v22 = vpop.f32.mrf.mxu0  ;;  %1647 = vmatprep.mubr.f32.mxu1 %v5176_v3 }
 0x171   : > { %v6687_v17 = vadd.f32 %v6585_v57, %v654_v22  ;;  %4806 = vmatmul.mubr.f32.gmra.mxu0 %v9574_v9 }
 0x172   : > { %v6690_v28 = vpop.f32.mrf.mxu1  ;;  %v656_v34 = vpop.f32.mrf.mxu0  ;;  %4808 = vmatprep.mubr.f32.mxu0 %v9531_v27 }
 0x173   : > { %1648 = vmatmul.mubr.f32.gmra.mxu1 %v6358_v7 }
 0x174   : > { %v6694_v18 = vpop.f32.mrf.mxu1  ;;  %v659_v21 = vpop.f32.mrf.mxu0  ;;  %1652 = vmatprep.mubr.f32.mxu1 %v5177_v5 }
 0x175   : > { %v6698_v0 = vadd.f32 %v6581_v35, %v659_v21  ;;  %4809 = vmatmul.mubr.f32.gmra.mxu0 %v9576_v29 }
 0x176   : > { %v6701_v57 = vpop.f32.mrf.mxu1  ;;  %v661_v9 = vpop.f32.mrf.mxu0  ;;  %4811 = vmatprep.mubr.f32.mxu0 %v5983_v53 }
 0x177   : > { %1653 = vmatmul.mubr.f32.gmra.mxu1 %v9537_v46 }
 0x178   : > { %v6705_v27 = vpop.f32.mrf.mxu1  ;;  %v664_v7 = vpop.f32.mrf.mxu0  ;;  %1657 = vmatprep.mubr.f32.mxu1 %v5178_v48 }
 0x179   : > { %v6709_v2 = vadd.f32 %v6594_v26, %v664_v7  ;;  %4812 = vmatmul.mubr.f32.gmra.mxu0 %v9577_v41 }
 0x17a   : > { %v6712_v35 = vpop.f32.mrf.mxu1  ;;  %v666_v29 = vpop.f32.mrf.mxu0  ;;  %4814 = vmatprep.mubr.f32.mxu0 %v6021_v38 }
 0x17b   : > { %1658 = vmatmul.mubr.f32.gmra.mxu1 %v6375_v49  ;;  %v5180_v49 = vld [vmem:[%s5540_s30 + $0x90] sm:$0xff] }
 0x17c   : > { %v6716_v53 = vpop.f32.mrf.mxu1  ;;  %v669_v46 = vpop.f32.mrf.mxu0  ;;  %1662 = vmatprep.mubr.f32.mxu1 %v5179_v19  ;;  %v9592_v19 = vld [vmem:[#allocation66_spill] sm:$0xff] }
 0x17d   : > { %v6720_v22 = vadd.f32 %v6590_v14, %v669_v46  ;;  %4815 = vmatmul.mubr.f32.gmra.mxu0 %v9578_v31 }
 0x17e   : > { %v6723_v41 = vpop.f32.mrf.mxu1  ;;  %v671_v26 = vpop.f32.mrf.mxu0  ;;  %4817 = vmatprep.mubr.f32.mxu0 %v6053_v45 }
 0x17f   : > { %1663 = vmatmul.mubr.f32.gmra.mxu1 %v9539_v1  ;;  %v5181_v1 = vld [vmem:[%s5540_s30 + $0x98] sm:$0xff] }
 0x180   : > { %v6727_v38 = vpop.f32.mrf.mxu1  ;;  %1667 = vmatprep.mubr.f32.mxu1 %v5180_v49  ;;  %v9594_v49 = vld [vmem:[#allocation20_spill] sm:$0xff] }
 0x181   : > { %v674_v3 = vpop.f32.mrf.mxu0  ;;  %4818 = vmatmul.mubr.f32.gmra.mxu0 %v9579_v58 }
 0x182   : > { %v6732_v14 = vadd.f32 %v6603_v40, %v674_v3  ;;  %4820 = vmatprep.mubr.f32.mxu0 %v9544_v42 }
 0x183   : > { %v1084_v31 = vpop.f32.mrf.mxu1  ;;  %1668 = vmatmul.mubr.f32.gmra.mxu1 %v6392_v44  ;;  %v676_v34 = vpop.f32.mrf.mxu0 }
 0x184   : > { %v6737_v45 = vadd.f32 %v1084_v31, %v6643_v37  ;;  %1672 = vmatprep.mubr.f32.mxu1 %v5181_v1  ;;  %v5182_v37 = vld [vmem:[%s5540_s30 + $0xa0] sm:$0xff]  ;;  %v9596_v31 = vld [vmem:[#allocation23_spill] sm:$0xff]  ;;  %v9597_v1 = vld [vmem:[#allocation70_spill] sm:$0xff] }
 0x185   : > { %v1086_v21 = vpop.f32.mrf.mxu1  ;;  %v679_v5 = vpop.f32.mrf.mxu0  ;;  %4821 = vmatmul.mubr.f32.gmra.mxu0 %v9580_v50 }
 0x186   : > { %v6742_v58 = vadd.f32 %v6599_v60, %v679_v5  ;;  %4823 = vmatprep.mubr.f32.mxu0 %v6123_v8  ;;  %v9598_v21 = vld [vmem:[#allocation69_spill] sm:$0xff] }
 0x187   : > { %v1089_v42 = vpop.f32.mrf.mxu1  ;;  %1673 = vmatmul.mubr.f32.gmra.mxu1 %v6037_v54  ;;  %v681_v40 = vpop.f32.mrf.mxu0 }
 0x188   : > { %v6747_v44 = vadd.f32 %v1089_v42, %v6654_v23  ;;  %1677 = vmatprep.mubr.f32.mxu1 %v5182_v37  ;;  %v9599_v40 = vld [vmem:[#allocation54_spill] sm:$0xff] }
 0x189   : > { %v1091_v9 = vpop.f32.mrf.mxu1  ;;  %v684_v7 = vpop.f32.mrf.mxu0  ;;  %4824 = vmatmul.mubr.f32.gmra.mxu0 %v9581_v20 }
 0x18a   : > { %v6752_v50 = vadd.f32 %v6612_v33, %v684_v7  ;;  %4826 = vmatprep.mubr.f32.mxu0 %v6163_v36  ;;  %v9600_v9 = vld [vmem:[#allocation44_spill] sm:$0xff] }
 0x18b   : > { %v1094_v60 = vpop.f32.mrf.mxu1  ;;  %1678 = vmatmul.mubr.f32.gmra.mxu1 %v6408_v43  ;;  %v686_v8 = vpop.f32.mrf.mxu0 }
 0x18c   : > { %v6757_v54 = vadd.f32 %v1094_v60, %v6665_v4  ;;  %1682 = vmatprep.mubr.f32.mxu1 %v6505_v56 }
 0x18d   : > { %v1096_v23 = vpop.f32.mrf.mxu1  ;;  %v689_v48 = vpop.f32.mrf.mxu0  ;;  %4827 = vmatmul.mubr.f32.gmra.mxu0 %v9582_v52 }
 0x18e   : > { %v6762_v20 = vadd.f32 %v6608_v30, %v689_v48  ;;  %4829 = vmatprep.mubr.f32.mxu0 %v6196_v47  ;;  %v9589_v30 = vld [vmem:[#allocation67_spill] sm:$0xff]  ;;  %v9601_v48 = vld [vmem:[#allocation36_spill] sm:$0xff] }
 0x18f   : > { %v1099_v33 = vpop.f32.mrf.mxu1  ;;  %1683 = vmatmul.mubr.f32.gmra.mxu1 %v9546_v62  ;;  %v691_v36 = vpop.f32.mrf.mxu0  ;;  %v9590_v47 = vld [vmem:[#allocation19_spill] sm:$0xff] }
 0x190   : > { %v6767_v43 = vadd.f32 %v1099_v33, %v6676_v12  ;;  %1687 = vmatprep.mubr.f32.mxu1 %v6518_v16  ;;  %v9591_v62 = vld [vmem:[#allocation59_spill] sm:$0xff] }
 0x191   : > { %v1101_v4 = vpop.f32.mrf.mxu1  ;;  %v694_v56 = vpop.f32.mrf.mxu0  ;;  %4830 = vmatmul.mubr.f32.gmra.mxu0 %v9586_v55  ;;  %v1469_v12 = vsel %vm349_vm0, %v9592_v19, %v9591_v62  ;;  %v9604_v19 = vld [vmem:[#allocation47_spill] sm:$0xff] }
 0x192   : > { %v6772_v52 = vadd.f32 %v6624_v13, %v694_v56  ;;  %4832 = vmatprep.mubr.f32.mxu0 %v9589_v30  ;;  %v9595_v13 = vld [vmem:[#allocation68_spill] sm:$0xff]  ;;  %v1472_v5 = vsel %vm256_vm2, %v9598_v21, %v1469_v12  ;;  %v9602_v4 = vld [vmem:[#allocation29_spill] sm:$0xff] }
 0x193   : > { %v1104_v29 = vpop.f32.mrf.mxu1  ;;  %1688 = vmatmul.mubr.f32.gmra.mxu1 %v9590_v47  ;;  %v696_v46 = vpop.f32.mrf.mxu0  ;;  %v9603_v47 = vld [vmem:[#allocation58_spill] sm:$0xff] }
 0x194   : > { %v6781_v16 = vadd.f32 %v1104_v29, %v6687_v17  ;;  %1692 = vmatprep.mubr.f32.mxu1 %v9594_v49 }
 0x195   : > { %v1106_v55 = vpop.f32.mrf.mxu1  ;;  %v699_v3 = vpop.f32.mrf.mxu0  ;;  %4833 = vmatmul.mubr.f32.gmra.mxu0 %v9595_v13  ;;  %v5183_v13 = vld [vmem:[%s5540_s30 + $0xd8] sm:$0xff] }
 0x196   : > { %v6786_v34 = vadd.f32 %v9596_v31, %v699_v3  ;;  %4835 = vmatprep.mubr.f32.mxu0 %v9597_v1 }
 0x197   : > { %v1109_v42 = vpop.f32.mrf.mxu1  ;;  %1693 = vmatmul.mubr.f32.gmra.mxu1 %v9599_v40  ;;  %v701_v17 = vpop.f32.mrf.mxu0 }
 0x198   : > { %v6794_v37 = vadd.f32 %v1109_v42, %v6698_v0  ;;  %1697 = vmatprep.mubr.f32.mxu1 %v9600_v9 }
 0x199   : > { %v1111_v7 = vpop.f32.mrf.mxu1  ;;  %v704_v60 = vpop.f32.mrf.mxu0  ;;  %4836 = vmatmul.mubr.f32.gmra.mxu0 %v1472_v5  ;;  %v9606_v5 = vld [vmem:[#allocation62_spill] sm:$0xff] }
 0x19a   : > { %v6798_v8 = vadd.f32 %v6639_v63, %v704_v60  ;;  %4838 = vmatprep.mubr.f32.mxu0 %v9589_v30  ;;  %v9607_v60 = vld [vmem:[#allocation32_spill] sm:$0xff] }
 0x19b   : > { %v1114_v23 = vpop.f32.mrf.mxu1  ;;  %1698 = vmatmul.mubr.f32.gmra.mxu1 %v9601_v48  ;;  %v706_v33 = vpop.f32.mrf.mxu0 }
 0x19c   : > { %v6803_v36 = vadd.f32 %v1114_v23, %v6709_v2  ;;  %1702 = vmatprep.mubr.f32.mxu1 %v9602_v4  ;;  %v9608_v33 = vld [vmem:[#allocation30_spill] sm:$0xff] }
 0x19d   : > { %v1116_v0 = vpop.f32.mrf.mxu1  ;;  %v709_v56 = vpop.f32.mrf.mxu0  ;;  %4839 = vmatmul.mubr.f32.gmra.mxu0 %v6630_v25  ;;  %v9605_v25 = vld [vmem:[#allocation41_spill] sm:$0xff] }
 0x19e   : > { %v6808_v29 = vadd.f32 %v6635_v11, %v709_v56  ;;  %v9609_v56 = vld [vmem:[#allocation65_spill] sm:$0xff] }
 0x19f   : > { %v1119_v63 = vpop.f32.mrf.mxu1  ;;  %1703 = vmatmul.mubr.f32.gmra.mxu1 %v9603_v47  ;;  %v711_v46 = vpop.f32.mrf.mxu0 }
 0x1a0   : > { %v6812_v62 = vadd.f32 %v1119_v63, %v6720_v22  ;;  %1707 = vmatprep.mubr.f32.mxu1 %v9604_v19 }
 0x1a1   : > { %v1121_v2 = vpop.f32.mrf.mxu1  ;;  %v714_v12 = vpop.f32.mrf.mxu0 }
 0x1a2   : > { %v6816_v49 = vadd.f32 %v6650_v59, %v714_v12  ;;  %v5184_v59 = vld [vmem:[%s5540_s30 + $0xe0] sm:$0xff]  ;;  %v9610_v12 = vld [vmem:[#allocation39_spill] sm:$0xff] }
 0x1a3   : > { %v1124_v55 = vpop.f32.mrf.mxu1  ;;  %1708 = vmatmul.mubr.f32.gmra.mxu1 %v9605_v25  ;;  %v716_v11 = vpop.f32.mrf.mxu0  ;;  %v5186_v25 = vld [vmem:[%s5540_s30 + $0xf8] sm:$0xff] }
 0x1a4   : > { %v6820_v3 = vadd.f32 %v1124_v55, %v6732_v14  ;;  %1712 = vmatprep.mubr.f32.mxu1 %v5183_v13 }
 0x1a5   : > { %v1126_v31 = vpop.f32.mrf.mxu1  ;;  %v719_v22 = vpop.f32.mrf.mxu0 }
 0x1a6   : > { %v9611_v31 = vld [vmem:[#allocation63_spill] sm:$0xff] }
 0x1a7   : > { %v1129_v1 = vpop.f32.mrf.mxu1  ;;  %1713 = vmatmul.mubr.f32.gmra.mxu1 %v9606_v5  ;;  %v721_v42 = vpop.f32.mrf.mxu0 }
 0x1a8   : > { %v6825_v40 = vadd.f32 %v1129_v1, %v6742_v58  ;;  %1717 = vmatprep.mubr.f32.mxu1 %v5184_v59  ;;  %v9612_v1 = vld [vmem:[#allocation43_spill] sm:$0xff] }
 0x1a9   : > { %v1131_v17 = vpop.f32.mrf.mxu1  ;;  %v724_v9 = vpop.f32.mrf.mxu0 }
 0x1aa   : > { %v950_v7 = vadd.f32 %v6661_v10, %v724_v9  ;;  %v5185_v10 = vld [vmem:[%s5540_s30 + $0xf0] sm:$0xff] }
 0x1ab   : > { %v1134_v14 = vpop.f32.mrf.mxu1  ;;  %1718 = vmatmul.mubr.f32.gmra.mxu1 %v9607_v60  ;;  %v726_v23 = vpop.f32.mrf.mxu0 }
 0x1ac   : > { %v6831_v48 = vadd.f32 %v1134_v14, %v6752_v50  ;;  %1722 = vmatprep.mubr.f32.mxu1 %v9608_v33 }
 0x1ad   : > { %v1136_v4 = vpop.f32.mrf.mxu1  ;;  %v729_v58 = vpop.f32.mrf.mxu0 }
 0x1af   : > { %v1139_v0 = vpop.f32.mrf.mxu1  ;;  %1723 = vmatmul.mubr.f32.gmra.mxu1 %v9609_v56  ;;  %v731_v63 = vpop.f32.mrf.mxu0 }
 0x1b0   : > { %v6836_v47 = vadd.f32 %v1139_v0, %v6762_v20  ;;  %1727 = vmatprep.mubr.f32.mxu1 %v5185_v10  ;;  %v1468_v20 = vsel %vm287_vm1, %v9612_v1, %v9611_v31 }
 0x1b1   : > { %v1141_v46 = vpop.f32.mrf.mxu1  ;;  %v734_v19 = vpop.f32.mrf.mxu0 }
 0x1b3   : > { %v1144_v2 = vpop.f32.mrf.mxu1  ;;  %1728 = vmatmul.mubr.f32.gmra.mxu1 %v9610_v12  ;;  %v736_v50 = vpop.f32.mrf.mxu0 }
 0x1b4   : > { %v6841_v55 = vadd.f32 %v1144_v2, %v6772_v52  ;;  %1732 = vmatprep.mubr.f32.mxu1 %v5186_v25  ;;  %v1471_v52 = vsel %vm253_vm3, %v9589_v30, %v1468_v20 }
 0x1b5   : > { %v1146_v11 = vpop.f32.mrf.mxu1  ;;  %v739_v13 = vpop.f32.mrf.mxu0 }
 0x1b7   : > { %v1149_v5 = vpop.f32.mrf.mxu1  ;;  %1733 = vmatmul.mubr.f32.gmra.mxu1 %v9598_v21  ;;  %v741_v42 = vpop.f32.mrf.mxu0 }
 0x1b8   : > { %v6850_v17 = vadd.f32 %v1149_v5, %v6786_v34  ;;  %1737 = vmatprep.mubr.f32.mxu1 %v5184_v59 }
 0x1b9   : > { %v1151_v9 = vpop.f32.mrf.mxu1  ;;  %v744_v14 = vpop.f32.mrf.mxu0 }
 0x1ba   : > { %v955_v9 = vadd.f32 %v6657_v6, %v729_v58 }
 0x1bb   : > { %v1154_v60 = vpop.f32.mrf.mxu1  ;;  %1738 = vmatmul.mubr.f32.gmra.mxu1 %v1471_v52  ;;  %v746_v23 = vpop.f32.mrf.mxu0 }
 0x1bc   : > { %v6856_v4 = vadd.f32 %v1154_v60, %v6798_v8  ;;  %1742 = vmatprep.mubr.f32.mxu1 %v9608_v33  ;;  %v945_v33 = vadd.f32 %v6646_v24, %v719_v22  ;;  %v960_v22 = vadd.f32 %v6672_v39, %v734_v19 }
 0x1bd   : > { %v1156_v21 = vpop.f32.mrf.mxu1  ;;  %v749_v0 = vpop.f32.mrf.mxu0 }
 0x1bf   : > { %v1159_v63 = vpop.f32.mrf.mxu1  ;;  %1743 = vmatmul.mubr.f32.gmra.mxu1 %v9609_v56  ;;  %v751_v34 = vpop.f32.mrf.mxu0 }
 0x1c0   : > { %v6861_v59 = vadd.f32 %v1159_v63, %v6808_v29 }
 0x1c1   : > { %v1161_v30 = vpop.f32.mrf.mxu1  ;;  %v754_v10 = vpop.f32.mrf.mxu0 }
 0x1c3   : > { %v1164_v46 = vpop.f32.mrf.mxu1  ;;  %v756_v2 = vpop.f32.mrf.mxu0 }
 0x1c4   : > { %v6864_v12 = vadd.f32 %v1164_v46, %v6816_v49 }
 0x1c5   : > { %v1166_v8 = vpop.f32.mrf.mxu1  ;;  %v759_v50 = vpop.f32.mrf.mxu0 }
 0x1c7   : > { %v1169_v25 = vpop.f32.mrf.mxu1  ;;  %v761_v11 = vpop.f32.mrf.mxu0 }
 0x1c8   : > { %v6867_v31 = vadd.f32 %v1169_v25, %v945_v33  ;;  %v970_v11 = vadd.f32 %v6683_v61, %v744_v14 }
 0x1c9   : > { %v1171_v56 = vpop.f32.mrf.mxu1  ;;  %v764_v1 = vpop.f32.mrf.mxu0 }
 0x1cb   : > { %v1174_v20 = vpop.f32.mrf.mxu1  ;;  %v766_v29 = vpop.f32.mrf.mxu0 }
 0x1cc   : > { %v6869_v5 = vadd.f32 %v1174_v20, %v950_v7  ;;  %v965_v7 = vadd.f32 %v6668_v51, %v739_v13 }
 0x1cd   : > { %v1176_v42 = vpop.f32.mrf.mxu1  ;;  %v769_v52 = vpop.f32.mrf.mxu0 }
 0x1ce   : > { %v975_v42 = vadd.f32 %v6679_v15, %v749_v0  ;;  %v985_v15 = vadd.f32 %v6690_v28, %v759_v50  ;;  %v995_v50 = vadd.f32 %v6701_v57, %v769_v52 }
 0x1cf   : > { %v1179_v49 = vpop.f32.mrf.mxu1  ;;  %v771_v60 = vpop.f32.mrf.mxu0 }
 0x1d0   : > { %v6872_v23 = vadd.f32 %v1179_v49, %v955_v9 }
 0x1d1   : > { %v1181_v21 = vpop.f32.mrf.mxu1  ;;  %v774_v24 = vpop.f32.mrf.mxu0 }
 0x1d2   : > { %v980_v21 = vadd.f32 %v6694_v18, %v754_v10  ;;  %v990_v10 = vadd.f32 %v6705_v27, %v764_v1 }
 0x1d3   : > { %v1184_v63 = vpop.f32.mrf.mxu1  ;;  %v776_v34 = vpop.f32.mrf.mxu0 }
 0x1d4   : > { %v6875_v30 = vadd.f32 %v1184_v63, %v960_v22 }
 0x1d5   : > { %v1186_v46 = vpop.f32.mrf.mxu1  ;;  %v779_v2 = vpop.f32.mrf.mxu0 }
 0x1d7   : > { %v1189_v8 = vpop.f32.mrf.mxu1  ;;  %v781_v33 = vpop.f32.mrf.mxu0 }
 0x1d8   : > { %v6878_v25 = vadd.f32 %v1189_v8, %v965_v7 }
 0x1d9   : > { %v1191_v6 = vpop.f32.mrf.mxu1  ;;  %v784_v58 = vpop.f32.mrf.mxu0 }
 0x1db   : > { %v1194_v56 = vpop.f32.mrf.mxu1  ;;  %v786_v20 = vpop.f32.mrf.mxu0 }
 0x1dc   : > { %v6881_v29 = vadd.f32 %v1194_v56, %v970_v11 }
 0x1dd   : > { %v1196_v39 = vpop.f32.mrf.mxu1  ;;  %v789_v19 = vpop.f32.mrf.mxu0 }
 0x1df   : > { %v1199_v9 = vpop.f32.mrf.mxu1  ;;  %v791_v49 = vpop.f32.mrf.mxu0 }
 0x1e0   : > { %v6884_v60 = vadd.f32 %v1199_v9, %v975_v42 }
 0x1e1   : > { %v1201_v51 = vpop.f32.mrf.mxu1  ;;  %v4715_v13 = vpop.f32.mrf.mxu0 }
 0x1e2   : > { %v6888_v22 = vadd.f32 %v4715_v13, %v6747_v44 }
 0x1e3   : > { %v1204_v61 = vpop.f32.mrf.mxu1  ;;  %v6890_v14 = vpop.f32.mrf.mxu0 }
 0x1e4   : > { %v6892_v63 = vadd.f32 %v1204_v61, %v980_v21 }
 0x1e5   : > { %v1206_v34 = vpop.f32.mrf.mxu1  ;;  %v4718_v46 = vpop.f32.mrf.mxu0 }
 0x1e6   : > { %v6896_v0 = vadd.f32 %v4718_v46, %v6767_v43 }
 0x1e7   : > { %v1209_v7 = vpop.f32.mrf.mxu1  ;;  %v6898_v8 = vpop.f32.mrf.mxu0 }
 0x1e8   : > { %v6900_v33 = vadd.f32 %v1209_v7, %v985_v15 }
 0x1e9   : > { %v1211_v18 = vpop.f32.mrf.mxu1  ;;  %v4721_v44 = vpop.f32.mrf.mxu0 }
 0x1ea   : > { %v6904_v6 = vadd.f32 %v4721_v44, %v6794_v37  ;;  %v1000_v37 = vadd.f32 %v6716_v53, %v774_v24 }
 0x1eb   : > { %v1214_v11 = vpop.f32.mrf.mxu1  ;;  %v6906_v56 = vpop.f32.mrf.mxu0 }
 0x1ec   : > { %v6908_v20 = vadd.f32 %v1214_v11, %v990_v10 }
 0x1ed   : > { %v1216_v28 = vpop.f32.mrf.mxu1  ;;  %v4724_v43 = vpop.f32.mrf.mxu0 }
 0x1ee   : > { %v6912_v39 = vadd.f32 %v4724_v43, %v6812_v62  ;;  %v1005_v62 = vadd.f32 %v6712_v35, %v779_v2 }
 0x1ef   : > { %v1219_v42 = vpop.f32.mrf.mxu1  ;;  %v6914_v9 = vpop.f32.mrf.mxu0 }
 0x1f0   : > { %v1220_v49 = vadd.f32 %v1219_v42, %v995_v50 }
 0x1f1   : > { %v1221_v27 = vpop.f32.mrf.mxu1  ;;  %v4727_v1 = vpop.f32.mrf.mxu0 }
 0x1f2   : > { %v6918_v51 = vadd.f32 %v4727_v1, %v6825_v40  ;;  %v1010_v40 = vadd.f32 %v6727_v38, %v784_v58 }
 0x1f3   : > { %v1224_v13 = vpop.f32.mrf.mxu1  ;;  %v6920_v21 = vpop.f32.mrf.mxu0 }
 0x1f4   : > { %v6922_v61 = vadd.f32 %v1224_v13, %v1000_v37 }
 0x1f5   : > { %v1226_v57 = vpop.f32.mrf.mxu1  ;;  %v4730_v52 = vpop.f32.mrf.mxu0 }
 0x1f6   : > { %9613 = vst [vmem:[#allocation26_spill] sm:$0xff] %v6922_v61  ;;  %v6926_v34 = vadd.f32 %v4730_v52, %v6836_v47  ;;  %v1015_v47 = vadd.f32 %v6723_v41, %v789_v19 }
 0x1f7   : > { %v1229_v46 = vpop.f32.mrf.mxu1  ;;  %v6928_v15 = vpop.f32.mrf.mxu0 }
 0x1f8   : > { %v1230_v7 = vadd.f32 %v1229_v46, %v1005_v62 }
 0x1f9   : > { %v1231_v53 = vpop.f32.mrf.mxu1  ;;  %v4733_v24 = vpop.f32.mrf.mxu0 }
 0x1fa   : > { %v6932_v18 = vadd.f32 %v4733_v24, %v6850_v17 }
 0x1fb   : > { %v1234_v44 = vpop.f32.mrf.mxu1  ;;  %v6934_v10 = vpop.f32.mrf.mxu0 }
 0x1fc   : > { %v6936_v11 = vadd.f32 %v1234_v44, %v1010_v40 }
 0x1fd   : > { %v1236_v35 = vpop.f32.mrf.mxu1  ;;  %v4736_v2 = vpop.f32.mrf.mxu0 }
 0x1fe   : > { %9614 = vst [vmem:[#allocation33_spill] sm:$0xff] %v6936_v11  ;;  %v6940_v28 = vadd.f32 %v4736_v2, %v6861_v59 }
 0x1ff   : > { %v1239_v43 = vpop.f32.mrf.mxu1  ;;  %v6942_v50 = vpop.f32.mrf.mxu0 }
 0x200   : > { %v1240_v42 = vadd.f32 %v1239_v43, %v1015_v47 }
 0x201   : > { %v1241_v38 = vpop.f32.mrf.mxu1  ;;  %v4739_v58 = vpop.f32.mrf.mxu0 }
 0x202   : > { %v6945_v17 = vadd.f32 %v4739_v58, %v6867_v31 }
 0x203   : > { %v1589_v27 = vpop.f32.mrf.mxu1  ;;  %v6947_v1 = vpop.f32.mrf.mxu0 }
 0x205   : > { %v1591_v37 = vpop.f32.mrf.mxu1  ;;  %v4742_v13 = vpop.f32.mrf.mxu0 }
 0x206   : > { %v6950_v57 = vadd.f32 %v4742_v13, %v6872_v23 }
 0x207   : > { %v1594_v41 = vpop.f32.mrf.mxu1  ;;  %v6952_v59 = vpop.f32.mrf.mxu0 }
 0x209   : > { %v1596_v19 = vpop.f32.mrf.mxu1  ;;  %v4745_v52 = vpop.f32.mrf.mxu0 }
 0x20a   : > { %v6955_v62 = vadd.f32 %v4745_v52, %v6878_v25 }
 0x20b   : > { %v1599_v46 = vpop.f32.mrf.mxu1  ;;  %v6957_v53 = vpop.f32.mrf.mxu0 }
 0x20d   : > { %v1601_v31 = vpop.f32.mrf.mxu1  ;;  %v4748_v24 = vpop.f32.mrf.mxu0 }
 0x20e   : > { %v6960_v40 = vadd.f32 %v4748_v24, %v6884_v60 }
 0x20f   : > { %v1604_v44 = vpop.f32.mrf.mxu1  ;;  %v6962_v35 = vpop.f32.mrf.mxu0 }
 0x211   : > { %v1606_v23 = vpop.f32.mrf.mxu1  ;;  %v4751_v2 = vpop.f32.mrf.mxu0 }
 0x212   : > { %v6965_v47 = vadd.f32 %v4751_v2, %v6900_v33 }
 0x213   : > { %v1609_v43 = vpop.f32.mrf.mxu1  ;;  %v6967_v38 = vpop.f32.mrf.mxu0 }
 0x215   : > { %v1611_v25 = vpop.f32.mrf.mxu1  ;;  %v4754_v58 = vpop.f32.mrf.mxu0 }
 0x216   : > { %v6969_v37 = vadd.f32 %v4754_v58, %v1220_v49 }
 0x217   : > { %v1614_v13 = vpop.f32.mrf.mxu1  ;;  %v6971_v19 = vpop.f32.mrf.mxu0 }
 0x218   : > { %9615 = vst [vmem:[#allocation52_spill] sm:$0xff] %v6969_v37 }
 0x219   : > { %v1616_v60 = vpop.f32.mrf.mxu1  ;;  %v4757_v52 = vpop.f32.mrf.mxu0 }
 0x21a   : > { %v6973_v31 = vadd.f32 %v4757_v52, %v1230_v7  ;;  %v1310_v60 = vadd.f32 %v6890_v14, %v6737_v45 }
 0x21b   : > { %v1619_v24 = vpop.f32.mrf.mxu1  ;;  %v6975_v23 = vpop.f32.mrf.mxu0 }
 0x21c   : > { %9616 = vst [vmem:[#allocation24_spill] sm:$0xff] %v6973_v31  ;;  %9617 = vst [vmem:[#allocation51_spill] sm:$0xff] %v6975_v23 }
 0x21d   : > { %v1621_v32 = vpop.f32.mrf.mxu1  ;;  %v4760_v33 = vpop.f32.mrf.mxu0 }
 0x21e   : > { %v6977_v2 = vadd.f32 %v4760_v33, %v1240_v42 }
 0x21f   : > { %v1624_v26 = vpop.f32.mrf.mxu1  ;;  %v6979_v11 = vpop.f32.mrf.mxu0 }
 0x220   : > { %9618 = vst [vmem:[#allocation27_spill] sm:$0xff] %v6977_v2  ;;  %9619 = vst [vmem:[#allocation34_spill] sm:$0xff] %v6979_v11 }
 0x221   : > { %v1626_v25 = vpop.f32.mrf.mxu1  ;;  %v4795_v49 = vpop.f32.mrf.mxu0 }
 0x222   : > { %v1820_v58 = vadd.f32 %v4795_v49, %v1594_v41  ;;  %v1320_v25 = vadd.f32 %v6898_v8, %v6757_v54 }
 0x223   : > { %v1629_v61 = vpop.f32.mrf.mxu1  ;;  %v1814_v37 = vpop.f32.mrf.mxu0 }
 0x224   : > { %v6984_v7 = vadd.f32 %v1820_v58, %v6888_v22  ;;  %v1815_v52 = vadd.f32 %v1814_v37, %v1589_v27 }
 0x225   : > { %v1631_v31 = vpop.f32.mrf.mxu1  ;;  %v4798_v32 = vpop.f32.mrf.mxu0 }
 0x226   : > { %v6986_v23 = vadd.f32 %v1815_v52, %v1310_v60  ;;  %v1830_v42 = vadd.f32 %v4798_v32, %v1604_v44  ;;  %v1330_v44 = vadd.f32 %v6906_v56, %v6781_v16  ;;  %v1340_v32 = vadd.f32 %v6914_v9, %v6803_v36 }
 0x227   : > { %v1634_v33 = vpop.f32.mrf.mxu1  ;;  %v1824_v2 = vpop.f32.mrf.mxu0 }
 0x228   : > { %v6991_v41 = vadd.f32 %v1830_v42, %v6896_v0  ;;  %v1825_v49 = vadd.f32 %v1824_v2, %v1599_v46  ;;  %v2005_v22 = vadd.f32 %v6984_v7, %v6986_v23 }
 0x229   : > { %v1636_v11 = vpop.f32.mrf.mxu1  ;;  %v4801_v45 = vpop.f32.mrf.mxu0 }
 0x22a   : > { %v6995_v14 = vadd.f32 %v1825_v49, %v1320_v25  ;;  %v1840_v27 = vadd.f32 %v4801_v45, %v1614_v13 }
 0x22b   : > { %v1639_v37 = vpop.f32.mrf.mxu1  ;;  %v1834_v31 = vpop.f32.mrf.mxu0 }
 0x22c   : > { %v2006_v58 = vadd.f32 %v2005_v22, %v6995_v14  ;;  %v7001_v54 = vadd.f32 %v1840_v27, %v6904_v6  ;;  %v1835_v0 = vadd.f32 %v1834_v31, %v1609_v43  ;;  %v1350_v27 = vadd.f32 %v6920_v21, %v6820_v3 }
 0x22d   : > { %v1641_v8 = vpop.f32.mrf.mxu1  ;;  %v4804_v11 = vpop.f32.mrf.mxu0 }
 0x22e   : > { %v7003_v46 = vadd.f32 %v1835_v0, %v1330_v44  ;;  %v2007_v2 = vadd.f32 %v2006_v58, %v6991_v41  ;;  %v1850_v60 = vadd.f32 %v4804_v11, %v1624_v26  ;;  %v1360_v11 = vadd.f32 %v6928_v15, %v6831_v48 }
 0x22f   : > { %v1644_v52 = vpop.f32.mrf.mxu1  ;;  %v1844_v13 = vpop.f32.mrf.mxu0 }
 0x230   : > { %v2008_v16 = vadd.f32 %v2007_v2, %v7003_v46  ;;  %v7010_v56 = vadd.f32 %v1850_v60, %v6912_v39  ;;  %v1845_v6 = vadd.f32 %v1844_v13, %v1619_v24 }
 0x231   : > { %v1646_v42 = vpop.f32.mrf.mxu1  ;;  %v4807_v43 = vpop.f32.mrf.mxu0 }
 0x232   : > { %v7012_v25 = vadd.f32 %v1845_v6, %v1340_v32  ;;  %v2009_v49 = vadd.f32 %v2008_v16, %v7001_v54  ;;  %v1860_v45 = vadd.f32 %v4807_v43, %v1634_v33 }
 0x233   : > { %v1649_v22 = vpop.f32.mrf.mxu1  ;;  %v1854_v26 = vpop.f32.mrf.mxu0 }
 0x234   : > { %v2010_v36 = vadd.f32 %v2009_v49, %v7012_v25  ;;  %v7019_v9 = vadd.f32 %v1860_v45, %v6918_v51  ;;  %v1855_v39 = vadd.f32 %v1854_v26, %v1629_v61 }
 0x235   : > { %v1651_v31 = vpop.f32.mrf.mxu1  ;;  %v4810_v24 = vpop.f32.mrf.mxu0 }
 0x236   : > { %v7021_v44 = vadd.f32 %v1855_v39, %v1350_v27  ;;  %v2011_v58 = vadd.f32 %v2010_v36, %v7010_v56  ;;  %v1870_v0 = vadd.f32 %v4810_v24, %v1644_v52  ;;  %v1370_v52 = vadd.f32 %v6934_v10, %v6841_v55 }
 0x237   : > { %v1654_v8 = vpop.f32.mrf.mxu1  ;;  %v1864_v33 = vpop.f32.mrf.mxu0  ;;  %v1380_v55 = vadd.f32 %v6942_v50, %v6856_v4  ;;  %v1390_v4 = vadd.f32 %v6947_v1, %v6864_v12 }
 0x238   : > { %v2012_v3 = vadd.f32 %v2011_v58, %v7021_v44  ;;  %v7028_v21 = vadd.f32 %v1870_v0, %v6926_v34  ;;  %v1865_v51 = vadd.f32 %v1864_v33, %v1639_v37 }
 0x239   : > { %v1656_v2 = vpop.f32.mrf.mxu1  ;;  %v4813_v61 = vpop.f32.mrf.mxu0 }
 0x23a   : > { %v7030_v60 = vadd.f32 %v1865_v51, %v1360_v11  ;;  %v2013_v13 = vadd.f32 %v2012_v3, %v7019_v9  ;;  %v1880_v45 = vadd.f32 %v4813_v61, %v1654_v8 }
 0x23b   : > { %v1659_v32 = vpop.f32.mrf.mxu1  ;;  %v1874_v16 = vpop.f32.mrf.mxu0 }
 0x23c   : > { %v2014_v6 = vadd.f32 %v2013_v13, %v7030_v60  ;;  %v1875_v48 = vadd.f32 %v1874_v16, %v1649_v22  ;;  %v7043_v10 = vadd.f32 %v1880_v45, %v6932_v18 }
 0x23d   : > { %v1661_v15 = vpop.f32.mrf.mxu1  ;;  %v4816_v42 = vpop.f32.mrf.mxu0 }
 0x23e   : > { %v7036_v43 = vadd.f32 %v1875_v48, %v1370_v52  ;;  %v2015_v34 = vadd.f32 %v2014_v6, %v7028_v21 }
 0x23f   : > { %v1664_v37 = vpop.f32.mrf.mxu1  ;;  %v1884_v49 = vpop.f32.mrf.mxu0 }
 0x240   : > { %v2016_v36 = vadd.f32 %v2015_v34, %v7036_v43  ;;  %v1885_v39 = vadd.f32 %v1884_v49, %v1659_v32  ;;  %v1890_v11 = vadd.f32 %v4816_v42, %v1664_v37  ;;  %v1400_v37 = vadd.f32 %v6952_v59, %v6869_v5 }
 0x241   : > { %v1666_v26 = vpop.f32.mrf.mxu1  ;;  %v4819_v27 = vpop.f32.mrf.mxu0 }
 0x242   : > { %v7045_v58 = vadd.f32 %v1885_v39, %v1380_v55  ;;  %v2017_v0 = vadd.f32 %v2016_v36, %v7043_v10  ;;  %v7052_v18 = vadd.f32 %v1890_v11, %v6940_v28 }
 0x243   : > { %v1669_v31 = vpop.f32.mrf.mxu1  ;;  %v1894_v22 = vpop.f32.mrf.mxu0 }
 0x244   : > { %v2018_v51 = vadd.f32 %v2017_v0, %v7045_v58  ;;  %v1895_v2 = vadd.f32 %v1894_v22, %v1669_v31  ;;  %v1410_v31 = vadd.f32 %v6957_v53, %v6875_v30  ;;  %v2478_v22 = vld [vmem:[#allocation7 + $0x1f0] sm:$0xff]  ;;  %v2477_v30 = vld [vmem:[#allocation7 + $0x1e8] sm:$0xff] }
 0x245   : > { %v1671_v24 = vpop.f32.mrf.mxu1  ;;  %v4822_v8 = vpop.f32.mrf.mxu0 }
 0x246   : > { %v7054_v16 = vadd.f32 %v1895_v2, %v1390_v4  ;;  %v2019_v52 = vadd.f32 %v2018_v51, %v7052_v18  ;;  %v2476_v51 = vld [vmem:[#allocation7 + $0x1e0] sm:$0xff]  ;;  %v1420_v2 = vadd.f32 %v6962_v35, %v6881_v29 }
 0x247   : > { %v1674_v33 = vpop.f32.mrf.mxu1  ;;  %v1904_v13 = vpop.f32.mrf.mxu0 }
 0x248   : > { %v1900_v6 = vadd.f32 %v4819_v27, %v1674_v33  ;;  %v2020_v49 = vadd.f32 %v2019_v52, %v7054_v16  ;;  %v2479_v27 = vld [vmem:[#allocation7 + $0x1f8] sm:$0xff] }
 0x249   : > { %v1676_v3 = vpop.f32.mrf.mxu1  ;;  %v4825_v32 = vpop.f32.mrf.mxu0  ;;  %2513 = vmatpush1.msra.mxu0 %v2479_v27 }
 0x24a   : > { %v7061_v12 = vadd.f32 %v1900_v6, %v6945_v17  ;;  %v9620_v17 = vmov 0.0  }
 0x24b   : > { %v1679_v61 = vpop.f32.mrf.mxu1  ;;  %v1914_v34 = vpop.f32.mrf.mxu0  ;;  %2514 = vmatprep.subr.mxu0 %v9620_v17 }
 0x24c   : > { %v1905_v15 = vadd.f32 %v1904_v13, %v1679_v61  ;;  %v2021_v55 = vadd.f32 %v2020_v49, %v7061_v12  ;;  %2515 = vmatpush1.msra.mxu0 %v2478_v22 }
 0x24d   : > { %v1681_v50 = vpop.f32.mrf.mxu1  ;;  %v4828_v39 = vpop.f32.mrf.mxu0  ;;  %2516 = vmatprep.subr.mxu0 %v9620_v17 }
 0x24e   : > { %v7063_v45 = vadd.f32 %v1905_v15, %v1400_v37  ;;  %2517 = vmatpush1.msra.mxu0 %v2477_v30  ;;  %v2468_v30 = vld [vmem:[#allocation7 + $0x1a0] sm:$0xff] }
 0x24f   : > { %v1684_v48 = vpop.f32.mrf.mxu1  ;;  %v1924_v11 = vpop.f32.mrf.mxu0  ;;  %2518 = vmatprep.subr.mxu0 %v9620_v17 }
 0x250   : > { %v1910_v28 = vadd.f32 %v4822_v8, %v1684_v48  ;;  %v2022_v24 = vadd.f32 %v2021_v55, %v7063_v45  ;;  %2519 = vmatpush1.msra.mxu0 %v2476_v51  ;;  %v2474_v48 = vld [vmem:[#allocation7 + $0x1d0] sm:$0xff] }
 0x251   : > { %v1686_v42 = vpop.f32.mrf.mxu1  ;;  %v4831_v50 = vpop.f32.mrf.mxu0  ;;  %2520 = vmatprep.subr.mxu0 %v9620_v17 }
 0x252   : > { %v7069_v5 = vadd.f32 %v1910_v28, %v6950_v57  ;;  %v2472_v28 = vld [vmem:[#allocation7 + $0x1c0] sm:$0xff] }
 0x253   : > { %v1689_v1 = vpop.f32.mrf.mxu1  ;;  %v1934_v42 = vpop.f32.mrf.mxu0 }
 0x254   : > { %v1915_v26 = vadd.f32 %v1914_v34, %v1689_v1  ;;  %v2023_v53 = vadd.f32 %v2022_v24, %v7069_v5  ;;  %v2473_v34 = vld [vmem:[#allocation7 + $0x1c8] sm:$0xff]  ;;  %v1430_v1 = vadd.f32 %v6967_v38, %v6892_v63 }
 0x255   : > { %v1691_v36 = vpop.f32.mrf.mxu1  ;;  %v4834_v27 = vpop.f32.mrf.mxu0 }
 0x256   : > { %v7073_v0 = vadd.f32 %v1915_v26, %v1410_v31  ;;  %v2471_v31 = vld [vmem:[#allocation7 + $0x1b8] sm:$0xff] }
 0x257   : > { %v1694_v59 = vpop.f32.mrf.mxu1  ;;  %v1944_v38 = vpop.f32.mrf.mxu0 }
 0x258   : > { %v1920_v33 = vadd.f32 %v4825_v32, %v1694_v59  ;;  %v2024_v61 = vadd.f32 %v2023_v53, %v7073_v0  ;;  %v2475_v32 = vld [vmem:[#allocation7 + $0x1d8] sm:$0xff]  ;;  %v2470_v59 = vld [vmem:[#allocation7 + $0x1b0] sm:$0xff]  ;;  %v1440_v53 = vadd.f32 %v6971_v19, %v6908_v20 }
 0x259   : > { %v1696_v8 = vpop.f32.mrf.mxu1  ;;  %2521 = vmatpush1.msra.mxu0 %v2475_v32 }
 0x25a   : > { %v7078_v57 = vadd.f32 %v1920_v33, %v6955_v62  ;;  %2522 = vmatprep.subr.mxu0 %v9620_v17  ;;  %v2469_v33 = vld [vmem:[#allocation7 + $0x1a8] sm:$0xff] }
 0x25b   : > { %v1699_v3 = vpop.f32.mrf.mxu1  ;;  %2523 = vmatpush1.msra.mxu0 %v2474_v48  ;;  %v9621_v48 = vld [vmem:[#allocation52_spill] sm:$0xff] }
 0x25c   : > { %v1925_v13 = vadd.f32 %v1924_v11, %v1699_v3  ;;  %v2025_v62 = vadd.f32 %v2024_v61, %v7078_v57  ;;  %2524 = vmatprep.subr.mxu0 %v9620_v17  ;;  %v4837_v61 = vpop.f32.mrf.mxu0 }
 0x25d   : > { %v1701_v4 = vpop.f32.mrf.mxu1  ;;  %2525 = vmatpush1.msra.mxu0 %v2473_v34  ;;  %v9623_v34 = vld [vmem:[#allocation51_spill] sm:$0xff] }
 0x25e   : > { %v7086_v52 = vadd.f32 %v1925_v13, %v1420_v2  ;;  %2526 = vmatprep.subr.mxu0 %v9620_v17  ;;  %v2467_v13 = vld [vmem:[#allocation7 + $0x198] sm:$0xff]  ;;  %v1954_v19 = vpop.f32.mrf.mxu0 }
 0x25f   : > { %v1704_v6 = vpop.f32.mrf.mxu1  ;;  %2527 = vmatpush1.msra.mxu0 %v2472_v28 }
 0x260   : > { %v2026_v29 = vadd.f32 %v2025_v62, %v7086_v52  ;;  %v1930_v35 = vadd.f32 %v4828_v39, %v1704_v6  ;;  %2528 = vmatprep.subr.mxu0 %v9620_v17  ;;  %v2465_v6 = vld [vmem:[#allocation7 + $0x188] sm:$0xff] }
 0x261   : > { %v1706_v15 = vpop.f32.mrf.mxu1  ;;  %2529 = vmatpush1.msra.mxu0 %v2471_v31 }
 0x262   : > { %v7092_v37 = vadd.f32 %v1930_v35, %v6960_v40  ;;  %2530 = vmatprep.subr.mxu0 %v9620_v17  ;;  %v2464_v15 = vld [vmem:[#allocation7 + $0x180] sm:$0xff] }
 0x263   : > { %v1709_v49 = vpop.f32.mrf.mxu1  ;;  %2531 = vmatpush1.msra.mxu0 %v2470_v59 }
 0x264   : > { %v2027_v26 = vadd.f32 %v2026_v29, %v7092_v37  ;;  %v1935_v36 = vadd.f32 %v1934_v42, %v1709_v49  ;;  %2532 = vmatprep.subr.mxu0 %v9620_v17  ;;  %v9622_v42 = vld [vmem:[#allocation26_spill] sm:$0xff] }
 0x265   : > { %v1711_v39 = vpop.f32.mrf.mxu1  ;;  %2533 = vmatpush1.msra.mxu0 %v2469_v33  ;;  %v1450_v49 = vadd.f32 %v9623_v34, %v9622_v42  ;;  %v2490_v42 = vld [vmem:[#allocation7 + $0x250] sm:$0xff] }
 0x266   : > { %v7099_v55 = vadd.f32 %v1935_v36, %v1430_v1  ;;  %2534 = vmatprep.subr.mxu0 %v9620_v17  ;;  %v4840_v39 = vpop.f32.mrf.mxu0 }
 0x267   : > { %v1714_v40 = vpop.f32.mrf.mxu1  ;;  %2535 = vmatpush1.msra.mxu0 %v2468_v30  ;;  %v2493_v30 = vld [vmem:[#allocation7 + $0x268] sm:$0xff] }
 0x268   : > { %v2028_v22 = vadd.f32 %v2027_v26, %v7099_v55  ;;  %v1940_v24 = vadd.f32 %v4831_v50, %v1714_v40  ;;  %2536 = vmatprep.subr.mxu0 %v9620_v17  ;;  %v2466_v50 = vld [vmem:[#allocation7 + $0x190] sm:$0xff]  ;;  %v2511_v26 = vld [vmem:[#allocation7 + $0x2f8] sm:$0xff] }
 0x269   : > { %v1716_v63 = vpop.f32.mrf.mxu1  ;;  %2537 = vmatpush1.msra.mxu0 %v2467_v13  ;;  %4841 = vmatprep.subr.mxu1 %v2511_v26  ;;  %v2510_v40 = vld [vmem:[#allocation7 + $0x2f0] sm:$0xff]  ;;  %v9625_v13 = vld [vmem:[#allocation33_spill] sm:$0xff] }
 0x26a   : > { %v7105_v8 = vadd.f32 %v1940_v24, %v6965_v47  ;;  %2538 = vmatprep.subr.mxu0 %v9620_v17  ;;  %4842 = vmatpush3.msra.mxu1 %v2511_v26  ;;  %v2489_v26 = vld [vmem:[#allocation7 + $0x248] sm:$0xff] }
 0x26b   : > { %v1719_v11 = vpop.f32.mrf.mxu1  ;;  %2539 = vmatpush1.msra.mxu0 %v2466_v50  ;;  %4843 = vmatprep.subr.mxu1 %v2510_v40 }
 0x26c   : > { %v2029_v3 = vadd.f32 %v2028_v22, %v7105_v8  ;;  %v1945_v51 = vadd.f32 %v1944_v38, %v1719_v11  ;;  %2540 = vmatprep.subr.mxu0 %v9620_v17  ;;  %v2494_v22 = vld [vmem:[#allocation7 + $0x270] sm:$0xff]  ;;  %4844 = vmatpush3.msra.mxu1 %v2510_v40  ;;  %v2509_v38 = vld [vmem:[#allocation7 + $0x2e8] sm:$0xff]  ;;  %v1964_v11 = vpop.f32.mrf.mxu0  ;;  %v2504_v40 = vld [vmem:[#allocation7 + $0x2c0] sm:$0xff] }
 0x26d   : > { %v1721_v2 = vpop.f32.mrf.mxu1  ;;  %2541 = vmatpush1.msra.mxu0 %v2465_v6  ;;  %4845 = vmatprep.subr.mxu1 %v2509_v38  ;;  %v2491_v6 = vld [vmem:[#allocation7 + $0x258] sm:$0xff] }
 0x26e   : > { %v7112_v4 = vadd.f32 %v1945_v51, %v1440_v53  ;;  %2542 = vmatprep.subr.mxu0 %v9620_v17  ;;  %v9624_v53 = vld [vmem:[#allocation24_spill] sm:$0xff]  ;;  %4846 = vmatpush3.msra.mxu1 %v2509_v38  ;;  %v2502_v38 = vld [vmem:[#allocation7 + $0x2b0] sm:$0xff] }
 0x26f   : > { %v1724_v47 = vpop.f32.mrf.mxu1  ;;  %2543 = vmatpush1.msra.mxu0 %v2464_v15  ;;  %v2508_v51 = vld [vmem:[#allocation7 + $0x2e0] sm:$0xff] }
 0x270   : > { %v2030_v32 = vadd.f32 %v2029_v3, %v7112_v4  ;;  %v1950_v62 = vadd.f32 %v4834_v27, %v1724_v47  ;;  %2544 = vmatprep.subr.mxu0 %v9620_v17  ;;  %v2495_v27 = vld [vmem:[#allocation7 + $0x278] sm:$0xff]  ;;  %4847 = vmatprep.subr.mxu1 %v2508_v51  ;;  %v9626_v47 = vld [vmem:[#allocation34_spill] sm:$0xff] }
 0x271   : > { %v1726_v20 = vpop.f32.mrf.mxu1  ;;  %2545 = vmatpush2.msra.mxu0 %v2495_v27  ;;  %v1460_v50 = vadd.f32 %v9626_v47, %v9625_v13  ;;  %4848 = vmatpush3.msra.mxu1 %v2508_v51  ;;  %v2499_v47 = vld [vmem:[#allocation7 + $0x298] sm:$0xff] }
 0x272   : > { %v7118_v29 = vadd.f32 %v1950_v62, %v9621_v48  ;;  %2546 = vmatprep.subr.mxu0 %v9620_v17  ;;  %v2507_v20 = vld [vmem:[#allocation7 + $0x2d8] sm:$0xff] }
 0x273   : > { %v1729_v35 = vpop.f32.mrf.mxu1  ;;  %2547 = vmatpush2.msra.mxu0 %v2494_v22  ;;  %4849 = vmatprep.subr.mxu1 %v2507_v20  ;;  %v2503_v22 = vld [vmem:[#allocation7 + $0x2b8] sm:$0xff] }
 0x274   : > { %v2031_v28 = vadd.f32 %v2030_v32, %v7118_v29  ;;  %v1955_v1 = vadd.f32 %v1954_v19, %v1729_v35  ;;  %2548 = vmatprep.subr.mxu0 %v9620_v17  ;;  %4850 = vmatpush3.msra.mxu1 %v2507_v20  ;;  %v2506_v35 = vld [vmem:[#allocation7 + $0x2d0] sm:$0xff] }
 0x275   : > { %v1731_v36 = vpop.f32.mrf.mxu1  ;;  %2549 = vmatpush2.msra.mxu0 %v2493_v30  ;;  %4851 = vmatprep.subr.mxu1 %v2506_v35  ;;  %v2501_v30 = vld [vmem:[#allocation7 + $0x2a8] sm:$0xff]  ;;  %v2482_v20 = vld [vmem:[#allocation7 + $0x210] sm:$0xff] }
 0x276   : > { %v7125_v31 = vadd.f32 %v1955_v1, %v1450_v49  ;;  %2550 = vmatprep.subr.mxu0 %v9620_v17  ;;  %4852 = vmatpush3.msra.mxu1 %v2506_v35  ;;  %v9627_v36 = vld [vmem:[#allocation27_spill] sm:$0xff]  ;;  %v2481_v35 = vld [vmem:[#allocation7 + $0x208] sm:$0xff] }
 0x277   : > { %v1734_v59 = vpop.f32.mrf.mxu1 }
 0x278   : > { %v2032_v24 = vadd.f32 %v2031_v28, %v7125_v31  ;;  %v1960_v63 = vadd.f32 %v4837_v61, %v1734_v59  ;;  %v2492_v61 = vld [vmem:[#allocation7 + $0x260] sm:$0xff]  ;;  %v2505_v28 = vld [vmem:[#allocation7 + $0x2c8] sm:$0xff] }
 0x279   : > { %v1736_v33 = vpop.f32.mrf.mxu1  ;;  %2551 = vmatpush2.msra.mxu0 %v2492_v61  ;;  %4853 = vmatprep.subr.mxu1 %v2505_v28  ;;  %v2488_v59 = vld [vmem:[#allocation7 + $0x240] sm:$0xff] }
 0x27a   : > { %v7131_v3 = vadd.f32 %v1960_v63, %v9624_v53  ;;  %2552 = vmatprep.subr.mxu0 %v9620_v17  ;;  %4854 = vmatpush3.msra.mxu1 %v2505_v28  ;;  %v2486_v33 = vld [vmem:[#allocation7 + $0x230] sm:$0xff]  ;;  %v2485_v53 = vld [vmem:[#allocation7 + $0x228] sm:$0xff]  ;;  %v2484_v61 = vld [vmem:[#allocation7 + $0x220] sm:$0xff] }
 0x27b   : > { %v1739_v2 = vpop.f32.mrf.mxu1  ;;  %2553 = vmatpush2.msra.mxu0 %v2491_v6  ;;  %4855 = vmatprep.subr.mxu1 %v2504_v40  ;;  %v2497_v6 = vld [vmem:[#allocation7 + $0x288] sm:$0xff] }
 0x27c   : > { %v2033_v32 = vadd.f32 %v2032_v24, %v7131_v3  ;;  %v1965_v62 = vadd.f32 %v1964_v11, %v1739_v2  ;;  %2554 = vmatprep.subr.mxu0 %v9620_v17  ;;  %4856 = vmatpush3.msra.mxu1 %v2504_v40  ;;  %v2487_v24 = vld [vmem:[#allocation7 + $0x238] sm:$0xff]  ;;  %v2500_v2 = vld [vmem:[#allocation7 + $0x2a0] sm:$0xff] }
 0x27d   : > { %v1741_v19 = vpop.f32.mrf.mxu1  ;;  %2555 = vmatpush2.msra.mxu0 %v2490_v42  ;;  %4857 = vmatprep.subr.mxu1 %v2503_v22  ;;  %v2480_v42 = vld [vmem:[#allocation7 + $0x200] sm:$0xff] }
 0x27e   : > { %v7138_v48 = vadd.f32 %v1965_v62, %v1460_v50  ;;  %2556 = vmatprep.subr.mxu0 %v9620_v17  ;;  %4858 = vmatpush3.msra.mxu1 %v2503_v22  ;;  %v2483_v50 = vld [vmem:[#allocation7 + $0x218] sm:$0xff]  ;;  %v2498_v62 = vld [vmem:[#allocation7 + $0x290] sm:$0xff] }
 0x27f   : > { %v1744_v15 = vpop.f32.mrf.mxu1  ;;  %2557 = vmatpush2.msra.mxu0 %v2489_v26  ;;  %4859 = vmatprep.subr.mxu1 %v2502_v38 }
 0x280   : > { %v2034_v34 = vadd.f32 %v2033_v32, %v7138_v48  ;;  %v1970_v49 = vadd.f32 %v4840_v39, %v1744_v15  ;;  %2558 = vmatprep.subr.mxu0 %v9620_v17  ;;  %4860 = vmatpush3.msra.mxu1 %v2502_v38  ;;  %v2496_v15 = vld [vmem:[#allocation7 + $0x280] sm:$0xff] }
 0x281   : > { %v1746_v1 = vpop.f32.mrf.mxu1  ;;  %2559 = vmatpush2.msra.mxu0 %v2488_v59  ;;  %4861 = vmatprep.subr.mxu1 %v2501_v30 }
 0x282   : > { %v7144_v27 = vadd.f32 %v1970_v49, %v9627_v36  ;;  %2560 = vmatprep.subr.mxu0 %v9620_v17  ;;  %4862 = vmatpush3.msra.mxu1 %v2501_v30  ;;  %v7158_v49 = vld [vmem:[#allocation7 + $0x178] sm:$0xff] }
 0x283   : > { %2561 = vmatpush2.msra.mxu0 %v2487_v24  ;;  %4863 = vmatprep.subr.mxu1 %v2500_v2 }
 0x284   : > { %v2035_v39 = vadd.f32 %v2034_v34, %v7144_v27  ;;  %2562 = vmatprep.subr.mxu0 %v9620_v17  ;;  %4864 = vmatpush3.msra.mxu1 %v2500_v2 }
 0x285   : > { %2563 = vmatpush2.msra.mxu0 %v2486_v33  ;;  %4865 = vmatprep.subr.mxu1 %v2499_v47 }
 0x286   : > { %v2036_v63 = vrot.slane %v2035_v39, 4  ;;  %2564 = vmatprep.subr.mxu0 %v9620_v17  ;;  %4866 = vmatpush3.msra.mxu1 %v2499_v47 }
 0x287   : > { %2565 = vmatpush2.msra.mxu0 %v2485_v53  ;;  %4867 = vmatprep.subr.mxu1 %v2498_v62 }
 0x288   : > { %v2037_v11 = vadd.f32 %v2036_v63, %v2035_v39  ;;  %2566 = vmatprep.subr.mxu0 %v9620_v17  ;;  %4868 = vmatpush3.msra.mxu1 %v2498_v62 }
 0x289   : > { %2567 = vmatpush2.msra.mxu0 %v2484_v61  ;;  %4869 = vmatprep.subr.mxu1 %v2497_v6 }
 0x28a   : > { %v2038_v51 = vrot.slane %v2037_v11, 2  ;;  %2568 = vmatprep.subr.mxu0 %v9620_v17  ;;  %4870 = vmatpush3.msra.mxu1 %v2497_v6 }
 0x28b   : > { %2569 = vmatpush2.msra.mxu0 %v2483_v50  ;;  %4871 = vmatprep.subr.mxu1 %v2496_v15 }
 0x28c   : > { %v2039_v13 = vadd.f32 %v2038_v51, %v2037_v11  ;;  %2570 = vmatprep.subr.mxu0 %v9620_v17  ;;  %4872 = vmatpush3.msra.mxu1 %v2496_v15 }
 0x28d   : > { %2571 = vmatpush2.msra.mxu0 %v2482_v20  ;;  %2962 = vmatprep.subr.mxu1 %v9620_v17 }
 0x28e   : > { %v2040_v32 = vrot.slane %v2039_v13, 1  ;;  %2572 = vmatprep.subr.mxu0 %v9620_v17 }
 0x28f   : > { %2573 = vmatpush2.msra.mxu0 %v2481_v35 }
 0x290   : > { %v2041_v19 = vadd.f32 %v2040_v32, %v2039_v13  ;;  %2574 = vmatprep.subr.mxu0 %v9620_v17 }
 0x291   : > { %2575 = vmatpush2.msra.mxu0 %v2480_v42 }
 0x292   : > { %v7156_v34 = vmul.f32 0.00390625, %v2041_v19  ;;  %4921 = vmatprep.subr.mxu0 %v7158_v49 }
 0x294   : > { %v7163_v28 = vsub.f32 %v7078_v57, %v7156_v34  ;;  %v7167_v1 = vsub.f32 %v7086_v52, %v7156_v34  ;;  %v7171_v26 = vsub.f32 %v7092_v37, %v7156_v34  ;;  %v7176_v36 = vsub.f32 %v7099_v55, %v7156_v34 }
 0x295   : > { %v7180_v40 = vsub.f32 %v7105_v8, %v7156_v34  ;;  %v7184_v57 = vsub.f32 %v7112_v4, %v7156_v34  ;;  %v7188_v52 = vsub.f32 %v7118_v29, %v7156_v34  ;;  %v7192_v37 = vsub.f32 %v7125_v31, %v7156_v34 }
 0x296   : > { %v7196_v55 = vsub.f32 %v7131_v3, %v7156_v34  ;;  %v7200_v8 = vsub.f32 %v7138_v48, %v7156_v34  ;;  %v7204_v4 = vsub.f32 %v7144_v27, %v7156_v34  ;;  %v7208_v29 = vsub.f32 %v6986_v23, %v7156_v34 }
 0x297   : > { %v7212_v31 = vsub.f32 %v6984_v7, %v7156_v34  ;;  %v7216_v3 = vsub.f32 %v6995_v14, %v7156_v34  ;;  %v7224_v27 = vsub.f32 %v6991_v41, %v7156_v34  ;;  %v7228_v23 = vsub.f32 %v7003_v46, %v7156_v34 }
 0x298   : > { %v2075_v48 = vmul.f32 %v7208_v29, %v7208_v29  ;;  %v7234_v14 = vsub.f32 %v7001_v54, %v7156_v34  ;;  %v7240_v41 = vsub.f32 %v7012_v25, %v7156_v34  ;;  %v7246_v38 = vsub.f32 %v7010_v56, %v7156_v34 }
 0x299   : > { %v2076_v59 = vmul.f32 %v7212_v31, %v7212_v31  ;;  %v2077_v7 = vmul.f32 %v7216_v3, %v7216_v3  ;;  %v2078_v22 = vmul.f32 %v7224_v27, %v7224_v27  ;;  %v2079_v46 = vmul.f32 %v7228_v23, %v7228_v23 }
 0x29a   : > { %v2080_v54 = vmul.f32 %v7234_v14, %v7234_v14  ;;  %v7252_v11 = vsub.f32 %v7021_v44, %v7156_v34  ;;  %v2081_v25 = vmul.f32 %v7240_v41, %v7240_v41  ;;  %v7258_v53 = vsub.f32 %v7019_v9, %v7156_v34 }
 0x29b   : > { %v2107_v39 = vadd.f32 %v2076_v59, %v2075_v48  ;;  %v2082_v56 = vmul.f32 %v7246_v38, %v7246_v38  ;;  %v7264_v2 = vsub.f32 %v7030_v60, %v7156_v34  ;;  %v7270_v13 = vsub.f32 %v7028_v21, %v7156_v34 }
 0x29c   : > { %v2083_v44 = vmul.f32 %v7252_v11, %v7252_v11  ;;  %v2084_v9 = vmul.f32 %v7258_v53, %v7258_v53  ;;  %v7276_v50 = vsub.f32 %v7036_v43, %v7156_v34  ;;  %v7282_v62 = vsub.f32 %v7043_v10, %v7156_v34 }
 0x29d   : > { %v2108_v24 = vadd.f32 %v2107_v39, %v2077_v7  ;;  %v2085_v60 = vmul.f32 %v7264_v2, %v7264_v2  ;;  %v2086_v21 = vmul.f32 %v7270_v13, %v7270_v13  ;;  %v7288_v19 = vsub.f32 %v7045_v58, %v7156_v34 }
 0x29e   : > { %v2087_v43 = vmul.f32 %v7276_v50, %v7276_v50  ;;  %v7294_v35 = vsub.f32 %v7052_v18, %v7156_v34  ;;  %v2088_v10 = vmul.f32 %v7282_v62, %v7282_v62  ;;  %v7300_v42 = vsub.f32 %v7054_v16, %v7156_v34 }
 0x29f   : > { %v2109_v63 = vadd.f32 %v2108_v24, %v2078_v22  ;;  %v2089_v58 = vmul.f32 %v7288_v19, %v7288_v19  ;;  %v7306_v59 = vsub.f32 %v7061_v12, %v7156_v34  ;;  %v7312_v39 = vsub.f32 %v7063_v45, %v7156_v34 }
 0x2a0   : > { %v2090_v18 = vmul.f32 %v7294_v35, %v7294_v35  ;;  %v2091_v16 = vmul.f32 %v7300_v42, %v7300_v42  ;;  %v7318_v24 = vsub.f32 %v7069_v5, %v7156_v34 }
 0x2a1   : > { %v2110_v33 = vadd.f32 %v2109_v63, %v2079_v46  ;;  %v2092_v12 = vmul.f32 %v7306_v59, %v7306_v59  ;;  %v7324_v63 = vsub.f32 %v7073_v0, %v7156_v34  ;;  %v2093_v45 = vmul.f32 %v7312_v39, %v7312_v39 }
 0x2a2   : > { %v2097_v0 = vmul.f32 %v7167_v1, %v7167_v1 }
 0x2a3   : > { %v2111_v30 = vadd.f32 %v2110_v33, %v2080_v54  ;;  %v2094_v33 = vmul.f32 %v7318_v24, %v7318_v24  ;;  %v2095_v5 = vmul.f32 %v7324_v63, %v7324_v63 }
 0x2a5   : > { %v2112_v51 = vadd.f32 %v2111_v30, %v2081_v25 }
 0x2a7   : > { %v2113_v61 = vadd.f32 %v2112_v51, %v2082_v56  ;;  %v2096_v56 = vmul.f32 %v7163_v28, %v7163_v28 }
 0x2a9   : > { %v2114_v47 = vadd.f32 %v2113_v61, %v2083_v44  ;;  %v2098_v44 = vmul.f32 %v7171_v26, %v7171_v26 }
 0x2ab   : > { %v2115_v32 = vadd.f32 %v2114_v47, %v2084_v9  ;;  %v2099_v9 = vmul.f32 %v7176_v36, %v7176_v36 }
 0x2ad   : > { %v2116_v20 = vadd.f32 %v2115_v32, %v2085_v60  ;;  %v2100_v60 = vmul.f32 %v7180_v40, %v7180_v40 }
 0x2af   : > { %v2117_v6 = vadd.f32 %v2116_v20, %v2086_v21  ;;  %v2101_v21 = vmul.f32 %v7184_v57, %v7184_v57 }
 0x2b1   : > { %v2118_v15 = vadd.f32 %v2117_v6, %v2087_v43  ;;  %v2102_v43 = vmul.f32 %v7188_v52, %v7188_v52 }
 0x2b3   : > { %v2119_v48 = vadd.f32 %v2118_v15, %v2088_v10  ;;  %v2103_v10 = vmul.f32 %v7192_v37, %v7192_v37 }
 0x2b5   : > { %v2120_v7 = vadd.f32 %v2119_v48, %v2089_v58  ;;  %v2104_v58 = vmul.f32 %v7196_v55, %v7196_v55 }
 0x2b7   : > { %v2121_v22 = vadd.f32 %v2120_v7, %v2090_v18  ;;  %v2105_v18 = vmul.f32 %v7200_v8, %v7200_v8 }
 0x2b9   : > { %v2122_v46 = vadd.f32 %v2121_v22, %v2091_v16  ;;  %v2106_v16 = vmul.f32 %v7204_v4, %v7204_v4 }
 0x2bb   : > { %v2123_v54 = vadd.f32 %v2122_v46, %v2092_v12 }
 0x2bd   : > { %v2124_v25 = vadd.f32 %v2123_v54, %v2093_v45 }
 0x2bf   : > { %v2125_v30 = vadd.f32 %v2124_v25, %v2094_v33 }
 0x2c1   : > { %v2126_v51 = vadd.f32 %v2125_v30, %v2095_v5 }
 0x2c3   : > { %v2127_v34 = vadd.f32 %v2126_v51, %v2096_v56 }
 0x2c5   : > { %v2128_v61 = vadd.f32 %v2127_v34, %v2097_v0 }
 0x2c7   : > { %v2129_v47 = vadd.f32 %v2128_v61, %v2098_v44 }
 0x2c9   : > { %v2130_v32 = vadd.f32 %v2129_v47, %v2099_v9 }
 0x2cb   : > { %v2131_v20 = vadd.f32 %v2130_v32, %v2100_v60 }
 0x2cd   : > { %v2132_v6 = vadd.f32 %v2131_v20, %v2101_v21 }
 0x2cf   : > { %v2133_v15 = vadd.f32 %v2132_v6, %v2102_v43 }
 0x2d1   : > { %v2134_v48 = vadd.f32 %v2133_v15, %v2103_v10 }
 0x2d3   : > { %v2135_v7 = vadd.f32 %v2134_v48, %v2104_v58  ;;  %v3432_v58 = vld [vmem:[#allocation7 + $0x368] sm:$0xff] }
 0x2d5   : > { %v2136_v22 = vadd.f32 %v2135_v7, %v2105_v18 }
 0x2d7   : > { %v2137_v12 = vadd.f32 %v2136_v22, %v2106_v16 }
 0x2d9   : > { %v2138_v46 = vrot.slane %v2137_v12, 4 }
 0x2db   : > { %v2139_v45 = vadd.f32 %v2138_v46, %v2137_v12 }
 0x2dd   : > { %v2140_v54 = vrot.slane %v2139_v45, 2 }
 0x2df   : > { %v2141_v33 = vadd.f32 %v2140_v54, %v2139_v45 }
 0x2e1   : > { %v2142_v25 = vrot.slane %v2141_v33, 1 }
 0x2e3   : > { %v2143_v5 = vadd.f32 %v2142_v25, %v2141_v33 }
 0x2e5   : > { %v2144_v30 = vmul.f32 0.00390625, %v2143_v5  ;;  %v2412_v5 = vld [vmem:[#allocation7 + $0x78] sm:$0xff] }
 0x2e7   : > { %v2145_v56 = vadd.f32 1e-05, %v2144_v30 }
 0x2e9   : > { %5153 = vrsqrt.f32 %v2145_v56 }
 0x2f6   : > { %v7354_v51 = vpop.eup %5153 }
 0x2f7   : > { %v2148_v0 = vmul.f32 %v7354_v51, %v7212_v31  ;;  %v2178_v34 = vmul.f32 %v7354_v51, %v7204_v4  ;;  %v2149_v44 = vmul.f32 %v7354_v51, %v7216_v3  ;;  %v2150_v61 = vmul.f32 %v7354_v51, %v7224_v27 }
 0x2f8   : > { %v2151_v9 = vmul.f32 %v7354_v51, %v7228_v23  ;;  %v2147_v32 = vmul.f32 %v7354_v51, %v7208_v29  ;;  %v2152_v4 = vmul.f32 %v7354_v51, %v7234_v14  ;;  %v2153_v3 = vmul.f32 %v7354_v51, %v7240_v41 }
 0x2f9   : > { %v7366_v47 = vmax.f32 %v2148_v0, 0.0  ;;  %v7368_v60 = vmax.f32 %v2178_v34, 0.0  ;;  %v7372_v31 = vmax.f32 %v2149_v44, 0.0  ;;  %v7374_v21 = vmax.f32 %v2150_v61, 0.0  ;;  %v2443_v34 = vld [vmem:[#allocation7 + $0x170] sm:$0xff] }
 0x2fa   : > { %v7380_v27 = vmax.f32 %v2151_v9, 0.0  ;;  %v7383_v20 = vmax.f32 %v2147_v32, 0.0  ;;  %v2154_v14 = vmul.f32 %v7354_v51, %v7246_v38  ;;  %v2155_v41 = vmul.f32 %v7354_v51, %v7252_v11 }
 0x2fb   : > { %9628 = vst [vmem:[#allocation25_spill] sm:$0xff] %v7366_v47  ;;  %9629 = vst [vmem:[#allocation35_spill] sm:$0xff] %v7368_v60  ;;  %v2214_v23 = vrot.slane %v7366_v47, 7  ;;  %v2275_v43 = vrot.slane %v7366_v47, 1  ;;  %v7387_v29 = vrot.slane %v7368_v60, 7  ;;  %v7390_v6 = vrot.slane %v7372_v31, 1 }
 0x2fc   : > { %9630 = vst [vmem:[#allocation28_spill] sm:$0xff] %v7372_v31  ;;  %9631 = vst [vmem:[#allocation37_spill] sm:$0xff] %v7374_v21  ;;  %2576 = vmatprep.mubr.f32.mxu0 %v7383_v20  ;;  %v7398_v10 = vrot.slane %v7383_v20, 7  ;;  %v7401_v15 = vrot.slane %v7383_v20, 1  ;;  %v7407_v18 = vrot.slane %v7374_v21, 1  ;;  %v7409_v7 = vmax.f32 %v2152_v4, 0.0 }
 0x2fd   : > { %9632 = vst [vmem:[#allocation55_spill] sm:$0xff] %v7380_v27  ;;  %9633 = vst [vmem:[#allocation56_spill] sm:$0xff] %v7383_v20  ;;  %v2329_v48 = vsel %vm349_vm0, %v2275_v43, %v7390_v6  ;;  %v7412_v38 = vrot.slane %v7372_v31, 7  ;;  %v7415_v11 = vrot.slane %v7374_v21, 7  ;;  %v2276_v16 = vrot.slane %v7380_v27, 1 }
 0x2fe   : > { %9635 = vst [vmem:[#allocation40_spill] sm:$0xff] %v7409_v7  ;;  %v7418_v22 = vmax.f32 %v2153_v3, 0.0  ;;  %v7423_v12 = vsel %vm349_vm0, %v7401_v15, %v2275_v43  ;;  %v2449_v46 = vsel %vm287_vm1, %v7387_v29, %v7398_v10  ;;  %v7432_v45 = vsel %vm287_vm1, %v7398_v10, %v2214_v23 }
 0x2ff   : > { %9637 = vst [vmem:[#allocation49_spill] sm:$0xff] %v7423_v12  ;;  %9638 = vst [vmem:[#allocation15_spill] sm:$0xff] %v7432_v45  ;;  %v2455_v54 = vsel %vm253_vm3, %v7423_v12, %v2449_v46  ;;  %4873 = vmatprep.mubr.f32.mxu1 %v7423_v12  ;;  %v7441_v25 = vsel %vm256_vm2, %v7432_v45, %v2329_v48  ;;  %v2156_v30 = vmul.f32 %v7354_v51, %v7258_v53  ;;  %v2411_v53 = vld [vmem:[#allocation7 + $0x70] sm:$0xff] }
 0x300   : > { %9636 = vst [vmem:[#allocation45_spill] sm:$0xff] %v7418_v22  ;;  %9640 = vst [vmem:[#allocation16_spill] sm:$0xff] %v7441_v25  ;;  %v2157_v56 = vmul.f32 %v7354_v51, %v7264_v2  ;;  %2577 = vmatmul.mubr.f32.vlgmr.msra.gmra.mxu0 %v2455_v54  ;;  %4874 = vmatmul.mubr.f32.vlgmr.msra.gmra.mxu1 %v7441_v25  ;;  %v7452_v0 = vsel %vm349_vm0, %v7390_v6, %v7407_v18  ;;  %v7454_v44 = vmax.f32 %v2154_v14, 0.0 }
 0x301   : > { %2581 = vmatprep.mubr.f32.mxu0 %v7366_v47  ;;  %4876 = vmatprep.mubr.f32.mxu1 %v7452_v0  ;;  %v7462_v2 = vsel %vm287_vm1, %v7412_v38, %v7415_v11  ;;  %v2327_v61 = vsel %vm349_vm0, %v7407_v18, %v2276_v16  ;;  %v2277_v9 = vrot.slane %v7409_v7, 1  ;;  %v7468_v32 = vmax.f32 %v2155_v41, 0.0  ;;  %v2410_v41 = vld [vmem:[#allocation7 + $0x68] sm:$0xff] }
 0x302   : > { %9641 = vst [vmem:[#allocation17_spill] sm:$0xff] %v7454_v44  ;;  %2963 = vmatpush1.msra.mxu1 %v2412_v5  ;;  %4922 = vmatpush3.msra.mxu0 %v7158_v49  ;;  %v2215_v4 = vrot.slane %v7380_v27, 7  ;;  %v9304_v3 = vrot.slane %v7409_v7, 7  ;;  %v2278_v43 = vrot.slane %v7418_v22, 1  ;;  %v2158_v14 = vmul.f32 %v7354_v51, %v7270_v13 }
 0x303   : > { %9642 = vst [vmem:[#allocation18_spill] sm:$0xff] %v7468_v32  ;;  %2964 = vmatprep.subr.mxu1 %v9620_v17  ;;  %4923 = vmatprep.subr.mxu0 %v2443_v34  ;;  %v7477_v48 = vmax.f32 %v2156_v30, 0.0  ;;  %v7483_v49 = vsel %vm256_vm2, %v7462_v2, %v2327_v61  ;;  %v2268_v46 = vsel %vm287_vm1, %v2214_v23, %v7412_v38  ;;  %v7488_v54 = vmax.f32 %v2157_v56, 0.0 }
 0x304   : > { %2965 = vmatpush1.msra.mxu1 %v2411_v53  ;;  %2582 = vmatmul.mubr.f32.gmra.mxu0 %v7432_v45  ;;  %9644 = vst [vmem:[#allocation31_spill] sm:$0xff] %v7483_v49  ;;  %v7494_v13 = vsel %vm349_vm0, %v2276_v16, %v2277_v9  ;;  %v2279_v5 = vrot.slane %v7454_v44, 1  ;;  %v2409_v53 = vld [vmem:[#allocation7 + $0x60] sm:$0xff]  ;;  %v7504_v23 = vsel %vm287_vm1, %v2215_v4, %v9304_v3  ;;  %v9309_v16 = vrot.slane %v7454_v44, 7 }
 0x305   : > { %9643 = vst [vmem:[#allocation21_spill] sm:$0xff] %v7477_v48  ;;  %9645 = vst [vmem:[#allocation38_spill] sm:$0xff] %v7488_v54  ;;  %4877 = vmatmul.mubr.f32.gmra.mxu1 %v7483_v49  ;;  %2966 = vmatprep.subr.mxu1 %v9620_v17  ;;  %v2325_v56 = vsel %vm349_vm0, %v2277_v9, %v2278_v43  ;;  %v2280_v61 = vrot.slane %v7468_v32, 1  ;;  %v2159_v30 = vmul.f32 %v7354_v51, %v7276_v50  ;;  %v2408_v50 = vld [vmem:[#allocation7 + $0x58] sm:$0xff] }
 0x306   : > { %9646 = vst [vmem:[#allocation42_spill] sm:$0xff] %v7494_v13  ;;  %2586 = vmatprep.mubr.f32.mxu0 %v7372_v31  ;;  %4879 = vmatprep.mubr.f32.mxu1 %v7494_v13  ;;  %9647 = vst [vmem:[#allocation46_spill] sm:$0xff] %v7504_v23  ;;  %v7515_v49 = vsel %vm253_vm3, %v7452_v0, %v2268_v46  ;;  %v2160_v3 = vmul.f32 %v7354_v51, %v7282_v62  ;;  %v7521_v25 = vmax.f32 %v2158_v14, 0.0  ;;  %v2407_v14 = vld [vmem:[#allocation7 + $0x50] sm:$0xff] }
 0x307   : > { %2967 = vmatpush1.msra.mxu1 %v2410_v41  ;;  %9648 = vst [vmem:[#allocation48_spill] sm:$0xff] %v7515_v49  ;;  %4924 = vmatpush3.msra.mxu0 %v2443_v34  ;;  %v2161_v9 = vmul.f32 %v7354_v51, %v7288_v19  ;;  %v7528_v41 = vsel %vm256_vm2, %v7504_v23, %v2325_v56  ;;  %v2281_v19 = vrot.slane %v7477_v48, 1  ;;  %v9651_v46 = vrot.slane %v7418_v22, 7 }
 0x308   : > { %2968 = vmatprep.subr.mxu1 %v9620_v17  ;;  %2587 = vmatmul.mubr.f32.gmra.mxu0 %v7515_v49  ;;  %9649 = vst [vmem:[#allocation50_spill] sm:$0xff] %v7528_v41  ;;  %v7533_v62 = vsel %vm349_vm0, %v2278_v43, %v2279_v5  ;;  %v2323_v43 = vsel %vm349_vm0, %v2279_v5, %v2280_v61  ;;  %v2282_v34 = vrot.slane %v7488_v54, 1  ;;  %v7551_v49 = vmax.f32 %v2159_v30, 0.0 }
 0x309   : > { %2969 = vmatpush1.msra.mxu1 %v2409_v53  ;;  %2591 = vmatprep.mubr.f32.mxu0 %v7374_v21  ;;  %9650 = vst [vmem:[#allocation53_spill] sm:$0xff] %v7533_v62  ;;  %v7545_v53 = vsel %vm287_vm1, %v9651_v46, %v9309_v16  ;;  %v2266_v46 = vsel %vm287_vm1, %v7415_v11, %v2215_v4  ;;  %v7561_v16 = vmax.f32 %v2160_v3, 0.0  ;;  %v7563_v56 = vmax.f32 %v2161_v9, 0.0 }
 0x30a   : > { %4880 = vmatmul.mubr.f32.gmra.mxu1 %v7528_v41  ;;  %2970 = vmatprep.subr.mxu1 %v9620_v17  ;;  %9652 = vst [vmem:[#allocation57_spill] sm:$0xff] %v7545_v53  ;;  %9653 = vst [vmem:[#allocation60_spill] sm:$0xff] %v7551_v49  ;;  %v2406_v41 = vld [vmem:[#allocation7 + $0x48] sm:$0xff]  ;;  %v2162_v5 = vmul.f32 %v7354_v51, %v7294_v35  ;;  %v7568_v30 = vsel %vm256_vm2, %v7545_v53, %v2323_v43  ;;  %v2405_v35 = vld [vmem:[#allocation7 + $0x40] sm:$0xff]  ;;  %v9656_v3 = vrot.slane %v7477_v48, 7 }
 0x30b   : > { %4882 = vmatprep.mubr.f32.mxu1 %v7533_v62  ;;  %2971 = vmatpush1.msra.mxu1 %v2408_v50  ;;  %9654 = vst [vmem:[#allocation14_spill] sm:$0xff] %v7568_v30  ;;  %v7575_v4 = vsel %vm349_vm0, %v2280_v61, %v2281_v19  ;;  %v9657_v9 = vrot.slane %v7468_v32, 7  ;;  %v2442_v43 = vld [vmem:[#allocation7 + $0x168] sm:$0xff]  ;;  %v7592_v61 = vsel %vm253_vm3, %v7494_v13, %v2266_v46  ;;  %v9324_v45 = vrot.slane %v7521_v25, 7 }
 0x30c   : > { %2972 = vmatprep.subr.mxu1 %v9620_v17  ;;  %2592 = vmatmul.mubr.f32.gmra.mxu0 %v7462_v2  ;;  %9655 = vst [vmem:[#allocation61_spill] sm:$0xff] %v7575_v4  ;;  %9659 = vst [vmem:[#allocation71_spill] sm:$0xff] %v7592_v61  ;;  %v2166_v12 = vmul.f32 %v7354_v51, %v7318_v24 }
 0x30d   : > { %2973 = vmatpush1.msra.mxu1 %v2407_v14  ;;  %2596 = vmatprep.mubr.f32.mxu0 %v7380_v27  ;;  %v7583_v50 = vsel %vm287_vm1, %v9657_v9, %v9656_v3  ;;  %v2321_v14 = vsel %vm349_vm0, %v2281_v19, %v2282_v34  ;;  %v2284_v3 = vrot.slane %v7551_v49, 1  ;;  %v2163_v19 = vmul.f32 %v7354_v51, %v7300_v42  ;;  %v2404_v9 = vld [vmem:[#allocation7 + $0x38] sm:$0xff] }
 0x30e   : > { %4883 = vmatmul.mubr.f32.gmra.mxu1 %v7568_v30  ;;  %2974 = vmatprep.subr.mxu1 %v9620_v17  ;;  %9658 = vst [vmem:[#allocation64_spill] sm:$0xff] %v7583_v50  ;;  %v2283_v30 = vrot.slane %v7521_v25, 1  ;;  %v7606_v46 = vsel %vm256_vm2, %v7583_v50, %v2321_v14  ;;  %v7608_v27 = vmax.f32 %v2162_v5, 0.0  ;;  %v2403_v14 = vld [vmem:[#allocation7 + $0x30] sm:$0xff]  ;;  %v9662_v5 = vrot.slane %v7488_v54, 7 }
 0x30f   : > { %4885 = vmatprep.mubr.f32.mxu1 %v7575_v4  ;;  %2975 = vmatpush1.msra.mxu1 %v2406_v41  ;;  %v2164_v41 = vmul.f32 %v7354_v51, %v7306_v59  ;;  %9660 = vst [vmem:[#allocation22_spill] sm:$0xff] %v7606_v46  ;;  %v2285_v59 = vrot.slane %v7561_v16, 1  ;;  %v7634_v47 = vmax.f32 %v2163_v19, 0.0 }
 0x310   : > { %2976 = vmatprep.subr.mxu1 %v9620_v17  ;;  %2597 = vmatmul.mubr.f32.gmra.mxu0 %v7592_v61  ;;  %v7614_v42 = vsel %vm349_vm0, %v2282_v34, %v2283_v30  ;;  %v2319_v34 = vsel %vm349_vm0, %v2283_v30, %v2284_v3  ;;  %v2165_v61 = vmul.f32 %v7354_v51, %v7312_v39  ;;  %v9663_v30 = vrot.slane %v7418_v22, 7 }
 0x311   : > { %2977 = vmatpush1.msra.mxu1 %v2405_v35  ;;  %4925 = vmatprep.subr.mxu0 %v2442_v43  ;;  %9661 = vst [vmem:[#allocation67_spill] sm:$0xff] %v7614_v42  ;;  %v2286_v35 = vrot.slane %v7563_v56, 1  ;;  %v7646_v39 = vmax.f32 %v2164_v41, 0.0  ;;  %v7656_v24 = vsel %vm349_vm0, %v2284_v3, %v2285_v59  ;;  %v2287_v19 = vrot.slane %v7608_v27, 1  ;;  %v2441_v3 = vld [vmem:[#allocation7 + $0x160] sm:$0xff] }
 0x312   : > { %4886 = vmatmul.mubr.f32.gmra.mxu1 %v7606_v46  ;;  %2978 = vmatprep.subr.mxu1 %v9620_v17  ;;  %v7626_v46 = vsel %vm287_vm1, %v9662_v5, %v9324_v45  ;;  %v2402_v5 = vld [vmem:[#allocation7 + $0x28] sm:$0xff]  ;;  %v9664_v45 = vrot.slane %v7409_v7, 7  ;;  %9667 = vst [vmem:[#allocation66_spill] sm:$0xff] %v7656_v24  ;;  %v9668_v41 = vrot.slane %v7561_v16, 7 }
 0x313   : > { %2601 = vmatprep.mubr.f32.mxu0 %v7409_v7  ;;  %4888 = vmatprep.mubr.f32.mxu1 %v7614_v42  ;;  %9665 = vst [vmem:[#allocation19_spill] sm:$0xff] %v7646_v39  ;;  %v2170_v7 = vmul.f32 %v7354_v51, %v7171_v26 }
 0x314   : > { %2979 = vmatpush1.msra.mxu1 %v2404_v9  ;;  %4926 = vmatpush3.msra.mxu0 %v2442_v43  ;;  %v2264_v13 = vsel %vm287_vm1, %v9664_v45, %v9663_v30  ;;  %v7651_v43 = vsel %vm256_vm2, %v7626_v46, %v2319_v34  ;;  %v2401_v45 = vld [vmem:[#allocation7 + $0x20] sm:$0xff]  ;;  %v9669_v9 = vrot.slane %v7551_v49, 7  ;;  %v2317_v34 = vsel %vm349_vm0, %v2285_v59, %v2286_v35 }
 0x315   : > { %2980 = vmatprep.subr.mxu1 %v9620_v17  ;;  %2602 = vmatmul.mubr.f32.gmra.mxu0 %v7504_v23  ;;  %9666 = vst [vmem:[#allocation59_spill] sm:$0xff] %v7651_v43  ;;  %v7679_v23 = vsel %vm253_vm3, %v7533_v62, %v2264_v13  ;;  %v2167_v59 = vmul.f32 %v7354_v51, %v7324_v63  ;;  %v2400_v63 = vld [vmem:[#allocation7 + $0x18] sm:$0xff]  ;;  %v7697_v30 = vmax.f32 %v2166_v12, 0.0  ;;  %v2399_v12 = vld [vmem:[#allocation7 + $0x10] sm:$0xff] }
 0x316   : > { %2981 = vmatpush1.msra.mxu1 %v2403_v14  ;;  %2606 = vmatprep.mubr.f32.mxu0 %v7418_v22  ;;  %v7667_v14 = vsel %vm287_vm1, %v9669_v9, %v9668_v41  ;;  %v9335_v22 = vrot.slane %v7608_v27, 7  ;;  %9671 = vst [vmem:[#allocation68_spill] sm:$0xff] %v7679_v23  ;;  %v2288_v41 = vrot.slane %v7634_v47, 1  ;;  %v2176_v9 = vmul.f32 %v7354_v51, %v7196_v55 }
 0x317   : > { %4889 = vmatmul.mubr.f32.gmra.mxu1 %v7651_v43  ;;  %2982 = vmatprep.subr.mxu1 %v9620_v17  ;;  %v7673_v43 = vmax.f32 %v2165_v61, 0.0  ;;  %v2168_v61 = vmul.f32 %v7354_v51, %v7163_v28  ;;  %v7695_v13 = vsel %vm256_vm2, %v7667_v14, %v2317_v34  ;;  %9673 = vst [vmem:[#allocation70_spill] sm:$0xff] %v7697_v30 }
 0x318   : > { %4891 = vmatprep.mubr.f32.mxu1 %v7656_v24  ;;  %2983 = vmatpush1.msra.mxu1 %v2402_v5  ;;  %v2175_v5 = vmul.f32 %v7354_v51, %v7192_v37  ;;  %9672 = vst [vmem:[#allocation23_spill] sm:$0xff] %v7695_v13  ;;  %v7703_v28 = vsel %vm349_vm0, %v2286_v35, %v2287_v19  ;;  %v9675_v37 = vrot.slane %v7563_v56, 7  ;;  %v2398_v35 = vld [vmem:[#allocation7 + $0x8] sm:$0xff] }
 0x319   : > { %9670 = vst [vmem:[#allocation20_spill] sm:$0xff] %v7673_v43  ;;  %2984 = vmatprep.subr.mxu1 %v9620_v17  ;;  %2607 = vmatmul.mubr.f32.gmra.mxu0 %v7679_v23  ;;  %9674 = vst [vmem:[#allocation69_spill] sm:$0xff] %v7703_v28  ;;  %v2315_v34 = vsel %vm349_vm0, %v2287_v19, %v2288_v41  ;;  %v2290_v62 = vrot.slane %v7673_v43, 1  ;;  %v7725_v23 = vmax.f32 %v2176_v9, 0.0  ;;  %v7729_v20 = vmax.f32 %v2168_v61, 0.0 }
 0x31a   : > { %2985 = vmatpush1.msra.mxu1 %v2401_v45  ;;  %4927 = vmatprep.subr.mxu0 %v2441_v3  ;;  %v7711_v55 = vsel %vm287_vm1, %v9675_v37, %v9335_v22  ;;  %v2289_v45 = vrot.slane %v7646_v39, 1  ;;  %v2169_v37 = vmul.f32 %v7354_v51, %v7167_v1  ;;  %v7723_v22 = vmax.f32 %v2167_v59, 0.0 }
 0x31b   : > { %4892 = vmatmul.mubr.f32.gmra.mxu1 %v7695_v13  ;;  %2986 = vmatprep.subr.mxu1 %v9620_v17  ;;  %v9343_v13 = vrot.slane %v7646_v39, 7  ;;  %9677 = vst [vmem:[#allocation44_spill] sm:$0xff] %v7725_v23  ;;  %v7731_v19 = vmax.f32 %v2175_v5, 0.0  ;;  %v9679_v1 = vrot.slane %v7468_v32, 7  ;;  %v9680_v59 = vrot.slane %v7454_v44, 7 }
 0x31c   : > { %2611 = vmatprep.mubr.f32.mxu0 %v7454_v44  ;;  %4894 = vmatprep.mubr.f32.mxu1 %v7703_v28  ;;  %9676 = vst [vmem:[#allocation54_spill] sm:$0xff] %v7723_v22  ;;  %v7744_v26 = vsel %vm256_vm2, %v7711_v55, %v2315_v34  ;;  %v2291_v61 = vrot.slane %v7697_v30, 1  ;;  %v7770_v5 = vsel %vm287_vm1, %v7415_v11, %v7398_v10 }
 0x31d   : > { %2987 = vmatpush1.msra.mxu1 %v2400_v63  ;;  %4928 = vmatpush3.msra.mxu0 %v2441_v3  ;;  %9678 = vst [vmem:[#allocation36_spill] sm:$0xff] %v7731_v19  ;;  %v2262_v9 = vsel %vm287_vm1, %v9680_v59, %v9679_v1  ;;  %9681 = vst [vmem:[#allocation29_spill] sm:$0xff] %v7744_v26  ;;  %v7749_v3 = vsel %vm349_vm0, %v2288_v41, %v2289_v45  ;;  %v2397_v63 = vld [vmem:[#allocation7] sm:$0xff]  ;;  %v2440_v1 = vld [vmem:[#allocation7 + $0x158] sm:$0xff]  ;;  %v7789_v10 = vrot.slane %v7731_v19, 1 }
 0x31e   : > { %2988 = vmatprep.subr.mxu1 %v9620_v17  ;;  %2612 = vmatmul.mubr.f32.gmra.mxu0 %v7545_v53  ;;  %v2313_v41 = vsel %vm349_vm0, %v2289_v45, %v2290_v62  ;;  %v2292_v45 = vrot.slane %v7723_v22, 1  ;;  %v2171_v59 = vmul.f32 %v7354_v51, %v7176_v36  ;;  %v7792_v11 = vrot.slane %v7731_v19, 7 }
 0x31f   : > { %2989 = vmatpush1.msra.mxu1 %v2399_v12  ;;  %2616 = vmatprep.mubr.f32.mxu0 %v7468_v32  ;;  %v9682_v12 = vrot.slane %v7634_v47, 7 }
 0x320   : > { %4895 = vmatmul.mubr.f32.gmra.mxu1 %v7744_v26  ;;  %2990 = vmatprep.subr.mxu1 %v9620_v17  ;;  %v7772_v26 = vmax.f32 %v2169_v37, 0.0  ;;  %v2172_v37 = vmul.f32 %v7354_v51, %v7180_v40  ;;  %v9688_v40 = vrot.slane %v7697_v30, 7  ;;  %v2311_v19 = vsel %vm349_vm0, %v2291_v61, %v2292_v45 }
 0x321   : > { %v7761_v34 = vsel %vm287_vm1, %v9682_v12, %v9343_v13  ;;  %4897 = vmatprep.mubr.f32.mxu1 %v7749_v3  ;;  %2991 = vmatpush1.msra.mxu1 %v2398_v35  ;;  %v7778_v12 = vsel %vm253_vm3, %v7575_v4, %v2262_v9  ;;  %v7782_v13 = vrot.slane %v7725_v23, 1  ;;  %v7795_v35 = vrot.slane %v7368_v60, 1  ;;  %v2428_v4 = vld [vmem:[#allocation7 + $0xf8] sm:$0xff] }
 0x322   : > { %9683 = vst [vmem:[#allocation58_spill] sm:$0xff] %v7761_v34  ;;  %9684 = vst [vmem:[#allocation47_spill] sm:$0xff] %v7772_v26  ;;  %2992 = vmatprep.subr.mxu1 %v9620_v17  ;;  %2617 = vmatmul.mubr.f32.gmra.mxu0 %v7778_v12  ;;  %v7799_v9 = vmax.f32 %v2170_v7, 0.0  ;;  %v7804_v36 = vsel %vm256_vm2, %v7761_v34, %v2313_v41  ;;  %v7811_v60 = vsel %vm349_vm0, %v2290_v62, %v2291_v61  ;;  %v2427_v62 = vld [vmem:[#allocation7 + $0xf0] sm:$0xff] }
 0x323   : > { %9685 = vst [vmem:[#allocation41_spill] sm:$0xff] %v7778_v12  ;;  %2993 = vmatpush1.msra.mxu1 %v2397_v63  ;;  %9687 = vst [vmem:[#allocation32_spill] sm:$0xff] %v7804_v36  ;;  %4929 = vmatprep.subr.mxu0 %v2440_v1  ;;  %v2293_v12 = vrot.slane %v7729_v20, 1  ;;  %v9689_v7 = vrot.slane %v7673_v43, 7  ;;  %v7842_v41 = vmax.f32 %v2171_v59, 0.0  ;;  %v7848_v61 = vsel %vm349_vm0, %v7795_v35, %v7789_v10 }
 0x324   : > { %9686 = vst [vmem:[#allocation62_spill] sm:$0xff] %v7799_v9  ;;  %4898 = vmatmul.mubr.f32.gmra.mxu1 %v7804_v36  ;;  %2994 = vmatprep.subr.mxu1 %v9620_v17  ;;  %v7826_v36 = vsel %vm349_vm0, %v7407_v18, %v7401_v15  ;;  %v2173_v18 = vmul.f32 %v7354_v51, %v7184_v57  ;;  %9694 = vst [vmem:[#allocation43_spill] sm:$0xff] %v7848_v61  ;;  %v2426_v57 = vld [vmem:[#allocation7 + $0xe8] sm:$0xff]  ;;  %v7866_v61 = vmax.f32 %v2172_v37, 0.0  ;;  %v2425_v37 = vld [vmem:[#allocation7 + $0xe0] sm:$0xff] }
 0x325   : > { %v7819_v63 = vsel %vm287_vm1, %v9689_v7, %v9688_v40  ;;  %9691 = vst [vmem:[#allocation65_spill] sm:$0xff] %v7826_v36  ;;  %2621 = vmatprep.mubr.f32.mxu0 %v7477_v48  ;;  %4900 = vmatprep.mubr.f32.mxu1 %v7811_v60  ;;  %v2294_v40 = vrot.slane %v7772_v26, 1  ;;  %v7838_v7 = vsel %vm349_vm0, %v7782_v13, %v7390_v6  ;;  %9693 = vst [vmem:[#allocation63_spill] sm:$0xff] %v7842_v41 }
 0x326   : > { %9690 = vst [vmem:[#allocation30_spill] sm:$0xff] %v7819_v63  ;;  %9692 = vst [vmem:[#allocation39_spill] sm:$0xff] %v7838_v7  ;;  %2995 = vmatpush2.msra.mxu1 %v2428_v4  ;;  %4930 = vmatpush3.msra.mxu0 %v2440_v1  ;;  %v7854_v32 = vsel %vm287_vm1, %v7387_v29, %v7792_v11  ;;  %v2174_v6 = vmul.f32 %v7354_v51, %v7188_v52  ;;  %v9696_v4 = vrot.slane %v7488_v54, 7 }
 0x327   : > { %9695 = vst [vmem:[#allocation52_spill] sm:$0xff] %v7854_v32  ;;  %2996 = vmatprep.subr.mxu1 %v9620_v17  ;;  %2622 = vmatmul.mubr.f32.gmra.mxu0 %v7583_v50  ;;  %v9697_v1 = vrot.slane %v7477_v48, 7  ;;  %9698 = vst [vmem:[#allocation26_spill] sm:$0xff] %v7866_v61  ;;  %v7871_v32 = vsel %vm256_vm2, %v7819_v63, %v2311_v19  ;;  %v7876_v52 = vsel %vm349_vm0, %v2292_v45, %v2293_v12  ;;  %v2439_v45 = vld [vmem:[#allocation7 + $0x150] sm:$0xff] }
 0x328   : > { %2997 = vmatpush2.msra.mxu1 %v2427_v62  ;;  %9699 = vst [vmem:[#allocation51_spill] sm:$0xff] %v7871_v32  ;;  %2626 = vmatprep.mubr.f32.mxu0 %v7488_v54  ;;  %v2295_v7 = vrot.slane %v7799_v9, 1  ;;  %v9700_v62 = vrot.slane %v7729_v20, 7  ;;  %v9367_v36 = vrot.slane %v7772_v26, 7  ;;  %v9366_v54 = vrot.slane %v7799_v9, 7 }
 0x329   : > { %v2260_v59 = vsel %vm287_vm1, %v9697_v1, %v9696_v4  ;;  %4901 = vmatmul.mubr.f32.gmra.mxu1 %v7871_v32  ;;  %2998 = vmatprep.subr.mxu1 %v9620_v17  ;;  %v9701_v4 = vrot.slane %v7723_v22, 7  ;;  %v2309_v1 = vsel %vm349_vm0, %v2293_v12, %v2294_v40  ;;  %v7893_v32 = vmax.f32 %v2173_v18, 0.0  ;;  %v2424_v18 = vld [vmem:[#allocation7 + $0xd8] sm:$0xff] }
 0x32a   : > { %4903 = vmatprep.mubr.f32.mxu1 %v7876_v52  ;;  %2999 = vmatpush2.msra.mxu1 %v2426_v57  ;;  %v7899_v50 = vsel %vm253_vm3, %v7614_v42, %v2260_v59  ;;  %v7909_v57 = vmax.f32 %v2174_v6, 0.0  ;;  %v7915_v59 = vsel %vm349_vm0, %v2294_v40, %v2295_v7  ;;  %v2423_v6 = vld [vmem:[#allocation7 + $0xd0] sm:$0xff] }
 0x32b   : > { %v7887_v19 = vsel %vm287_vm1, %v9701_v4, %v9700_v62  ;;  %9703 = vst [vmem:[#allocation33_spill] sm:$0xff] %v7893_v32  ;;  %9704 = vst [vmem:[#allocation34_spill] sm:$0xff] %v7899_v50  ;;  %v2296_v62 = vrot.slane %v7842_v41, 1  ;;  %3000 = vmatprep.subr.mxu1 %v9620_v17  ;;  %2627 = vmatmul.mubr.f32.gmra.mxu0 %v7899_v50  ;;  %v2297_v4 = vrot.slane %v7866_v61, 1  ;;  %v2298_v42 = vrot.slane %v7893_v32, 1 }
 0x32c   : > { %9702 = vst [vmem:[#allocation24_spill] sm:$0xff] %v7887_v19  ;;  %3001 = vmatpush2.msra.mxu1 %v2425_v37  ;;  %v7907_v12 = vsel %vm256_vm2, %v7887_v19, %v2309_v1  ;;  %4931 = vmatprep.subr.mxu0 %v2439_v45  ;;  %9706 = vst [vmem:[#allocation13_spill] sm:$0xff] %v7909_v57  ;;  %v7923_v37 = vsel %vm287_vm1, %v9367_v36, %v9366_v54  ;;  %v2422_v36 = vld [vmem:[#allocation7 + $0xc8] sm:$0xff]  ;;  %v9708_v50 = vrot.slane %v7551_v49, 7 }
 0x32d   : > { %9705 = vst [vmem:[#allocation27_spill] sm:$0xff] %v7907_v12  ;;  %4904 = vmatmul.mubr.f32.gmra.mxu1 %v7907_v12  ;;  %3002 = vmatprep.subr.mxu1 %v9620_v17  ;;  %9707 = vst [vmem:[#allocation72_spill] sm:$0xff] %v7923_v37  ;;  %v2307_v1 = vsel %vm349_vm0, %v2295_v7, %v2296_v62  ;;  %v2177_v54 = vmul.f32 %v7354_v51, %v7200_v8  ;;  %v9709_v7 = vrot.slane %v7521_v25, 7  ;;  %v2421_v51 = vld [vmem:[#allocation7 + $0xc0] sm:$0xff] }
 0x32e   : > { %2631 = vmatprep.mubr.f32.mxu0 %v7521_v25  ;;  %4906 = vmatprep.mubr.f32.mxu1 %v7915_v59  ;;  %v7946_v12 = vsel %vm256_vm2, %v7923_v37, %v2307_v1  ;;  %v7953_v8 = vsel %vm349_vm0, %v2296_v62, %v2297_v4  ;;  %v2438_v1 = vld [vmem:[#allocation7 + $0x148] sm:$0xff] }
 0x32f   : > { %3003 = vmatpush2.msra.mxu1 %v2424_v18  ;;  %4932 = vmatpush3.msra.mxu0 %v2439_v45  ;;  %v2258_v40 = vsel %vm287_vm1, %v9709_v7, %v9708_v50  ;;  %9710 = vst [vmem:[#allocation73_spill] sm:$0xff] %v7946_v12  ;;  %v9711_v45 = vrot.slane %v7866_v61, 7  ;;  %v9712_v50 = vrot.slane %v7842_v41, 7  ;;  %v2299_v7 = vrot.slane %v7909_v57, 1 }
 0x330   : > { %3004 = vmatprep.subr.mxu1 %v9620_v17  ;;  %2632 = vmatmul.mubr.f32.gmra.mxu0 %v7626_v46  ;;  %v7972_v62 = vsel %vm253_vm3, %v7656_v24, %v2258_v40  ;;  %v2419_v40 = vld [vmem:[#allocation7 + $0xb0] sm:$0xff]  ;;  %v9717_v24 = vrot.slane %v7563_v56, 7 }
 0x331   : > { %3005 = vmatpush2.msra.mxu1 %v2423_v6  ;;  %2636 = vmatprep.mubr.f32.mxu0 %v7551_v49  ;;  %v7961_v18 = vsel %vm287_vm1, %v9712_v50, %v9711_v45  ;;  %v2305_v6 = vsel %vm349_vm0, %v2297_v4, %v2298_v42  ;;  %v9379_v49 = vrot.slane %v7893_v32, 7  ;;  %v9378_v45 = vrot.slane %v7909_v57, 7 }
 0x332   : > { %4907 = vmatmul.mubr.f32.gmra.mxu1 %v7946_v12  ;;  %3006 = vmatprep.subr.mxu1 %v9620_v17  ;;  %9713 = vst [vmem:[#allocation74_spill] sm:$0xff] %v7961_v18  ;;  %v7966_v12 = vmax.f32 %v2177_v54, 0.0  ;;  %v7981_v54 = vsel %vm256_vm2, %v7961_v18, %v2305_v6  ;;  %v7987_v4 = vsel %vm349_vm0, %v2298_v42, %v2299_v7  ;;  %v8003_v42 = vrot.slane %v7725_v23, 7 }
 0x333   : > { %4909 = vmatprep.mubr.f32.mxu1 %v7953_v8  ;;  %3007 = vmatpush2.msra.mxu1 %v2422_v36  ;;  %9715 = vst [vmem:[#allocation76_spill] sm:$0xff] %v7981_v54  ;;  %v2420_v36 = vld [vmem:[#allocation7 + $0xb8] sm:$0xff]  ;;  %v2303_v50 = vsel %vm349_vm0, %v2299_v7, %v7789_v10 }
 0x334   : > { %9714 = vst [vmem:[#allocation75_spill] sm:$0xff] %v7966_v12  ;;  %3008 = vmatprep.subr.mxu1 %v9620_v17  ;;  %2637 = vmatmul.mubr.f32.gmra.mxu0 %v7972_v62  ;;  %v2450_v6 = vrot.slane %v7966_v12, 1 }
 0x335   : > { %3009 = vmatpush2.msra.mxu1 %v2421_v51  ;;  %4933 = vmatprep.subr.mxu0 %v2438_v1  ;;  %v7997_v51 = vsel %vm287_vm1, %v9379_v49, %v9378_v45  ;;  %v9718_v45 = vrot.slane %v7561_v16, 7 }
 0x336   : > { %4910 = vmatmul.mubr.f32.gmra.mxu1 %v7981_v54  ;;  %3010 = vmatprep.subr.mxu1 %v9620_v17  ;;  %9716 = vst [vmem:[#allocation77_spill] sm:$0xff] %v7997_v51  ;;  %v2418_v54 = vld [vmem:[#allocation7 + $0xa8] sm:$0xff]  ;;  %v8017_v7 = vsel %vm256_vm2, %v7997_v51, %v2303_v50  ;;  %v9385_v50 = vrot.slane %v7966_v12, 7 }
 0x337   : > { %2641 = vmatprep.mubr.f32.mxu0 %v7561_v16  ;;  %4912 = vmatprep.mubr.f32.mxu1 %v7987_v4  ;;  %v2256_v49 = vsel %vm287_vm1, %v9718_v45, %v9717_v24  ;;  %9719 = vst [vmem:[#allocation78_spill] sm:$0xff] %v8017_v7  ;;  %v8032_v24 = vsel %vm287_vm1, %v7792_v11, %v8003_v42 }
 0x338   : > { %3011 = vmatpush2.msra.mxu1 %v2420_v36  ;;  %4934 = vmatpush3.msra.mxu0 %v2438_v1  ;;  %v8026_v1 = vsel %vm349_vm0, %v7789_v10, %v7782_v13  ;;  %v2417_v36 = vld [vmem:[#allocation7 + $0xa0] sm:$0xff]  ;;  %v2453_v45 = vsel %vm349_vm0, %v7782_v13, %v2450_v6  ;;  %v8041_v10 = vsel %vm253_vm3, %v7703_v28, %v2256_v49  ;;  %v9722_v28 = vrot.slane %v7608_v27, 7 }
 0x339   : > { %3012 = vmatprep.subr.mxu1 %v9620_v17  ;;  %2642 = vmatmul.mubr.f32.gmra.mxu0 %v7667_v14  ;;  %v8049_v13 = vsel %vm256_vm2, %v8032_v24, %v2453_v45  ;;  %v8056_v49 = vsel %vm349_vm0, %v2450_v6, %v7795_v35  ;;  %v2454_v45 = vsel %vm349_vm0, %v7795_v35, %v7401_v15  ;;  %v2414_v6 = vld [vmem:[#allocation7 + $0x88] sm:$0xff]  ;;  %v2413_v15 = vld [vmem:[#allocation7 + $0x80] sm:$0xff] }
 0x33a   : > { %3013 = vmatpush2.msra.mxu1 %v2419_v40  ;;  %2646 = vmatprep.mubr.f32.mxu0 %v7563_v56  ;;  %v2437_v40 = vld [vmem:[#allocation7 + $0x140] sm:$0xff]  ;;  %9720 = vst [vmem:[#allocation79_spill] sm:$0xff] %v8049_v13  ;;  %v2271_v35 = vsel %vm287_vm1, %v8003_v42, %v7412_v38  ;;  %v2435_v38 = vld [vmem:[#allocation7 + $0x130] sm:$0xff] }
 0x33b   : > { %4913 = vmatmul.mubr.f32.gmra.mxu1 %v8017_v7  ;;  %3014 = vmatprep.subr.mxu1 %v9620_v17  ;;  %v2416_v7 = vld [vmem:[#allocation7 + $0x98] sm:$0xff] }
 0x33c   : > { %4915 = vmatprep.mubr.f32.mxu1 %v8026_v1  ;;  %3015 = vmatpush2.msra.mxu1 %v2418_v54  ;;  %v2415_v54 = vld [vmem:[#allocation7 + $0x90] sm:$0xff] }
 0x33d   : > { %3016 = vmatprep.subr.mxu1 %v9620_v17  ;;  %2647 = vmatmul.mubr.f32.gmra.mxu0 %v8041_v10 }
 0x33e   : > { %3017 = vmatpush2.msra.mxu1 %v2417_v36  ;;  %4935 = vmatprep.subr.mxu0 %v2437_v40  ;;  %v8065_v36 = vsel %vm287_vm1, %v9385_v50, %v7387_v29 }
 0x33f   : > { %4916 = vmatmul.mubr.f32.gmra.mxu1 %v8049_v13  ;;  %3018 = vmatprep.subr.mxu1 %v9620_v17  ;;  %v9721_v13 = vrot.slane %v7634_v47, 7  ;;  %v2462_v50 = vsel %vm256_vm2, %v8065_v36, %v2454_v45 }
 0x340   : > { %2651 = vmatprep.mubr.f32.mxu0 %v7608_v27  ;;  %4918 = vmatprep.mubr.f32.mxu1 %v8056_v49 }
 0x341   : > { %3019 = vmatpush2.msra.mxu1 %v2416_v7  ;;  %4936 = vmatpush3.msra.mxu0 %v2437_v40  ;;  %v2254_v29 = vsel %vm287_vm1, %v9722_v28, %v9721_v13  ;;  %v2436_v7 = vld [vmem:[#allocation7 + $0x138] sm:$0xff]  ;;  %v8099_v40 = vsel %vm253_vm3, %v7452_v0, %v2271_v35  ;;  %v9724_v13 = vrot.slane %v7673_v43, 7 }
 0x342   : > { %3020 = vmatprep.subr.mxu1 %v9620_v17  ;;  %2652 = vmatmul.mubr.f32.gmra.mxu0 %v7711_v55  ;;  %v8092_v28 = vsel %vm253_vm3, %v7749_v3, %v2254_v29  ;;  %9723 = vst [vmem:[#allocation80_spill] sm:$0xff] %v8099_v40  ;;  %v9726_v29 = vld [vmem:[#allocation56_spill] sm:$0xff]  ;;  %v2432_v35 = vld [vmem:[#allocation7 + $0x118] sm:$0xff] }
 0x343   : > { %3021 = vmatpush2.msra.mxu1 %v2415_v54  ;;  %2656 = vmatprep.mubr.f32.mxu0 %v7634_v47  ;;  %v9725_v54 = vrot.slane %v7646_v39, 7 }
 0x344   : > { %4919 = vmatmul.mubr.f32.gmra.mxu1 %v2462_v50  ;;  %3022 = vmatprep.subr.mxu1 %v9620_v17  ;;  %v2434_v50 = vld [vmem:[#allocation7 + $0x128] sm:$0xff] }
 0x345   : > { %3023 = vmatpush2.msra.mxu1 %v2414_v6  ;;  %3026 = vmatprep.mubr.f32.mxu1 %v7372_v31  ;;  %v2252_v45 = vsel %vm287_vm1, %v9725_v54, %v9724_v13  ;;  %v2433_v6 = vld [vmem:[#allocation7 + $0x120] sm:$0xff]  ;;  %v2431_v13 = vld [vmem:[#allocation7 + $0x110] sm:$0xff]  ;;  %v9729_v54 = vld [vmem:[#allocation25_spill] sm:$0xff] }
 0x346   : > { %3024 = vmatprep.subr.mxu1 %v9620_v17  ;;  %2657 = vmatmul.mubr.f32.gmra.mxu0 %v8092_v28 }
 0x347   : > { %3025 = vmatpush2.msra.mxu1 %v2413_v15  ;;  %4937 = vmatprep.subr.mxu0 %v2436_v7  ;;  %v8117_v15 = vsel %vm253_vm3, %v7811_v60, %v2252_v45  ;;  %v2430_v45 = vld [vmem:[#allocation7 + $0x108] sm:$0xff] }
 0x348   : > { %3027 = vmatmul.mubr.f32.vlgmr.msra.gmra.mxu1 %v8099_v40  ;;  %2661 = vmatprep.mubr.f32.mxu0 %v7646_v39  ;;  %9727 = vst [vmem:[#allocation56_spill] sm:$0xff] %v8117_v15 }
 0x349   : > { %3031 = vmatprep.mubr.f32.mxu1 %v7374_v21  ;;  %4938 = vmatpush3.msra.mxu0 %v2436_v7  ;;  %v9728_v7 = vld [vmem:[#allocation49_spill] sm:$0xff] }
 0x34a   : > { %2662 = vmatmul.mubr.f32.gmra.mxu0 %v7761_v34  ;;  %4939 = vmatprep.subr.mxu0 %v2435_v38 }
 0x34b   : > { %2666 = vmatprep.mubr.f32.mxu0 %v7673_v43  ;;  %4940 = vmatpush3.msra.mxu0 %v2435_v38  ;;  %v2335_v38 = vsel %vm253_vm3, %v9728_v7, %v7770_v5  ;;  %v2429_v5 = vld [vmem:[#allocation7 + $0x100] sm:$0xff] }
 0x34c   : > { %3032 = vmatmul.mubr.f32.gmra.mxu1 %v7462_v2  ;;  %4941 = vmatprep.subr.mxu0 %v2434_v50 }
 0x34d   : > { %3036 = vmatprep.mubr.f32.mxu1 %v9726_v29  ;;  %4942 = vmatpush3.msra.mxu0 %v2434_v50  ;;  %v9730_v50 = vrot.slane %v7723_v22, 7  ;;  %v9731_v29 = vrot.slane %v7697_v30, 7 }
 0x34e   : > { %2667 = vmatmul.mubr.f32.gmra.mxu0 %v8117_v15  ;;  %4943 = vmatprep.subr.mxu0 %v2433_v6 }
 0x34f   : > { %2671 = vmatprep.mubr.f32.mxu0 %v7697_v30  ;;  %4944 = vmatpush3.msra.mxu0 %v2433_v6  ;;  %v2250_v40 = vsel %vm287_vm1, %v9731_v29, %v9730_v50  ;;  %v9732_v6 = vld [vmem:[#allocation15_spill] sm:$0xff]  ;;  %v3464_v29 = vld [vmem:[#allocation7 + $0x468] sm:$0xff] }
 0x350   : > { %3037 = vmatmul.mubr.f32.gmra.mxu1 %v2335_v38  ;;  %4945 = vmatprep.subr.mxu0 %v2432_v35  ;;  %v3466_v38 = vld [vmem:[#allocation7 + $0x478] sm:$0xff] }
 0x351   : > { %3041 = vmatprep.mubr.f32.mxu1 %v9729_v54  ;;  %4946 = vmatpush3.msra.mxu0 %v2432_v35  ;;  %v8139_v35 = vsel %vm253_vm3, %v7876_v52, %v2250_v40  ;;  %v3465_v54 = vld [vmem:[#allocation7 + $0x470] sm:$0xff]  ;;  %v9735_v40 = vrot.slane %v7772_v26, 7 }
 0x352   : > { %2672 = vmatmul.mubr.f32.gmra.mxu0 %v7819_v63  ;;  %4947 = vmatprep.subr.mxu0 %v2431_v13  ;;  %9733 = vst [vmem:[#allocation49_spill] sm:$0xff] %v8139_v35 }
 0x353   : > { %2676 = vmatprep.mubr.f32.mxu0 %v7723_v22  ;;  %4948 = vmatpush3.msra.mxu0 %v2431_v13  ;;  %v9734_v13 = vld [vmem:[#allocation48_spill] sm:$0xff] }
 0x354   : > { %3042 = vmatmul.mubr.f32.gmra.mxu1 %v9732_v6  ;;  %4949 = vmatprep.subr.mxu0 %v2430_v45 }
 0x355   : > { %3046 = vmatprep.mubr.f32.mxu1 %v7372_v31  ;;  %4950 = vmatpush3.msra.mxu0 %v2430_v45  ;;  %v9736_v45 = vrot.slane %v7729_v20, 7  ;;  %v3459_v31 = vld [vmem:[#allocation7 + $0x440] sm:$0xff] }
 0x356   : > { %2677 = vmatmul.mubr.f32.gmra.mxu0 %v8139_v35  ;;  %4951 = vmatprep.subr.mxu0 %v2429_v5 }
 0x357   : > { %2681 = vmatprep.mubr.f32.mxu0 %v7729_v20  ;;  %4952 = vmatpush3.msra.mxu0 %v2429_v5  ;;  %v2248_v50 = vsel %vm287_vm1, %v9736_v45, %v9735_v40  ;;  %v9737_v5 = vld [vmem:[#allocation55_spill] sm:$0xff]  ;;  %v9740_v45 = vld [vmem:[#allocation40_spill] sm:$0xff] }
 0x358   : > { %3047 = vmatmul.mubr.f32.gmra.mxu1 %v9734_v13  ;;  %5001 = vmatprep.subr.mxu1 %v3466_v38  ;;  %v8159_v6 = vsel %vm253_vm3, %v7915_v59, %v2248_v50  ;;  %v3462_v13 = vld [vmem:[#allocation7 + $0x458] sm:$0xff]  ;;  %v9741_v50 = vrot.slane %v7842_v41, 7 }
 0x359   : > { %3051 = vmatprep.mubr.f32.mxu1 %v7374_v21  ;;  %5002 = vmatpush3.msra.mxu1 %v3466_v38  ;;  %9738 = vst [vmem:[#allocation25_spill] sm:$0xff] %v8159_v6  ;;  %v3463_v38 = vld [vmem:[#allocation7 + $0x460] sm:$0xff]  ;;  %v9739_v40 = vld [vmem:[#allocation71_spill] sm:$0xff] }
 0x35a   : > { %2682 = vmatmul.mubr.f32.gmra.mxu0 %v7887_v19  ;;  %3467 = vmatprep.subr.mxu0 %v9620_v17 }
 0x35b   : > { %2686 = vmatprep.mubr.f32.mxu0 %v7772_v26  ;;  %5003 = vmatprep.subr.mxu1 %v3465_v54 }
 0x35c   : > { %3052 = vmatmul.mubr.f32.gmra.mxu1 %v7462_v2 }
 0x35d   : > { %3056 = vmatprep.mubr.f32.mxu1 %v9737_v5  ;;  %5004 = vmatpush3.msra.mxu1 %v3465_v54  ;;  %v3461_v5 = vld [vmem:[#allocation7 + $0x450] sm:$0xff]  ;;  %v9742_v54 = vrot.slane %v7799_v9, 7 }
 0x35e   : > { %2687 = vmatmul.mubr.f32.gmra.mxu0 %v8159_v6  ;;  %5005 = vmatprep.subr.mxu1 %v3464_v29 }
 0x35f   : > { %2691 = vmatprep.mubr.f32.mxu0 %v7799_v9  ;;  %5006 = vmatpush3.msra.mxu1 %v3464_v29  ;;  %v2246_v21 = vsel %vm287_vm1, %v9742_v54, %v9741_v50  ;;  %v3460_v29 = vld [vmem:[#allocation7 + $0x448] sm:$0xff]  ;;  %v9746_v50 = vld [vmem:[#allocation68_spill] sm:$0xff]  ;;  %v3457_v54 = vld [vmem:[#allocation7 + $0x430] sm:$0xff] }
 0x360   : > { %3057 = vmatmul.mubr.f32.gmra.mxu1 %v9739_v40  ;;  %5007 = vmatprep.subr.mxu1 %v3463_v38  ;;  %v9743_v40 = vld [vmem:[#allocation46_spill] sm:$0xff] }
 0x361   : > { %3061 = vmatprep.mubr.f32.mxu1 %v9740_v45  ;;  %5008 = vmatpush3.msra.mxu1 %v3463_v38  ;;  %v9744_v45 = vld [vmem:[#allocation45_spill] sm:$0xff]  ;;  %v8178_v38 = vsel %vm253_vm3, %v7953_v8, %v2246_v21  ;;  %v9747_v21 = vrot.slane %v7893_v32, 7 }
 0x362   : > { %2692 = vmatmul.mubr.f32.gmra.mxu0 %v7923_v37  ;;  %5009 = vmatprep.subr.mxu1 %v3462_v13  ;;  %9745 = vst [vmem:[#allocation15_spill] sm:$0xff] %v8178_v38 }
 0x363   : > { %2696 = vmatprep.mubr.f32.mxu0 %v7842_v41  ;;  %5010 = vmatpush3.msra.mxu1 %v3462_v13  ;;  %v3458_v13 = vld [vmem:[#allocation7 + $0x438] sm:$0xff] }
 0x364   : > { %3062 = vmatmul.mubr.f32.gmra.mxu1 %v9743_v40  ;;  %5011 = vmatprep.subr.mxu1 %v3461_v5 }
 0x365   : > { %3066 = vmatprep.mubr.f32.mxu1 %v9744_v45  ;;  %5012 = vmatpush3.msra.mxu1 %v3461_v5  ;;  %v9748_v5 = vrot.slane %v7866_v61, 7 }
 0x366   : > { %2697 = vmatmul.mubr.f32.gmra.mxu0 %v8178_v38  ;;  %5013 = vmatprep.subr.mxu1 %v3460_v29 }
 0x367   : > { %2701 = vmatprep.mubr.f32.mxu0 %v7866_v61  ;;  %5014 = vmatpush3.msra.mxu1 %v3460_v29  ;;  %v2244_v45 = vsel %vm287_vm1, %v9748_v5, %v9747_v21  ;;  %v3456_v29 = vld [vmem:[#allocation7 + $0x428] sm:$0xff]  ;;  %v3453_v5 = vld [vmem:[#allocation7 + $0x410] sm:$0xff] }
 0x368   : > { %3067 = vmatmul.mubr.f32.gmra.mxu1 %v9746_v50  ;;  %5015 = vmatprep.subr.mxu1 %v3459_v31  ;;  %v3455_v50 = vld [vmem:[#allocation7 + $0x420] sm:$0xff]  ;;  %v9751_v21 = vld [vmem:[#allocation41_spill] sm:$0xff] }
 0x369   : > { %3071 = vmatprep.mubr.f32.mxu1 %v7454_v44  ;;  %5016 = vmatpush3.msra.mxu1 %v3459_v31  ;;  %v9749_v44 = vld [vmem:[#allocation18_spill] sm:$0xff]  ;;  %v8197_v31 = vsel %vm253_vm3, %v7987_v4, %v2244_v45  ;;  %v9752_v45 = vrot.slane %v7909_v57, 7 }
 0x36a   : > { %2702 = vmatmul.mubr.f32.gmra.mxu0 %v7961_v18  ;;  %5017 = vmatprep.subr.mxu1 %v3458_v13  ;;  %9750 = vst [vmem:[#allocation48_spill] sm:$0xff] %v8197_v31 }
 0x36b   : > { %2706 = vmatprep.mubr.f32.mxu0 %v7893_v32  ;;  %5018 = vmatpush3.msra.mxu1 %v3458_v13  ;;  %v3454_v13 = vld [vmem:[#allocation7 + $0x418] sm:$0xff] }
 0x36c   : > { %3072 = vmatmul.mubr.f32.gmra.mxu1 %v7545_v53  ;;  %5019 = vmatprep.subr.mxu1 %v3457_v54  ;;  %v9754_v53 = vld [vmem:[#allocation64_spill] sm:$0xff] }
 0x36d   : > { %3076 = vmatprep.mubr.f32.mxu1 %v9749_v44  ;;  %5020 = vmatpush3.msra.mxu1 %v3457_v54  ;;  %v2242_v54 = vsel %vm287_vm1, %v9752_v45, %v7792_v11  ;;  %v9753_v44 = vld [vmem:[#allocation36_spill] sm:$0xff]  ;;  %v9757_v11 = vld [vmem:[#allocation34_spill] sm:$0xff] }
 0x36e   : > { %2707 = vmatmul.mubr.f32.gmra.mxu0 %v8197_v31  ;;  %5021 = vmatprep.subr.mxu1 %v3456_v29  ;;  %v9759_v45 = vld [vmem:[#allocation60_spill] sm:$0xff] }
 0x36f   : > { %2711 = vmatprep.mubr.f32.mxu0 %v7909_v57  ;;  %5022 = vmatpush3.msra.mxu1 %v3456_v29  ;;  %v3452_v29 = vld [vmem:[#allocation7 + $0x408] sm:$0xff] }
 0x370   : > { %3077 = vmatmul.mubr.f32.gmra.mxu1 %v9751_v21  ;;  %5023 = vmatprep.subr.mxu1 %v3455_v50  ;;  %v9755_v21 = vld [vmem:[#allocation38_spill] sm:$0xff] }
 0x371   : > { %3081 = vmatprep.mubr.f32.mxu1 %v7477_v48  ;;  %5024 = vmatpush3.msra.mxu1 %v3455_v50  ;;  %v8215_v50 = vsel %vm253_vm3, %v8026_v1, %v2242_v54  ;;  %v3451_v48 = vld [vmem:[#allocation7 + $0x400] sm:$0xff] }
 0x372   : > { %2712 = vmatmul.mubr.f32.gmra.mxu0 %v7997_v51  ;;  %5025 = vmatprep.subr.mxu1 %v3454_v13  ;;  %9756 = vst [vmem:[#allocation46_spill] sm:$0xff] %v8215_v50 }
 0x373   : > { %2716 = vmatprep.mubr.f32.mxu0 %v9753_v44  ;;  %5026 = vmatpush3.msra.mxu1 %v3454_v13  ;;  %v9758_v13 = vrot.slane %v7966_v12, 7 }
 0x374   : > { %3082 = vmatmul.mubr.f32.gmra.mxu1 %v9754_v53  ;;  %5027 = vmatprep.subr.mxu1 %v3453_v5 }
 0x375   : > { %3086 = vmatprep.mubr.f32.mxu1 %v9755_v21  ;;  %5028 = vmatpush3.msra.mxu1 %v3453_v5  ;;  %v2448_v5 = vsel %vm287_vm1, %v8003_v42, %v9758_v13  ;;  %v3434_v42 = vld [vmem:[#allocation7 + $0x378] sm:$0xff] }
 0x376   : > { %2717 = vmatmul.mubr.f32.gmra.mxu0 %v8215_v50  ;;  %5029 = vmatprep.subr.mxu1 %v3452_v29  ;;  %v8233_v54 = vsel %vm253_vm3, %v8056_v49, %v2448_v5  ;;  %v3433_v5 = vld [vmem:[#allocation7 + $0x370] sm:$0xff] }
 0x377   : > { %2721 = vmatprep.mubr.f32.mxu0 %v7725_v23  ;;  %5030 = vmatpush3.msra.mxu1 %v3452_v29  ;;  %9760 = vst [vmem:[#allocation64_spill] sm:$0xff] %v8233_v54  ;;  %v9762_v29 = vld [vmem:[#allocation65_spill] sm:$0xff] }
 0x378   : > { %3087 = vmatmul.mubr.f32.gmra.mxu1 %v9757_v11  ;;  %5031 = vmatprep.subr.mxu1 %v3451_v48  ;;  %v2366_v13 = vsel %vm256_vm2, %v7462_v2, %v9762_v29  ;;  %v3429_v29 = vld [vmem:[#allocation7 + $0x350] sm:$0xff] }
 0x379   : > { %3091 = vmatprep.mubr.f32.mxu1 %v7521_v25  ;;  %5032 = vmatpush3.msra.mxu1 %v3451_v48  ;;  %v9761_v48 = vld [vmem:[#allocation35_spill] sm:$0xff] }
 0x37a   : > { %2722 = vmatmul.mubr.f32.gmra.mxu0 %v8032_v24 }
 0x37b   : > { %2726 = vmatprep.mubr.f32.mxu0 %v7966_v12  ;;  %v9768_v12 = vld [vmem:[#allocation14_spill] sm:$0xff] }
 0x37c   : > { %3092 = vmatmul.mubr.f32.gmra.mxu1 %v7626_v46 }
 0x37d   : > { %3096 = vmatprep.mubr.f32.mxu1 %v9759_v45 }
 0x37e   : > { %2727 = vmatmul.mubr.f32.gmra.mxu0 %v8233_v54  ;;  %v3431_v54 = vld [vmem:[#allocation7 + $0x360] sm:$0xff] }
 0x37f   : > { %2731 = vmatprep.mubr.f32.mxu0 %v9761_v48  ;;  %v9763_v48 = vld [vmem:[#allocation16_spill] sm:$0xff] }
 0x380   : > { %3097 = vmatmul.mubr.f32.gmra.mxu1 %v7972_v62 }
 0x381   : > { %3101 = vmatprep.mubr.f32.mxu1 %v7561_v16 }
 0x382   : > { %2732 = vmatmul.mubr.f32.gmra.mxu0 %v8065_v36 }
 0x383   : > { %4953 = vmatprep.mubr.f32.mxu0 %v7452_v0 }
 0x384   : > { %3102 = vmatmul.mubr.f32.gmra.mxu1 %v7667_v14 }
 0x385   : > { %3106 = vmatprep.mubr.f32.mxu1 %v7563_v56 }
 0x386   : > { %4954 = vmatmul.mubr.f32.vlgmr.msra.gmra.mxu0 %v2366_v13  ;;  %v9766_v13 = vld [vmem:[#allocation50_spill] sm:$0xff] }
 0x387   : > { %4956 = vmatprep.mubr.f32.mxu0 %v9728_v7  ;;  %3468 = vmatpush1.msra.mxu0 %v3434_v42  ;;  %v3430_v7 = vld [vmem:[#allocation7 + $0x358] sm:$0xff] }
 0x388   : > { %3107 = vmatmul.mubr.f32.gmra.mxu1 %v8041_v10  ;;  %3469 = vmatprep.subr.mxu0 %v9620_v17  ;;  %v9764_v42 = vld [vmem:[#allocation31_spill] sm:$0xff] }
 0x389   : > { %3111 = vmatprep.mubr.f32.mxu1 %v7608_v27  ;;  %3470 = vmatpush1.msra.mxu0 %v3433_v5  ;;  %v9767_v5 = vld [vmem:[#allocation53_spill] sm:$0xff] }
 0x38a   : > { %4957 = vmatmul.mubr.f32.gmra.mxu0 %v9763_v48  ;;  %3471 = vmatprep.subr.mxu0 %v9620_v17  ;;  %v9765_v48 = vld [vmem:[#allocation42_spill] sm:$0xff] }
 0x38b   : > { %4959 = vmatprep.mubr.f32.mxu0 %v7452_v0  ;;  %3472 = vmatpush1.msra.mxu0 %v3432_v58  ;;  %v3428_v58 = vld [vmem:[#allocation7 + $0x348] sm:$0xff] }
 0x38c   : > { %3112 = vmatmul.mubr.f32.gmra.mxu1 %v7711_v55  ;;  %3473 = vmatprep.subr.mxu0 %v9620_v17 }
 0x38d   : > { %3116 = vmatprep.mubr.f32.mxu1 %v7634_v47  ;;  %3474 = vmatpush1.msra.mxu0 %v3431_v54  ;;  %v3427_v54 = vld [vmem:[#allocation7 + $0x340] sm:$0xff] }
 0x38e   : > { %4960 = vmatmul.mubr.f32.gmra.mxu0 %v9764_v42  ;;  %3475 = vmatprep.subr.mxu0 %v9620_v17 }
 0x38f   : > { %4962 = vmatprep.mubr.f32.mxu0 %v9765_v48  ;;  %3476 = vmatpush1.msra.mxu0 %v3430_v7  ;;  %v3426_v7 = vld [vmem:[#allocation7 + $0x338] sm:$0xff] }
 0x390   : > { %3117 = vmatmul.mubr.f32.gmra.mxu1 %v8092_v28  ;;  %3477 = vmatprep.subr.mxu0 %v9620_v17 }
 0x391   : > { %3121 = vmatprep.mubr.f32.mxu1 %v7646_v39  ;;  %3478 = vmatpush1.msra.mxu0 %v3429_v29  ;;  %v3425_v29 = vld [vmem:[#allocation7 + $0x330] sm:$0xff]  ;;  %v9769_v39 = vld [vmem:[#allocation61_spill] sm:$0xff] }
 0x392   : > { %4963 = vmatmul.mubr.f32.gmra.mxu0 %v9766_v13  ;;  %3479 = vmatprep.subr.mxu0 %v9620_v17 }
 0x393   : > { %4965 = vmatprep.mubr.f32.mxu0 %v9767_v5  ;;  %3480 = vmatpush1.msra.mxu0 %v3428_v58  ;;  %v3424_v58 = vld [vmem:[#allocation7 + $0x328] sm:$0xff] }
 0x394   : > { %3122 = vmatmul.mubr.f32.gmra.mxu1 %v7761_v34  ;;  %3481 = vmatprep.subr.mxu0 %v9620_v17  ;;  %v9770_v34 = vld [vmem:[#allocation22_spill] sm:$0xff] }
 0x395   : > { %3126 = vmatprep.mubr.f32.mxu1 %v7673_v43  ;;  %3482 = vmatpush1.msra.mxu0 %v3427_v54  ;;  %v3423_v54 = vld [vmem:[#allocation7 + $0x320] sm:$0xff]  ;;  %v9771_v43 = vld [vmem:[#allocation67_spill] sm:$0xff] }
 0x396   : > { %4966 = vmatmul.mubr.f32.gmra.mxu0 %v9768_v12  ;;  %3483 = vmatprep.subr.mxu0 %v9620_v17 }
 0x397   : > { %4968 = vmatprep.mubr.f32.mxu0 %v9769_v39  ;;  %3484 = vmatpush1.msra.mxu0 %v3426_v7  ;;  %v3422_v7 = vld [vmem:[#allocation7 + $0x318] sm:$0xff] }
 0x398   : > { %3127 = vmatmul.mubr.f32.gmra.mxu1 %v8117_v15  ;;  %3485 = vmatprep.subr.mxu0 %v9620_v17  ;;  %v9772_v15 = vld [vmem:[#allocation59_spill] sm:$0xff] }
 0x399   : > { %3131 = vmatprep.mubr.f32.mxu1 %v7697_v30  ;;  %3486 = vmatpush1.msra.mxu0 %v3425_v29  ;;  %v3421_v29 = vld [vmem:[#allocation7 + $0x310] sm:$0xff] }
 0x39a   : > { %4969 = vmatmul.mubr.f32.gmra.mxu0 %v9770_v34  ;;  %3487 = vmatprep.subr.mxu0 %v9620_v17  ;;  %v9773_v30 = vld [vmem:[#allocation66_spill] sm:$0xff] }
 0x39b   : > { %4971 = vmatprep.mubr.f32.mxu0 %v9771_v43  ;;  %3488 = vmatpush1.msra.mxu0 %v3424_v58  ;;  %v3420_v58 = vld [vmem:[#allocation7 + $0x308] sm:$0xff] }
 0x39c   : > { %3132 = vmatmul.mubr.f32.gmra.mxu1 %v7819_v63  ;;  %3489 = vmatprep.subr.mxu0 %v9620_v17  ;;  %v9774_v63 = vld [vmem:[#allocation23_spill] sm:$0xff] }
 0x39d   : > { %3136 = vmatprep.mubr.f32.mxu1 %v7723_v22  ;;  %3490 = vmatpush1.msra.mxu0 %v3423_v54  ;;  %v3419_v54 = vld [vmem:[#allocation7 + $0x300] sm:$0xff]  ;;  %v9775_v22 = vld [vmem:[#allocation69_spill] sm:$0xff] }
 0x39e   : > { %4972 = vmatmul.mubr.f32.gmra.mxu0 %v9772_v15  ;;  %3491 = vmatprep.subr.mxu0 %v9620_v17 }
 0x39f   : > { %4974 = vmatprep.mubr.f32.mxu0 %v9773_v30  ;;  %3492 = vmatpush1.msra.mxu0 %v3422_v7  ;;  %v3450_v7 = vld [vmem:[#allocation7 + $0x3f8] sm:$0xff] }
 0x3a0   : > { %3137 = vmatmul.mubr.f32.gmra.mxu1 %v8139_v35  ;;  %3493 = vmatprep.subr.mxu0 %v9620_v17  ;;  %v9776_v35 = vld [vmem:[#allocation29_spill] sm:$0xff] }
 0x3a1   : > { %3141 = vmatprep.mubr.f32.mxu1 %v7729_v20  ;;  %3494 = vmatpush1.msra.mxu0 %v3421_v29  ;;  %v3449_v29 = vld [vmem:[#allocation7 + $0x3f0] sm:$0xff] }
 0x3a2   : > { %4975 = vmatmul.mubr.f32.gmra.mxu0 %v9774_v63  ;;  %3495 = vmatprep.subr.mxu0 %v9620_v17 }
 0x3a3   : > { %4977 = vmatprep.mubr.f32.mxu0 %v9775_v22  ;;  %3496 = vmatpush1.msra.mxu0 %v3420_v58  ;;  %v3448_v58 = vld [vmem:[#allocation7 + $0x3e8] sm:$0xff] }
 0x3a4   : > { %3142 = vmatmul.mubr.f32.gmra.mxu1 %v7887_v19  ;;  %3497 = vmatprep.subr.mxu0 %v9620_v17  ;;  %v9777_v19 = vld [vmem:[#allocation32_spill] sm:$0xff] }
 0x3a5   : > { %3146 = vmatprep.mubr.f32.mxu1 %v7772_v26  ;;  %3498 = vmatpush1.msra.mxu0 %v3419_v54  ;;  %v3447_v54 = vld [vmem:[#allocation7 + $0x3e0] sm:$0xff]  ;;  %v9786_v26 = vld [vmem:[#allocation37_spill] sm:$0xff] }
 0x3a6   : > { %4978 = vmatmul.mubr.f32.gmra.mxu0 %v9776_v35  ;;  %3499 = vmatprep.subr.mxu0 %v9620_v17 }
 0x3a7   : > { %4980 = vmatprep.mubr.f32.mxu0 %v7749_v3  ;;  %3500 = vmatpush2.msra.mxu0 %v3450_v7  ;;  %v3446_v7 = vld [vmem:[#allocation7 + $0x3d8] sm:$0xff] }
 0x3a8   : > { %3147 = vmatmul.mubr.f32.gmra.mxu1 %v8159_v6  ;;  %3501 = vmatprep.subr.mxu0 %v9620_v17  ;;  %v9778_v6 = vld [vmem:[#allocation51_spill] sm:$0xff] }
 0x3a9   : > { %3151 = vmatprep.mubr.f32.mxu1 %v7799_v9  ;;  %3502 = vmatpush2.msra.mxu0 %v3449_v29  ;;  %v3445_v29 = vld [vmem:[#allocation7 + $0x3d0] sm:$0xff]  ;;  %v9785_v9 = vld [vmem:[#allocation80_spill] sm:$0xff] }
 0x3aa   : > { %4981 = vmatmul.mubr.f32.gmra.mxu0 %v9777_v19  ;;  %3503 = vmatprep.subr.mxu0 %v9620_v17 }
 0x3ab   : > { %4983 = vmatprep.mubr.f32.mxu0 %v7811_v60  ;;  %3504 = vmatpush2.msra.mxu0 %v3448_v58  ;;  %v3444_v58 = vld [vmem:[#allocation7 + $0x3c8] sm:$0xff] }
 0x3ac   : > { %3152 = vmatmul.mubr.f32.gmra.mxu1 %v7923_v37  ;;  %3505 = vmatprep.subr.mxu0 %v9620_v17  ;;  %v9779_v37 = vld [vmem:[#allocation27_spill] sm:$0xff] }
 0x3ad   : > { %3156 = vmatprep.mubr.f32.mxu1 %v7842_v41  ;;  %3506 = vmatpush2.msra.mxu0 %v3447_v54  ;;  %v3443_v54 = vld [vmem:[#allocation7 + $0x3c0] sm:$0xff] }
 0x3ae   : > { %4984 = vmatmul.mubr.f32.gmra.mxu0 %v9778_v6  ;;  %3507 = vmatprep.subr.mxu0 %v9620_v17 }
 0x3af   : > { %4986 = vmatprep.mubr.f32.mxu0 %v7876_v52  ;;  %3508 = vmatpush2.msra.mxu0 %v3446_v7  ;;  %v3442_v7 = vld [vmem:[#allocation7 + $0x3b8] sm:$0xff] }
 0x3b0   : > { %3157 = vmatmul.mubr.f32.gmra.mxu1 %v8178_v38  ;;  %3509 = vmatprep.subr.mxu0 %v9620_v17  ;;  %v9780_v38 = vld [vmem:[#allocation73_spill] sm:$0xff] }
 0x3b1   : > { %3161 = vmatprep.mubr.f32.mxu1 %v7866_v61  ;;  %3510 = vmatpush2.msra.mxu0 %v3445_v29  ;;  %v3441_v29 = vld [vmem:[#allocation7 + $0x3b0] sm:$0xff]  ;;  %v9784_v61 = vld [vmem:[#allocation28_spill] sm:$0xff] }
 0x3b2   : > { %4987 = vmatmul.mubr.f32.gmra.mxu0 %v9779_v37  ;;  %3511 = vmatprep.subr.mxu0 %v9620_v17 }
 0x3b3   : > { %4989 = vmatprep.mubr.f32.mxu0 %v7915_v59  ;;  %3512 = vmatpush2.msra.mxu0 %v3444_v58  ;;  %v3440_v58 = vld [vmem:[#allocation7 + $0x3a8] sm:$0xff] }
 0x3b4   : > { %3162 = vmatmul.mubr.f32.gmra.mxu1 %v7961_v18  ;;  %3513 = vmatprep.subr.mxu0 %v9620_v17  ;;  %v9781_v18 = vld [vmem:[#allocation76_spill] sm:$0xff] }
 0x3b5   : > { %3166 = vmatprep.mubr.f32.mxu1 %v7893_v32  ;;  %3514 = vmatpush2.msra.mxu0 %v3443_v54  ;;  %v3439_v54 = vld [vmem:[#allocation7 + $0x3a0] sm:$0xff] }
 0x3b6   : > { %4990 = vmatmul.mubr.f32.gmra.mxu0 %v9780_v38  ;;  %3515 = vmatprep.subr.mxu0 %v9620_v17 }
 0x3b7   : > { %4992 = vmatprep.mubr.f32.mxu0 %v7953_v8  ;;  %3516 = vmatpush2.msra.mxu0 %v3442_v7  ;;  %v3438_v7 = vld [vmem:[#allocation7 + $0x398] sm:$0xff] }
 0x3b8   : > { %3167 = vmatmul.mubr.f32.gmra.mxu1 %v8197_v31  ;;  %3517 = vmatprep.subr.mxu0 %v9620_v17  ;;  %v9782_v31 = vld [vmem:[#allocation78_spill] sm:$0xff] }
 0x3b9   : > { %3171 = vmatprep.mubr.f32.mxu1 %v7909_v57  ;;  %3518 = vmatpush2.msra.mxu0 %v3441_v29  ;;  %v3437_v29 = vld [vmem:[#allocation7 + $0x390] sm:$0xff] }
 0x3ba   : > { %4993 = vmatmul.mubr.f32.gmra.mxu0 %v9781_v18  ;;  %3519 = vmatprep.subr.mxu0 %v9620_v17 }
 0x3bb   : > { %4995 = vmatprep.mubr.f32.mxu0 %v7987_v4  ;;  %3520 = vmatpush2.msra.mxu0 %v3440_v58  ;;  %v3436_v58 = vld [vmem:[#allocation7 + $0x388] sm:$0xff] }
 0x3bc   : > { %3172 = vmatmul.mubr.f32.gmra.mxu1 %v7997_v51  ;;  %3521 = vmatprep.subr.mxu0 %v9620_v17 }
 0x3bd   : > { %3176 = vmatprep.mubr.f32.mxu1 %v9753_v44  ;;  %3522 = vmatpush2.msra.mxu0 %v3439_v54  ;;  %v9783_v44 = vld [vmem:[#allocation39_spill] sm:$0xff] }
 0x3be   : > { %4996 = vmatmul.mubr.f32.gmra.mxu0 %v9782_v31  ;;  %3523 = vmatprep.subr.mxu0 %v9620_v17  ;;  %v8339_v54 = vsel %vm256_vm2, %v8032_v24, %v9783_v44 }
 0x3bf   : > { %4998 = vmatprep.mubr.f32.mxu0 %v8026_v1  ;;  %3524 = vmatpush2.msra.mxu0 %v3438_v7  ;;  %v3435_v7 = vld [vmem:[#allocation7 + $0x380] sm:$0xff] }
 0x3c0   : > { %3177 = vmatmul.mubr.f32.gmra.mxu1 %v8215_v50  ;;  %3525 = vmatprep.subr.mxu0 %v9620_v17  ;;  %v2578_v51 = vpop.f32.mrf.mxu0  ;;  %v4875_v57 = vpop.f32.mrf.mxu1 }
 0x3c1   : > { %3181 = vmatprep.mubr.f32.mxu1 %v7725_v23  ;;  %3526 = vmatpush2.msra.mxu0 %v3437_v29 }
 0x3c2   : > { %4999 = vmatmul.mubr.f32.gmra.mxu0 %v8339_v54  ;;  %3527 = vmatprep.subr.mxu0 %v9620_v17  ;;  %v2580_v50 = vpop.f32.mrf.mxu0  ;;  %v2803_v32 = vpop.f32.mrf.mxu1 }
 0x3c3   : > { %3528 = vmatpush2.msra.mxu0 %v3436_v58  ;;  %3531 = vmatprep.mubr.f32.mxu0 %v9784_v61  ;;  %v8344_v41 = vadd.f32 %v2803_v32, %v2578_v51 }
 0x3c4   : > { %3182 = vmatmul.mubr.f32.gmra.mxu1 %v8032_v24  ;;  %3529 = vmatprep.subr.mxu0 %v9620_v17  ;;  %v2583_v29 = vpop.f32.mrf.mxu0 }
 0x3c5   : > { %5033 = vmatprep.mubr.f32.mxu1 %v7452_v0  ;;  %3530 = vmatpush2.msra.mxu0 %v3435_v7  ;;  %v8349_v44 = vadd.f32 %v4875_v57, %v2583_v29  ;;  %v4878_v23 = vpop.f32.mrf.mxu1  ;;  %v9787_v57 = vld [vmem:[#allocation55_spill] sm:$0xff]  ;;  %v9789_v29 = vld [vmem:[#allocation40_spill] sm:$0xff] }
 0x3c6   : > { %3532 = vmatmul.mubr.f32.vlgmr.msra.gmra.mxu0 %v9785_v9  ;;  %v2585_v50 = vpop.f32.mrf.mxu0 }
 0x3c7   : > { %3536 = vmatprep.mubr.f32.mxu0 %v9786_v26  ;;  %v2813_v58 = vpop.f32.mrf.mxu1 }
 0x3c8   : > { %5034 = vmatmul.mubr.f32.vlgmr.msra.gmra.mxu1 %v9764_v42  ;;  %v2588_v32 = vpop.f32.mrf.mxu0  ;;  %v9788_v42 = vld [vmem:[#allocation71_spill] sm:$0xff] }
 0x3c9   : > { %5036 = vmatprep.mubr.f32.mxu1 %v9765_v48  ;;  %v8355_v61 = vadd.f32 %v2813_v58, %v2588_v32 }
 0x3ca   : > { %3537 = vmatmul.mubr.f32.gmra.mxu0 %v7462_v2  ;;  %v4881_v17 = vpop.f32.mrf.mxu1  ;;  %v2590_v0 = vpop.f32.mrf.mxu0 }
 0x3cb   : > { %3541 = vmatprep.mubr.f32.mxu0 %v9787_v57  ;;  %v9791_v57 = vld [vmem:[#allocation68_spill] sm:$0xff] }
 0x3cc   : > { %5037 = vmatmul.mubr.f32.gmra.mxu1 %v9766_v13  ;;  %v2823_v9 = vpop.f32.mrf.mxu1  ;;  %v2593_v51 = vpop.f32.mrf.mxu0 }
 0x3cd   : > { %5039 = vmatprep.mubr.f32.mxu1 %v9767_v5  ;;  %v8361_v26 = vadd.f32 %v4878_v23, %v2593_v51  ;;  %v9790_v23 = vld [vmem:[#allocation45_spill] sm:$0xff] }
 0x3ce   : > { %3542 = vmatmul.mubr.f32.gmra.mxu0 %v9788_v42  ;;  %v4884_v7 = vpop.f32.mrf.mxu1  ;;  %v2595_v48 = vpop.f32.mrf.mxu0  ;;  %v9792_v51 = vld [vmem:[#allocation17_spill] sm:$0xff] }
 0x3cf   : > { %3546 = vmatprep.mubr.f32.mxu0 %v9789_v29  ;;  %v9793_v48 = vld [vmem:[#allocation57_spill] sm:$0xff] }
 0x3d0   : > { %5040 = vmatmul.mubr.f32.gmra.mxu1 %v9768_v12  ;;  %v2833_v2 = vpop.f32.mrf.mxu1  ;;  %v2598_v50 = vpop.f32.mrf.mxu0 }
 0x3d1   : > { %5042 = vmatprep.mubr.f32.mxu1 %v9769_v39  ;;  %v8367_v58 = vadd.f32 %v2823_v9, %v2598_v50 }
 0x3d2   : > { %3547 = vmatmul.mubr.f32.gmra.mxu0 %v9743_v40  ;;  %v4887_v13 = vpop.f32.mrf.mxu1  ;;  %v2600_v5 = vpop.f32.mrf.mxu0 }
 0x3d3   : > { %3551 = vmatprep.mubr.f32.mxu0 %v9790_v23  ;;  %v9795_v5 = vld [vmem:[#allocation41_spill] sm:$0xff] }
 0x3d4   : > { %5043 = vmatmul.mubr.f32.gmra.mxu1 %v9770_v34  ;;  %v2843_v32 = vpop.f32.mrf.mxu1 }
 0x3d5   : > { %5045 = vmatprep.mubr.f32.mxu1 %v9771_v43  ;;  %v2603_v0 = vpop.f32.mrf.mxu0  ;;  %v9794_v43 = vld [vmem:[#allocation18_spill] sm:$0xff] }
 0x3d6   : > { %3552 = vmatmul.mubr.f32.gmra.mxu0 %v9791_v57  ;;  %v8374_v12 = vadd.f32 %v4881_v17, %v2603_v0 }
 0x3d7   : > { %3556 = vmatprep.mubr.f32.mxu0 %v9792_v51  ;;  %v4890_v39 = vpop.f32.mrf.mxu1  ;;  %v2605_v9 = vpop.f32.mrf.mxu0 }
 0x3d8   : > { %5046 = vmatmul.mubr.f32.gmra.mxu1 %v9772_v15 }
 0x3d9   : > { %5048 = vmatprep.mubr.f32.mxu1 %v9773_v30  ;;  %v2853_v40 = vpop.f32.mrf.mxu1  ;;  %v2608_v42 = vpop.f32.mrf.mxu0  ;;  %v9796_v30 = vld [vmem:[#allocation21_spill] sm:$0xff] }
 0x3da   : > { %3557 = vmatmul.mubr.f32.gmra.mxu0 %v9793_v48  ;;  %v8380_v34 = vadd.f32 %v2833_v2, %v2608_v42  ;;  %v9798_v42 = vld [vmem:[#allocation43_spill] sm:$0xff] }
 0x3db   : > { %3561 = vmatprep.mubr.f32.mxu0 %v9794_v43  ;;  %v8383_v29 = vpop.f32.mrf.mxu1  ;;  %v2610_v17 = vpop.f32.mrf.mxu0 }
 0x3dc   : > { %5049 = vmatmul.mubr.f32.gmra.mxu1 %v9774_v63  ;;  %v9801_v17 = vld [vmem:[#allocation20_spill] sm:$0xff] }
 0x3dd   : > { %5051 = vmatprep.mubr.f32.mxu1 %v9775_v22  ;;  %v2863_v50 = vpop.f32.mrf.mxu1 }
 0x3de   : > { %3562 = vmatmul.mubr.f32.gmra.mxu0 %v9795_v5  ;;  %v2613_v15 = vpop.f32.mrf.mxu0 }
 0x3df   : > { %3566 = vmatprep.mubr.f32.mxu0 %v9796_v30  ;;  %v8389_v23 = vadd.f32 %v4884_v7, %v2613_v15  ;;  %v9802_v30 = vld [vmem:[#allocation56_spill] sm:$0xff] }
 0x3e0   : > { %5052 = vmatmul.mubr.f32.gmra.mxu1 %v9776_v35  ;;  %v8392_v2 = vpop.f32.mrf.mxu1  ;;  %v2615_v0 = vpop.f32.mrf.mxu0 }
 0x3e1   : > { %5054 = vmatprep.mubr.f32.mxu1 %v7749_v3 }
 0x3e2   : > { %3567 = vmatmul.mubr.f32.gmra.mxu0 %v9754_v53  ;;  %v2873_v63 = vpop.f32.mrf.mxu1  ;;  %v2618_v57 = vpop.f32.mrf.mxu0 }
 0x3e3   : > { %3571 = vmatprep.mubr.f32.mxu0 %v9755_v21  ;;  %v8397_v22 = vadd.f32 %v2843_v32, %v2618_v57 }
 0x3e4   : > { %5055 = vmatmul.mubr.f32.gmra.mxu1 %v9777_v19  ;;  %v8400_v51 = vpop.f32.mrf.mxu1  ;;  %v2620_v7 = vpop.f32.mrf.mxu0 }
 0x3e5   : > { %5057 = vmatprep.mubr.f32.mxu1 %v7811_v60 }
 0x3e6   : > { %3572 = vmatmul.mubr.f32.gmra.mxu0 %v9757_v11  ;;  %v8404_v35 = vpop.f32.mrf.mxu1 }
 0x3e7   : > { %3576 = vmatprep.mubr.f32.mxu0 %v7521_v25  ;;  %v2623_v53 = vpop.f32.mrf.mxu0 }
 0x3e8   : > { %5058 = vmatmul.mubr.f32.gmra.mxu1 %v9778_v6  ;;  %v8408_v3 = vadd.f32 %v4887_v13, %v2623_v53 }
 0x3e9   : > { %5060 = vmatprep.mubr.f32.mxu1 %v7876_v52  ;;  %v8411_v21 = vpop.f32.mrf.mxu1  ;;  %v2625_v19 = vpop.f32.mrf.mxu0 }
 0x3ea   : > { %3577 = vmatmul.mubr.f32.gmra.mxu0 %v7626_v46 }
 0x3eb   : > { %3581 = vmatprep.mubr.f32.mxu0 %v9759_v45  ;;  %v8415_v60 = vpop.f32.mrf.mxu1  ;;  %v2628_v11 = vpop.f32.mrf.mxu0 }
 0x3ec   : > { %5061 = vmatmul.mubr.f32.gmra.mxu1 %v9779_v37  ;;  %v8418_v25 = vadd.f32 %v2853_v40, %v2628_v11  ;;  %v9804_v11 = vld [vmem:[#allocation30_spill] sm:$0xff] }
 0x3ed   : > { %5063 = vmatprep.mubr.f32.mxu1 %v7915_v59  ;;  %v8421_v6 = vpop.f32.mrf.mxu1  ;;  %v2630_v13 = vpop.f32.mrf.mxu0 }
 0x3ee   : > { %3582 = vmatmul.mubr.f32.gmra.mxu0 %v7972_v62  ;;  %v9805_v13 = vld [vmem:[#allocation54_spill] sm:$0xff] }
 0x3ef   : > { %3586 = vmatprep.mubr.f32.mxu0 %v7561_v16  ;;  %v8425_v52 = vpop.f32.mrf.mxu1 }
 0x3f0   : > { %5064 = vmatmul.mubr.f32.gmra.mxu1 %v9780_v38  ;;  %v2633_v46 = vpop.f32.mrf.mxu0 }
 0x3f1   : > { %5066 = vmatprep.mubr.f32.mxu1 %v7953_v8  ;;  %v8429_v45 = vadd.f32 %v4890_v39, %v2633_v46  ;;  %v9797_v39 = vld [vmem:[#allocation79_spill] sm:$0xff] }
 0x3f2   : > { %v8431_v37 = vpop.f32.mrf.mxu1  ;;  %3587 = vmatmul.mubr.f32.gmra.mxu0 %v7667_v14  ;;  %v2635_v59 = vpop.f32.mrf.mxu0 }
 0x3f3   : > { %3591 = vmatprep.mubr.f32.mxu0 %v7563_v56 }
 0x3f4   : > { %5067 = vmatmul.mubr.f32.gmra.mxu1 %v9781_v18  ;;  %v8436_v62 = vpop.f32.mrf.mxu1  ;;  %v2638_v16 = vpop.f32.mrf.mxu0 }
 0x3f5   : > { %5069 = vmatprep.mubr.f32.mxu1 %v7987_v4  ;;  %v8439_v38 = vadd.f32 %v2863_v50, %v2638_v16 }
 0x3f6   : > { %v8441_v32 = vpop.f32.mrf.mxu1  ;;  %3592 = vmatmul.mubr.f32.gmra.mxu0 %v8041_v10  ;;  %v2640_v8 = vpop.f32.mrf.mxu0 }
 0x3f7   : > { %3596 = vmatprep.mubr.f32.mxu0 %v7608_v27 }
 0x3f8   : > { %5070 = vmatmul.mubr.f32.gmra.mxu1 %v9782_v31  ;;  %v8446_v14 = vpop.f32.mrf.mxu1 }
 0x3f9   : > { %5072 = vmatprep.mubr.f32.mxu1 %v8026_v1  ;;  %v2643_v56 = vpop.f32.mrf.mxu0 }
 0x3fa   : > { %v8450_v18 = vadd.f32 %v8383_v29, %v2643_v56  ;;  %3597 = vmatmul.mubr.f32.gmra.mxu0 %v7711_v55  ;;  %v3416_v55 = vsel %vm256_vm2, %v8065_v36, %v9798_v42  ;;  %v9800_v29 = vld [vmem:[#allocation58_spill] sm:$0xff]  ;;  %v9806_v56 = vld [vmem:[#allocation49_spill] sm:$0xff] }
 0x3fb   : > { %v8453_v4 = vpop.f32.mrf.mxu1  ;;  %3601 = vmatprep.mubr.f32.mxu0 %v7634_v47  ;;  %v2645_v10 = vpop.f32.mrf.mxu0  ;;  %v9799_v47 = vld [vmem:[#allocation19_spill] sm:$0xff] }
 0x3fc   : > { %5073 = vmatmul.mubr.f32.gmra.mxu1 %v9797_v39 }
 0x3fd   : > { %5075 = vmatprep.mubr.f32.mxu1 %v8056_v49  ;;  %v8458_v27 = vpop.f32.mrf.mxu1  ;;  %v2648_v31 = vpop.f32.mrf.mxu0 }
 0x3fe   : > { %v8460_v9 = vadd.f32 %v2873_v63, %v2648_v31  ;;  %3602 = vmatmul.mubr.f32.gmra.mxu0 %v8092_v28  ;;  %v9803_v63 = vld [vmem:[#allocation70_spill] sm:$0xff] }
 0x3ff   : > { %v8463_v40 = vpop.f32.mrf.mxu1  ;;  %3606 = vmatprep.mubr.f32.mxu0 %v9799_v47  ;;  %v2650_v48 = vpop.f32.mrf.mxu0  ;;  %v9808_v47 = vld [vmem:[#allocation47_spill] sm:$0xff] }
 0x400   : > { %5076 = vmatmul.mubr.f32.gmra.mxu1 %v3416_v55  ;;  %v9807_v55 = vld [vmem:[#allocation24_spill] sm:$0xff] }
 0x401   : > { %5078 = vmatprep.mubr.f32.mxu1 %v8026_v1  ;;  %v8471_v49 = vpop.f32.mrf.mxu1 }
 0x402   : > { %v2653_v43 = vpop.f32.mrf.mxu0  ;;  %3607 = vmatmul.mubr.f32.gmra.mxu0 %v9800_v29 }
 0x403   : > { %v8475_v28 = vadd.f32 %v8392_v2, %v2653_v43  ;;  %3611 = vmatprep.mubr.f32.mxu0 %v9801_v17  ;;  %v9809_v17 = vld [vmem:[#allocation25_spill] sm:$0xff] }
 0x404   : > { %v8478_v50 = vpop.f32.mrf.mxu1  ;;  %5079 = vmatmul.mubr.f32.gmra.mxu1 %v8339_v54  ;;  %v2655_v33 = vpop.f32.mrf.mxu0 }
 0x405   : > { %v9810_v33 = vld [vmem:[#allocation62_spill] sm:$0xff] }
 0x406   : > { %v8481_v5 = vpop.f32.mrf.mxu1  ;;  %v2658_v15 = vpop.f32.mrf.mxu0  ;;  %3612 = vmatmul.mubr.f32.gmra.mxu0 %v9802_v30 }
 0x407   : > { %v8485_v0 = vadd.f32 %v8404_v35, %v2658_v15  ;;  %3616 = vmatprep.mubr.f32.mxu0 %v9803_v63 }
 0x408   : > { %v3028_v57 = vpop.f32.mrf.mxu1  ;;  %v2660_v2 = vpop.f32.mrf.mxu0 }
 0x409   : > { %v8489_v7 = vadd.f32 %v3028_v57, %v8344_v41  ;;  %v9811_v2 = vld [vmem:[#allocation72_spill] sm:$0xff] }
 0x40a   : > { %v3030_v53 = vpop.f32.mrf.mxu1  ;;  %v2663_v19 = vpop.f32.mrf.mxu0  ;;  %3617 = vmatmul.mubr.f32.gmra.mxu0 %v9804_v11 }
 0x40b   : > { %v8493_v54 = vadd.f32 %v8400_v51, %v2663_v19  ;;  %3621 = vmatprep.mubr.f32.mxu0 %v9805_v13  ;;  %v9812_v53 = vld [vmem:[#allocation63_spill] sm:$0xff] }
 0x40c   : > { %v3033_v46 = vpop.f32.mrf.mxu1  ;;  %v2665_v59 = vpop.f32.mrf.mxu0 }
 0x40d   : > { %v8497_v35 = vadd.f32 %v3033_v46, %v8349_v44  ;;  %v9813_v59 = vld [vmem:[#allocation15_spill] sm:$0xff] }
 0x40e   : > { %v3035_v16 = vpop.f32.mrf.mxu1  ;;  %v2668_v8 = vpop.f32.mrf.mxu0  ;;  %3622 = vmatmul.mubr.f32.gmra.mxu0 %v9806_v56 }
 0x40f   : > { %v8501_v41 = vadd.f32 %v8415_v60, %v2668_v8  ;;  %3626 = vmatprep.mubr.f32.mxu0 %v7729_v20  ;;  %v9814_v16 = vld [vmem:[#allocation26_spill] sm:$0xff] }
 0x410   : > { %v3038_v10 = vpop.f32.mrf.mxu1  ;;  %v2670_v39 = vpop.f32.mrf.mxu0 }
 0x411   : > { %v8505_v51 = vadd.f32 %v3038_v10, %v8355_v61 }
 0x412   : > { %v3040_v31 = vpop.f32.mrf.mxu1  ;;  %v2673_v42 = vpop.f32.mrf.mxu0  ;;  %3627 = vmatmul.mubr.f32.gmra.mxu0 %v9807_v55 }
 0x413   : > { %v8509_v44 = vadd.f32 %v8411_v21, %v2673_v42  ;;  %3631 = vmatprep.mubr.f32.mxu0 %v9808_v47  ;;  %v9815_v31 = vld [vmem:[#allocation74_spill] sm:$0xff]  ;;  %v9816_v42 = vld [vmem:[#allocation33_spill] sm:$0xff] }
 0x414   : > { %v3043_v48 = vpop.f32.mrf.mxu1  ;;  %v2675_v43 = vpop.f32.mrf.mxu0 }
 0x415   : > { %v8513_v60 = vadd.f32 %v3043_v48, %v8361_v26 }
 0x416   : > { %v3045_v20 = vpop.f32.mrf.mxu1  ;;  %v2678_v29 = vpop.f32.mrf.mxu0  ;;  %3632 = vmatmul.mubr.f32.gmra.mxu0 %v9809_v17 }
 0x417   : > { %v8517_v61 = vadd.f32 %v8425_v52, %v2678_v29  ;;  %3636 = vmatprep.mubr.f32.mxu0 %v9810_v33  ;;  %v9817_v20 = vld [vmem:[#allocation48_spill] sm:$0xff]  ;;  %v9818_v29 = vld [vmem:[#allocation13_spill] sm:$0xff] }
 0x418   : > { %v3048_v15 = vpop.f32.mrf.mxu1  ;;  %v2680_v30 = vpop.f32.mrf.mxu0 }
 0x419   : > { %v8521_v21 = vadd.f32 %v3048_v15, %v8367_v58 }
 0x41a   : > { %v3050_v63 = vpop.f32.mrf.mxu1  ;;  %v2683_v57 = vpop.f32.mrf.mxu0  ;;  %3637 = vmatmul.mubr.f32.gmra.mxu0 %v9811_v2 }
 0x41b   : > { %v8525_v26 = vadd.f32 %v8421_v6, %v2683_v57  ;;  %3641 = vmatprep.mubr.f32.mxu0 %v9812_v53  ;;  %v9819_v63 = vld [vmem:[#allocation77_spill] sm:$0xff]  ;;  %v9820_v57 = vld [vmem:[#allocation36_spill] sm:$0xff] }
 0x41c   : > { %v3053_v19 = vpop.f32.mrf.mxu1  ;;  %v2685_v11 = vpop.f32.mrf.mxu0 }
 0x41d   : > { %v8529_v52 = vadd.f32 %v3053_v19, %v8374_v12 }
 0x41e   : > { %v3055_v13 = vpop.f32.mrf.mxu1  ;;  %v2688_v46 = vpop.f32.mrf.mxu0  ;;  %3642 = vmatmul.mubr.f32.gmra.mxu0 %v9813_v59 }
 0x41f   : > { %v8533_v58 = vadd.f32 %v8436_v62, %v2688_v46  ;;  %3646 = vmatprep.mubr.f32.mxu0 %v9814_v16  ;;  %v9821_v13 = vld [vmem:[#allocation46_spill] sm:$0xff]  ;;  %v9822_v46 = vld [vmem:[#allocation44_spill] sm:$0xff] }
 0x420   : > { %v3058_v8 = vpop.f32.mrf.mxu1  ;;  %v2690_v56 = vpop.f32.mrf.mxu0 }
 0x421   : > { %v8537_v6 = vadd.f32 %v3058_v8, %v8380_v34 }
 0x422   : > { %v3060_v10 = vpop.f32.mrf.mxu1  ;;  %v2693_v39 = vpop.f32.mrf.mxu0  ;;  %3647 = vmatmul.mubr.f32.gmra.mxu0 %v9815_v31 }
 0x423   : > { %v8541_v12 = vadd.f32 %v8431_v37, %v2693_v39  ;;  %3651 = vmatprep.mubr.f32.mxu0 %v9816_v42  ;;  %v9823_v10 = vld [vmem:[#allocation75_spill] sm:$0xff] }
 0x424   : > { %v3063_v55 = vpop.f32.mrf.mxu1  ;;  %v2695_v47 = vpop.f32.mrf.mxu0 }
 0x425   : > { %v8545_v62 = vadd.f32 %v3063_v55, %v8389_v23  ;;  %v9824_v47 = vld [vmem:[#allocation64_spill] sm:$0xff] }
 0x426   : > { %v3065_v48 = vpop.f32.mrf.mxu1  ;;  %v2698_v43 = vpop.f32.mrf.mxu0  ;;  %3652 = vmatmul.mubr.f32.gmra.mxu0 %v9817_v20 }
 0x427   : > { %v8549_v34 = vadd.f32 %v8446_v14, %v2698_v43  ;;  %3656 = vmatprep.mubr.f32.mxu0 %v9818_v29  ;;  %v9825_v48 = vld [vmem:[#allocation35_spill] sm:$0xff] }
 0x428   : > { %v3068_v17 = vpop.f32.mrf.mxu1  ;;  %v2700_v33 = vpop.f32.mrf.mxu0 }
 0x429   : > { %v8553_v37 = vadd.f32 %v3068_v17, %v8397_v22 }
 0x42a   : > { %v3070_v15 = vpop.f32.mrf.mxu1  ;;  %v2703_v30 = vpop.f32.mrf.mxu0  ;;  %3657 = vmatmul.mubr.f32.gmra.mxu0 %v9819_v63 }
 0x42b   : > { %v8557_v23 = vadd.f32 %v8441_v32, %v2703_v30  ;;  %3661 = vmatprep.mubr.f32.mxu0 %v9820_v57  ;;  %v9826_v30 = vld [vmem:[#allocation52_spill] sm:$0xff] }
 0x42c   : > { %v3073_v2 = vpop.f32.mrf.mxu1  ;;  %v2705_v53 = vpop.f32.mrf.mxu0 }
 0x42d   : > { %v8561_v14 = vadd.f32 %v3073_v2, %v8408_v3  ;;  %v3415_v2 = vsel %vm253_vm3, %v8026_v1, %v9826_v30 }
 0x42e   : > { %v3075_v19 = vpop.f32.mrf.mxu1  ;;  %v2708_v11 = vpop.f32.mrf.mxu0  ;;  %3662 = vmatmul.mubr.f32.gmra.mxu0 %v9821_v13 }
 0x42f   : > { %v8565_v22 = vadd.f32 %v8458_v27, %v2708_v11  ;;  %3666 = vmatprep.mubr.f32.mxu0 %v9822_v46 }
 0x430   : > { %v3078_v59 = vpop.f32.mrf.mxu1  ;;  %v2710_v16 = vpop.f32.mrf.mxu0 }
 0x431   : > { %v8569_v32 = vadd.f32 %v3078_v59, %v8418_v25 }
 0x432   : > { %v3080_v8 = vpop.f32.mrf.mxu1  ;;  %v2713_v56 = vpop.f32.mrf.mxu0  ;;  %3667 = vmatmul.mubr.f32.gmra.mxu0 %v8032_v24 }
 0x433   : > { %v8573_v3 = vadd.f32 %v8453_v4, %v2713_v56  ;;  %3671 = vmatprep.mubr.f32.mxu0 %v9823_v10 }
 0x434   : > { %v3083_v39 = vpop.f32.mrf.mxu1  ;;  %v2715_v31 = vpop.f32.mrf.mxu0 }
 0x435   : > { %v8577_v27 = vadd.f32 %v3083_v39, %v8429_v45 }
 0x436   : > { %v3085_v42 = vpop.f32.mrf.mxu1  ;;  %v2718_v55 = vpop.f32.mrf.mxu0  ;;  %3672 = vmatmul.mubr.f32.gmra.mxu0 %v9824_v47 }
 0x437   : > { %v8581_v25 = vadd.f32 %v8471_v49, %v2718_v55  ;;  %3676 = vmatprep.mubr.f32.mxu0 %v9825_v48 }
 0x438   : > { %v3088_v43 = vpop.f32.mrf.mxu1  ;;  %v2720_v20 = vpop.f32.mrf.mxu0 }
 0x439   : > { %v8585_v4 = vadd.f32 %v3088_v43, %v8439_v38 }
 0x43a   : > { %v3090_v29 = vpop.f32.mrf.mxu1  ;;  %v2723_v17 = vpop.f32.mrf.mxu0  ;;  %3677 = vmatmul.mubr.f32.gmra.mxu0 %v8065_v36 }
 0x43b   : > { %v8589_v45 = vadd.f32 %v8463_v40, %v2723_v17  ;;  %3681 = vmatprep.mubr.f32.mxu0 %v9820_v57 }
 0x43c   : > { %v3093_v33 = vpop.f32.mrf.mxu1  ;;  %v2725_v15 = vpop.f32.mrf.mxu0 }
 0x43d   : > { %v3094_v49 = vadd.f32 %v3093_v33, %v8450_v18 }
 0x43e   : > { %v3095_v38 = vpop.f32.mrf.mxu1  ;;  %v2728_v53 = vpop.f32.mrf.mxu0  ;;  %3682 = vmatmul.mubr.f32.gmra.mxu0 %v3415_v2 }
 0x43f   : > { %v8598_v19 = vadd.f32 %v8481_v5, %v2728_v53  ;;  %3686 = vmatprep.mubr.f32.mxu0 %v9822_v46 }
 0x440   : > { %v3098_v36 = vpop.f32.mrf.mxu1  ;;  %v2730_v40 = vpop.f32.mrf.mxu0 }
 0x441   : > { %v8602_v57 = vadd.f32 %v3098_v36, %v8460_v9 }
 0x442   : > { %v3100_v11 = vpop.f32.mrf.mxu1  ;;  %v2733_v18 = vpop.f32.mrf.mxu0  ;;  %3687 = vmatmul.mubr.f32.gmra.mxu0 %v8032_v24 }
 0x443   : > { %v8606_v13 = vadd.f32 %v8478_v50, %v2733_v18 }
 0x444   : > { %v3103_v1 = vpop.f32.mrf.mxu1  ;;  %v2735_v59 = vpop.f32.mrf.mxu0 }
 0x445   : > { %v3104_v16 = vadd.f32 %v3103_v1, %v8475_v28 }
 0x446   : > { %v3105_v5 = vpop.f32.mrf.mxu1  ;;  %v4955_v8 = vpop.f32.mrf.mxu0 }
 0x447   : > { %v8610_v46 = vadd.f32 %v4955_v8, %v8497_v35 }
 0x448   : > { %v3108_v56 = vpop.f32.mrf.mxu1  ;;  %v3253_v10 = vpop.f32.mrf.mxu0 }
 0x449   : > { %v3109_v9 = vadd.f32 %v3108_v56, %v8485_v0  ;;  %v8614_v39 = vadd.f32 %v3253_v10, %v8489_v7 }
 0x44a   : > { %v3110_v24 = vpop.f32.mrf.mxu1  ;;  %v4958_v31 = vpop.f32.mrf.mxu0 }
 0x44b   : > { %v8617_v50 = vadd.f32 %v4958_v31, %v8513_v60 }
 0x44c   : > { %v3113_v42 = vpop.f32.mrf.mxu1  ;;  %v3263_v55 = vpop.f32.mrf.mxu0 }
 0x44d   : > { %v3114_v28 = vadd.f32 %v3113_v42, %v8493_v54  ;;  %v8621_v47 = vadd.f32 %v3263_v55, %v8505_v51 }
 0x44e   : > { %v3115_v35 = vpop.f32.mrf.mxu1  ;;  %v4961_v48 = vpop.f32.mrf.mxu0 }
 0x44f   : > { %v8624_v43 = vadd.f32 %v4961_v48, %v8529_v52 }
 0x450   : > { %v3118_v0 = vpop.f32.mrf.mxu1  ;;  %v3273_v7 = vpop.f32.mrf.mxu0 }
 0x451   : > { %v3119_v20 = vadd.f32 %v3118_v0, %v8501_v41  ;;  %v8628_v29 = vadd.f32 %v3273_v7, %v8521_v21 }
 0x452   : > { %v3120_v60 = vpop.f32.mrf.mxu1  ;;  %v4964_v17 = vpop.f32.mrf.mxu0 }
 0x453   : > { %v8631_v33 = vadd.f32 %v4964_v17, %v8545_v62 }
 0x454   : > { %v3123_v54 = vpop.f32.mrf.mxu1  ;;  %v3283_v51 = vpop.f32.mrf.mxu0 }
 0x455   : > { %v3124_v15 = vadd.f32 %v3123_v54, %v8509_v44  ;;  %v8635_v30 = vadd.f32 %v3283_v51, %v8537_v6 }
 0x456   : > { %v3125_v52 = vpop.f32.mrf.mxu1  ;;  %v4967_v63 = vpop.f32.mrf.mxu0 }
 0x457   : > { %v8638_v2 = vadd.f32 %v4967_v63, %v8561_v14 }
 0x458   : > { %v3128_v41 = vpop.f32.mrf.mxu1  ;;  %v3293_v21 = vpop.f32.mrf.mxu0 }
 0x459   : > { %v3129_v38 = vadd.f32 %v3128_v41, %v8517_v61  ;;  %v8642_v53 = vadd.f32 %v3293_v21, %v8553_v37 }
 0x45a   : > { %v3130_v62 = vpop.f32.mrf.mxu1  ;;  %v4970_v36 = vpop.f32.mrf.mxu0 }
 0x45b   : > { %v8645_v40 = vadd.f32 %v4970_v36, %v8577_v27 }
 0x45c   : > { %v3133_v44 = vpop.f32.mrf.mxu1  ;;  %v3303_v6 = vpop.f32.mrf.mxu0 }
 0x45d   : > { %v3134_v11 = vadd.f32 %v3133_v44, %v8525_v26  ;;  %v8649_v18 = vadd.f32 %v3303_v6, %v8569_v32 }
 0x45e   : > { %v3135_v14 = vpop.f32.mrf.mxu1  ;;  %v4973_v1 = vpop.f32.mrf.mxu0 }
 0x45f   : > { %v8651_v59 = vadd.f32 %v4973_v1, %v3094_v49 }
 0x460   : > { %v3138_v61 = vpop.f32.mrf.mxu1  ;;  %v3313_v5 = vpop.f32.mrf.mxu0 }
 0x461   : > { %v3139_v37 = vadd.f32 %v3138_v61, %v8533_v58  ;;  %v8655_v8 = vadd.f32 %v3313_v5, %v8585_v4 }
 0x462   : > { %v3140_v27 = vpop.f32.mrf.mxu1  ;;  %v4976_v56 = vpop.f32.mrf.mxu0 }
 0x463   : > { %v8657_v10 = vadd.f32 %v4976_v56, %v3104_v16 }
 0x464   : > { %v3143_v24 = vpop.f32.mrf.mxu1  ;;  %v3323_v26 = vpop.f32.mrf.mxu0 }
 0x465   : > { %v3144_v32 = vadd.f32 %v3143_v24, %v8541_v12  ;;  %v8661_v31 = vadd.f32 %v3323_v26, %v8602_v57 }
 0x466   : > { %v3145_v49 = vpop.f32.mrf.mxu1  ;;  %v4979_v42 = vpop.f32.mrf.mxu0 }
 0x467   : > { %v8663_v55 = vadd.f32 %v4979_v42, %v3114_v28 }
 0x468   : > { %v3148_v35 = vpop.f32.mrf.mxu1  ;;  %v3333_v58 = vpop.f32.mrf.mxu0 }
 0x469   : > { %v3149_v4 = vadd.f32 %v3148_v35, %v8549_v34  ;;  %v8666_v48 = vadd.f32 %v3333_v58, %v3109_v9 }
 0x46a   : > { %v3150_v0 = vpop.f32.mrf.mxu1  ;;  %v4982_v16 = vpop.f32.mrf.mxu0 }
 0x46b   : > { %v8668_v7 = vadd.f32 %v4982_v16, %v3124_v15 }
 0x46c   : > { %v3153_v60 = vpop.f32.mrf.mxu1  ;;  %v3343_v17 = vpop.f32.mrf.mxu0 }
 0x46d   : > { %v3154_v12 = vadd.f32 %v3153_v60, %v8557_v23  ;;  %v8671_v57 = vadd.f32 %v3343_v17, %v3119_v20 }
 0x46e   : > { %v3155_v54 = vpop.f32.mrf.mxu1  ;;  %v4985_v51 = vpop.f32.mrf.mxu0 }
 0x46f   : > { %v8673_v28 = vadd.f32 %v4985_v51, %v3134_v11 }
 0x470   : > { %v3158_v52 = vpop.f32.mrf.mxu1  ;;  %v3353_v63 = vpop.f32.mrf.mxu0 }
 0x471   : > { %v3159_v34 = vadd.f32 %v3158_v52, %v8565_v22  ;;  %v8676_v9 = vadd.f32 %v3353_v63, %v3129_v38 }
 0x472   : > { %v3160_v41 = vpop.f32.mrf.mxu1  ;;  %v4988_v21 = vpop.f32.mrf.mxu0 }
 0x473   : > { %v8678_v15 = vadd.f32 %v4988_v21, %v3144_v32 }
 0x474   : > { %v3163_v62 = vpop.f32.mrf.mxu1  ;;  %v3363_v36 = vpop.f32.mrf.mxu0 }
 0x475   : > { %v3164_v23 = vadd.f32 %v3163_v62, %v8573_v3  ;;  %v8681_v20 = vadd.f32 %v3363_v36, %v3139_v37 }
 0x476   : > { %v3165_v44 = vpop.f32.mrf.mxu1  ;;  %v4991_v6 = vpop.f32.mrf.mxu0 }
 0x477   : > { %v8683_v11 = vadd.f32 %v4991_v6, %v3154_v12 }
 0x478   : > { %v3168_v14 = vpop.f32.mrf.mxu1  ;;  %v3373_v1 = vpop.f32.mrf.mxu0 }
 0x479   : > { %v3169_v22 = vadd.f32 %v3168_v14, %v8581_v25  ;;  %v8686_v38 = vadd.f32 %v3373_v1, %v3149_v4 }
 0x47a   : > { %v3170_v61 = vpop.f32.mrf.mxu1  ;;  %v4994_v5 = vpop.f32.mrf.mxu0 }
 0x47b   : > { %v8688_v27 = vadd.f32 %v4994_v5, %v3164_v23 }
 0x47c   : > { %v3173_v56 = vpop.f32.mrf.mxu1  ;;  %v3383_v24 = vpop.f32.mrf.mxu0 }
 0x47d   : > { %v3174_v3 = vadd.f32 %v3173_v56, %v8589_v45  ;;  %v8691_v37 = vadd.f32 %v3383_v24, %v3159_v34 }
 0x47e   : > { %v3175_v26 = vpop.f32.mrf.mxu1  ;;  %v4997_v32 = vpop.f32.mrf.mxu0 }
 0x47f   : > { %v8693_v49 = vadd.f32 %v4997_v32, %v3174_v3 }
 0x480   : > { %v3178_v42 = vpop.f32.mrf.mxu1  ;;  %v3393_v35 = vpop.f32.mrf.mxu0 }
 0x481   : > { %v3179_v25 = vadd.f32 %v3178_v42, %v8598_v19  ;;  %v8696_v58 = vadd.f32 %v3393_v35, %v3169_v22 }
 0x482   : > { %v3180_v4 = vpop.f32.mrf.mxu1  ;;  %v5000_v0 = vpop.f32.mrf.mxu0 }
 0x484   : > { %v3183_v16 = vpop.f32.mrf.mxu1  ;;  %v3403_v60 = vpop.f32.mrf.mxu0 }
 0x485   : > { %v3184_v17 = vadd.f32 %v3183_v16, %v8606_v13  ;;  %v8699_v12 = vadd.f32 %v3403_v60, %v3179_v25 }
 0x486   : > { %v3185_v45 = vpop.f32.mrf.mxu1  ;;  %v3533_v54 = vpop.f32.mrf.mxu0 }
 0x487   : > { %v8701_v51 = vadd.f32 %v5000_v0, %v3184_v17 }
 0x488   : > { %v5035_v52 = vpop.f32.mrf.mxu1  ;;  %v3535_v63 = vpop.f32.mrf.mxu0 }
 0x48a   : > { %v3758_v34 = vpop.f32.mrf.mxu1  ;;  %v3538_v41 = vpop.f32.mrf.mxu0 }
 0x48b   : > { %v3759_v21 = vadd.f32 %v3758_v34, %v3533_v54  ;;  %v3764_v19 = vadd.f32 %v5035_v52, %v3538_v41 }
 0x48c   : > { %v5038_v62 = vpop.f32.mrf.mxu1  ;;  %v3540_v36 = vpop.f32.mrf.mxu0 }
 0x48d   : > { %v8704_v23 = vadd.f32 %v3759_v21, %v8614_v39  ;;  %v8707_v44 = vadd.f32 %v3764_v19, %v8610_v46 }
 0x48e   : > { %v3768_v13 = vpop.f32.mrf.mxu1  ;;  %v3543_v6 = vpop.f32.mrf.mxu0 }
 0x48f   : > { %v3769_v14 = vadd.f32 %v3768_v13, %v3543_v6 }
 0x490   : > { %v3545_v1 = vpop.f32.mrf.mxu0  ;;  %v5041_v61 = vpop.f32.mrf.mxu1 }
 0x491   : > { %v8710_v22 = vadd.f32 %v3769_v14, %v8621_v47 }
 0x492   : > { %v3548_v5 = vpop.f32.mrf.mxu0  ;;  %v3778_v26 = vpop.f32.mrf.mxu1 }
 0x493   : > { %v3774_v56 = vadd.f32 %v5038_v62, %v3548_v5  ;;  %v3949_v5 = vadd.f32 %v8707_v44, %v8704_v23 }
 0x494   : > { %v3550_v24 = vpop.f32.mrf.mxu0  ;;  %v5044_v35 = vpop.f32.mrf.mxu1 }
 0x495   : > { %v8713_v3 = vadd.f32 %v3774_v56, %v8617_v50 }
 0x496   : > { %v3553_v39 = vpop.f32.mrf.mxu0  ;;  %v3788_v16 = vpop.f32.mrf.mxu1 }
 0x497   : > { %v3779_v32 = vadd.f32 %v3778_v26, %v3553_v39  ;;  %v3950_v26 = vadd.f32 %v3949_v5, %v8710_v22 }
 0x498   : > { %v3555_v42 = vpop.f32.mrf.mxu0  ;;  %v5047_v45 = vpop.f32.mrf.mxu1 }
 0x499   : > { %v8716_v46 = vadd.f32 %v3779_v32, %v8628_v29  ;;  %v3951_v42 = vadd.f32 %v3950_v26, %v8713_v3 }
 0x49a   : > { %v3558_v25 = vpop.f32.mrf.mxu0  ;;  %v3798_v52 = vpop.f32.mrf.mxu1 }
 0x49b   : > { %v3784_v4 = vadd.f32 %v5041_v61, %v3558_v25 }
 0x49c   : > { %v3560_v0 = vpop.f32.mrf.mxu0  ;;  %v5050_v41 = vpop.f32.mrf.mxu1 }
 0x49d   : > { %v8719_v47 = vadd.f32 %v3784_v4, %v8624_v43 }
 0x49e   : > { %v3563_v60 = vpop.f32.mrf.mxu0  ;;  %v3808_v19 = vpop.f32.mrf.mxu1 }
 0x49f   : > { %v3789_v39 = vadd.f32 %v3788_v16, %v3563_v60 }
 0x4a0   : > { %v3565_v17 = vpop.f32.mrf.mxu0  ;;  %v5053_v13 = vpop.f32.mrf.mxu1 }
 0x4a1   : > { %v3952_v17 = vadd.f32 %v3951_v42, %v8716_v46 }
 0x4a2   : > { %v3568_v50 = vpop.f32.mrf.mxu0  ;;  %v3818_v43 = vpop.f32.mrf.mxu1 }
 0x4a3   : > { %v3794_v25 = vadd.f32 %v5044_v35, %v3568_v50 }
 0x4a4   : > { %v3570_v54 = vpop.f32.mrf.mxu0  ;;  %v5056_v56 = vpop.f32.mrf.mxu1 }
 0x4a5   : > { %v8727_v54 = vadd.f32 %v3789_v39, %v8635_v30 }
 0x4a6   : > { %v3573_v63 = vpop.f32.mrf.mxu0  ;;  %v3828_v4 = vpop.f32.mrf.mxu1 }
 0x4a8   : > { %v3575_v34 = vpop.f32.mrf.mxu0  ;;  %v5059_v16 = vpop.f32.mrf.mxu1 }
 0x4a9   : > { %v3799_v34 = vadd.f32 %v3798_v52, %v3573_v63 }
 0x4aa   : > { %v3578_v21 = vpop.f32.mrf.mxu0  ;;  %v3838_v39 = vpop.f32.mrf.mxu1 }
 0x4ab   : > { %v8735_v35 = vadd.f32 %v3799_v34, %v8642_v53 }
 0x4ac   : > { %v3580_v29 = vpop.f32.mrf.mxu0 }
 0x4ae   : > { %v3583_v62 = vpop.f32.mrf.mxu0 }
 0x4af   : > { %v3809_v50 = vadd.f32 %v3808_v19, %v3583_v62 }
 0x4b0   : > { %v3585_v36 = vpop.f32.mrf.mxu0 }
 0x4b1   : > { %v3953_v36 = vadd.f32 %v3952_v17, %v8719_v47 }
 0x4b2   : > { %v3588_v6 = vpop.f32.mrf.mxu0 }
 0x4b3   : > { %v3954_v5 = vadd.f32 %v3953_v36, %v8727_v54  ;;  %v3814_v63 = vadd.f32 %v5050_v41, %v3588_v6 }
 0x4b4   : > { %v3590_v14 = vpop.f32.mrf.mxu0 }
 0x4b5   : > { %v8731_v14 = vadd.f32 %v3794_v25, %v8631_v33  ;;  %v8747_v19 = vadd.f32 %v3814_v63, %v8645_v40  ;;  %v5062_v25 = vpop.f32.mrf.mxu1 }
 0x4b6   : > { %v3593_v1 = vpop.f32.mrf.mxu0 }
 0x4b7   : > { %v3955_v30 = vadd.f32 %v3954_v5, %v8731_v14 }
 0x4b8   : > { %v3595_v61 = vpop.f32.mrf.mxu0 }
 0x4b9   : > { %v3804_v61 = vadd.f32 %v5047_v45, %v3578_v21  ;;  %v3956_v33 = vadd.f32 %v3955_v30, %v8735_v35  ;;  %v8743_v45 = vadd.f32 %v3809_v50, %v8649_v18  ;;  %v3819_v21 = vadd.f32 %v3818_v43, %v3593_v1 }
 0x4ba   : > { %v3598_v24 = vpop.f32.mrf.mxu0 }
 0x4bb   : > { %v8739_v52 = vadd.f32 %v3804_v61, %v8638_v2  ;;  %v3824_v62 = vadd.f32 %v5053_v13, %v3598_v24  ;;  %v8751_v41 = vadd.f32 %v3819_v21, %v8655_v8 }
 0x4bc   : > { %v3600_v32 = vpop.f32.mrf.mxu0 }
 0x4bd   : > { %v3957_v53 = vadd.f32 %v3956_v33, %v8739_v52  ;;  %v8755_v43 = vadd.f32 %v3824_v62, %v8651_v59 }
 0x4be   : > { %v3603_v0 = vpop.f32.mrf.mxu0 }
 0x4bf   : > { %v3958_v2 = vadd.f32 %v3957_v53, %v8743_v45  ;;  %v3829_v6 = vadd.f32 %v3828_v4, %v3603_v0 }
 0x4c0   : > { %v3605_v29 = vpop.f32.mrf.mxu0 }
 0x4c1   : > { %v3959_v18 = vadd.f32 %v3958_v2, %v8747_v19  ;;  %v3848_v29 = vpop.f32.mrf.mxu1  ;;  %v8759_v13 = vadd.f32 %v3829_v6, %v8661_v31 }
 0x4c2   : > { %v3608_v60 = vpop.f32.mrf.mxu0 }
 0x4c3   : > { %v3834_v1 = vadd.f32 %v5056_v56, %v3608_v60  ;;  %v3960_v40 = vadd.f32 %v3959_v18, %v8751_v41  ;;  %v5065_v5 = vpop.f32.mrf.mxu1 }
 0x4c4   : > { %v3610_v26 = vpop.f32.mrf.mxu0 }
 0x4c5   : > { %v3961_v8 = vadd.f32 %v3960_v40, %v8755_v43  ;;  %v8763_v4 = vadd.f32 %v3834_v1, %v8657_v10 }
 0x4c6   : > { %v3613_v32 = vpop.f32.mrf.mxu0 }
 0x4c7   : > { %v3839_v24 = vadd.f32 %v3838_v39, %v3613_v32  ;;  %v3962_v59 = vadd.f32 %v3961_v8, %v8759_v13  ;;  %v3858_v39 = vpop.f32.mrf.mxu1 }
 0x4c8   : > { %v3615_v42 = vpop.f32.mrf.mxu0 }
 0x4c9   : > { %v8767_v56 = vadd.f32 %v3839_v24, %v8666_v48  ;;  %v3963_v31 = vadd.f32 %v3962_v59, %v8763_v4  ;;  %v5068_v53 = vpop.f32.mrf.mxu1 }
 0x4ca   : > { %v3618_v17 = vpop.f32.mrf.mxu0 }
 0x4cb   : > { %v3844_v0 = vadd.f32 %v5059_v16, %v3618_v17  ;;  %v3964_v10 = vadd.f32 %v3963_v31, %v8767_v56 }
 0x4cc   : > { %v3620_v34 = vpop.f32.mrf.mxu0 }
 0x4cd   : > { %v8771_v30 = vadd.f32 %v3844_v0, %v8663_v55  ;;  %v3868_v34 = vpop.f32.mrf.mxu1 }
 0x4ce   : > { %v3623_v36 = vpop.f32.mrf.mxu0 }
 0x4cf   : > { %v3849_v60 = vadd.f32 %v3848_v29, %v3623_v36  ;;  %v3965_v48 = vadd.f32 %v3964_v10, %v8771_v30 }
 0x4d0   : > { %v3625_v61 = vpop.f32.mrf.mxu0 }
 0x4d1   : > { %v8775_v16 = vadd.f32 %v3849_v60, %v8671_v57 }
 0x4d2   : > { %v3628_v50 = vpop.f32.mrf.mxu0 }
 0x4d3   : > { %v3854_v63 = vadd.f32 %v5062_v25, %v3628_v50  ;;  %v3966_v55 = vadd.f32 %v3965_v48, %v8775_v16 }
 0x4d4   : > { %v3630_v26 = vpop.f32.mrf.mxu0 }
 0x4d5   : > { %v8779_v42 = vadd.f32 %v3854_v63, %v8668_v7 }
 0x4d6   : > { %v3633_v32 = vpop.f32.mrf.mxu0 }
 0x4d7   : > { %v3859_v33 = vadd.f32 %v3858_v39, %v3633_v32  ;;  %v3967_v6 = vadd.f32 %v3966_v55, %v8779_v42 }
 0x4d8   : > { %v3635_v21 = vpop.f32.mrf.mxu0 }
 0x4d9   : > { %v8783_v25 = vadd.f32 %v3859_v33, %v8676_v9  ;;  %v5071_v9 = vpop.f32.mrf.mxu1 }
 0x4da   : > { %v3638_v62 = vpop.f32.mrf.mxu0 }
 0x4db   : > { %v3864_v17 = vadd.f32 %v5065_v5, %v3638_v62  ;;  %v3968_v1 = vadd.f32 %v3967_v6, %v8783_v25  ;;  %v3878_v5 = vpop.f32.mrf.mxu1 }
 0x4dc   : > { %v3640_v2 = vpop.f32.mrf.mxu0 }
 0x4dd   : > { %v8787_v57 = vadd.f32 %v3864_v17, %v8673_v28  ;;  %v5074_v63 = vpop.f32.mrf.mxu1 }
 0x4de   : > { %v3643_v18 = vpop.f32.mrf.mxu0 }
 0x4df   : > { %v3869_v7 = vadd.f32 %v3868_v34, %v3643_v18  ;;  %v3969_v36 = vadd.f32 %v3968_v1, %v8787_v57  ;;  %v3888_v21 = vpop.f32.mrf.mxu1 }
 0x4e0   : > { %v3645_v29 = vpop.f32.mrf.mxu0 }
 0x4e1   : > { %v8792_v40 = vadd.f32 %v3869_v7, %v8681_v20  ;;  %v5077_v17 = vpop.f32.mrf.mxu1 }
 0x4e2   : > { %v3648_v24 = vpop.f32.mrf.mxu0 }
 0x4e3   : > { %v3970_v61 = vadd.f32 %v3969_v36, %v8792_v40  ;;  %v3874_v8 = vadd.f32 %v5068_v53, %v3648_v24  ;;  %v3898_v1 = vpop.f32.mrf.mxu1 }
 0x4e4   : > { %v3650_v0 = vpop.f32.mrf.mxu0 }
 0x4e5   : > { %v3940_v28 = vadd.f32 %v3874_v8, %v8678_v15  ;;  %v5080_v24 = vpop.f32.mrf.mxu1 }
 0x4e6   : > { %v3653_v50 = vpop.f32.mrf.mxu0 }
 0x4e7   : > { %v3971_v59 = vadd.f32 %v3970_v61, %v3940_v28  ;;  %v3879_v60 = vadd.f32 %v3878_v5, %v3653_v50  ;;  %v3908_v50 = vpop.f32.mrf.mxu1 }
 0x4e8   : > { %v3655_v26 = vpop.f32.mrf.mxu0 }
 0x4e9   : > { %v3941_v31 = vadd.f32 %v3879_v60, %v8686_v38 }
 0x4ea   : > { %v3658_v39 = vpop.f32.mrf.mxu0 }
 0x4eb   : > { %v3972_v32 = vadd.f32 %v3971_v59, %v3941_v31  ;;  %v3884_v20 = vadd.f32 %v5071_v9, %v3658_v39 }
 0x4ec   : > { %v3660_v10 = vpop.f32.mrf.mxu0 }
 0x4ed   : > { %v3942_v33 = vadd.f32 %v3884_v20, %v8683_v11 }
 0x4ee   : > { %v3663_v48 = vpop.f32.mrf.mxu0 }
 0x4ef   : > { %v3973_v53 = vadd.f32 %v3972_v32, %v3942_v33  ;;  %v3889_v62 = vadd.f32 %v3888_v21, %v3663_v48 }
 0x4f0   : > { %v3665_v55 = vpop.f32.mrf.mxu0 }
 0x4f1   : > { %v3943_v15 = vadd.f32 %v3889_v62, %v8691_v37 }
 0x4f2   : > { %v3668_v2 = vpop.f32.mrf.mxu0 }
 0x4f3   : > { %v3974_v6 = vadd.f32 %v3973_v53, %v3943_v15  ;;  %v3894_v34 = vadd.f32 %v5074_v63, %v3668_v2 }
 0x4f4   : > { %v3670_v18 = vpop.f32.mrf.mxu0 }
 0x4f5   : > { %v3944_v38 = vadd.f32 %v3894_v34, %v8688_v27 }
 0x4f6   : > { %v3673_v7 = vpop.f32.mrf.mxu0 }
 0x4f7   : > { %v3975_v29 = vadd.f32 %v3974_v6, %v3944_v38  ;;  %v3899_v36 = vadd.f32 %v3898_v1, %v3673_v7 }
 0x4f8   : > { %v3675_v9 = vpop.f32.mrf.mxu0 }
 0x4f9   : > { %v3945_v11 = vadd.f32 %v3899_v36, %v8696_v58 }
 0x4fa   : > { %v3678_v61 = vpop.f32.mrf.mxu0 }
 0x4fb   : > { %v3976_v8 = vadd.f32 %v3975_v29, %v3945_v11  ;;  %v3904_v0 = vadd.f32 %v5077_v17, %v3678_v61 }
 0x4fc   : > { %v3680_v5 = vpop.f32.mrf.mxu0 }
 0x4fd   : > { %v3946_v37 = vadd.f32 %v3904_v0, %v8693_v49 }
 0x4fe   : > { %v3683_v59 = vpop.f32.mrf.mxu0 }
 0x4ff   : > { %v3977_v60 = vadd.f32 %v3976_v8, %v3946_v37  ;;  %v3909_v26 = vadd.f32 %v3908_v50, %v3683_v59 }
 0x500   : > { %v3685_v63 = vpop.f32.mrf.mxu0 }
 0x501   : > { %v3947_v27 = vadd.f32 %v3909_v26, %v8699_v12 }
 0x502   : > { %v3688_v39 = vpop.f32.mrf.mxu0 }
 0x503   : > { %v3978_v32 = vadd.f32 %v3977_v60, %v3947_v27  ;;  %v3914_v20 = vadd.f32 %v5080_v24, %v3688_v39 }
 0x504   : > { %v3690_v10 = vpop.f32.mrf.mxu0 }
 0x505   : > { %v3948_v58 = vadd.f32 %v3914_v20, %v8701_v51 }
 0x507   : > { %v3979_v21 = vadd.f32 %v3978_v32, %v3948_v58 }
 0x509   : > { %v3980_v48 = vrot.slane %v3979_v21, 4 }
 0x50b   : > { %v3981_v53 = vadd.f32 %v3980_v48, %v3979_v21 }
 0x50d   : > { %v3982_v62 = vrot.slane %v3981_v53, 2 }
 0x50f   : > { %v3983_v55 = vadd.f32 %v3982_v62, %v3981_v53 }
 0x511   : > { %v3984_v17 = vrot.slane %v3983_v55, 1 }
 0x513   : > { %v3985_v49 = vadd.f32 %v3984_v17, %v3983_v55 }
 0x515   : > { %v8804_v2 = vmul.f32 0.00390625, %v3985_v49 }
 0x517   : > { %v8808_v6 = vsub.f32 %v8787_v57, %v8804_v2  ;;  %v8812_v12 = vsub.f32 %v8792_v40, %v8804_v2  ;;  %v8815_v34 = vsub.f32 %v3940_v28, %v8804_v2  ;;  %v8818_v51 = vsub.f32 %v3941_v31, %v8804_v2 }
 0x518   : > { %v8821_v18 = vsub.f32 %v3942_v33, %v8804_v2  ;;  %v8824_v1 = vsub.f32 %v3943_v15, %v8804_v2  ;;  %v8827_v7 = vsub.f32 %v3944_v38, %v8804_v2  ;;  %v8830_v57 = vsub.f32 %v3945_v11, %v8804_v2 }
 0x519   : > { %v8833_v40 = vsub.f32 %v3946_v37, %v8804_v2  ;;  %v8836_v28 = vsub.f32 %v3947_v27, %v8804_v2  ;;  %v8839_v31 = vsub.f32 %v3948_v58, %v8804_v2  ;;  %v8843_v33 = vsub.f32 %v8704_v23, %v8804_v2 }
 0x51a   : > { %v8847_v15 = vsub.f32 %v8707_v44, %v8804_v2  ;;  %v8851_v38 = vsub.f32 %v8710_v22, %v8804_v2  ;;  %v8859_v9 = vsub.f32 %v8713_v3, %v8804_v2  ;;  %v8863_v23 = vsub.f32 %v8716_v46, %v8804_v2 }
 0x51b   : > { %v4019_v29 = vmul.f32 %v8843_v33, %v8843_v33  ;;  %v8869_v22 = vsub.f32 %v8719_v47, %v8804_v2  ;;  %v8875_v3 = vsub.f32 %v8727_v54, %v8804_v2  ;;  %v8881_v0 = vsub.f32 %v8731_v14, %v8804_v2 }
 0x51c   : > { %v4020_v36 = vmul.f32 %v8847_v15, %v8847_v15  ;;  %v4021_v44 = vmul.f32 %v8851_v38, %v8851_v38  ;;  %v4022_v24 = vmul.f32 %v8859_v9, %v8859_v9  ;;  %v4023_v46 = vmul.f32 %v8863_v23, %v8863_v23 }
 0x51d   : > { %v4024_v47 = vmul.f32 %v8869_v22, %v8869_v22  ;;  %v8887_v37 = vsub.f32 %v8735_v35, %v8804_v2  ;;  %v4025_v54 = vmul.f32 %v8875_v3, %v8875_v3  ;;  %v8893_v59 = vsub.f32 %v8739_v52, %v8804_v2 }
 0x51e   : > { %v4051_v11 = vadd.f32 %v4020_v36, %v4019_v29  ;;  %v4026_v14 = vmul.f32 %v8881_v0, %v8881_v0  ;;  %v8899_v26 = vsub.f32 %v8743_v45, %v8804_v2  ;;  %v8905_v27 = vsub.f32 %v8747_v19, %v8804_v2 }
 0x51f   : > { %v4027_v35 = vmul.f32 %v8887_v37, %v8887_v37  ;;  %v4028_v52 = vmul.f32 %v8893_v59, %v8893_v59  ;;  %v8911_v32 = vsub.f32 %v8751_v41, %v8804_v2  ;;  %v8917_v10 = vsub.f32 %v8755_v43, %v8804_v2 }
 0x520   : > { %v4052_v61 = vadd.f32 %v4051_v11, %v4021_v44  ;;  %v4029_v45 = vmul.f32 %v8899_v26, %v8899_v26  ;;  %v4030_v19 = vmul.f32 %v8905_v27, %v8905_v27  ;;  %v8923_v21 = vsub.f32 %v8759_v13, %v8804_v2 }
 0x521   : > { %v4031_v41 = vmul.f32 %v8911_v32, %v8911_v32  ;;  %v8929_v53 = vsub.f32 %v8763_v4, %v8804_v2  ;;  %v4032_v43 = vmul.f32 %v8917_v10, %v8917_v10  ;;  %v8935_v55 = vsub.f32 %v8767_v56, %v8804_v2 }
 0x522   : > { %v4053_v8 = vadd.f32 %v4052_v61, %v4022_v24  ;;  %v4033_v13 = vmul.f32 %v8923_v21, %v8923_v21  ;;  %v8941_v49 = vsub.f32 %v8771_v30, %v8804_v2  ;;  %v8947_v36 = vsub.f32 %v8775_v16, %v8804_v2 }
 0x523   : > { %v4034_v4 = vmul.f32 %v8929_v53, %v8929_v53  ;;  %v4035_v56 = vmul.f32 %v8935_v55, %v8935_v55  ;;  %v8953_v11 = vsub.f32 %v8779_v42, %v8804_v2  ;;  %v8959_v61 = vsub.f32 %v8783_v25, %v8804_v2 }
 0x524   : > { %v4054_v5 = vadd.f32 %v4053_v8, %v4023_v46  ;;  %v4036_v30 = vmul.f32 %v8941_v49, %v8941_v49  ;;  %v4037_v16 = vmul.f32 %v8947_v36, %v8947_v36  ;;  %v4041_v25 = vmul.f32 %v8812_v12, %v8812_v12 }
 0x525   : > { %v4038_v8 = vmul.f32 %v8953_v11, %v8953_v11  ;;  %v4039_v42 = vmul.f32 %v8959_v61, %v8959_v61 }
 0x526   : > { %v4055_v50 = vadd.f32 %v4054_v5, %v4024_v47 }
 0x528   : > { %v4056_v60 = vadd.f32 %v4055_v50, %v4025_v54  ;;  %v4040_v54 = vmul.f32 %v8808_v6, %v8808_v6 }
 0x52a   : > { %v4057_v63 = vadd.f32 %v4056_v60, %v4026_v14  ;;  %v4042_v14 = vmul.f32 %v8815_v34, %v8815_v34 }
 0x52c   : > { %v4058_v39 = vadd.f32 %v4057_v63, %v4027_v35  ;;  %v4043_v35 = vmul.f32 %v8818_v51, %v8818_v51 }
 0x52e   : > { %v4059_v20 = vadd.f32 %v4058_v39, %v4028_v52  ;;  %v4044_v52 = vmul.f32 %v8821_v18, %v8821_v18 }
 0x530   : > { %v4060_v58 = vadd.f32 %v4059_v20, %v4029_v45  ;;  %v4045_v45 = vmul.f32 %v8824_v1, %v8824_v1 }
 0x532   : > { %v4061_v48 = vadd.f32 %v4060_v58, %v4030_v19  ;;  %v4046_v19 = vmul.f32 %v8827_v7, %v8827_v7 }
 0x534   : > { %v4062_v62 = vadd.f32 %v4061_v48, %v4031_v41  ;;  %v4047_v41 = vmul.f32 %v8830_v57, %v8830_v57 }
 0x536   : > { %v4063_v17 = vadd.f32 %v4062_v62, %v4032_v43  ;;  %v4048_v43 = vmul.f32 %v8833_v40, %v8833_v40 }
 0x538   : > { %v4064_v29 = vadd.f32 %v4063_v17, %v4033_v13  ;;  %v4049_v13 = vmul.f32 %v8836_v28, %v8836_v28 }
 0x53a   : > { %v4065_v44 = vadd.f32 %v4064_v29, %v4034_v4  ;;  %v4050_v4 = vmul.f32 %v8839_v31, %v8839_v31 }
 0x53c   : > { %v4066_v24 = vadd.f32 %v4065_v44, %v4035_v56 }
 0x53e   : > { %v4067_v46 = vadd.f32 %v4066_v24, %v4036_v30 }
 0x540   : > { %v4068_v47 = vadd.f32 %v4067_v46, %v4037_v16 }
 0x542   : > { %v4069_v5 = vadd.f32 %v4068_v47, %v4038_v8 }
 0x544   : > { %v4070_v50 = vadd.f32 %v4069_v5, %v4039_v42 }
 0x546   : > { %v4071_v2 = vadd.f32 %v4070_v50, %v4040_v54 }
 0x548   : > { %v4072_v60 = vadd.f32 %v4071_v2, %v4041_v25 }
 0x54a   : > { %v4073_v63 = vadd.f32 %v4072_v60, %v4042_v14 }
 0x54c   : > { %v4074_v39 = vadd.f32 %v4073_v63, %v4043_v35 }
 0x54e   : > { %v4075_v20 = vadd.f32 %v4074_v39, %v4044_v52  ;;  %v5187_v52 = vld [vmem:[%s5540_s30 + $0xf8] sm:$0xff] }
 0x550   : > { %v4076_v58 = vadd.f32 %v4075_v20, %v4045_v45  ;;  %v5191_v20 = vld [vmem:[%s5540_s30 + $0x18] sm:$0xff] }
 0x552   : > { %v4077_v48 = vadd.f32 %v4076_v58, %v4046_v19  ;;  %v5192_v19 = vld [vmem:[%s5540_s30 + $0x20] sm:$0xff]  ;;  %v5193_v58 = vld [vmem:[%s5540_s30 + $0x28] sm:$0xff] }
 0x554   : > { %v4078_v62 = vadd.f32 %v4077_v48, %v4047_v41  ;;  %v5194_v41 = vld [vmem:[%s5540_s30 + $0x30] sm:$0xff] }
 0x556   : > { %v4079_v17 = vadd.f32 %v4078_v62, %v4048_v43  ;;  %v5195_v43 = vld [vmem:[%s5540_s30 + $0x38] sm:$0xff] }
 0x558   : > { %v4080_v29 = vadd.f32 %v4079_v17, %v4049_v13  ;;  %v5196_v13 = vld [vmem:[%s5540_s30 + $0x40] sm:$0xff] }
 0x55a   : > { %v4081_v56 = vadd.f32 %v4080_v29, %v4050_v4  ;;  %v5197_v4 = vld [vmem:[%s5540_s30 + $0x48] sm:$0xff] }
 0x55c   : > { %v4082_v44 = vrot.slane %v4081_v56, 4 }
 0x55e   : > { %v4083_v30 = vadd.f32 %v4082_v44, %v4081_v56  ;;  %v5198_v56 = vld [vmem:[%s5540_s30 + $0x50] sm:$0xff] }
 0x560   : > { %v4084_v24 = vrot.slane %v4083_v30, 2 }
 0x562   : > { %v4085_v16 = vadd.f32 %v4084_v24, %v4083_v30  ;;  %v5199_v30 = vld [vmem:[%s5540_s30 + $0x58] sm:$0xff] }
 0x564   : > { %v4086_v46 = vrot.slane %v4085_v16, 1 }
 0x566   : > { %v4087_v8 = vadd.f32 %v4086_v46, %v4085_v16  ;;  %v5200_v16 = vld [vmem:[%s5540_s30 + $0x60] sm:$0xff] }
 0x568   : > { %v4088_v47 = vmul.f32 0.00390625, %v4087_v8  ;;  %v5201_v8 = vld [vmem:[%s5540_s30 + $0x68] sm:$0xff] }
 0x56a   : > { %v4089_v42 = vadd.f32 1e-05, %v4088_v47 }
 0x56c   : > { %5155 = vrsqrt.f32 %v4089_v42  ;;  %v5202_v42 = vld [vmem:[%s5540_s30 + $0x70] sm:$0xff] }
 0x579   : > { %v5156_v5 = vpop.eup %5155 }
 0x57a   : > { %v4122_v54 = vmul.f32 %v5156_v5, %v8839_v31  ;;  %v4091_v50 = vmul.f32 %v5156_v5, %v8843_v33  ;;  %v4092_v25 = vmul.f32 %v5156_v5, %v8847_v15  ;;  %v4093_v2 = vmul.f32 %v5156_v5, %v8851_v38 }
 0x57b   : > { %v4094_v14 = vmul.f32 %v5156_v5, %v8859_v9  ;;  %v4095_v60 = vmul.f32 %v5156_v5, %v8863_v23  ;;  %v4096_v35 = vmul.f32 %v5156_v5, %v8869_v22  ;;  %v4097_v63 = vmul.f32 %v5156_v5, %v8875_v3 }
 0x57c   : > { %v4154_v39 = vadd.f32 %v5187_v52, %v4122_v54  ;;  %v4098_v45 = vmul.f32 %v5156_v5, %v8881_v0  ;;  %v4099_v31 = vmul.f32 %v5156_v5, %v8887_v37  ;;  %v4100_v33 = vmul.f32 %v5156_v5, %v8893_v59  ;;  %v5203_v54 = vld [vmem:[%s5540_s30 + $0x78] sm:$0xff] }
 0x57d   : > { %v4101_v15 = vmul.f32 %v5156_v5, %v8899_v26  ;;  %v4102_v38 = vmul.f32 %v5156_v5, %v8905_v27  ;;  %v4103_v9 = vmul.f32 %v5156_v5, %v8911_v32  ;;  %v4104_v23 = vmul.f32 %v5156_v5, %v8917_v10  ;;  %v5207_v52 = vld [vmem:[%s5540_s30 + $0x98] sm:$0xff] }
 0x57e   : > { %4186 = vst [vmem:[%s9007_s18 + $0xf8] sm:$0xff] %v4154_v39  ;;  %v4105_v22 = vmul.f32 %v5156_v5, %v8923_v21  ;;  %v4106_v3 = vmul.f32 %v5156_v5, %v8929_v53  ;;  %v4107_v0 = vmul.f32 %v5156_v5, %v8935_v55  ;;  %v4108_v37 = vmul.f32 %v5156_v5, %v8941_v49 }
 0x57f   : > { %v4109_v59 = vmul.f32 %v5156_v5, %v8947_v36  ;;  %v9016_v26 = vmul.f32 %v5156_v5, %v8953_v11  ;;  %v9019_v27 = vmul.f32 %v5156_v5, %v8959_v61  ;;  %v9022_v32 = vmul.f32 %v5156_v5, %v8808_v6  ;;  %v5189_v11 = vld [vmem:[%s5540_s30 + $0x8] sm:$0xff]  ;;  %v5190_v61 = vld [vmem:[%s5540_s30 + $0x10] sm:$0xff] }
 0x580   : > { %v9025_v10 = vmul.f32 %v5156_v5, %v8812_v12  ;;  %v9028_v21 = vmul.f32 %v5156_v5, %v8815_v34  ;;  %v9031_v53 = vmul.f32 %v5156_v5, %v8818_v51  ;;  %v9034_v55 = vmul.f32 %v5156_v5, %v8821_v18  ;;  %v5188_v18 = vld [vmem:[%s5540_s30] sm:$0xff] }
 0x581   : > { %v9037_v49 = vmul.f32 %v5156_v5, %v8824_v1  ;;  %v9040_v6 = vmul.f32 %v5156_v5, %v8827_v7  ;;  %v9043_v12 = vmul.f32 %v5156_v5, %v8830_v57  ;;  %v9046_v34 = vmul.f32 %v5156_v5, %v8833_v40 }
 0x582   : > { %v9049_v51 = vmul.f32 %v5156_v5, %v8836_v28  ;;  %v4123_v36 = vadd.f32 %v5188_v18, %v4091_v50  ;;  %v4124_v1 = vadd.f32 %v5189_v11, %v4092_v25  ;;  %v4125_v7 = vadd.f32 %v5190_v61, %v4093_v2  ;;  %v5204_v25 = vld [vmem:[%s5540_s30 + $0x80] sm:$0xff]  ;;  %v5218_v18 = vld [vmem:[%s5540_s30 + $0xf0] sm:$0xff] }
 0x583   : > { %v4126_v57 = vadd.f32 %v5191_v20, %v4094_v14  ;;  %v4127_v40 = vadd.f32 %v5192_v19, %v4095_v60  ;;  %v4128_v28 = vadd.f32 %v5193_v58, %v4096_v35  ;;  %v4129_v48 = vadd.f32 %v5194_v41, %v4097_v63  ;;  %v5205_v14 = vld [vmem:[%s5540_s30 + $0x88] sm:$0xff]  ;;  %v5206_v35 = vld [vmem:[%s5540_s30 + $0x90] sm:$0xff] }
 0x584   : > { %v4130_v62 = vadd.f32 %v5195_v43, %v4098_v45  ;;  %v4131_v17 = vadd.f32 %v5196_v13, %v4099_v31  ;;  %v4132_v29 = vadd.f32 %v5197_v4, %v4100_v33  ;;  %v4133_v44 = vadd.f32 %v5198_v56, %v4101_v15  ;;  %4155 = vst [vmem:[%s9007_s18] sm:$0xff] %v4123_v36  ;;  %v5208_v45 = vld [vmem:[%s5540_s30 + $0xa0] sm:$0xff]  ;;  %v5209_v33 = vld [vmem:[%s5540_s30 + $0xa8] sm:$0xff] }
 0x585   : > { %4156 = vst [vmem:[%s9007_s18 + $0x8] sm:$0xff] %v4124_v1  ;;  %4157 = vst [vmem:[%s9007_s18 + $0x10] sm:$0xff] %v4125_v7  ;;  %v4134_v24 = vadd.f32 %v5199_v30, %v4102_v38  ;;  %v4135_v46 = vadd.f32 %v5200_v16, %v4103_v9  ;;  %v4136_v47 = vadd.f32 %v5201_v8, %v4104_v23  ;;  %v5210_v38 = vld [vmem:[%s5540_s30 + $0xb0] sm:$0xff]  ;;  %v5211_v23 = vld [vmem:[%s5540_s30 + $0xb8] sm:$0xff] }
 0x586   : > { %v4137_v5 = vadd.f32 %v5202_v42, %v4105_v22  ;;  %4158 = vst [vmem:[%s9007_s18 + $0x18] sm:$0xff] %v4126_v57  ;;  %4159 = vst [vmem:[%s9007_s18 + $0x20] sm:$0xff] %v4127_v40  ;;  %v4138_v50 = vadd.f32 %v5203_v54, %v4106_v3  ;;  %v4139_v2 = vadd.f32 %v5204_v25, %v4107_v0  ;;  %v5212_v3 = vld [vmem:[%s5540_s30 + $0xc0] sm:$0xff] }
 0x587   : > { %4160 = vst [vmem:[%s9007_s18 + $0x28] sm:$0xff] %v4128_v28  ;;  %4161 = vst [vmem:[%s9007_s18 + $0x30] sm:$0xff] %v4129_v48  ;;  %v4140_v60 = vadd.f32 %v5205_v14, %v4108_v37  ;;  %v4141_v63 = vadd.f32 %v5206_v35, %v4109_v59  ;;  %v4142_v39 = vadd.f32 %v5207_v52, %v9016_v26  ;;  %v5213_v37 = vld [vmem:[%s5540_s30 + $0xc8] sm:$0xff]  ;;  %v5214_v26 = vld [vmem:[%s5540_s30 + $0xd0] sm:$0xff] }
 0x588   : > { %4162 = vst [vmem:[%s9007_s18 + $0x38] sm:$0xff] %v4130_v62  ;;  %4163 = vst [vmem:[%s9007_s18 + $0x40] sm:$0xff] %v4131_v17  ;;  %v4143_v31 = vadd.f32 %v5208_v45, %v9019_v27  ;;  %v4144_v15 = vadd.f32 %v5209_v33, %v9022_v32  ;;  %v4145_v9 = vadd.f32 %v5210_v38, %v9025_v10  ;;  %v5215_v32 = vld [vmem:[%s5540_s30 + $0xd8] sm:$0xff] }
 0x589   : > { %4164 = vst [vmem:[%s9007_s18 + $0x48] sm:$0xff] %v4132_v29  ;;  %4165 = vst [vmem:[%s9007_s18 + $0x50] sm:$0xff] %v4133_v44  ;;  %v4146_v22 = vadd.f32 %v5211_v23, %v9028_v21  ;;  %v4147_v0 = vadd.f32 %v5212_v3, %v9031_v53  ;;  %v4148_v59 = vadd.f32 %v5213_v37, %v9034_v55  ;;  %v5216_v21 = vld [vmem:[%s5540_s30 + $0xe0] sm:$0xff]  ;;  %v5217_v55 = vld [vmem:[%s5540_s30 + $0xe8] sm:$0xff] }
 0x58a   : > { %4166 = vst [vmem:[%s9007_s18 + $0x58] sm:$0xff] %v4134_v24  ;;  %4167 = vst [vmem:[%s9007_s18 + $0x60] sm:$0xff] %v4135_v46  ;;  %v4149_v27 = vadd.f32 %v5214_v26, %v9037_v49  ;;  %v4150_v10 = vadd.f32 %v5215_v32, %v9040_v6  ;;  %v4151_v53 = vadd.f32 %v5216_v21, %v9043_v12 }
 0x58b   : > { %4168 = vst [vmem:[%s9007_s18 + $0x68] sm:$0xff] %v4136_v47  ;;  %4169 = vst [vmem:[%s9007_s18 + $0x70] sm:$0xff] %v4137_v5  ;;  %v4152_v49 = vadd.f32 %v5217_v55, %v9046_v34  ;;  %v4153_v36 = vadd.f32 %v5218_v18, %v9049_v51 }
 0x58c   : > { %4170 = vst [vmem:[%s9007_s18 + $0x78] sm:$0xff] %v4138_v50  ;;  %4171 = vst [vmem:[%s9007_s18 + $0x80] sm:$0xff] %v4139_v2 }
 0x58d   : > { %4172 = vst [vmem:[%s9007_s18 + $0x88] sm:$0xff] %v4140_v60  ;;  %4173 = vst [vmem:[%s9007_s18 + $0x90] sm:$0xff] %v4141_v63 }
 0x58e   : > { %4174 = vst [vmem:[%s9007_s18 + $0x98] sm:$0xff] %v4142_v39  ;;  %4175 = vst [vmem:[%s9007_s18 + $0xa0] sm:$0xff] %v4143_v31 }
 0x58f   : > { %4176 = vst [vmem:[%s9007_s18 + $0xa8] sm:$0xff] %v4144_v15  ;;  %4177 = vst [vmem:[%s9007_s18 + $0xb0] sm:$0xff] %v4145_v9 }
 0x590   : > { %4178 = vst [vmem:[%s9007_s18 + $0xb8] sm:$0xff] %v4146_v22  ;;  %4179 = vst [vmem:[%s9007_s18 + $0xc0] sm:$0xff] %v4147_v0 }
 0x591   : > { %4180 = vst [vmem:[%s9007_s18 + $0xc8] sm:$0xff] %v4148_v59  ;;  %4181 = vst [vmem:[%s9007_s18 + $0xd0] sm:$0xff] %v4149_v27 }
 0x592   : > { %4182 = vst [vmem:[%s9007_s18 + $0xd8] sm:$0xff] %v4150_v10  ;;  %4183 = vst [vmem:[%s9007_s18 + $0xe0] sm:$0xff] %v4151_v53 }
 0x593   : > { %4184 = vst [vmem:[%s9007_s18 + $0xe8] sm:$0xff] %v4152_v49  ;;  %4185 = vst [vmem:[%s9007_s18 + $0xf0] sm:$0xff] %v4153_v36 }
 0x594   : > { %5312 = shalt.err (!%p5309_p3)
}
 0x595   : > { %s5313_s17 = scalar_lea.hbm %s9112_s29, 4096  ;;  %s5317_s26 = scalar_lea.hbm %s9182_s3, 8192 }
 0x596   : > { %p5314_p11 = scmp.ne.s32.totalorder %s9112_s29, %s5313_s17  ;;  %p5318_p4 = scmp.lt.s32.totalorder %s9112_s29, %s9182_s3 }
 0x597   : > { %p5319_p6 = scmp.lt.s32.totalorder %s5317_s26, %s5313_s17 }
 0x598   : > { %p5315_p9 = pnand %p5314_p11, %p9828_p2 }
 0x599   : > { %p5320_p8 = por %p5319_p6, %p5318_p4 }
 0x59a   : > { %p5316_p1 = pneg %p5315_p9 }
 0x59c   : > { %p5321_p5 = pnand %p5320_p8, %p5316_p1 }
 0x59e   : > { %5324 = shalt.err (!%p5321_p5)
}
 0x59f   : > { %s5376_s30 = smov 128   ;;  %s5377_s18 = smov 8  }
 0x5a0   : > { %5091 = dma.vmem_to_hbm [thread:$0]  (%p9828_p2), %s9116_s27, 4096, %s9112_s29, %s4188_s16, %s5376_s30, %s5376_s30, %s5377_s18  }
 0x5a1 PF: > { %s4216_s20 = sand.u32 1, %s5355_s12   ;;  %p9829_p7 = scmp.ne.s32.totalorder %s9421_s19, 0 }
 0x5a2   : > { %p9830_p12 = scmp.ge.s32.totalorder %s5367_s15, 2  ;;  %s4217_s28 = scalar_lea.sflag [#allocation4], %s4216_s20 }
 0x5a4   : > { %p5105_p13 = pnand %p9830_p12, %p9829_p7 }
 0x5a6   : > { %p5106_p0 = pneg %p5105_p13 }
 0x5a8   : > { %5350 = dma.done.wait (%p5106_p0), %s4217_s28, 4096  }
 0x5a9   : > { %5352 = vsyncadd (%p5106_p0), %s4217_s28, 4294963200  ;;  %p17_p10 = scmp.ge.s32.totalorder %s5476_s7, 4   ;;  %s9831_s12 = smov %s5359_s13 }
 0x5aa   : > { %s9832_s13 = smov %s5363_s14  ;;  %s9833_s14 = smov %s5492_s11 }
 0x5ab   : > { %s9834_s15 = smov %s5476_s7  ;;  %19 = sbr.rel (!%p17_p10) target bundleno = 6 (0x6), region = 89 }
 0x5b0   :  { %4222 = vsyncpa [#allocation3], 1 }
 0x5b1   :  { %4224 = vsyncpa [#allocation3 + $0x1], 1 }
 0x5b2   :  { %4225 = vsyncpa [#allocation6], 1 }
 0x5b3   :  { %4226 = vsyncpa [#allocation4], 1 }
 0x5b4   :  { %4228 = vsyncpa [#allocation4 + $0x1], 1 }

// kernel: tpu_custom_call.1
= control target key start
LH: loop header
LB: loop body
LE: loop exit
PB: predicated region body
PF: predicated region fallthrough
CT: control target
= control target key end

     0   :  { %8 = vsyncpa [#allocation3], 0  ;;  %s9179_s0 = inlined_call_operand.hbm [shape: f32[2,16,16,128], index: 0, kind: input, shape index: {}]   ;;  %s9180_s1 = inlined_call_operand.hbm [shape: f32[3,384,128], index: 1, kind: input, shape index: {}]   ;;  %s9181_s2 = inlined_call_operand.hbm [shape: f32[3,384,128], index: 2, kind: input, shape index: {}]   ;;  %s9182_s3 = inlined_call_operand.hbm [shape: f32[2,16,16,128], index: 3, kind: output, shape index: {}]  }
   0x1   :  { %10 = vsyncpa [#allocation3 + $0x1], 0 }
   0x2   :  { %11 = vsyncpa [#allocation6], 0 }
   0x3   :  { %12 = vsyncpa [#allocation4], 0 }
   0x4   :  { %14 = vsyncpa [#allocation4 + $0x1], 0  ;;  %s5398_s12 = smov 0   ;;  %s5400_s13 = smov 0  }
   0x5   :  { %s5402_s14 = smov 0   ;;  %s5404_s15 = smov 0  }
   0x6 LB: > { %s5419_s16 = sadd.s32 4294967295, %s5367_s15   ;;  %s4293_s17 = sadd.s32 4294967294, %s5367_s15   ;;  %s5367_s15 = sphi %s5404_s15, %s9834_s15   ;;  %s5363_s14 = sphi %s5402_s14, %s9833_s14   ;;  %s5359_s13 = sphi %s5400_s13, %s9832_s13   ;;  %s5355_s12 = sphi %s5398_s12, %s9831_s12  }
   0x7   : > { %p40_p0 = scmp.ne.s32.totalorder %s5359_s13, %s5355_s12  ;;  %p9183_p1 = scmp.eq.s32.totalorder %s5419_s16, 0 }
   0x8   : > { %p106_p2 = scmp.eq.s32.totalorder %s5419_s16, 1  ;;  %p112_p3 = scmp.eq.s32.totalorder %s4293_s17, 1 }
   0x9   : > { %p5428_p4 = por %p9183_p1, %p40_p0  ;;  %p4294_p5 = scmp.ge.s32.totalorder %s5367_s15, 1 }
   0xa   : > { %p5433_p6 = por %p112_p3, %p40_p0  ;;  %p119_p7 = scmp.lt.s32.totalorder %s5367_s15, 3 }
   0xb   : > { %s9420_s18 = scalar_select %p5428_p4, 1, 0 }
   0xc   : > { %s9421_s19 = scalar_select %p5433_p6, 1, 0 }
   0xd   : > { %p5438_p8 = pnand %p4294_p5, %p119_p7  ;;  %s5369_s21 = smov [#allocation5]  }
   0xe   : > { %s131_s22 = sshll.u32 %s5369_s21, 4  ;;  %s5370_s24 = smov [#allocation7]   ;;  %s132_s22 = int_to_ptr.vmem [resolvable:$true] %s131_s22 }
   0xf   : > { %s9422_s20 = scalar_select %p5438_p8, 1, 0 }
  0x10   : > { %p5093_p9 = pneg %p5438_p8  ;;  %s144_s25 = sshll.u32 %s5370_s24, 4  ;;  %s145_s25 = int_to_ptr.vmem [resolvable:$true] %s144_s25 }
  0x11   : > { %s5230_s26 = scalar_lea.vmem %s132_s22, 18432  ;;  %p5238_p5 = scmp.lt.s32.totalorder %s132_s22, %s132_s22 }
  0x12   : > { %p5447_p11 = pnand %p5093_p9, %p9183_p1  ;;  %p5231_p13 = scmp.ne.s32.totalorder %s132_s22, %s5230_s26 }
  0x13   : > { %p5239_p7 = scmp.lt.s32.totalorder %s5230_s26, %s5230_s26 }
  0x14   : > { %p5221_p12 = pneg %p5447_p11 }
  0x15   : > { %p5240_p10 = por %p5239_p7, %p5238_p5 }
  0x16   : > { %p5233_p0 = pnand %p5231_p13, %p5221_p12 }
  0x18   : > { %p5234_p3 = pneg %p5233_p0 }
  0x1a   : > { %p5241_p9 = pnand %p5240_p10, %p5234_p3 }
  0x1c   : > { %5244 = shalt.err (!%p5241_p9)
}
  0x1d   : > { %s5371_s27 = smov 128   ;;  %s5372_s28 = smov 8  }
  0x1e   : > { %5096 = dma.hbm_to_vmem [thread:$0]  (!%p5447_p11), %s9180_s1, 18432, %s132_s22, [#allocation6], %s5371_s27, %s5371_s27, %s5372_s28  }
  0x1f   : > { %s5256_s4 = scalar_lea.vmem %s145_s25, 18432  ;;  %p5264_p10 = scmp.lt.s32.totalorder %s145_s25, %s145_s25 }
  0x20   : > { %p5257_p13 = scmp.ne.s32.totalorder %s145_s25, %s5256_s4  ;;  %p5265_p3 = scmp.lt.s32.totalorder %s5256_s4, %s5256_s4 }
  0x22   : > { %p5259_p0 = pnand %p5257_p13, %p5221_p12  ;;  %p5266_p7 = por %p5265_p3, %p5264_p10 }
  0x24   : > { %p5260_p5 = pneg %p5259_p0 }
  0x26   : > { %p5267_p9 = pnand %p5266_p7, %p5260_p5 }
  0x28   : > { %5270 = shalt.err (!%p5267_p9)
}
  0x29   : > { %5099 = dma.hbm_to_vmem [thread:$0]  (!%p5447_p11), %s9181_s2, 18432, %s145_s25, [#allocation6], %s5371_s27, %s5371_s27, %s5372_s28  }
  0x2a   : > { %s5476_s7 = sadd.s32 1, %s5367_s15   ;;  %s27_s8 = sadd.s32 1, %s5363_s14 }
  0x2b   : > { %s24_s9 = ssub.s32 %s5367_s15, %s5476_s7  ;;  %p34_p12 = scmp.ne.s32.totalorder %s5363_s14, %s5359_s13 }
  0x2c   : > { %p25_p13 = scmp.eq.s32.totalorder %s24_s9, 0  ;;  %p35_p0 = scmp.eq.s32.totalorder %s5367_s15, 0 }
  0x2d   : > { %p5486_p5 = por %p106_p2, %p34_p12  ;;  %p5110_p10 = scmp.lt.s32.totalorder %s5367_s15, 2 }
  0x2e   : > { %s5492_s11 = scalar_select %p25_p13, %s5363_s14, %s27_s8  }
  0x2f   : > { %s9424_s10 = scalar_select %p5486_p5, 1, 0 }
  0x30   : > { %p36_p3 = por %p35_p0, %p34_p12  ;;  %s158_s17 = sand.u32 1, %s5363_s14  }
  0x31   : > { %s4298_s21 = sshll.u32 %s158_s17, 8  ;;  %s4311_s22 = sshll.u32 %s5367_s15, 12 }
  0x32   : > { %s5499_s25 = scalar_lea.hbm %s9179_s0, %s4311_s22  ;;  %s162_s26 = scalar_lea.vmem [#allocation2], %s4298_s21 }
  0x33   : > { %s169_s29 = sshll.u32 %s162_s26, 4  ;;  %p5503_p2 = pnand %p5110_p10, %p36_p3  ;;  %s5501_s29 = int_to_ptr.vmem [resolvable:$true] %s169_s29 }
  0x34   : > { %s5507_s4 = scalar_lea.sflag [#allocation3], %s158_s17  ;;  %s5271_s5 = scalar_lea.hbm %s5499_s25, 4096 }
  0x35   : > { %p5272_p11 = scmp.ne.s32.totalorder %s5499_s25, %s5271_s5  ;;  %p5273_p7 = pneg %p5503_p2 }
  0x36   : > { %s5276_s9 = scalar_lea.hbm %s9179_s0, 8192  ;;  %p5277_p13 = scmp.lt.s32.totalorder %s5499_s25, %s9179_s0 }
  0x37   : > { %p5274_p9 = pnand %p5273_p7, %p5272_p11  ;;  %p5278_p0 = scmp.lt.s32.totalorder %s5276_s9, %s5271_s5 }
  0x39   : > { %p5275_p12 = pneg %p5274_p9  ;;  %p5279_p10 = por %p5278_p0, %p5277_p13 }
  0x3b   : > { %p5280_p3 = pnand %p5279_p10, %p5275_p12 }
  0x3d   : > { %5283 = shalt.err (!%p5280_p3)
}
  0x3e   : > { %s5284_s17 = scalar_lea.vmem %s5501_s29, 4096  ;;  %s5373_s23 = smov [#allocation2]  }
  0x3f   : > { %p5285_p1 = scmp.ne.s32.totalorder %s5501_s29, %s5284_s17  ;;  %s5289_s24 = sshll.u32 %s5373_s23, 4  ;;  %s5290_s24 = int_to_ptr.vmem [resolvable:$false] %s5289_s24 }
  0x40   : > { %s5291_s26 = scalar_lea.vmem %s5290_s24, 8192  ;;  %p5292_p9 = scmp.lt.s32.totalorder %s5501_s29, %s5290_s24 }
  0x41   : > { %p5287_p6 = pnand %p5285_p1, %p5273_p7  ;;  %p5293_p5 = scmp.lt.s32.totalorder %s5291_s26, %s5284_s17 }
  0x43   : > { %p5288_p11 = pneg %p5287_p6  ;;  %p5294_p4 = por %p5293_p5, %p5292_p9 }
  0x45   : > { %p5295_p8 = pnand %p5294_p4, %p5288_p11 }
  0x47   : > { %5298 = shalt.err (!%p5295_p8)
}
  0x48   : > { %5103 = dma.hbm_to_vmem [thread:$0]  (!%p5503_p2), %s5499_s25, 4096, %s5501_s29, %s5507_s4, %s5371_s27, %s5371_s27, %s5372_s28  }
  0x49   : > { %p9426_p1 = scmp.ne.s32.totalorder %s9422_s20, 0 }
  0x4b   : > { %181 = sbr.rel (%p9426_p1) target bundleno = 1441 (0x5a1), region = 32 }
  0x50   : > { %s5534_s5 = sand.u32 1, %s5359_s13   ;;  %p9427_p4 = scmp.ne.s32.totalorder %s9420_s18, 0 }
  0x51   : > { %s4302_s6 = sshll.u32 %s5534_s5, 8  ;;  %s184_s8 = scalar_lea.sflag [#allocation3], %s5534_s5 }
  0x52   : > { %s5540_s30 = scalar_lea.vmem [#allocation2], %s4302_s6 }
  0x53   : > { %5342 = dma.done.wait (%p9427_p4), %s184_s8, 4096  }
  0x54   : > { %5344 = vsyncadd (%p9427_p4), %s184_s8, 4294963200  ;;  %p9428_p6 = scmp.eq.s32.totalorder %s5419_s16, 0 }
  0x56   : > { %5346 = dma.done.wait (%p9428_p6), [#allocation6], 36864   ;;  %p9429_p8 = pmov %p9428_p6 }
  0x57   : > { %v9203_v0 = vmov 0.0   ;;  %v535_v1 = vld [vmem:[#allocation5 + $0x1f8] sm:$0xff]  ;;  %v534_v3 = vld [vmem:[#allocation5 + $0x1f0] sm:$0xff]  ;;  %v533_v5 = vld [vmem:[#allocation5 + $0x1e8] sm:$0xff]  ;;  %v250_v19 = vlaneseq  ;;  %s9007_s18 = scalar_lea.vmem [#allocation8], %s4302_s6  ;;  %s4312_s20 = sshll.u32 %s5419_s16, 12 }
  0x58   : > { %5348 = vsyncadd (%p9429_p8), [#allocation6], 4294930432  ;;  %568 = vmatprep.subr.mxu0 %v9203_v0  ;;  %v567_v2 = vld [vmem:[#allocation5 + $0x2f8] sm:$0xff]  ;;  %v566_v4 = vld [vmem:[#allocation5 + $0x2f0] sm:$0xff]  ;;  %s4201_s27 = sshll.u32 %s9007_s18, 4  ;;  %s9112_s29 = scalar_lea.hbm %s9182_s3, %s4312_s20  ;;  %s9116_s27 = int_to_ptr.vmem [resolvable:$true] %s4201_s27 }
  0x59   : > { %569 = vmatpush1.msra.mxu0 %v535_v1  ;;  %4601 = vmatprep.subr.mxu1 %v567_v2  ;;  %v565_v6 = vld [vmem:[#allocation5 + $0x2e8] sm:$0xff]  ;;  %v532_v7 = vld [vmem:[#allocation5 + $0x1e0] sm:$0xff]  ;;  %v531_v9 = vld [vmem:[#allocation5 + $0x1d8] sm:$0xff]  ;;  %v5560_v24 = vshrl.u32 %v250_v19, 7  ;;  %s4188_s16 = scalar_lea.sflag [#allocation4], %s5534_s5  ;;  %s5299_s4 = scalar_lea.vmem %s9116_s27, 4096 }
  0x5a   : > { %570 = vmatprep.subr.mxu0 %v9203_v0  ;;  %4602 = vmatpush3.msra.mxu1 %v567_v2  ;;  %v564_v8 = vld [vmem:[#allocation5 + $0x2e0] sm:$0xff]  ;;  %v563_v10 = vld [vmem:[#allocation5 + $0x2d8] sm:$0xff]  ;;  %v530_v11 = vld [vmem:[#allocation5 + $0x1d0] sm:$0xff]  ;;  %p5300_p5 = scmp.ne.s32.totalorder %s9116_s27, %s5299_s4  ;;  %p9828_p2 = scmp.ne.s32.totalorder %s9424_s10, 0 }
  0x5b   : > { %571 = vmatpush1.msra.mxu0 %v534_v3  ;;  %4603 = vmatprep.subr.mxu1 %v566_v4  ;;  %v562_v12 = vld [vmem:[#allocation5 + $0x2d0] sm:$0xff]  ;;  %v529_v13 = vld [vmem:[#allocation5 + $0x1c8] sm:$0xff]  ;;  %v528_v15 = vld [vmem:[#allocation5 + $0x1c0] sm:$0xff]  ;;  %9430 = vst [vmem:[#allocation12_spill] sm:$0xff] %v5560_v24  ;;  %v5574_v32 = vadd.s32 8, %v5560_v24  ;;  %vm349_vm0 = vcmp.lt.s32.totalorder %v5560_v24, 7 }
  0x5c   : > { %572 = vmatprep.subr.mxu0 %v9203_v0  ;;  %4604 = vmatpush3.msra.mxu1 %v566_v4  ;;  %v561_v14 = vld [vmem:[#allocation5 + $0x2c8] sm:$0xff]  ;;  %v560_v16 = vld [vmem:[#allocation5 + $0x2c0] sm:$0xff]  ;;  %v527_v17 = vld [vmem:[#allocation5 + $0x1b8] sm:$0xff]  ;;  %vm287_vm1 = vcmp.lt.s32.totalorder %v5560_v24, 1  ;;  %vm253_vm3 = vcmp.eq.s32.totalorder %v5560_v24, 0  ;;  %p5301_p7 = pnand %p5300_p5, %p9828_p2  ;;  %s5375_s9 = smov [#allocation8]  }
  0x5d   : > { %573 = vmatpush1.msra.mxu0 %v533_v5  ;;  %4605 = vmatprep.subr.mxu1 %v565_v6  ;;  %v559_v18 = vld [vmem:[#allocation5 + $0x2b8] sm:$0xff]  ;;  %v526_v20 = vld [vmem:[#allocation5 + $0x1b0] sm:$0xff]  ;;  %v525_v22 = vld [vmem:[#allocation5 + $0x1a8] sm:$0xff]  ;;  %9431 = vst [vmem:[#allocation13_spill] sm:$0xff] %v5574_v32  ;;  %vm256_vm2 = vcmp.eq.s32.totalorder %v5574_v32, 15  ;;  %s5303_s21 = sshll.u32 %s5375_s9, 4  ;;  %s5304_s21 = int_to_ptr.vmem [resolvable:$false] %s5303_s21 }
  0x5e   : > { %574 = vmatprep.subr.mxu0 %v9203_v0  ;;  %4606 = vmatpush3.msra.mxu1 %v565_v6  ;;  %v558_v21 = vld [vmem:[#allocation5 + $0x2b0] sm:$0xff]  ;;  %v557_v23 = vld [vmem:[#allocation5 + $0x2a8] sm:$0xff]  ;;  %v524_v25 = vld [vmem:[#allocation5 + $0x1a0] sm:$0xff]  ;;  %p5302_p12 = pneg %p5301_p7  ;;  %s5305_s22 = scalar_lea.vmem %s5304_s21, 8192 }
  0x5f   : > { %575 = vmatpush1.msra.mxu0 %v532_v7  ;;  %4607 = vmatprep.subr.mxu1 %v564_v8  ;;  %v556_v26 = vld [vmem:[#allocation5 + $0x2a0] sm:$0xff]  ;;  %v5567_v28 = vld [vmem:[%s5540_s30 + $0x8] sm:$0xff]  ;;  %v5570_v29 = vld [vmem:[%s5540_s30 + $0x10] sm:$0xff]  ;;  %p5306_p13 = scmp.lt.s32.totalorder %s9116_s27, %s5304_s21  ;;  %p5307_p0 = scmp.lt.s32.totalorder %s5305_s22, %s5299_s4 }
  0x60   : > { %576 = vmatprep.subr.mxu0 %v9203_v0  ;;  %4608 = vmatpush3.msra.mxu1 %v564_v8  ;;  %v5564_v27 = vld [vmem:[%s5540_s30] sm:$0xff]  ;;  %v523_v30 = vld [vmem:[#allocation5 + $0x198] sm:$0xff]  ;;  %v522_v33 = vld [vmem:[#allocation5 + $0x190] sm:$0xff]  ;;  %v322_v35 = vrot.slane %v5567_v28, 1  ;;  %v9193_v37 = vrot.slane %v5567_v28, 7  ;;  %v5583_v38 = vrot.slane %v5570_v29, 1 }
  0x61   : > { %577 = vmatpush1.msra.mxu0 %v531_v9  ;;  %4609 = vmatprep.subr.mxu1 %v563_v10  ;;  %v555_v31 = vld [vmem:[#allocation5 + $0x298] sm:$0xff]  ;;  %v554_v34 = vld [vmem:[#allocation5 + $0x290] sm:$0xff]  ;;  %v5579_v36 = vrot.slane %v5564_v27, 7  ;;  %v521_v39 = vld [vmem:[#allocation5 + $0x188] sm:$0xff]  ;;  %v5589_v41 = vrot.slane %v5564_v27, 1  ;;  %v5613_v49 = vrot.slane %v5570_v29, 7  ;;  %p5308_p10 = por %p5307_p0, %p5306_p13 }
  0x62   : > { %578 = vmatprep.subr.mxu0 %v9203_v0  ;;  %4610 = vmatpush3.msra.mxu1 %v563_v10  ;;  %9432 = vst [vmem:[#allocation14_spill] sm:$0xff] %v5583_v38  ;;  %v553_v40 = vld [vmem:[#allocation5 + $0x288] sm:$0xff]  ;;  %v5592_v42 = vld [vmem:[%s5540_s30 + $0x18] sm:$0xff]  ;;  %v5595_v43 = vld [vmem:[%s5540_s30 + $0x20] sm:$0xff]  ;;  %v377_v47 = vsel %vm349_vm0, %v322_v35, %v5583_v38 }
  0x63   : > { %579 = vmatpush1.msra.mxu0 %v530_v11  ;;  %4611 = vmatprep.subr.mxu1 %v562_v12  ;;  %v520_v44 = vld [vmem:[#allocation5 + $0x180] sm:$0xff]  ;;  %v5604_v46 = vsel %vm287_vm1, %v5579_v36, %v9193_v37  ;;  %v5610_v48 = vrot.slane %v5592_v42, 1  ;;  %v5616_v50 = vrot.slane %v5592_v42, 7  ;;  %v323_v51 = vrot.slane %v5595_v43, 1  ;;  %v551_v53 = vld [vmem:[#allocation5 + $0x278] sm:$0xff]  ;;  %v5631_v55 = vld [vmem:[%s5540_s30 + $0x28] sm:$0xff]  ;;  %p5309_p3 = pnand %p5308_p10, %p5302_p12 }
  0x64   : > { %580 = vmatprep.subr.mxu0 %v9203_v0  ;;  %4612 = vmatpush3.msra.mxu1 %v562_v12  ;;  %v552_v45 = vld [vmem:[#allocation5 + $0x280] sm:$0xff]  ;;  %v5623_v52 = vsel %vm349_vm0, %v5589_v41, %v322_v35  ;;  %v5628_v54 = vsel %vm256_vm2, %v5604_v46, %v377_v47  ;;  %v5634_v56 = vld [vmem:[%s5540_s30 + $0x30] sm:$0xff]  ;;  %v468_v57 = vld [vmem:[#allocation5 + $0x78] sm:$0xff]  ;;  %v324_v62 = vrot.slane %v5631_v55, 1  ;;  %v9192_v63 = vrot.slane %v5595_v43, 7 }
  0x65   : > { %581 = vmatpush1.msra.mxu0 %v529_v13  ;;  %4613 = vmatprep.subr.mxu1 %v561_v14  ;;  %9433 = vst [vmem:[#allocation15_spill] sm:$0xff] %v5628_v54  ;;  %v550_v58 = vld [vmem:[#allocation5 + $0x270] sm:$0xff]  ;;  %v5642_v59 = vsel %vm349_vm0, %v5583_v38, %v5610_v48  ;;  %v5648_v60 = vsel %vm287_vm1, %v5613_v49, %v5616_v50  ;;  %v9190_v1 = vrot.slane %v5631_v55, 7  ;;  %v325_v2 = vrot.slane %v5634_v56, 1  ;;  %v5660_v3 = vld [vmem:[%s5540_s30 + $0x38] sm:$0xff]  ;;  %v549_v5 = vld [vmem:[#allocation5 + $0x268] sm:$0xff] }
  0x66   : > { %582 = vmatprep.subr.mxu0 %v9203_v0  ;;  %4614 = vmatpush3.msra.mxu1 %v561_v14  ;;  %v375_v61 = vsel %vm349_vm0, %v5610_v48, %v323_v51  ;;  %v467_v4 = vld [vmem:[#allocation5 + $0x70] sm:$0xff]  ;;  %v5664_v6 = vld [vmem:[%s5540_s30 + $0x40] sm:$0xff]  ;;  %v466_v8 = vld [vmem:[#allocation5 + $0x68] sm:$0xff]  ;;  %v326_v9 = vrot.slane %v5660_v3, 1  ;;  %v9191_v10 = vrot.slane %v5634_v56, 7  ;;  %v9188_v14 = vrot.slane %v5660_v3, 7 }
  0x67   : > { %583 = vmatpush1.msra.mxu0 %v528_v15  ;;  %4615 = vmatprep.subr.mxu1 %v560_v16  ;;  %v5670_v7 = vsel %vm256_vm2, %v5648_v60, %v375_v61  ;;  %v548_v11 = vld [vmem:[#allocation5 + $0x260] sm:$0xff]  ;;  %v5682_v12 = vsel %vm287_vm1, %v9192_v63, %v9190_v1  ;;  %v373_v13 = vsel %vm349_vm0, %v324_v62, %v325_v2  ;;  %v327_v15 = vrot.slane %v5664_v6, 1  ;;  %v547_v19 = vld [vmem:[#allocation5 + $0x258] sm:$0xff]  ;;  %v545_v47 = vld [vmem:[#allocation5 + $0x248] sm:$0xff] }
  0x68   : > { %584 = vmatprep.subr.mxu0 %v9203_v0  ;;  %4616 = vmatpush3.msra.mxu1 %v560_v16  ;;  %9434 = vst [vmem:[#allocation16_spill] sm:$0xff] %v5670_v7  ;;  %v5689_v16 = vld [vmem:[%s5540_s30 + $0x48] sm:$0xff]  ;;  %v5724_v35 = vld [vmem:[%s5540_s30 + $0x58] sm:$0xff]  ;;  %v5802_v1 = vsel %vm287_vm1, %v5616_v50, %v5579_v36  ;;  %v5810_v63 = vld [vmem:[%s5540_s30 + $0xc0] sm:$0xff] }
  0x69   : > { %585 = vmatpush1.msra.mxu0 %v527_v17  ;;  %4617 = vmatprep.subr.mxu1 %v559_v18  ;;  %v5695_v17 = vsel %vm349_vm0, %v323_v51, %v324_v62  ;;  %v5171_v24 = vld [vmem:[%s5540_s30 + $0x48] sm:$0xff] }
  0x6a   : > { %586 = vmatprep.subr.mxu0 %v9203_v0  ;;  %4618 = vmatpush3.msra.mxu1 %v559_v18  ;;  %9435 = vst [vmem:[#allocation17_spill] sm:$0xff] %v5695_v17  ;;  %v465_v18 = vld [vmem:[#allocation5 + $0x60] sm:$0xff] }
  0x6b   : > { %587 = vmatpush1.msra.mxu0 %v526_v20  ;;  %4619 = vmatprep.subr.mxu1 %v558_v21  ;;  %v5699_v20 = vld [vmem:[%s5540_s30 + $0x50] sm:$0xff] }
  0x6c   : > { %588 = vmatprep.subr.mxu0 %v9203_v0  ;;  %4620 = vmatpush3.msra.mxu1 %v558_v21  ;;  %v5705_v21 = vsel %vm256_vm2, %v5682_v12, %v373_v13  ;;  %v461_v13 = vld [vmem:[#allocation5 + $0x40] sm:$0xff] }
  0x6d   : > { %589 = vmatpush1.msra.mxu0 %v525_v22  ;;  %4621 = vmatprep.subr.mxu1 %v557_v23  ;;  %9436 = vst [vmem:[#allocation18_spill] sm:$0xff] %v5705_v21  ;;  %v328_v22 = vrot.slane %v5689_v16, 1 }
  0x6e   : > { %590 = vmatprep.subr.mxu0 %v9203_v0  ;;  %4622 = vmatpush3.msra.mxu1 %v557_v23  ;;  %v464_v23 = vld [vmem:[#allocation5 + $0x58] sm:$0xff] }
  0x6f   : > { %591 = vmatpush1.msra.mxu0 %v524_v25  ;;  %4623 = vmatprep.subr.mxu1 %v556_v26  ;;  %v5716_v25 = vsel %vm287_vm1, %v9191_v10, %v9188_v14  ;;  %v5750_v61 = vsel %vm349_vm0, %v327_v15, %v328_v22  ;;  %v5793_v14 = vld [vmem:[%s5540_s30 + $0xb0] sm:$0xff] }
  0x70   : > { %592 = vmatprep.subr.mxu0 %v9203_v0  ;;  %4624 = vmatpush3.msra.mxu1 %v556_v26  ;;  %v371_v26 = vsel %vm349_vm0, %v326_v9, %v327_v15  ;;  %v5777_v15 = vld [vmem:[%s5540_s30 + $0x80] sm:$0xff]  ;;  %9445 = vst [vmem:[#allocation27_spill] sm:$0xff] %v5793_v14  ;;  %v9454_v37 = vrot.slane %v5793_v14, 7 }
  0x71   : > { %593 = vmatpush1.msra.mxu0 %v523_v30  ;;  %4625 = vmatprep.subr.mxu1 %v555_v31  ;;  %v9189_v30 = vrot.slane %v5664_v6, 7  ;;  %v5742_v51 = vsel %vm256_vm2, %v5716_v25, %v371_v26  ;;  %v9195_v26 = vrot.slane %v5777_v15, 7 }
  0x72   : > { %594 = vmatprep.subr.mxu0 %v9203_v0  ;;  %4626 = vmatpush3.msra.mxu1 %v555_v31  ;;  %v9187_v31 = vrot.slane %v5689_v16, 7  ;;  %9439 = vst [vmem:[#allocation21_spill] sm:$0xff] %v5742_v51 }
  0x73   : > { %595 = vmatpush1.msra.mxu0 %v522_v33  ;;  %4627 = vmatprep.subr.mxu1 %v554_v34  ;;  %v546_v33 = vld [vmem:[#allocation5 + $0x250] sm:$0xff] }
  0x74   : > { %596 = vmatprep.subr.mxu0 %v9203_v0  ;;  %4628 = vmatpush3.msra.mxu1 %v554_v34  ;;  %v9194_v34 = vrot.slane %v5699_v20, 1  ;;  %v5758_v62 = vsel %vm287_vm1, %v9189_v30, %v9187_v31  ;;  %v5796_v30 = vld [vmem:[%s5540_s30 + $0xc8] sm:$0xff] }
  0x75   : > { %597 = vmatpush1.msra.mxu0 %v521_v39  ;;  %4629 = vmatprep.subr.mxu1 %v553_v40  ;;  %v5730_v39 = vsel %vm349_vm0, %v325_v2, %v326_v9  ;;  %9440 = vst [vmem:[#allocation22_spill] sm:$0xff] %v5758_v62  ;;  %v330_v2 = vrot.slane %v5724_v35, 1  ;;  %9446 = vst [vmem:[#allocation28_spill] sm:$0xff] %v5796_v30 }
  0x76   : > { %598 = vmatprep.subr.mxu0 %v9203_v0  ;;  %4630 = vmatpush3.msra.mxu1 %v553_v40  ;;  %v463_v40 = vld [vmem:[#allocation5 + $0x50] sm:$0xff]  ;;  %v369_v9 = vsel %vm349_vm0, %v328_v22, %v9194_v34  ;;  %v5789_v22 = vld [vmem:[%s5540_s30 + $0xa0] sm:$0xff] }
  0x77   : > { %599 = vmatpush1.msra.mxu0 %v520_v44  ;;  %4631 = vmatprep.subr.mxu1 %v552_v45  ;;  %v5733_v44 = vld [vmem:[%s5540_s30 + $0x60] sm:$0xff]  ;;  %9444 = vst [vmem:[#allocation26_spill] sm:$0xff] %v5789_v22  ;;  %v5816_v34 = vld [vmem:[%s5540_s30 + $0xd0] sm:$0xff] }
  0x78   : > { %600 = vmatprep.subr.mxu0 %v9203_v0  ;;  %4632 = vmatpush3.msra.mxu1 %v552_v45  ;;  %9437 = vst [vmem:[#allocation19_spill] sm:$0xff] %v5733_v44  ;;  %v5736_v45 = vld [vmem:[%s5540_s30 + $0x78] sm:$0xff] }
  0x79   : > { %4633 = vmatprep.mubr.f32.mxu1 %v5623_v52  ;;  %601 = vmatpush2.msra.mxu0 %v551_v53  ;;  %9438 = vst [vmem:[#allocation20_spill] sm:$0xff] %v5736_v45  ;;  %v462_v53 = vld [vmem:[#allocation5 + $0x48] sm:$0xff] }
  0x7a   : > { %4634 = vmatmul.mubr.f32.vlgmr.msra.gmra.mxu1 %v5628_v54  ;;  %1018 = vmatprep.subr.mxu1 %v9203_v0 }
  0x7b   : > { %602 = vmatprep.subr.mxu0 %v9203_v0  ;;  %1019 = vmatpush1.msra.mxu1 %v468_v57  ;;  %v5745_v57 = vld [vmem:[%s5540_s30 + $0x88] sm:$0xff] }
  0x7c   : > { %603 = vmatpush2.msra.mxu0 %v550_v58  ;;  %1020 = vmatprep.subr.mxu1 %v9203_v0  ;;  %v544_v58 = vld [vmem:[#allocation5 + $0x240] sm:$0xff] }
  0x7d   : > { %604 = vmatprep.subr.mxu0 %v9203_v0  ;;  %4636 = vmatprep.mubr.f32.mxu1 %v5642_v59 }
  0x7e   : > { %1021 = vmatpush1.msra.mxu1 %v467_v4  ;;  %605 = vmatpush2.msra.mxu0 %v549_v5  ;;  %v5763_v5 = vld [vmem:[%s5540_s30 + $0x98] sm:$0xff] }
  0x7f   : > { %4637 = vmatmul.mubr.f32.gmra.mxu1 %v5670_v7  ;;  %1022 = vmatprep.subr.mxu1 %v9203_v0  ;;  %9441 = vst [vmem:[#allocation23_spill] sm:$0xff] %v5763_v5  ;;  %v543_v4 = vld [vmem:[#allocation5 + $0x238] sm:$0xff]  ;;  %v9461_v7 = vrot.slane %v5699_v20, 7 }
  0x80   : > { %606 = vmatprep.subr.mxu0 %v9203_v0  ;;  %1023 = vmatpush1.msra.mxu1 %v466_v8  ;;  %v5766_v8 = vld [vmem:[%s5540_s30 + $0xa8] sm:$0xff] }
  0x81   : > { %607 = vmatpush2.msra.mxu0 %v548_v11  ;;  %1024 = vmatprep.subr.mxu1 %v9203_v0  ;;  %9442 = vst [vmem:[#allocation24_spill] sm:$0xff] %v5766_v8  ;;  %v5839_v11 = vsel %vm256_vm2, %v5758_v62, %v369_v9  ;;  %v460_v9 = vld [vmem:[#allocation5 + $0x38] sm:$0xff]  ;;  %v9455_v38 = vrot.slane %v5766_v8, 7 }
  0x82   : > { %608 = vmatprep.subr.mxu0 %v9203_v0  ;;  %4639 = vmatprep.mubr.f32.mxu1 %v5695_v17  ;;  %9449 = vst [vmem:[#allocation31_spill] sm:$0xff] %v5839_v11 }
  0x83   : > { %1025 = vmatpush1.msra.mxu1 %v465_v18  ;;  %609 = vmatpush2.msra.mxu0 %v547_v19  ;;  %v9196_v18 = vrot.slane %v5736_v45, 7  ;;  %v5781_v19 = vld [vmem:[%s5540_s30 + $0x90] sm:$0xff] }
  0x84   : > { %4640 = vmatmul.mubr.f32.gmra.mxu1 %v5705_v21  ;;  %1026 = vmatprep.subr.mxu1 %v9203_v0  ;;  %v9197_v31 = vrot.slane %v5781_v19, 7  ;;  %v9460_v21 = vrot.slane %v5724_v35, 7 }
  0x85   : > { %610 = vmatprep.subr.mxu0 %v9203_v0  ;;  %1027 = vmatpush1.msra.mxu1 %v464_v23  ;;  %v5784_v23 = vld [vmem:[%s5540_s30 + $0xb8] sm:$0xff]  ;;  %v5825_v10 = vsel %vm287_vm1, %v9196_v18, %v9195_v26  ;;  %v5845_v26 = vld [vmem:[%s5540_s30 + $0x70] sm:$0xff] }
  0x86   : > { %611 = vmatpush2.msra.mxu0 %v546_v33  ;;  %1028 = vmatprep.subr.mxu1 %v9203_v0  ;;  %9443 = vst [vmem:[#allocation25_spill] sm:$0xff] %v5784_v23  ;;  %v9198_v33 = vrot.slane %v5745_v57, 7  ;;  %9447 = vst [vmem:[#allocation29_spill] sm:$0xff] %v5825_v10  ;;  %v5887_v54 = vsel %vm287_vm1, %v9461_v7, %v9460_v21  ;;  %v9213_v21 = vrot.slane %v5733_v44, 7  ;;  %v5945_v10 = vld [vmem:[%s5540_s30 + $0xf0] sm:$0xff] }
  0x87   : > { %612 = vmatprep.subr.mxu0 %v9203_v0  ;;  %4642 = vmatprep.mubr.f32.mxu1 %v5730_v39  ;;  %9462 = vst [vmem:[#allocation36_spill] sm:$0xff] %v5887_v54 }
  0x88   : > { %1029 = vmatpush1.msra.mxu1 %v463_v40  ;;  %613 = vmatpush2.msra.mxu0 %v545_v47  ;;  %v9202_v47 = vrot.slane %v5789_v22, 7  ;;  %v5842_v40 = vld [vmem:[%s5540_s30 + $0x68] sm:$0xff] }
  0x89   : > { %4643 = vmatmul.mubr.f32.gmra.mxu1 %v5742_v51  ;;  %1030 = vmatprep.subr.mxu1 %v9203_v0  ;;  %9450 = vst [vmem:[#allocation32_spill] sm:$0xff] %v5842_v40  ;;  %v5871_v51 = vsel %vm287_vm1, %v9455_v38, %v9454_v37  ;;  %v9463_v37 = vrot.slane %v5733_v44, 1  ;;  %v332_v7 = vrot.slane %v5842_v40, 1 }
  0x8a   : > { %614 = vmatprep.subr.mxu0 %v9203_v0  ;;  %1031 = vmatpush1.msra.mxu1 %v462_v53  ;;  %v5833_v53 = vsel %vm287_vm1, %v9198_v33, %v9197_v31  ;;  %v9451_v31 = vrot.slane %v5763_v5, 7  ;;  %v9453_v33 = vrot.slane %v5699_v20, 1  ;;  %9456 = vst [vmem:[#allocation34_spill] sm:$0xff] %v5871_v51  ;;  %v9464_v51 = vrot.slane %v5816_v34, 7 }
  0x8b   : > { %9448 = vst [vmem:[#allocation30_spill] sm:$0xff] %v5833_v53  ;;  %615 = vmatpush2.msra.mxu0 %v544_v58  ;;  %1032 = vmatprep.subr.mxu1 %v9203_v0  ;;  %v367_v38 = vsel %vm349_vm0, %v330_v2, %v9463_v37  ;;  %v459_v37 = vld [vmem:[#allocation5 + $0x30] sm:$0xff]  ;;  %v539_v53 = vld [vmem:[#allocation5 + $0x218] sm:$0xff] }
  0x8c   : > { %v5855_v58 = vsel %vm287_vm1, %v9451_v31, %v9202_v47  ;;  %616 = vmatprep.subr.mxu0 %v9203_v0  ;;  %4645 = vmatprep.mubr.f32.mxu1 %v5750_v61  ;;  %v5863_v18 = vsel %vm349_vm0, %v9453_v33, %v330_v2  ;;  %v9457_v31 = vrot.slane %v5810_v63, 7  ;;  %v9458_v47 = vrot.slane %v5784_v23, 7  ;;  %v542_v33 = vld [vmem:[#allocation5 + $0x230] sm:$0xff] }
  0x8d   : > { %9452 = vst [vmem:[#allocation33_spill] sm:$0xff] %v5855_v58  ;;  %1033 = vmatpush1.msra.mxu1 %v461_v13  ;;  %617 = vmatpush2.msra.mxu0 %v543_v4  ;;  %v9467_v13 = vmov 0.0   ;;  %v333_v2 = vrot.slane %v5845_v26, 1  ;;  %v5941_v58 = vld [vmem:[%s5540_s30 + $0xf8] sm:$0xff] }
  0x8e   : > { %v5879_v0 = vsel %vm287_vm1, %v9458_v47, %v9457_v31  ;;  %v9465_v47 = vrot.slane %v5796_v30, 7  ;;  %4646 = vmatmul.mubr.f32.gmra.mxu1 %v5839_v11  ;;  %1034 = vmatprep.subr.mxu1 %v9467_v13  ;;  %v9212_v31 = vrot.slane %v5842_v40, 7  ;;  %v5927_v11 = vld [vmem:[%s5540_s30 + $0xe8] sm:$0xff]  ;;  %v5960_v40 = vrot.slane %v5941_v58, 7 }
  0x8f   : > { %9459 = vst [vmem:[#allocation35_spill] sm:$0xff] %v5879_v0  ;;  %618 = vmatprep.subr.mxu0 %v9467_v13  ;;  %1035 = vmatpush1.msra.mxu1 %v460_v9  ;;  %v541_v0 = vld [vmem:[#allocation5 + $0x228] sm:$0xff]  ;;  %v540_v9 = vld [vmem:[#allocation5 + $0x220] sm:$0xff]  ;;  %9470 = vst [vmem:[#allocation40_spill] sm:$0xff] %v5927_v11 }
  0x90   : > { %v5899_v4 = vsel %vm287_vm1, %v9465_v47, %v9464_v51  ;;  %619 = vmatpush2.msra.mxu0 %v542_v33  ;;  %1036 = vmatprep.subr.mxu1 %v9467_v13  ;;  %v5912_v51 = vsel %vm256_vm2, %v5887_v54, %v367_v38  ;;  %v458_v47 = vld [vmem:[#allocation5 + $0x28] sm:$0xff]  ;;  %v5922_v33 = vsel %vm287_vm1, %v9213_v21, %v9212_v31  ;;  %v335_v21 = vrot.slane %v5777_v15, 1 }
  0x91   : > { %9466 = vst [vmem:[#allocation37_spill] sm:$0xff] %v5899_v4  ;;  %9468 = vst [vmem:[#allocation38_spill] sm:$0xff] %v5912_v51  ;;  %620 = vmatprep.subr.mxu0 %v9467_v13  ;;  %4648 = vmatprep.mubr.f32.mxu1 %v5863_v18  ;;  %v365_v38 = vsel %vm349_vm0, %v332_v7, %v333_v2  ;;  %v334_v4 = vrot.slane %v5736_v45, 1  ;;  %v9475_v54 = vrot.slane %v5736_v45, 7  ;;  %v537_v45 = vld [vmem:[#allocation5 + $0x208] sm:$0xff] }
  0x92   : > { %1037 = vmatpush1.msra.mxu1 %v459_v37  ;;  %621 = vmatpush2.msra.mxu0 %v541_v0  ;;  %9469 = vst [vmem:[#allocation39_spill] sm:$0xff] %v5922_v33  ;;  %v9471_v0 = vrot.slane %v5733_v44, 1  ;;  %9474 = vst [vmem:[#allocation43_spill] sm:$0xff] %v5960_v40 }
  0x93   : > { %4649 = vmatmul.mubr.f32.gmra.mxu1 %v5912_v51  ;;  %1038 = vmatprep.subr.mxu1 %v9467_v13  ;;  %v457_v51 = vld [vmem:[#allocation5 + $0x20] sm:$0xff]  ;;  %v363_v31 = vsel %vm349_vm0, %v334_v4, %v335_v21 }
  0x94   : > { %v5935_v37 = vsel %vm349_vm0, %v9471_v0, %v332_v7  ;;  %622 = vmatprep.subr.mxu0 %v9467_v13  ;;  %1039 = vmatpush1.msra.mxu1 %v458_v47  ;;  %v5951_v7 = vsel %vm256_vm2, %v5922_v33, %v365_v38  ;;  %v5954_v0 = vrot.slane %v5927_v11, 7  ;;  %v456_v47 = vld [vmem:[#allocation5 + $0x18] sm:$0xff]  ;;  %v9476_v38 = vrot.slane %v5845_v26, 7 }
  0x95   : > { %9472 = vst [vmem:[#allocation41_spill] sm:$0xff] %v5935_v37  ;;  %623 = vmatpush2.msra.mxu0 %v540_v9  ;;  %1040 = vmatprep.subr.mxu1 %v9467_v13  ;;  %9473 = vst [vmem:[#allocation42_spill] sm:$0xff] %v5951_v7  ;;  %v538_v9 = vld [vmem:[#allocation5 + $0x210] sm:$0xff] }
  0x96   : > { %624 = vmatprep.subr.mxu0 %v9467_v13  ;;  %4651 = vmatprep.mubr.f32.mxu1 %v5935_v37  ;;  %v5968_v33 = vsel %vm287_vm1, %v9476_v38, %v9475_v54  ;;  %v9478_v37 = vrot.slane %v5945_v10, 7  ;;  %v336_v54 = vrot.slane %v5745_v57, 1  ;;  %v455_v38 = vld [vmem:[#allocation5 + $0x10] sm:$0xff] }
  0x97   : > { %1041 = vmatpush1.msra.mxu1 %v457_v51  ;;  %625 = vmatpush2.msra.mxu0 %v539_v53  ;;  %9477 = vst [vmem:[#allocation44_spill] sm:$0xff] %v5968_v33  ;;  %v5983_v53 = vsel %vm349_vm0, %v333_v2, %v334_v4  ;;  %v337_v51 = vrot.slane %v5781_v19, 1  ;;  %v505_v4 = vsel %vm287_vm1, %v5960_v40, %v5579_v36  ;;  %v454_v2 = vld [vmem:[#allocation5 + $0x8] sm:$0xff]  ;;  %v338_v36 = vrot.slane %v5763_v5, 1 }
  0x98   : > { %v5977_v44 = vsel %vm287_vm1, %v5954_v0, %v9478_v37  ;;  %4652 = vmatmul.mubr.f32.gmra.mxu1 %v5951_v7  ;;  %1042 = vmatprep.subr.mxu1 %v9467_v13  ;;  %v5992_v37 = vsel %vm256_vm2, %v5968_v33, %v363_v31  ;;  %v9482_v31 = vrot.slane %v5777_v15, 7  ;;  %v339_v33 = vrot.slane %v5789_v22, 1 }
  0x99   : > { %9479 = vst [vmem:[#allocation45_spill] sm:$0xff] %v5977_v44  ;;  %626 = vmatprep.subr.mxu0 %v9467_v13  ;;  %1043 = vmatpush1.msra.mxu1 %v456_v47  ;;  %9480 = vst [vmem:[#allocation46_spill] sm:$0xff] %v5992_v37  ;;  %v536_v47 = vld [vmem:[#allocation5 + $0x200] sm:$0xff]  ;;  %v361_v44 = vsel %vm349_vm0, %v336_v54, %v337_v51 }
  0x9a   : > { %627 = vmatpush2.msra.mxu0 %v538_v9  ;;  %1044 = vmatprep.subr.mxu1 %v9467_v13  ;;  %v9481_v9 = vrot.slane %v5745_v57, 7 }
  0x9b   : > { %628 = vmatprep.subr.mxu0 %v9467_v13  ;;  %4654 = vmatprep.mubr.f32.mxu1 %v5983_v53 }
  0x9c   : > { %1045 = vmatpush1.msra.mxu1 %v455_v38  ;;  %629 = vmatpush2.msra.mxu0 %v537_v45  ;;  %v6007_v7 = vsel %vm287_vm1, %v9482_v31, %v9481_v9  ;;  %v511_v45 = vsel %vm253_vm3, %v5623_v52, %v505_v4  ;;  %v6021_v38 = vsel %vm349_vm0, %v335_v21, %v336_v54  ;;  %v453_v9 = vld [vmem:[#allocation5] sm:$0xff]  ;;  %v484_v4 = vld [vmem:[#allocation5 + $0xf8] sm:$0xff]  ;;  %v9486_v21 = vrot.slane %v5781_v19, 7 }
  0x9d   : > { %9483 = vst [vmem:[#allocation47_spill] sm:$0xff] %v6007_v7  ;;  %4655 = vmatmul.mubr.f32.gmra.mxu1 %v5992_v37  ;;  %1046 = vmatprep.subr.mxu1 %v9467_v13  ;;  %v6027_v31 = vsel %vm256_vm2, %v6007_v7, %v361_v44  ;;  %v340_v37 = vrot.slane %v5766_v8, 1  ;;  %v341_v44 = vrot.slane %v5793_v14, 1  ;;  %v6046_v7 = vsel %vm349_vm0, %v5610_v48, %v5589_v41 }
  0x9e   : > { %630 = vmatprep.subr.mxu0 %v9467_v13  ;;  %1047 = vmatpush1.msra.mxu1 %v454_v2  ;;  %9484 = vst [vmem:[#allocation48_spill] sm:$0xff] %v6027_v31  ;;  %v9485_v2 = vrot.slane %v5763_v5, 7  ;;  %9487 = vst [vmem:[#allocation49_spill] sm:$0xff] %v6046_v7 }
  0x9f   : > { %631 = vmatpush2.msra.mxu0 %v536_v47  ;;  %632 = vmatprep.mubr.f32.mxu0 %v5564_v27  ;;  %v359_v47 = vsel %vm349_vm0, %v338_v36, %v339_v33 }
  0xa0   : > { %1048 = vmatprep.subr.mxu1 %v9467_v13  ;;  %633 = vmatmul.mubr.f32.vlgmr.msra.gmra.mxu0 %v511_v45  ;;  %v6037_v54 = vsel %vm287_vm1, %v9486_v21, %v9485_v2  ;;  %v6053_v45 = vsel %vm349_vm0, %v337_v51, %v338_v36  ;;  %v483_v2 = vld [vmem:[#allocation5 + $0xf0] sm:$0xff]  ;;  %v9488_v21 = vrot.slane %v5567_v28, 7  ;;  %v482_v51 = vld [vmem:[#allocation5 + $0xe8] sm:$0xff]  ;;  %v9490_v36 = vrot.slane %v5766_v8, 7 }
  0xa1   : > { %4657 = vmatprep.mubr.f32.mxu1 %v6021_v38  ;;  %1049 = vmatpush1.msra.mxu1 %v453_v9  ;;  %v6064_v48 = vsel %vm256_vm2, %v6037_v54, %v359_v47  ;;  %v9491_v9 = vrot.slane %v5789_v22, 7  ;;  %v343_v47 = vrot.slane %v5810_v63, 1  ;;  %v9496_v8 = vrot.slane %v5793_v14, 7  ;;  %v6117_v22 = vld [vmem:[%s5540_s30 + $0xe0] sm:$0xff] }
  0xa2   : > { %4658 = vmatmul.mubr.f32.gmra.mxu1 %v6027_v31  ;;  %1050 = vmatprep.subr.mxu1 %v9467_v13  ;;  %v315_v5 = vsel %vm287_vm1, %v9488_v21, %v5613_v49  ;;  %9489 = vst [vmem:[#allocation50_spill] sm:$0xff] %v6064_v48  ;;  %v342_v31 = vrot.slane %v5784_v23, 1  ;;  %9499 = vst [vmem:[#allocation56_spill] sm:$0xff] %v6117_v22 }
  0xa3   : > { %1051 = vmatpush2.msra.mxu1 %v484_v4  ;;  %637 = vmatprep.mubr.f32.mxu0 %v5567_v28  ;;  %v6074_v21 = vsel %vm287_vm1, %v9491_v9, %v9490_v36  ;;  %v357_v4 = vsel %vm349_vm0, %v340_v37, %v341_v44  ;;  %v6084_v7 = vsel %vm253_vm3, %v5642_v59, %v315_v5  ;;  %v481_v9 = vld [vmem:[#allocation5 + $0xe0] sm:$0xff]  ;;  %v480_v5 = vld [vmem:[#allocation5 + $0xd8] sm:$0xff] }
  0xa4   : > { %1052 = vmatprep.subr.mxu1 %v9467_v13  ;;  %638 = vmatmul.mubr.f32.gmra.mxu0 %v5604_v46  ;;  %9492 = vst [vmem:[#allocation51_spill] sm:$0xff] %v6074_v21  ;;  %v6090_v36 = vsel %vm349_vm0, %v339_v33, %v340_v37  ;;  %v355_v37 = vsel %vm349_vm0, %v342_v31, %v343_v47 }
  0xa5   : > { %4660 = vmatprep.mubr.f32.mxu1 %v6053_v45  ;;  %1053 = vmatpush2.msra.mxu1 %v483_v2  ;;  %9493 = vst [vmem:[#allocation52_spill] sm:$0xff] %v6090_v36  ;;  %v6096_v2 = vsel %vm256_vm2, %v6074_v21, %v357_v4  ;;  %v345_v4 = vrot.slane %v5816_v34, 1  ;;  %v6113_v21 = vld [vmem:[%s5540_s30 + $0xd8] sm:$0xff] }
  0xa6   : > { %4661 = vmatmul.mubr.f32.gmra.mxu1 %v6064_v48  ;;  %1054 = vmatprep.subr.mxu1 %v9467_v13  ;;  %9494 = vst [vmem:[#allocation53_spill] sm:$0xff] %v6096_v2  ;;  %v9495_v48 = vrot.slane %v5784_v23, 7  ;;  %9498 = vst [vmem:[#allocation55_spill] sm:$0xff] %v6113_v21  ;;  %v9500_v23 = vrot.slane %v5595_v43, 7 }
  0xa7   : > { %1055 = vmatpush2.msra.mxu1 %v482_v51  ;;  %642 = vmatprep.mubr.f32.mxu0 %v5570_v29  ;;  %v344_v51 = vrot.slane %v5796_v30, 1 }
  0xa8   : > { %1056 = vmatprep.subr.mxu1 %v9467_v13  ;;  %643 = vmatmul.mubr.f32.gmra.mxu0 %v6084_v7  ;;  %v6106_v33 = vsel %vm287_vm1, %v9496_v8, %v9495_v48  ;;  %v6123_v8 = vsel %vm349_vm0, %v341_v44, %v342_v31  ;;  %v479_v48 = vld [vmem:[#allocation5 + $0xd0] sm:$0xff]  ;;  %v313_v14 = vsel %vm287_vm1, %v5616_v50, %v9500_v23  ;;  %v478_v31 = vld [vmem:[#allocation5 + $0xc8] sm:$0xff]  ;;  %v9502_v44 = vrot.slane %v5796_v30, 7 }
  0xa9   : > { %9497 = vst [vmem:[#allocation54_spill] sm:$0xff] %v6106_v33  ;;  %4663 = vmatprep.mubr.f32.mxu1 %v6090_v36  ;;  %1057 = vmatpush2.msra.mxu1 %v481_v9  ;;  %v6134_v9 = vsel %vm256_vm2, %v6106_v33, %v355_v37  ;;  %v9503_v36 = vrot.slane %v5810_v63, 7  ;;  %v353_v23 = vsel %vm349_vm0, %v344_v51, %v345_v4  ;;  %v6151_v37 = vrot.slane %v6117_v22, 1 }
  0xaa   : > { %4664 = vmatmul.mubr.f32.gmra.mxu1 %v6096_v2  ;;  %1058 = vmatprep.subr.mxu1 %v9467_v13  ;;  %9501 = vst [vmem:[#allocation57_spill] sm:$0xff] %v6134_v9  ;;  %v346_v2 = vrot.slane %v6113_v21, 1  ;;  %v6157_v30 = vsel %vm253_vm3, %v5695_v17, %v313_v14  ;;  %v6172_v14 = vrot.slane %v5927_v11, 1  ;;  %v506_v17 = vrot.slane %v5945_v10, 1 }
  0xab   : > { %1059 = vmatpush2.msra.mxu1 %v480_v5  ;;  %647 = vmatprep.mubr.f32.mxu0 %v5592_v42  ;;  %v6145_v50 = vsel %vm287_vm1, %v9503_v36, %v9502_v44  ;;  %9505 = vst [vmem:[#allocation59_spill] sm:$0xff] %v6151_v37  ;;  %v6163_v36 = vsel %vm349_vm0, %v343_v47, %v344_v51  ;;  %v477_v44 = vld [vmem:[#allocation5 + $0xc0] sm:$0xff]  ;;  %v476_v5 = vld [vmem:[#allocation5 + $0xb8] sm:$0xff]  ;;  %v9508_v47 = vrot.slane %v6113_v21, 7  ;;  %v9509_v51 = vrot.slane %v5816_v34, 7 }
  0xac   : > { %1060 = vmatprep.subr.mxu1 %v9467_v13  ;;  %648 = vmatmul.mubr.f32.gmra.mxu0 %v5648_v60  ;;  %9504 = vst [vmem:[#allocation58_spill] sm:$0xff] %v6145_v50  ;;  %9507 = vst [vmem:[#allocation61_spill] sm:$0xff] %v6172_v14  ;;  %v9512_v11 = vrot.slane %v5634_v56, 7  ;;  %v9513_v21 = vrot.slane %v5631_v55, 7 }
  0xad   : > { %4666 = vmatprep.mubr.f32.mxu1 %v6123_v8  ;;  %1061 = vmatpush2.msra.mxu1 %v479_v48  ;;  %v6169_v48 = vsel %vm256_vm2, %v6145_v50, %v353_v23  ;;  %v351_v23 = vsel %vm349_vm0, %v346_v2, %v6151_v37 }
  0xae   : > { %4667 = vmatmul.mubr.f32.gmra.mxu1 %v6134_v9  ;;  %1062 = vmatprep.subr.mxu1 %v9467_v13  ;;  %9506 = vst [vmem:[#allocation60_spill] sm:$0xff] %v6169_v48  ;;  %v6188_v9 = vrot.slane %v6117_v22, 7  ;;  %v311_v22 = vsel %vm287_vm1, %v9513_v21, %v9512_v11  ;;  %v509_v11 = vsel %vm349_vm0, %v6172_v14, %v506_v17  ;;  %v6222_v21 = vrot.slane %v5941_v58, 1 }
  0xaf   : > { %1063 = vmatpush2.msra.mxu1 %v478_v31  ;;  %652 = vmatprep.mubr.f32.mxu0 %v5595_v43  ;;  %v6182_v31 = vsel %vm287_vm1, %v9509_v51, %v9508_v47  ;;  %v6196_v47 = vsel %vm349_vm0, %v345_v4, %v346_v2  ;;  %v475_v51 = vld [vmem:[#allocation5 + $0xb0] sm:$0xff]  ;;  %v474_v2 = vld [vmem:[#allocation5 + $0xa8] sm:$0xff] }
  0xb0   : > { %1064 = vmatprep.subr.mxu1 %v9467_v13  ;;  %653 = vmatmul.mubr.f32.gmra.mxu0 %v6157_v30  ;;  %9510 = vst [vmem:[#allocation62_spill] sm:$0xff] %v6182_v31  ;;  %9511 = vst [vmem:[#allocation63_spill] sm:$0xff] %v6188_v9  ;;  %v6216_v4 = vsel %vm287_vm1, %v6188_v9, %v5954_v0 }
  0xb1   : > { %4669 = vmatprep.mubr.f32.mxu1 %v6163_v36  ;;  %1065 = vmatpush2.msra.mxu1 %v477_v44  ;;  %v6208_v44 = vsel %vm256_vm2, %v6182_v31, %v351_v23  ;;  %9515 = vst [vmem:[#allocation65_spill] sm:$0xff] %v6216_v4  ;;  %9516 = vst [vmem:[#allocation66_spill] sm:$0xff] %v6222_v21  ;;  %v6236_v23 = vsel %vm349_vm0, %v6151_v37, %v6172_v14  ;;  %v471_v14 = vld [vmem:[#allocation5 + $0x90] sm:$0xff] }
  0xb2   : > { %4670 = vmatmul.mubr.f32.gmra.mxu1 %v6169_v48  ;;  %1066 = vmatprep.subr.mxu1 %v9467_v13  ;;  %9514 = vst [vmem:[#allocation64_spill] sm:$0xff] %v6208_v44  ;;  %9517 = vst [vmem:[#allocation67_spill] sm:$0xff] %v6236_v23  ;;  %v473_v48 = vld [vmem:[#allocation5 + $0xa0] sm:$0xff] }
  0xb3   : > { %1067 = vmatpush2.msra.mxu1 %v476_v5  ;;  %657 = vmatprep.mubr.f32.mxu0 %v5631_v55  ;;  %v6228_v5 = vsel %vm253_vm3, %v5730_v39, %v311_v22  ;;  %v472_v22 = vld [vmem:[#allocation5 + $0x98] sm:$0xff] }
  0xb4   : > { %1068 = vmatprep.subr.mxu1 %v9467_v13  ;;  %658 = vmatmul.mubr.f32.gmra.mxu0 %v5682_v12 }
  0xb5   : > { %4672 = vmatprep.mubr.f32.mxu1 %v6196_v47  ;;  %1069 = vmatpush2.msra.mxu1 %v475_v51  ;;  %v6242_v51 = vsel %vm256_vm2, %v6216_v4, %v509_v11  ;;  %v6263_v11 = vsel %vm349_vm0, %v506_v17, %v6222_v21  ;;  %v500_v17 = vld [vmem:[#allocation5 + $0x178] sm:$0xff] }
  0xb6   : > { %4673 = vmatmul.mubr.f32.gmra.mxu1 %v6208_v44  ;;  %1070 = vmatprep.subr.mxu1 %v9467_v13  ;;  %9518 = vst [vmem:[#allocation68_spill] sm:$0xff] %v6242_v51  ;;  %v9519_v44 = vrot.slane %v5945_v10, 7  ;;  %9521 = vst [vmem:[#allocation70_spill] sm:$0xff] %v6263_v11 }
  0xb7   : > { %1071 = vmatpush2.msra.mxu1 %v474_v2  ;;  %662 = vmatprep.mubr.f32.mxu0 %v5634_v56  ;;  %v510_v2 = vsel %vm349_vm0, %v6222_v21, %v5589_v41  ;;  %v1486_v21 = vld [vmem:[#allocation5 + $0x358] sm:$0xff] }
  0xb8   : > { %1072 = vmatprep.subr.mxu1 %v9467_v13  ;;  %663 = vmatmul.mubr.f32.gmra.mxu0 %v6228_v5  ;;  %v6251_v37 = vsel %vm287_vm1, %v9519_v44, %v5960_v40  ;;  %v9522_v44 = vrot.slane %v5664_v6, 7 }
  0xb9   : > { %9520 = vst [vmem:[#allocation69_spill] sm:$0xff] %v6251_v37  ;;  %4675 = vmatprep.mubr.f32.mxu1 %v6236_v23  ;;  %1073 = vmatpush2.msra.mxu1 %v473_v48  ;;  %v518_v41 = vsel %vm256_vm2, %v6251_v37, %v510_v2  ;;  %v9523_v48 = vrot.slane %v5660_v3, 7 }
  0xba   : > { %4676 = vmatmul.mubr.f32.gmra.mxu1 %v6242_v51  ;;  %1074 = vmatprep.subr.mxu1 %v9467_v13  ;;  %v470_v51 = vld [vmem:[#allocation5 + $0x88] sm:$0xff] }
  0xbb   : > { %1075 = vmatpush2.msra.mxu1 %v472_v22  ;;  %667 = vmatprep.mubr.f32.mxu0 %v5660_v3  ;;  %v309_v40 = vsel %vm287_vm1, %v9523_v48, %v9522_v44  ;;  %v318_v22 = vsel %vm287_vm1, %v5954_v0, %v5613_v49  ;;  %v469_v44 = vld [vmem:[#allocation5 + $0x80] sm:$0xff]  ;;  %v1490_v49 = vld [vmem:[#allocation5 + $0x378] sm:$0xff]  ;;  %v9525_v0 = vrot.slane %v5699_v20, 7  ;;  %v1489_v48 = vld [vmem:[#allocation5 + $0x370] sm:$0xff] }
  0xbc   : > { %1076 = vmatprep.subr.mxu1 %v9467_v13  ;;  %668 = vmatmul.mubr.f32.gmra.mxu0 %v5716_v25  ;;  %v6286_v2 = vsel %vm253_vm3, %v5750_v61, %v309_v40  ;;  %v499_v40 = vld [vmem:[#allocation5 + $0x170] sm:$0xff] }
  0xbd   : > { %4678 = vmatprep.mubr.f32.mxu1 %v6263_v11  ;;  %1077 = vmatpush2.msra.mxu1 %v471_v14  ;;  %9524 = vst [vmem:[#allocation71_spill] sm:$0xff] %v6286_v2  ;;  %v6292_v14 = vsel %vm253_vm3, %v5642_v59, %v318_v22  ;;  %v387_v22 = vsel %vm253_vm3, %v5623_v52, %v5802_v1 }
  0xbe   : > { %4679 = vmatmul.mubr.f32.gmra.mxu1 %v518_v41  ;;  %1078 = vmatprep.subr.mxu1 %v9467_v13 }
  0xbf   : > { %4681 = vmatprep.subr.mxu0 %v500_v17  ;;  %1079 = vmatpush2.msra.mxu1 %v470_v51  ;;  %v9526_v51 = vrot.slane %v5689_v16, 7 }
  0xc0   : > { %4682 = vmatpush3.msra.mxu0 %v500_v17  ;;  %672 = vmatprep.mubr.f32.mxu0 %v5664_v6 }
  0xc1   : > { %1080 = vmatprep.subr.mxu1 %v9467_v13  ;;  %673 = vmatmul.mubr.f32.gmra.mxu0 %v6286_v2  ;;  %v307_v41 = vsel %vm287_vm1, %v9526_v51, %v9525_v0  ;;  %v9527_v0 = vld [vmem:[#allocation19_spill] sm:$0xff] }
  0xc2   : > { %1081 = vmatpush2.msra.mxu1 %v469_v44  ;;  %1082 = vmatprep.mubr.f32.mxu1 %v5570_v29  ;;  %v6312_v17 = vsel %vm253_vm3, %v5863_v18, %v307_v41  ;;  %v498_v44 = vld [vmem:[#allocation5 + $0x168] sm:$0xff]  ;;  %v9528_v51 = vrot.slane %v9527_v0, 7  ;;  %v9529_v41 = vrot.slane %v5724_v35, 7 }
  0xc3   : > { %1083 = vmatmul.mubr.f32.vlgmr.msra.gmra.mxu1 %v6292_v14  ;;  %1523 = vmatprep.subr.mxu1 %v9467_v13 }
  0xc4   : > { %1524 = vmatpush1.msra.mxu1 %v1490_v49  ;;  %677 = vmatprep.mubr.f32.mxu0 %v5689_v16  ;;  %v1488_v49 = vld [vmem:[#allocation5 + $0x368] sm:$0xff]  ;;  %v305_v1 = vsel %vm287_vm1, %v9529_v41, %v9528_v51  ;;  %v497_v51 = vld [vmem:[#allocation5 + $0x160] sm:$0xff] }
  0xc5   : > { %678 = vmatmul.mubr.f32.gmra.mxu0 %v5758_v62  ;;  %1087 = vmatprep.mubr.f32.mxu1 %v5592_v42  ;;  %v1484_v41 = vld [vmem:[#allocation5 + $0x348] sm:$0xff] }
  0xc6   : > { %4683 = vmatprep.subr.mxu0 %v499_v40  ;;  %1525 = vmatprep.subr.mxu1 %v9467_v13 }
  0xc7   : > { %1088 = vmatmul.mubr.f32.gmra.mxu1 %v5648_v60  ;;  %4684 = vmatpush3.msra.mxu0 %v499_v40  ;;  %v1487_v40 = vld [vmem:[#allocation5 + $0x360] sm:$0xff] }
  0xc8   : > { %1526 = vmatpush1.msra.mxu1 %v1489_v48  ;;  %682 = vmatprep.mubr.f32.mxu0 %v5699_v20  ;;  %v9530_v48 = vld [vmem:[#allocation36_spill] sm:$0xff] }
  0xc9   : > { %683 = vmatmul.mubr.f32.gmra.mxu0 %v6312_v17  ;;  %1092 = vmatprep.mubr.f32.mxu1 %v5564_v27  ;;  %v9531_v27 = vld [vmem:[#allocation41_spill] sm:$0xff] }
  0xca   : > { %1527 = vmatprep.subr.mxu1 %v9467_v13  ;;  %687 = vmatprep.mubr.f32.mxu0 %v5724_v35 }
  0xcb   : > { %1093 = vmatmul.mubr.f32.gmra.mxu1 %v387_v22  ;;  %4685 = vmatprep.subr.mxu0 %v498_v44  ;;  %v6336_v22 = vsel %vm253_vm3, %v9531_v27, %v305_v1  ;;  %v1483_v1 = vld [vmem:[#allocation5 + $0x340] sm:$0xff] }
  0xcc   : > { %1528 = vmatpush1.msra.mxu1 %v1488_v49  ;;  %1097 = vmatprep.mubr.f32.mxu1 %v5567_v28  ;;  %v9532_v28 = vld [vmem:[#allocation32_spill] sm:$0xff] }
  0xcd   : > { %688 = vmatmul.mubr.f32.gmra.mxu0 %v9530_v48  ;;  %1529 = vmatprep.subr.mxu1 %v9467_v13  ;;  %v9534_v49 = vrot.slane %v9532_v28, 7 }
  0xce   : > { %4686 = vmatpush3.msra.mxu0 %v498_v44  ;;  %1530 = vmatpush1.msra.mxu1 %v1487_v40  ;;  %v1485_v44 = vld [vmem:[#allocation5 + $0x350] sm:$0xff]  ;;  %v496_v40 = vld [vmem:[#allocation5 + $0x158] sm:$0xff] }
  0xcf   : > { %1098 = vmatmul.mubr.f32.gmra.mxu1 %v5604_v46  ;;  %692 = vmatprep.mubr.f32.mxu0 %v9527_v0  ;;  %v9533_v46 = vrot.slane %v5845_v26, 7 }
  0xd0   : > { %1102 = vmatprep.mubr.f32.mxu1 %v5570_v29  ;;  %1531 = vmatprep.subr.mxu1 %v9467_v13 }
  0xd1   : > { %693 = vmatmul.mubr.f32.gmra.mxu0 %v6336_v22  ;;  %1532 = vmatpush1.msra.mxu1 %v1486_v21  ;;  %v303_v29 = vsel %vm287_vm1, %v9534_v49, %v9533_v46  ;;  %v9535_v21 = vld [vmem:[#allocation39_spill] sm:$0xff]  ;;  %v9537_v46 = vld [vmem:[#allocation44_spill] sm:$0xff] }
  0xd2   : > { %697 = vmatprep.mubr.f32.mxu0 %v9532_v28  ;;  %4687 = vmatprep.subr.mxu0 %v497_v51 }
  0xd3   : > { %1103 = vmatmul.mubr.f32.gmra.mxu1 %v6084_v7  ;;  %1533 = vmatprep.subr.mxu1 %v9467_v13  ;;  %v6358_v7 = vsel %vm253_vm3, %v5983_v53, %v303_v29  ;;  %v1481_v29 = vld [vmem:[#allocation5 + $0x330] sm:$0xff] }
  0xd4   : > { %1107 = vmatprep.mubr.f32.mxu1 %v5592_v42  ;;  %4688 = vmatpush3.msra.mxu0 %v497_v51  ;;  %v495_v42 = vld [vmem:[#allocation5 + $0x150] sm:$0xff]  ;;  %v9536_v51 = vld [vmem:[#allocation20_spill] sm:$0xff] }
  0xd5   : > { %698 = vmatmul.mubr.f32.gmra.mxu0 %v9535_v21  ;;  %1534 = vmatpush1.msra.mxu1 %v1485_v44  ;;  %v1482_v44 = vld [vmem:[#allocation5 + $0x338] sm:$0xff] }
  0xd6   : > { %702 = vmatprep.mubr.f32.mxu0 %v5845_v26  ;;  %1535 = vmatprep.subr.mxu1 %v9467_v13 }
  0xd7   : > { %1108 = vmatmul.mubr.f32.gmra.mxu1 %v5648_v60  ;;  %4689 = vmatprep.subr.mxu0 %v496_v40 }
  0xd8   : > { %1112 = vmatprep.mubr.f32.mxu1 %v5595_v43  ;;  %1536 = vmatpush1.msra.mxu1 %v1484_v41  ;;  %v9538_v43 = vld [vmem:[#allocation29_spill] sm:$0xff]  ;;  %v493_v41 = vld [vmem:[#allocation5 + $0x140] sm:$0xff] }
  0xd9   : > { %703 = vmatmul.mubr.f32.gmra.mxu0 %v6358_v7  ;;  %1537 = vmatprep.subr.mxu1 %v9467_v13  ;;  %v6375_v49 = vsel %vm253_vm3, %v6021_v38, %v9538_v43  ;;  %v1478_v43 = vld [vmem:[#allocation5 + $0x318] sm:$0xff] }
  0xda   : > { %707 = vmatprep.mubr.f32.mxu0 %v9536_v51  ;;  %4690 = vmatpush3.msra.mxu0 %v496_v40  ;;  %v1480_v40 = vld [vmem:[#allocation5 + $0x328] sm:$0xff] }
  0xdb   : > { %1113 = vmatmul.mubr.f32.gmra.mxu1 %v6157_v30  ;;  %4691 = vmatprep.subr.mxu0 %v495_v42 }
  0xdc   : > { %1117 = vmatprep.mubr.f32.mxu1 %v5631_v55  ;;  %1538 = vmatpush1.msra.mxu1 %v1483_v1  ;;  %v494_v55 = vld [vmem:[#allocation5 + $0x148] sm:$0xff]  ;;  %v9539_v1 = vld [vmem:[#allocation47_spill] sm:$0xff] }
  0xdd   : > { %708 = vmatmul.mubr.f32.gmra.mxu0 %v9537_v46  ;;  %1539 = vmatprep.subr.mxu1 %v9467_v13 }
  0xde   : > { %712 = vmatprep.mubr.f32.mxu0 %v5777_v15  ;;  %1540 = vmatpush1.msra.mxu1 %v1482_v44 }
  0xdf   : > { %1118 = vmatmul.mubr.f32.gmra.mxu1 %v5682_v12  ;;  %1541 = vmatprep.subr.mxu1 %v9467_v13 }
  0xe0   : > { %1122 = vmatprep.mubr.f32.mxu1 %v5634_v56  ;;  %4692 = vmatpush3.msra.mxu0 %v495_v42  ;;  %v1479_v56 = vld [vmem:[#allocation5 + $0x320] sm:$0xff]  ;;  %v9540_v42 = vld [vmem:[#allocation30_spill] sm:$0xff] }
  0xe1   : > { %713 = vmatmul.mubr.f32.gmra.mxu0 %v6375_v49  ;;  %1542 = vmatpush1.msra.mxu1 %v1481_v29  ;;  %v6392_v44 = vsel %vm253_vm3, %v6053_v45, %v9540_v42  ;;  %v1477_v29 = vld [vmem:[#allocation5 + $0x310] sm:$0xff]  ;;  %v9544_v42 = vld [vmem:[#allocation52_spill] sm:$0xff] }
  0xe2   : > { %717 = vmatprep.mubr.f32.mxu0 %v5745_v57  ;;  %1543 = vmatprep.subr.mxu1 %v9467_v13 }
  0xe3   : > { %1123 = vmatmul.mubr.f32.gmra.mxu1 %v6228_v5  ;;  %4693 = vmatprep.subr.mxu0 %v494_v55 }
  0xe4   : > { %1127 = vmatprep.mubr.f32.mxu1 %v5660_v3  ;;  %1544 = vmatpush1.msra.mxu1 %v1480_v40  ;;  %v9541_v3 = vld [vmem:[#allocation23_spill] sm:$0xff]  ;;  %v9542_v40 = vld [vmem:[#allocation26_spill] sm:$0xff] }
  0xe5   : > { %718 = vmatmul.mubr.f32.gmra.mxu0 %v9539_v1  ;;  %1545 = vmatprep.subr.mxu1 %v9467_v13 }
  0xe6   : > { %722 = vmatprep.mubr.f32.mxu0 %v5781_v19  ;;  %4694 = vmatpush3.msra.mxu0 %v494_v55  ;;  %v492_v55 = vld [vmem:[#allocation5 + $0x138] sm:$0xff] }
  0xe7   : > { %1128 = vmatmul.mubr.f32.gmra.mxu1 %v5716_v25  ;;  %4695 = vmatprep.subr.mxu0 %v493_v41 }
  0xe8   : > { %1132 = vmatprep.mubr.f32.mxu1 %v5664_v6  ;;  %1546 = vmatpush1.msra.mxu1 %v1479_v56  ;;  %v1476_v6 = vld [vmem:[#allocation5 + $0x308] sm:$0xff] }
  0xe9   : > { %723 = vmatmul.mubr.f32.gmra.mxu0 %v6392_v44  ;;  %1547 = vmatprep.subr.mxu1 %v9467_v13  ;;  %v9543_v56 = vld [vmem:[#allocation33_spill] sm:$0xff] }
  0xea   : > { %727 = vmatprep.mubr.f32.mxu0 %v9541_v3  ;;  %1548 = vmatpush1.msra.mxu1 %v1478_v43  ;;  %v6408_v43 = vsel %vm253_vm3, %v9544_v42, %v9543_v56  ;;  %v1506_v56 = vld [vmem:[#allocation5 + $0x3f8] sm:$0xff] }
  0xeb   : > { %1133 = vmatmul.mubr.f32.gmra.mxu1 %v6286_v2  ;;  %1549 = vmatprep.subr.mxu1 %v9467_v13 }
  0xec   : > { %1137 = vmatprep.mubr.f32.mxu1 %v5689_v16  ;;  %4696 = vmatpush3.msra.mxu0 %v493_v41  ;;  %v491_v16 = vld [vmem:[#allocation5 + $0x130] sm:$0xff]  ;;  %v1475_v41 = vld [vmem:[#allocation5 + $0x300] sm:$0xff] }
  0xed   : > { %728 = vmatmul.mubr.f32.gmra.mxu0 %v6037_v54  ;;  %1550 = vmatpush1.msra.mxu1 %v1477_v29  ;;  %v9545_v29 = vld [vmem:[#allocation24_spill] sm:$0xff] }
  0xee   : > { %732 = vmatprep.mubr.f32.mxu0 %v9542_v40  ;;  %1551 = vmatprep.subr.mxu1 %v9467_v13 }
  0xef   : > { %1138 = vmatmul.mubr.f32.gmra.mxu1 %v5758_v62  ;;  %4697 = vmatprep.subr.mxu0 %v492_v55  ;;  %v9546_v62 = vld [vmem:[#allocation51_spill] sm:$0xff] }
  0xf0   : > { %1142 = vmatprep.mubr.f32.mxu1 %v5699_v20  ;;  %1552 = vmatpush1.msra.mxu1 %v1476_v6  ;;  %v9547_v20 = vld [vmem:[#allocation27_spill] sm:$0xff]  ;;  %v9548_v6 = vld [vmem:[#allocation34_spill] sm:$0xff] }
  0xf1   : > { %733 = vmatmul.mubr.f32.gmra.mxu0 %v6408_v43  ;;  %1553 = vmatprep.subr.mxu1 %v9467_v13  ;;  %v6425_v2 = vsel %vm253_vm3, %v6123_v8, %v9548_v6  ;;  %v1502_v6 = vld [vmem:[#allocation5 + $0x3d8] sm:$0xff] }
  0xf2   : > { %737 = vmatprep.mubr.f32.mxu0 %v9545_v29  ;;  %4698 = vmatpush3.msra.mxu0 %v492_v55  ;;  %9549 = vst [vmem:[#allocation19_spill] sm:$0xff] %v6425_v2  ;;  %v1505_v55 = vld [vmem:[#allocation5 + $0x3f0] sm:$0xff]  ;;  %v9550_v29 = vld [vmem:[#allocation25_spill] sm:$0xff] }
  0xf3   : > { %1143 = vmatmul.mubr.f32.gmra.mxu1 %v6312_v17  ;;  %4699 = vmatprep.subr.mxu0 %v491_v16 }
  0xf4   : > { %1147 = vmatprep.mubr.f32.mxu1 %v5724_v35  ;;  %1554 = vmatpush1.msra.mxu1 %v1475_v41  ;;  %v490_v35 = vld [vmem:[#allocation5 + $0x128] sm:$0xff] }
  0xf5   : > { %738 = vmatmul.mubr.f32.gmra.mxu0 %v9546_v62  ;;  %1555 = vmatprep.subr.mxu1 %v9467_v13  ;;  %v1504_v41 = vld [vmem:[#allocation5 + $0x3e8] sm:$0xff] }
  0xf6   : > { %742 = vmatprep.mubr.f32.mxu0 %v9547_v20  ;;  %1556 = vmatpush2.msra.mxu1 %v1506_v56  ;;  %v489_v56 = vld [vmem:[#allocation5 + $0x120] sm:$0xff] }
  0xf7   : > { %1148 = vmatmul.mubr.f32.gmra.mxu1 %v9530_v48  ;;  %1557 = vmatprep.subr.mxu1 %v9467_v13 }
  0xf8   : > { %1152 = vmatprep.mubr.f32.mxu1 %v9527_v0  ;;  %4700 = vmatpush3.msra.mxu0 %v491_v16  ;;  %v1503_v0 = vld [vmem:[#allocation5 + $0x3e0] sm:$0xff]  ;;  %v9551_v16 = vld [vmem:[#allocation35_spill] sm:$0xff] }
  0xf9   : > { %743 = vmatmul.mubr.f32.gmra.mxu0 %v6425_v2  ;;  %1558 = vmatpush2.msra.mxu1 %v1505_v55  ;;  %v6442_v20 = vsel %vm253_vm3, %v6163_v36, %v9551_v16  ;;  %v488_v55 = vld [vmem:[#allocation5 + $0x118] sm:$0xff]  ;;  %v1499_v16 = vld [vmem:[#allocation5 + $0x3c0] sm:$0xff] }
  0xfa   : > { %747 = vmatprep.mubr.f32.mxu0 %v9550_v29  ;;  %1559 = vmatprep.subr.mxu1 %v9467_v13  ;;  %9552 = vst [vmem:[#allocation36_spill] sm:$0xff] %v6442_v20  ;;  %v1500_v29 = vld [vmem:[#allocation5 + $0x3c8] sm:$0xff] }
  0xfb   : > { %1153 = vmatmul.mubr.f32.gmra.mxu1 %v6336_v22  ;;  %4701 = vmatprep.subr.mxu0 %v490_v35 }
  0xfc   : > { %1157 = vmatprep.mubr.f32.mxu1 %v9532_v28  ;;  %1560 = vmatpush2.msra.mxu1 %v1504_v41  ;;  %v9553_v28 = vld [vmem:[#allocation28_spill] sm:$0xff]  ;;  %v487_v41 = vld [vmem:[#allocation5 + $0x110] sm:$0xff] }
  0xfd   : > { %748 = vmatmul.mubr.f32.gmra.mxu0 %v6106_v33  ;;  %1561 = vmatprep.subr.mxu1 %v9467_v13 }
  0xfe   : > { %752 = vmatprep.mubr.f32.mxu0 %v5810_v63  ;;  %4702 = vmatpush3.msra.mxu0 %v490_v35  ;;  %v1501_v63 = vld [vmem:[#allocation5 + $0x3d0] sm:$0xff] }
  0xff   : > { %1158 = vmatmul.mubr.f32.gmra.mxu1 %v9535_v21  ;;  %4703 = vmatprep.subr.mxu0 %v489_v56 }
 0x100   : > { %1162 = vmatprep.mubr.f32.mxu1 %v5845_v26  ;;  %1562 = vmatpush2.msra.mxu1 %v1503_v0  ;;  %v9554_v26 = vld [vmem:[#allocation37_spill] sm:$0xff] }
 0x101   : > { %753 = vmatmul.mubr.f32.gmra.mxu0 %v6442_v20  ;;  %1563 = vmatprep.subr.mxu1 %v9467_v13  ;;  %v6458_v35 = vsel %vm253_vm3, %v6196_v47, %v9554_v26  ;;  %v1497_v26 = vld [vmem:[#allocation5 + $0x3b0] sm:$0xff] }
 0x102   : > { %757 = vmatprep.mubr.f32.mxu0 %v9553_v28  ;;  %1564 = vmatpush2.msra.mxu1 %v1502_v6  ;;  %9555 = vst [vmem:[#allocation41_spill] sm:$0xff] %v6458_v35  ;;  %v9558_v6 = vld [vmem:[#allocation56_spill] sm:$0xff] }
 0x103   : > { %1163 = vmatmul.mubr.f32.gmra.mxu1 %v6358_v7  ;;  %1565 = vmatprep.subr.mxu1 %v9467_v13 }
 0x104   : > { %1167 = vmatprep.mubr.f32.mxu1 %v9536_v51  ;;  %4704 = vmatpush3.msra.mxu0 %v489_v56  ;;  %v9556_v51 = vld [vmem:[#allocation55_spill] sm:$0xff] }
 0x105   : > { %758 = vmatmul.mubr.f32.gmra.mxu0 %v6145_v50  ;;  %1566 = vmatpush2.msra.mxu1 %v1501_v63  ;;  %v9557_v56 = vrot.slane %v9556_v51, 7  ;;  %v1498_v63 = vld [vmem:[#allocation5 + $0x3b8] sm:$0xff] }
 0x106   : > { %762 = vmatprep.mubr.f32.mxu0 %v5816_v34  ;;  %4705 = vmatprep.subr.mxu0 %v488_v55  ;;  %v486_v34 = vld [vmem:[#allocation5 + $0x108] sm:$0xff] }
 0x107   : > { %1168 = vmatmul.mubr.f32.gmra.mxu1 %v9537_v46  ;;  %4706 = vmatpush3.msra.mxu0 %v488_v55  ;;  %v289_v0 = vsel %vm287_vm1, %v9557_v56, %v6188_v9  ;;  %v9560_v55 = vld [vmem:[#allocation40_spill] sm:$0xff]  ;;  %v6505_v56 = vld [vmem:[%s5540_s30 + $0xa8] sm:$0xff]  ;;  %v9574_v9 = vld [vmem:[#allocation38_spill] sm:$0xff] }
 0x108   : > { %1172 = vmatprep.mubr.f32.mxu1 %v5777_v15  ;;  %1567 = vmatprep.subr.mxu1 %v9467_v13  ;;  %v485_v15 = vld [vmem:[#allocation5 + $0x100] sm:$0xff]  ;;  %v6478_v28 = vsel %vm253_vm3, %v6236_v23, %v289_v0 }
 0x109   : > { %763 = vmatmul.mubr.f32.gmra.mxu0 %v6458_v35  ;;  %4707 = vmatprep.subr.mxu0 %v487_v41  ;;  %9559 = vst [vmem:[#allocation32_spill] sm:$0xff] %v6478_v28 }
 0x10a   : > { %767 = vmatprep.mubr.f32.mxu0 %v9556_v51  ;;  %1568 = vmatpush2.msra.mxu1 %v1500_v29 }
 0x10b   : > { %1173 = vmatmul.mubr.f32.gmra.mxu1 %v6375_v49  ;;  %4708 = vmatpush3.msra.mxu0 %v487_v41  ;;  %v9561_v41 = vld [vmem:[#allocation45_spill] sm:$0xff] }
 0x10c   : > { %1177 = vmatprep.mubr.f32.mxu1 %v5745_v57  ;;  %4709 = vmatprep.subr.mxu0 %v486_v34  ;;  %v1522_v57 = vld [vmem:[#allocation5 + $0x478] sm:$0xff]  ;;  %v6494_v29 = vsel %vm253_vm3, %v6263_v11, %v9561_v41  ;;  %v1519_v41 = vld [vmem:[#allocation5 + $0x460] sm:$0xff] }
 0x10d   : > { %768 = vmatmul.mubr.f32.gmra.mxu0 %v6182_v31  ;;  %1569 = vmatprep.subr.mxu1 %v9467_v13  ;;  %9562 = vst [vmem:[#allocation39_spill] sm:$0xff] %v6494_v29  ;;  %v5170_v11 = vld [vmem:[%s5540_s30 + $0x40] sm:$0xff] }
 0x10e   : > { %772 = vmatprep.mubr.f32.mxu0 %v9558_v6  ;;  %4710 = vmatpush3.msra.mxu0 %v486_v34  ;;  %v1493_v34 = vld [vmem:[#allocation5 + $0x390] sm:$0xff] }
 0x10f   : > { %1178 = vmatmul.mubr.f32.gmra.mxu1 %v9539_v1  ;;  %4711 = vmatprep.subr.mxu0 %v485_v15 }
 0x110   : > { %1182 = vmatprep.mubr.f32.mxu1 %v5781_v19  ;;  %1570 = vmatpush2.msra.mxu1 %v1499_v16  ;;  %v1496_v19 = vld [vmem:[#allocation5 + $0x3a8] sm:$0xff]  ;;  %v6518_v16 = vld [vmem:[%s5540_s30 + $0xb0] sm:$0xff] }
 0x111   : > { %773 = vmatmul.mubr.f32.gmra.mxu0 %v6478_v28  ;;  %1571 = vmatprep.subr.mxu1 %v9467_v13 }
 0x112   : > { %777 = vmatprep.mubr.f32.mxu0 %v9560_v55  ;;  %4712 = vmatpush3.msra.mxu0 %v485_v15  ;;  %v1491_v15 = vld [vmem:[#allocation5 + $0x380] sm:$0xff]  ;;  %v6525_v55 = vld [vmem:[%s5540_s30 + $0xb8] sm:$0xff] }
 0x113   : > { %1183 = vmatmul.mubr.f32.gmra.mxu1 %v6392_v44  ;;  %4761 = vmatprep.subr.mxu0 %v1522_v57  ;;  %9564 = vst [vmem:[#allocation20_spill] sm:$0xff] %v6525_v55 }
 0x114   : > { %1187 = vmatprep.mubr.f32.mxu1 %v9541_v3  ;;  %1572 = vmatpush2.msra.mxu1 %v1498_v63  ;;  %v1495_v3 = vld [vmem:[#allocation5 + $0x3a0] sm:$0xff]  ;;  %v1521_v63 = vld [vmem:[#allocation5 + $0x470] sm:$0xff] }
 0x115   : > { %778 = vmatmul.mubr.f32.gmra.mxu0 %v6216_v4  ;;  %1573 = vmatprep.subr.mxu1 %v9467_v13 }
 0x116   : > { %782 = vmatprep.mubr.f32.mxu0 %v5945_v10  ;;  %1574 = vmatpush2.msra.mxu1 %v1497_v26  ;;  %v1494_v10 = vld [vmem:[#allocation5 + $0x398] sm:$0xff]  ;;  %v1520_v26 = vld [vmem:[#allocation5 + $0x468] sm:$0xff] }
 0x117   : > { %1188 = vmatmul.mubr.f32.gmra.mxu1 %v6037_v54  ;;  %1575 = vmatprep.subr.mxu1 %v9467_v13 }
 0x118   : > { %1192 = vmatprep.mubr.f32.mxu1 %v9542_v40  ;;  %1576 = vmatpush2.msra.mxu1 %v1496_v19  ;;  %v1492_v40 = vld [vmem:[#allocation5 + $0x388] sm:$0xff]  ;;  %v9565_v19 = vld [vmem:[#allocation15_spill] sm:$0xff] }
 0x119   : > { %783 = vmatmul.mubr.f32.gmra.mxu0 %v6494_v29  ;;  %1577 = vmatprep.subr.mxu1 %v9467_v13  ;;  %v9576_v29 = vld [vmem:[#allocation42_spill] sm:$0xff] }
 0x11a   : > { %787 = vmatprep.mubr.f32.mxu0 %v5941_v58  ;;  %1578 = vmatpush2.msra.mxu1 %v1495_v3  ;;  %v9563_v58 = vld [vmem:[#allocation49_spill] sm:$0xff]  ;;  %v9567_v3 = vld [vmem:[#allocation16_spill] sm:$0xff] }
 0x11b   : > { %1193 = vmatmul.mubr.f32.gmra.mxu1 %v6408_v43  ;;  %1579 = vmatprep.subr.mxu1 %v9467_v13  ;;  %v422_v0 = vsel %vm256_vm2, %v5648_v60, %v9563_v58  ;;  %v1516_v58 = vld [vmem:[#allocation5 + $0x448] sm:$0xff] }
 0x11c   : > { %1197 = vmatprep.mubr.f32.mxu1 %v6505_v56  ;;  %1580 = vmatpush2.msra.mxu1 %v1494_v10  ;;  %v9568_v10 = vld [vmem:[#allocation17_spill] sm:$0xff] }
 0x11d   : > { %788 = vmatmul.mubr.f32.gmra.mxu0 %v6251_v37  ;;  %1581 = vmatprep.subr.mxu1 %v9467_v13 }
 0x11e   : > { %4713 = vmatprep.mubr.f32.mxu0 %v5642_v59  ;;  %1582 = vmatpush2.msra.mxu1 %v1493_v34  ;;  %v1517_v34 = vld [vmem:[#allocation5 + $0x450] sm:$0xff] }
 0x11f   : > { %1198 = vmatmul.mubr.f32.gmra.mxu1 %v9546_v62  ;;  %1583 = vmatprep.subr.mxu1 %v9467_v13 }
 0x120   : > { %1202 = vmatprep.mubr.f32.mxu1 %v6518_v16  ;;  %1584 = vmatpush2.msra.mxu1 %v1492_v40  ;;  %v6539_v40 = vld [vmem:[%s5540_s30 + $0xc8] sm:$0xff] }
 0x121   : > { %4714 = vmatmul.mubr.f32.vlgmr.msra.gmra.mxu0 %v422_v0  ;;  %1585 = vmatprep.subr.mxu1 %v9467_v13  ;;  %9569 = vst [vmem:[#allocation29_spill] sm:$0xff] %v6539_v40  ;;  %v9570_v0 = vld [vmem:[#allocation18_spill] sm:$0xff] }
 0x122   : > { %4716 = vmatprep.mubr.f32.mxu0 %v5623_v52  ;;  %1586 = vmatpush2.msra.mxu1 %v1491_v15  ;;  %v6532_v52 = vld [vmem:[%s5540_s30 + $0xc0] sm:$0xff] }
 0x123   : > { %1203 = vmatmul.mubr.f32.gmra.mxu1 %v6425_v2  ;;  %4762 = vmatpush3.msra.mxu0 %v1522_v57  ;;  %9566 = vst [vmem:[#allocation44_spill] sm:$0xff] %v6532_v52  ;;  %v1518_v57 = vld [vmem:[#allocation5 + $0x458] sm:$0xff]  ;;  %v1515_v15 = vld [vmem:[#allocation5 + $0x440] sm:$0xff] }
 0x124   : > { %1207 = vmatprep.mubr.f32.mxu1 %v6525_v55  ;;  %4763 = vmatprep.subr.mxu0 %v1521_v63  ;;  %v9586_v55 = vld [vmem:[#allocation64_spill] sm:$0xff]  ;;  %v9587_v2 = vld [vmem:[#allocation71_spill] sm:$0xff] }
 0x125   : > { %4717 = vmatmul.mubr.f32.gmra.mxu0 %v9565_v19  ;;  %v9572_v19 = vld [vmem:[#allocation21_spill] sm:$0xff] }
 0x126   : > { %4719 = vmatprep.mubr.f32.mxu0 %v5642_v59  ;;  %4764 = vmatpush3.msra.mxu0 %v1521_v63  ;;  %v6546_v63 = vld [vmem:[%s5540_s30 + $0xd0] sm:$0xff] }
 0x127   : > { %1208 = vmatmul.mubr.f32.gmra.mxu1 %v6106_v33  ;;  %4765 = vmatprep.subr.mxu0 %v1520_v26  ;;  %9571 = vst [vmem:[#allocation47_spill] sm:$0xff] %v6546_v63 }
 0x128   : > { %1212 = vmatprep.mubr.f32.mxu1 %v6532_v52  ;;  %4766 = vmatpush3.msra.mxu0 %v1520_v26  ;;  %v1514_v26 = vld [vmem:[#allocation5 + $0x438] sm:$0xff]  ;;  %v9582_v52 = vld [vmem:[#allocation60_spill] sm:$0xff] }
 0x129   : > { %4720 = vmatmul.mubr.f32.gmra.mxu0 %v9567_v3  ;;  %4767 = vmatprep.subr.mxu0 %v1519_v41 }
 0x12a   : > { %4722 = vmatprep.mubr.f32.mxu0 %v9568_v10  ;;  %4768 = vmatpush3.msra.mxu0 %v1519_v41  ;;  %v1513_v41 = vld [vmem:[#allocation5 + $0x430] sm:$0xff] }
 0x12b   : > { %1213 = vmatmul.mubr.f32.gmra.mxu1 %v6442_v20  ;;  %4769 = vmatprep.subr.mxu0 %v1518_v57  ;;  %v9581_v20 = vld [vmem:[#allocation57_spill] sm:$0xff] }
 0x12c   : > { %1217 = vmatprep.mubr.f32.mxu1 %v6539_v40  ;;  %4770 = vmatpush3.msra.mxu0 %v1518_v57  ;;  %v1512_v57 = vld [vmem:[#allocation5 + $0x428] sm:$0xff] }
 0x12d   : > { %4723 = vmatmul.mubr.f32.gmra.mxu0 %v9570_v0  ;;  %4771 = vmatprep.subr.mxu0 %v1517_v34 }
 0x12e   : > { %4725 = vmatprep.mubr.f32.mxu0 %v5730_v39  ;;  %4772 = vmatpush3.msra.mxu0 %v1517_v34  ;;  %v9573_v34 = vld [vmem:[#allocation31_spill] sm:$0xff] }
 0x12f   : > { %1218 = vmatmul.mubr.f32.gmra.mxu1 %v6145_v50  ;;  %4773 = vmatprep.subr.mxu0 %v1516_v58  ;;  %v9580_v50 = vld [vmem:[#allocation53_spill] sm:$0xff] }
 0x130   : > { %1222 = vmatprep.mubr.f32.mxu1 %v6546_v63  ;;  %4774 = vmatpush3.msra.mxu0 %v1516_v58  ;;  %v1511_v58 = vld [vmem:[#allocation5 + $0x420] sm:$0xff] }
 0x131   : > { %4726 = vmatmul.mubr.f32.gmra.mxu0 %v9572_v19  ;;  %4775 = vmatprep.subr.mxu0 %v1515_v15  ;;  %v5166_v63 = vld [vmem:[%s5540_s30 + $0x20] sm:$0xff] }
 0x132   : > { %4728 = vmatprep.mubr.f32.mxu0 %v5750_v61  ;;  %4776 = vmatpush3.msra.mxu0 %v1515_v15  ;;  %v1510_v15 = vld [vmem:[#allocation5 + $0x418] sm:$0xff] }
 0x133   : > { %1223 = vmatmul.mubr.f32.gmra.mxu1 %v6458_v35  ;;  %4777 = vmatprep.subr.mxu0 %v1514_v26 }
 0x134   : > { %1227 = vmatprep.mubr.f32.mxu1 %v9556_v51  ;;  %4778 = vmatpush3.msra.mxu0 %v1514_v26  ;;  %v1509_v26 = vld [vmem:[#allocation5 + $0x410] sm:$0xff] }
 0x135   : > { %4729 = vmatmul.mubr.f32.gmra.mxu0 %v9573_v34  ;;  %4779 = vmatprep.subr.mxu0 %v1513_v41 }
 0x136   : > { %4731 = vmatprep.mubr.f32.mxu0 %v5863_v18  ;;  %4780 = vmatpush3.msra.mxu0 %v1513_v41  ;;  %v6563_v41 = vld [vmem:[%s5540_s30 + $0xe8] sm:$0xff] }
 0x137   : > { %1228 = vmatmul.mubr.f32.gmra.mxu1 %v6182_v31  ;;  %4781 = vmatprep.subr.mxu0 %v1512_v57  ;;  %9575 = vst [vmem:[#allocation30_spill] sm:$0xff] %v6563_v41  ;;  %v5164_v31 = vld [vmem:[%s5540_s30 + $0x10] sm:$0xff] }
 0x138   : > { %1232 = vmatprep.mubr.f32.mxu1 %v9558_v6  ;;  %4782 = vmatpush3.msra.mxu0 %v1512_v57  ;;  %v1508_v57 = vld [vmem:[#allocation5 + $0x408] sm:$0xff] }
 0x139   : > { %4732 = vmatmul.mubr.f32.gmra.mxu0 %v9574_v9  ;;  %4783 = vmatprep.subr.mxu0 %v1511_v58 }
 0x13a   : > { %4734 = vmatprep.mubr.f32.mxu0 %v9531_v27  ;;  %v6559_v51 = vpop.f32.mrf.mxu1  ;;  %4784 = vmatpush3.msra.mxu0 %v1511_v58  ;;  %v1507_v58 = vld [vmem:[#allocation5 + $0x400] sm:$0xff] }
 0x13b   : > { %1233 = vmatmul.mubr.f32.gmra.mxu1 %v6478_v28  ;;  %4785 = vmatprep.subr.mxu0 %v1510_v15 }
 0x13c   : > { %1237 = vmatprep.mubr.f32.mxu1 %v6563_v41  ;;  %v6566_v6 = vpop.f32.mrf.mxu1  ;;  %4786 = vmatpush3.msra.mxu0 %v1510_v15  ;;  %v9577_v41 = vld [vmem:[#allocation46_spill] sm:$0xff] }
 0x13d   : > { %4735 = vmatmul.mubr.f32.gmra.mxu0 %v9576_v29  ;;  %4787 = vmatprep.subr.mxu0 %v1509_v26 }
 0x13e   : > { %4737 = vmatprep.mubr.f32.mxu0 %v5983_v53  ;;  %4788 = vmatpush3.msra.mxu0 %v1509_v26  ;;  %v5165_v26 = vld [vmem:[%s5540_s30 + $0x18] sm:$0xff] }
 0x13f   : > { %1238 = vmatmul.mubr.f32.gmra.mxu1 %v6216_v4  ;;  %v6571_v28 = vpop.f32.mrf.mxu1  ;;  %4789 = vmatprep.subr.mxu0 %v1508_v57 }
 0x140   : > { %1587 = vmatprep.mubr.f32.mxu1 %v5164_v31  ;;  %4790 = vmatpush3.msra.mxu0 %v1508_v57  ;;  %v9578_v31 = vld [vmem:[#allocation48_spill] sm:$0xff] }
 0x141   : > { %4738 = vmatmul.mubr.f32.gmra.mxu0 %v9577_v41  ;;  %v6575_v15 = vpop.f32.mrf.mxu1  ;;  %4791 = vmatprep.subr.mxu0 %v1507_v58 }
 0x142   : > { %4740 = vmatprep.mubr.f32.mxu0 %v6021_v38  ;;  %4792 = vmatpush3.msra.mxu0 %v1507_v58  ;;  %v9579_v58 = vld [vmem:[#allocation50_spill] sm:$0xff] }
 0x143   : > { %1588 = vmatmul.mubr.f32.vlgmr.msra.gmra.mxu1 %v6292_v14  ;;  %2512 = vmatprep.subr.mxu0 %v9467_v13  ;;  %v5167_v13 = vld [vmem:[%s5540_s30 + $0x28] sm:$0xff] }
 0x144   : > { %1592 = vmatprep.mubr.f32.mxu1 %v5165_v26  ;;  %v6581_v35 = vpop.f32.mrf.mxu1 }
 0x145   : > { %4741 = vmatmul.mubr.f32.gmra.mxu0 %v9578_v31 }
 0x146   : > { %4743 = vmatprep.mubr.f32.mxu0 %v6053_v45  ;;  %v6585_v57 = vpop.f32.mrf.mxu1 }
 0x147   : > { %1593 = vmatmul.mubr.f32.gmra.mxu1 %v5648_v60 }
 0x148   : > { %1597 = vmatprep.mubr.f32.mxu1 %v5166_v63  ;;  %v5168_v63 = vld [vmem:[%s5540_s30 + $0x30] sm:$0xff] }
 0x149   : > { %4744 = vmatmul.mubr.f32.gmra.mxu0 %v9579_v58  ;;  %v6590_v14 = vpop.f32.mrf.mxu1 }
 0x14a   : > { %4746 = vmatprep.mubr.f32.mxu0 %v9544_v42 }
 0x14b   : > { %1598 = vmatmul.mubr.f32.gmra.mxu1 %v6157_v30  ;;  %v6594_v26 = vpop.f32.mrf.mxu1 }
 0x14c   : > { %1602 = vmatprep.mubr.f32.mxu1 %v5167_v13  ;;  %v5169_v13 = vld [vmem:[%s5540_s30 + $0x38] sm:$0xff] }
 0x14d   : > { %4747 = vmatmul.mubr.f32.gmra.mxu0 %v9580_v50 }
 0x14e   : > { %4749 = vmatprep.mubr.f32.mxu0 %v6123_v8  ;;  %v6599_v60 = vpop.f32.mrf.mxu1 }
 0x14f   : > { %1603 = vmatmul.mubr.f32.gmra.mxu1 %v5682_v12  ;;  %v9583_v12 = vld [vmem:[#allocation14_spill] sm:$0xff] }
 0x150   : > { %1607 = vmatprep.mubr.f32.mxu1 %v5168_v63  ;;  %v6603_v40 = vpop.f32.mrf.mxu1  ;;  %v9584_v63 = vld [vmem:[#allocation61_spill] sm:$0xff] }
 0x151   : > { %4750 = vmatmul.mubr.f32.gmra.mxu0 %v9581_v20  ;;  %v380_v37 = vsel %vm349_vm0, %v9584_v63, %v9583_v12  ;;  %v9588_v12 = vld [vmem:[#allocation22_spill] sm:$0xff] }
 0x152   : > { %4752 = vmatprep.mubr.f32.mxu0 %v6163_v36 }
 0x153   : > { %1608 = vmatmul.mubr.f32.gmra.mxu1 %v6228_v5  ;;  %v6608_v30 = vpop.f32.mrf.mxu1 }
 0x154   : > { %1612 = vmatprep.mubr.f32.mxu1 %v5169_v13 }
 0x155   : > { %4753 = vmatmul.mubr.f32.gmra.mxu0 %v9582_v52  ;;  %v6612_v33 = vpop.f32.mrf.mxu1 }
 0x156   : > { %4755 = vmatprep.mubr.f32.mxu0 %v6196_v47 }
 0x157   : > { %1613 = vmatmul.mubr.f32.gmra.mxu1 %v5716_v25  ;;  %v6630_v25 = vsel %vm256_vm2, %v6216_v4, %v380_v37  ;;  %v5173_v4 = vld [vmem:[%s5540_s30 + $0x58] sm:$0xff] }
 0x158   : > { %1617 = vmatprep.mubr.f32.mxu1 %v5170_v11  ;;  %v6621_v5 = vpop.f32.mrf.mxu1 }
 0x159   : > { %9585 = vst [vmem:[#allocation23_spill] sm:$0xff] %v6621_v5  ;;  %4756 = vmatmul.mubr.f32.gmra.mxu0 %v9586_v55 }
 0x15a   : > { %v6624_v13 = vpop.f32.mrf.mxu1  ;;  %4758 = vmatprep.mubr.f32.mxu0 %v6236_v23  ;;  %v5172_v23 = vld [vmem:[%s5540_s30 + $0x50] sm:$0xff] }
 0x15b   : > { %1618 = vmatmul.mubr.f32.gmra.mxu1 %v9587_v2 }
 0x15c   : > { %1622 = vmatprep.mubr.f32.mxu1 %v5171_v24 }
 0x15d   : > { %4759 = vmatmul.mubr.f32.gmra.mxu0 %v6630_v25  ;;  %v6635_v11 = vpop.f32.mrf.mxu1 }
 0x15e   : > { %4793 = vmatprep.mubr.f32.mxu0 %v5642_v59 }
 0x15f   : > { %1623 = vmatmul.mubr.f32.gmra.mxu1 %v9588_v12  ;;  %v6639_v63 = vpop.f32.mrf.mxu1 }
 0x160   : > { %v634_v5 = vpop.f32.mrf.mxu0  ;;  %1627 = vmatprep.mubr.f32.mxu1 %v5172_v23 }
 0x161   : > { %v6643_v37 = vadd.f32 %v6566_v6, %v634_v5  ;;  %4794 = vmatmul.mubr.f32.vlgmr.msra.gmra.mxu0 %v9567_v3  ;;  %v5174_v5 = vld [vmem:[%s5540_s30 + $0x60] sm:$0xff] }
 0x162   : > { %v6646_v24 = vpop.f32.mrf.mxu1  ;;  %v636_v2 = vpop.f32.mrf.mxu0  ;;  %4796 = vmatprep.mubr.f32.mxu0 %v9568_v10 }
 0x163   : > { %1628 = vmatmul.mubr.f32.gmra.mxu1 %v6312_v17  ;;  %v5175_v2 = vld [vmem:[%s5540_s30 + $0x68] sm:$0xff] }
 0x164   : > { %v6650_v59 = vpop.f32.mrf.mxu1  ;;  %v639_v12 = vpop.f32.mrf.mxu0  ;;  %1632 = vmatprep.mubr.f32.mxu1 %v5173_v4 }
 0x165   : > { %v6654_v23 = vadd.f32 %v6559_v51, %v639_v12  ;;  %4797 = vmatmul.mubr.f32.gmra.mxu0 %v9570_v0 }
 0x166   : > { %v6657_v6 = vpop.f32.mrf.mxu1  ;;  %v641_v3 = vpop.f32.mrf.mxu0  ;;  %4799 = vmatprep.mubr.f32.mxu0 %v5730_v39 }
 0x167   : > { %1633 = vmatmul.mubr.f32.gmra.mxu1 %v9530_v48  ;;  %v5176_v3 = vld [vmem:[%s5540_s30 + $0x70] sm:$0xff] }
 0x168   : > { %v6661_v10 = vpop.f32.mrf.mxu1  ;;  %v644_v17 = vpop.f32.mrf.mxu0  ;;  %1637 = vmatprep.mubr.f32.mxu1 %v5174_v5  ;;  %v5177_v5 = vld [vmem:[%s5540_s30 + $0x78] sm:$0xff] }
 0x169   : > { %v6665_v4 = vadd.f32 %v6575_v15, %v644_v17  ;;  %4800 = vmatmul.mubr.f32.gmra.mxu0 %v9572_v19 }
 0x16a   : > { %v6668_v51 = vpop.f32.mrf.mxu1  ;;  %v646_v0 = vpop.f32.mrf.mxu0  ;;  %4802 = vmatprep.mubr.f32.mxu0 %v5750_v61 }
 0x16b   : > { %1638 = vmatmul.mubr.f32.gmra.mxu1 %v6336_v22 }
 0x16c   : > { %v6672_v39 = vpop.f32.mrf.mxu1  ;;  %v649_v48 = vpop.f32.mrf.mxu0  ;;  %1642 = vmatprep.mubr.f32.mxu1 %v5175_v2 }
 0x16d   : > { %v6676_v12 = vadd.f32 %v6571_v28, %v649_v48  ;;  %4803 = vmatmul.mubr.f32.gmra.mxu0 %v9573_v34  ;;  %v5178_v48 = vld [vmem:[%s5540_s30 + $0x80] sm:$0xff] }
 0x16e   : > { %v6679_v15 = vpop.f32.mrf.mxu1  ;;  %v651_v19 = vpop.f32.mrf.mxu0  ;;  %4805 = vmatprep.mubr.f32.mxu0 %v5863_v18 }
 0x16f   : > { %1643 = vmatmul.mubr.f32.gmra.mxu1 %v9535_v21  ;;  %v5179_v19 = vld [vmem:[%s5540_s30 + $0x88] sm:$0xff] }
 0x170   : > { %v6683_v61 = vpop.f32.mrf.mxu1  ;;  %v654_v22 = vpop.f32.mrf.mxu0  ;;  %1647 = vmatprep.mubr.f32.mxu1 %v5176_v3 }
 0x171   : > { %v6687_v17 = vadd.f32 %v6585_v57, %v654_v22  ;;  %4806 = vmatmul.mubr.f32.gmra.mxu0 %v9574_v9 }
 0x172   : > { %v6690_v28 = vpop.f32.mrf.mxu1  ;;  %v656_v34 = vpop.f32.mrf.mxu0  ;;  %4808 = vmatprep.mubr.f32.mxu0 %v9531_v27 }
 0x173   : > { %1648 = vmatmul.mubr.f32.gmra.mxu1 %v6358_v7 }
 0x174   : > { %v6694_v18 = vpop.f32.mrf.mxu1  ;;  %v659_v21 = vpop.f32.mrf.mxu0  ;;  %1652 = vmatprep.mubr.f32.mxu1 %v5177_v5 }
 0x175   : > { %v6698_v0 = vadd.f32 %v6581_v35, %v659_v21  ;;  %4809 = vmatmul.mubr.f32.gmra.mxu0 %v9576_v29 }
 0x176   : > { %v6701_v57 = vpop.f32.mrf.mxu1  ;;  %v661_v9 = vpop.f32.mrf.mxu0  ;;  %4811 = vmatprep.mubr.f32.mxu0 %v5983_v53 }
 0x177   : > { %1653 = vmatmul.mubr.f32.gmra.mxu1 %v9537_v46 }
 0x178   : > { %v6705_v27 = vpop.f32.mrf.mxu1  ;;  %v664_v7 = vpop.f32.mrf.mxu0  ;;  %1657 = vmatprep.mubr.f32.mxu1 %v5178_v48 }
 0x179   : > { %v6709_v2 = vadd.f32 %v6594_v26, %v664_v7  ;;  %4812 = vmatmul.mubr.f32.gmra.mxu0 %v9577_v41 }
 0x17a   : > { %v6712_v35 = vpop.f32.mrf.mxu1  ;;  %v666_v29 = vpop.f32.mrf.mxu0  ;;  %4814 = vmatprep.mubr.f32.mxu0 %v6021_v38 }
 0x17b   : > { %1658 = vmatmul.mubr.f32.gmra.mxu1 %v6375_v49  ;;  %v5180_v49 = vld [vmem:[%s5540_s30 + $0x90] sm:$0xff] }
 0x17c   : > { %v6716_v53 = vpop.f32.mrf.mxu1  ;;  %v669_v46 = vpop.f32.mrf.mxu0  ;;  %1662 = vmatprep.mubr.f32.mxu1 %v5179_v19  ;;  %v9592_v19 = vld [vmem:[#allocation66_spill] sm:$0xff] }
 0x17d   : > { %v6720_v22 = vadd.f32 %v6590_v14, %v669_v46  ;;  %4815 = vmatmul.mubr.f32.gmra.mxu0 %v9578_v31 }
 0x17e   : > { %v6723_v41 = vpop.f32.mrf.mxu1  ;;  %v671_v26 = vpop.f32.mrf.mxu0  ;;  %4817 = vmatprep.mubr.f32.mxu0 %v6053_v45 }
 0x17f   : > { %1663 = vmatmul.mubr.f32.gmra.mxu1 %v9539_v1  ;;  %v5181_v1 = vld [vmem:[%s5540_s30 + $0x98] sm:$0xff] }
 0x180   : > { %v6727_v38 = vpop.f32.mrf.mxu1  ;;  %1667 = vmatprep.mubr.f32.mxu1 %v5180_v49  ;;  %v9594_v49 = vld [vmem:[#allocation20_spill] sm:$0xff] }
 0x181   : > { %v674_v3 = vpop.f32.mrf.mxu0  ;;  %4818 = vmatmul.mubr.f32.gmra.mxu0 %v9579_v58 }
 0x182   : > { %v6732_v14 = vadd.f32 %v6603_v40, %v674_v3  ;;  %4820 = vmatprep.mubr.f32.mxu0 %v9544_v42 }
 0x183   : > { %v1084_v31 = vpop.f32.mrf.mxu1  ;;  %1668 = vmatmul.mubr.f32.gmra.mxu1 %v6392_v44  ;;  %v676_v34 = vpop.f32.mrf.mxu0 }
 0x184   : > { %v6737_v45 = vadd.f32 %v1084_v31, %v6643_v37  ;;  %1672 = vmatprep.mubr.f32.mxu1 %v5181_v1  ;;  %v5182_v37 = vld [vmem:[%s5540_s30 + $0xa0] sm:$0xff]  ;;  %v9596_v31 = vld [vmem:[#allocation23_spill] sm:$0xff]  ;;  %v9597_v1 = vld [vmem:[#allocation70_spill] sm:$0xff] }
 0x185   : > { %v1086_v21 = vpop.f32.mrf.mxu1  ;;  %v679_v5 = vpop.f32.mrf.mxu0  ;;  %4821 = vmatmul.mubr.f32.gmra.mxu0 %v9580_v50 }
 0x186   : > { %v6742_v58 = vadd.f32 %v6599_v60, %v679_v5  ;;  %4823 = vmatprep.mubr.f32.mxu0 %v6123_v8  ;;  %v9598_v21 = vld [vmem:[#allocation69_spill] sm:$0xff] }
 0x187   : > { %v1089_v42 = vpop.f32.mrf.mxu1  ;;  %1673 = vmatmul.mubr.f32.gmra.mxu1 %v6037_v54  ;;  %v681_v40 = vpop.f32.mrf.mxu0 }
 0x188   : > { %v6747_v44 = vadd.f32 %v1089_v42, %v6654_v23  ;;  %1677 = vmatprep.mubr.f32.mxu1 %v5182_v37  ;;  %v9599_v40 = vld [vmem:[#allocation54_spill] sm:$0xff] }
 0x189   : > { %v1091_v9 = vpop.f32.mrf.mxu1  ;;  %v684_v7 = vpop.f32.mrf.mxu0  ;;  %4824 = vmatmul.mubr.f32.gmra.mxu0 %v9581_v20 }
 0x18a   : > { %v6752_v50 = vadd.f32 %v6612_v33, %v684_v7  ;;  %4826 = vmatprep.mubr.f32.mxu0 %v6163_v36  ;;  %v9600_v9 = vld [vmem:[#allocation44_spill] sm:$0xff] }
 0x18b   : > { %v1094_v60 = vpop.f32.mrf.mxu1  ;;  %1678 = vmatmul.mubr.f32.gmra.mxu1 %v6408_v43  ;;  %v686_v8 = vpop.f32.mrf.mxu0 }
 0x18c   : > { %v6757_v54 = vadd.f32 %v1094_v60, %v6665_v4  ;;  %1682 = vmatprep.mubr.f32.mxu1 %v6505_v56 }
 0x18d   : > { %v1096_v23 = vpop.f32.mrf.mxu1  ;;  %v689_v48 = vpop.f32.mrf.mxu0  ;;  %4827 = vmatmul.mubr.f32.gmra.mxu0 %v9582_v52 }
 0x18e   : > { %v6762_v20 = vadd.f32 %v6608_v30, %v689_v48  ;;  %4829 = vmatprep.mubr.f32.mxu0 %v6196_v47  ;;  %v9589_v30 = vld [vmem:[#allocation67_spill] sm:$0xff]  ;;  %v9601_v48 = vld [vmem:[#allocation36_spill] sm:$0xff] }
 0x18f   : > { %v1099_v33 = vpop.f32.mrf.mxu1  ;;  %1683 = vmatmul.mubr.f32.gmra.mxu1 %v9546_v62  ;;  %v691_v36 = vpop.f32.mrf.mxu0  ;;  %v9590_v47 = vld [vmem:[#allocation19_spill] sm:$0xff] }
 0x190   : > { %v6767_v43 = vadd.f32 %v1099_v33, %v6676_v12  ;;  %1687 = vmatprep.mubr.f32.mxu1 %v6518_v16  ;;  %v9591_v62 = vld [vmem:[#allocation59_spill] sm:$0xff] }
 0x191   : > { %v1101_v4 = vpop.f32.mrf.mxu1  ;;  %v694_v56 = vpop.f32.mrf.mxu0  ;;  %4830 = vmatmul.mubr.f32.gmra.mxu0 %v9586_v55  ;;  %v1469_v12 = vsel %vm349_vm0, %v9592_v19, %v9591_v62  ;;  %v9604_v19 = vld [vmem:[#allocation47_spill] sm:$0xff] }
 0x192   : > { %v6772_v52 = vadd.f32 %v6624_v13, %v694_v56  ;;  %4832 = vmatprep.mubr.f32.mxu0 %v9589_v30  ;;  %v9595_v13 = vld [vmem:[#allocation68_spill] sm:$0xff]  ;;  %v1472_v5 = vsel %vm256_vm2, %v9598_v21, %v1469_v12  ;;  %v9602_v4 = vld [vmem:[#allocation29_spill] sm:$0xff] }
 0x193   : > { %v1104_v29 = vpop.f32.mrf.mxu1  ;;  %1688 = vmatmul.mubr.f32.gmra.mxu1 %v9590_v47  ;;  %v696_v46 = vpop.f32.mrf.mxu0  ;;  %v9603_v47 = vld [vmem:[#allocation58_spill] sm:$0xff] }
 0x194   : > { %v6781_v16 = vadd.f32 %v1104_v29, %v6687_v17  ;;  %1692 = vmatprep.mubr.f32.mxu1 %v9594_v49 }
 0x195   : > { %v1106_v55 = vpop.f32.mrf.mxu1  ;;  %v699_v3 = vpop.f32.mrf.mxu0  ;;  %4833 = vmatmul.mubr.f32.gmra.mxu0 %v9595_v13  ;;  %v5183_v13 = vld [vmem:[%s5540_s30 + $0xd8] sm:$0xff] }
 0x196   : > { %v6786_v34 = vadd.f32 %v9596_v31, %v699_v3  ;;  %4835 = vmatprep.mubr.f32.mxu0 %v9597_v1 }
 0x197   : > { %v1109_v42 = vpop.f32.mrf.mxu1  ;;  %1693 = vmatmul.mubr.f32.gmra.mxu1 %v9599_v40  ;;  %v701_v17 = vpop.f32.mrf.mxu0 }
 0x198   : > { %v6794_v37 = vadd.f32 %v1109_v42, %v6698_v0  ;;  %1697 = vmatprep.mubr.f32.mxu1 %v9600_v9 }
 0x199   : > { %v1111_v7 = vpop.f32.mrf.mxu1  ;;  %v704_v60 = vpop.f32.mrf.mxu0  ;;  %4836 = vmatmul.mubr.f32.gmra.mxu0 %v1472_v5  ;;  %v9606_v5 = vld [vmem:[#allocation62_spill] sm:$0xff] }
 0x19a   : > { %v6798_v8 = vadd.f32 %v6639_v63, %v704_v60  ;;  %4838 = vmatprep.mubr.f32.mxu0 %v9589_v30  ;;  %v9607_v60 = vld [vmem:[#allocation32_spill] sm:$0xff] }
 0x19b   : > { %v1114_v23 = vpop.f32.mrf.mxu1  ;;  %1698 = vmatmul.mubr.f32.gmra.mxu1 %v9601_v48  ;;  %v706_v33 = vpop.f32.mrf.mxu0 }
 0x19c   : > { %v6803_v36 = vadd.f32 %v1114_v23, %v6709_v2  ;;  %1702 = vmatprep.mubr.f32.mxu1 %v9602_v4  ;;  %v9608_v33 = vld [vmem:[#allocation30_spill] sm:$0xff] }
 0x19d   : > { %v1116_v0 = vpop.f32.mrf.mxu1  ;;  %v709_v56 = vpop.f32.mrf.mxu0  ;;  %4839 = vmatmul.mubr.f32.gmra.mxu0 %v6630_v25  ;;  %v9605_v25 = vld [vmem:[#allocation41_spill] sm:$0xff] }
 0x19e   : > { %v6808_v29 = vadd.f32 %v6635_v11, %v709_v56  ;;  %v9609_v56 = vld [vmem:[#allocation65_spill] sm:$0xff] }
 0x19f   : > { %v1119_v63 = vpop.f32.mrf.mxu1  ;;  %1703 = vmatmul.mubr.f32.gmra.mxu1 %v9603_v47  ;;  %v711_v46 = vpop.f32.mrf.mxu0 }
 0x1a0   : > { %v6812_v62 = vadd.f32 %v1119_v63, %v6720_v22  ;;  %1707 = vmatprep.mubr.f32.mxu1 %v9604_v19 }
 0x1a1   : > { %v1121_v2 = vpop.f32.mrf.mxu1  ;;  %v714_v12 = vpop.f32.mrf.mxu0 }
 0x1a2   : > { %v6816_v49 = vadd.f32 %v6650_v59, %v714_v12  ;;  %v5184_v59 = vld [vmem:[%s5540_s30 + $0xe0] sm:$0xff]  ;;  %v9610_v12 = vld [vmem:[#allocation39_spill] sm:$0xff] }
 0x1a3   : > { %v1124_v55 = vpop.f32.mrf.mxu1  ;;  %1708 = vmatmul.mubr.f32.gmra.mxu1 %v9605_v25  ;;  %v716_v11 = vpop.f32.mrf.mxu0  ;;  %v5186_v25 = vld [vmem:[%s5540_s30 + $0xf8] sm:$0xff] }
 0x1a4   : > { %v6820_v3 = vadd.f32 %v1124_v55, %v6732_v14  ;;  %1712 = vmatprep.mubr.f32.mxu1 %v5183_v13 }
 0x1a5   : > { %v1126_v31 = vpop.f32.mrf.mxu1  ;;  %v719_v22 = vpop.f32.mrf.mxu0 }
 0x1a6   : > { %v9611_v31 = vld [vmem:[#allocation63_spill] sm:$0xff] }
 0x1a7   : > { %v1129_v1 = vpop.f32.mrf.mxu1  ;;  %1713 = vmatmul.mubr.f32.gmra.mxu1 %v9606_v5  ;;  %v721_v42 = vpop.f32.mrf.mxu0 }
 0x1a8   : > { %v6825_v40 = vadd.f32 %v1129_v1, %v6742_v58  ;;  %1717 = vmatprep.mubr.f32.mxu1 %v5184_v59  ;;  %v9612_v1 = vld [vmem:[#allocation43_spill] sm:$0xff] }
 0x1a9   : > { %v1131_v17 = vpop.f32.mrf.mxu1  ;;  %v724_v9 = vpop.f32.mrf.mxu0 }
 0x1aa   : > { %v950_v7 = vadd.f32 %v6661_v10, %v724_v9  ;;  %v5185_v10 = vld [vmem:[%s5540_s30 + $0xf0] sm:$0xff] }
 0x1ab   : > { %v1134_v14 = vpop.f32.mrf.mxu1  ;;  %1718 = vmatmul.mubr.f32.gmra.mxu1 %v9607_v60  ;;  %v726_v23 = vpop.f32.mrf.mxu0 }
 0x1ac   : > { %v6831_v48 = vadd.f32 %v1134_v14, %v6752_v50  ;;  %1722 = vmatprep.mubr.f32.mxu1 %v9608_v33 }
 0x1ad   : > { %v1136_v4 = vpop.f32.mrf.mxu1  ;;  %v729_v58 = vpop.f32.mrf.mxu0 }
 0x1af   : > { %v1139_v0 = vpop.f32.mrf.mxu1  ;;  %1723 = vmatmul.mubr.f32.gmra.mxu1 %v9609_v56  ;;  %v731_v63 = vpop.f32.mrf.mxu0 }
 0x1b0   : > { %v6836_v47 = vadd.f32 %v1139_v0, %v6762_v20  ;;  %1727 = vmatprep.mubr.f32.mxu1 %v5185_v10  ;;  %v1468_v20 = vsel %vm287_vm1, %v9612_v1, %v9611_v31 }
 0x1b1   : > { %v1141_v46 = vpop.f32.mrf.mxu1  ;;  %v734_v19 = vpop.f32.mrf.mxu0 }
 0x1b3   : > { %v1144_v2 = vpop.f32.mrf.mxu1  ;;  %1728 = vmatmul.mubr.f32.gmra.mxu1 %v9610_v12  ;;  %v736_v50 = vpop.f32.mrf.mxu0 }
 0x1b4   : > { %v6841_v55 = vadd.f32 %v1144_v2, %v6772_v52  ;;  %1732 = vmatprep.mubr.f32.mxu1 %v5186_v25  ;;  %v1471_v52 = vsel %vm253_vm3, %v9589_v30, %v1468_v20 }
 0x1b5   : > { %v1146_v11 = vpop.f32.mrf.mxu1  ;;  %v739_v13 = vpop.f32.mrf.mxu0 }
 0x1b7   : > { %v1149_v5 = vpop.f32.mrf.mxu1  ;;  %1733 = vmatmul.mubr.f32.gmra.mxu1 %v9598_v21  ;;  %v741_v42 = vpop.f32.mrf.mxu0 }
 0x1b8   : > { %v6850_v17 = vadd.f32 %v1149_v5, %v6786_v34  ;;  %1737 = vmatprep.mubr.f32.mxu1 %v5184_v59 }
 0x1b9   : > { %v1151_v9 = vpop.f32.mrf.mxu1  ;;  %v744_v14 = vpop.f32.mrf.mxu0 }
 0x1ba   : > { %v955_v9 = vadd.f32 %v6657_v6, %v729_v58 }
 0x1bb   : > { %v1154_v60 = vpop.f32.mrf.mxu1  ;;  %1738 = vmatmul.mubr.f32.gmra.mxu1 %v1471_v52  ;;  %v746_v23 = vpop.f32.mrf.mxu0 }
 0x1bc   : > { %v6856_v4 = vadd.f32 %v1154_v60, %v6798_v8  ;;  %1742 = vmatprep.mubr.f32.mxu1 %v9608_v33  ;;  %v945_v33 = vadd.f32 %v6646_v24, %v719_v22  ;;  %v960_v22 = vadd.f32 %v6672_v39, %v734_v19 }
 0x1bd   : > { %v1156_v21 = vpop.f32.mrf.mxu1  ;;  %v749_v0 = vpop.f32.mrf.mxu0 }
 0x1bf   : > { %v1159_v63 = vpop.f32.mrf.mxu1  ;;  %1743 = vmatmul.mubr.f32.gmra.mxu1 %v9609_v56  ;;  %v751_v34 = vpop.f32.mrf.mxu0 }
 0x1c0   : > { %v6861_v59 = vadd.f32 %v1159_v63, %v6808_v29 }
 0x1c1   : > { %v1161_v30 = vpop.f32.mrf.mxu1  ;;  %v754_v10 = vpop.f32.mrf.mxu0 }
 0x1c3   : > { %v1164_v46 = vpop.f32.mrf.mxu1  ;;  %v756_v2 = vpop.f32.mrf.mxu0 }
 0x1c4   : > { %v6864_v12 = vadd.f32 %v1164_v46, %v6816_v49 }
 0x1c5   : > { %v1166_v8 = vpop.f32.mrf.mxu1  ;;  %v759_v50 = vpop.f32.mrf.mxu0 }
 0x1c7   : > { %v1169_v25 = vpop.f32.mrf.mxu1  ;;  %v761_v11 = vpop.f32.mrf.mxu0 }
 0x1c8   : > { %v6867_v31 = vadd.f32 %v1169_v25, %v945_v33  ;;  %v970_v11 = vadd.f32 %v6683_v61, %v744_v14 }
 0x1c9   : > { %v1171_v56 = vpop.f32.mrf.mxu1  ;;  %v764_v1 = vpop.f32.mrf.mxu0 }
 0x1cb   : > { %v1174_v20 = vpop.f32.mrf.mxu1  ;;  %v766_v29 = vpop.f32.mrf.mxu0 }
 0x1cc   : > { %v6869_v5 = vadd.f32 %v1174_v20, %v950_v7  ;;  %v965_v7 = vadd.f32 %v6668_v51, %v739_v13 }
 0x1cd   : > { %v1176_v42 = vpop.f32.mrf.mxu1  ;;  %v769_v52 = vpop.f32.mrf.mxu0 }
 0x1ce   : > { %v975_v42 = vadd.f32 %v6679_v15, %v749_v0  ;;  %v985_v15 = vadd.f32 %v6690_v28, %v759_v50  ;;  %v995_v50 = vadd.f32 %v6701_v57, %v769_v52 }
 0x1cf   : > { %v1179_v49 = vpop.f32.mrf.mxu1  ;;  %v771_v60 = vpop.f32.mrf.mxu0 }
 0x1d0   : > { %v6872_v23 = vadd.f32 %v1179_v49, %v955_v9 }
 0x1d1   : > { %v1181_v21 = vpop.f32.mrf.mxu1  ;;  %v774_v24 = vpop.f32.mrf.mxu0 }
 0x1d2   : > { %v980_v21 = vadd.f32 %v6694_v18, %v754_v10  ;;  %v990_v10 = vadd.f32 %v6705_v27, %v764_v1 }
 0x1d3   : > { %v1184_v63 = vpop.f32.mrf.mxu1  ;;  %v776_v34 = vpop.f32.mrf.mxu0 }
 0x1d4   : > { %v6875_v30 = vadd.f32 %v1184_v63, %v960_v22 }
 0x1d5   : > { %v1186_v46 = vpop.f32.mrf.mxu1  ;;  %v779_v2 = vpop.f32.mrf.mxu0 }
 0x1d7   : > { %v1189_v8 = vpop.f32.mrf.mxu1  ;;  %v781_v33 = vpop.f32.mrf.mxu0 }
 0x1d8   : > { %v6878_v25 = vadd.f32 %v1189_v8, %v965_v7 }
 0x1d9   : > { %v1191_v6 = vpop.f32.mrf.mxu1  ;;  %v784_v58 = vpop.f32.mrf.mxu0 }
 0x1db   : > { %v1194_v56 = vpop.f32.mrf.mxu1  ;;  %v786_v20 = vpop.f32.mrf.mxu0 }
 0x1dc   : > { %v6881_v29 = vadd.f32 %v1194_v56, %v970_v11 }
 0x1dd   : > { %v1196_v39 = vpop.f32.mrf.mxu1  ;;  %v789_v19 = vpop.f32.mrf.mxu0 }
 0x1df   : > { %v1199_v9 = vpop.f32.mrf.mxu1  ;;  %v791_v49 = vpop.f32.mrf.mxu0 }
 0x1e0   : > { %v6884_v60 = vadd.f32 %v1199_v9, %v975_v42 }
 0x1e1   : > { %v1201_v51 = vpop.f32.mrf.mxu1  ;;  %v4715_v13 = vpop.f32.mrf.mxu0 }
 0x1e2   : > { %v6888_v22 = vadd.f32 %v4715_v13, %v6747_v44 }
 0x1e3   : > { %v1204_v61 = vpop.f32.mrf.mxu1  ;;  %v6890_v14 = vpop.f32.mrf.mxu0 }
 0x1e4   : > { %v6892_v63 = vadd.f32 %v1204_v61, %v980_v21 }
 0x1e5   : > { %v1206_v34 = vpop.f32.mrf.mxu1  ;;  %v4718_v46 = vpop.f32.mrf.mxu0 }
 0x1e6   : > { %v6896_v0 = vadd.f32 %v4718_v46, %v6767_v43 }
 0x1e7   : > { %v1209_v7 = vpop.f32.mrf.mxu1  ;;  %v6898_v8 = vpop.f32.mrf.mxu0 }
 0x1e8   : > { %v6900_v33 = vadd.f32 %v1209_v7, %v985_v15 }
 0x1e9   : > { %v1211_v18 = vpop.f32.mrf.mxu1  ;;  %v4721_v44 = vpop.f32.mrf.mxu0 }
 0x1ea   : > { %v6904_v6 = vadd.f32 %v4721_v44, %v6794_v37  ;;  %v1000_v37 = vadd.f32 %v6716_v53, %v774_v24 }
 0x1eb   : > { %v1214_v11 = vpop.f32.mrf.mxu1  ;;  %v6906_v56 = vpop.f32.mrf.mxu0 }
 0x1ec   : > { %v6908_v20 = vadd.f32 %v1214_v11, %v990_v10 }
 0x1ed   : > { %v1216_v28 = vpop.f32.mrf.mxu1  ;;  %v4724_v43 = vpop.f32.mrf.mxu0 }
 0x1ee   : > { %v6912_v39 = vadd.f32 %v4724_v43, %v6812_v62  ;;  %v1005_v62 = vadd.f32 %v6712_v35, %v779_v2 }
 0x1ef   : > { %v1219_v42 = vpop.f32.mrf.mxu1  ;;  %v6914_v9 = vpop.f32.mrf.mxu0 }
 0x1f0   : > { %v1220_v49 = vadd.f32 %v1219_v42, %v995_v50 }
 0x1f1   : > { %v1221_v27 = vpop.f32.mrf.mxu1  ;;  %v4727_v1 = vpop.f32.mrf.mxu0 }
 0x1f2   : > { %v6918_v51 = vadd.f32 %v4727_v1, %v6825_v40  ;;  %v1010_v40 = vadd.f32 %v6727_v38, %v784_v58 }
 0x1f3   : > { %v1224_v13 = vpop.f32.mrf.mxu1  ;;  %v6920_v21 = vpop.f32.mrf.mxu0 }
 0x1f4   : > { %v6922_v61 = vadd.f32 %v1224_v13, %v1000_v37 }
 0x1f5   : > { %v1226_v57 = vpop.f32.mrf.mxu1  ;;  %v4730_v52 = vpop.f32.mrf.mxu0 }
 0x1f6   : > { %9613 = vst [vmem:[#allocation26_spill] sm:$0xff] %v6922_v61  ;;  %v6926_v34 = vadd.f32 %v4730_v52, %v6836_v47  ;;  %v1015_v47 = vadd.f32 %v6723_v41, %v789_v19 }
 0x1f7   : > { %v1229_v46 = vpop.f32.mrf.mxu1  ;;  %v6928_v15 = vpop.f32.mrf.mxu0 }
 0x1f8   : > { %v1230_v7 = vadd.f32 %v1229_v46, %v1005_v62 }
 0x1f9   : > { %v1231_v53 = vpop.f32.mrf.mxu1  ;;  %v4733_v24 = vpop.f32.mrf.mxu0 }
 0x1fa   : > { %v6932_v18 = vadd.f32 %v4733_v24, %v6850_v17 }
 0x1fb   : > { %v1234_v44 = vpop.f32.mrf.mxu1  ;;  %v6934_v10 = vpop.f32.mrf.mxu0 }
 0x1fc   : > { %v6936_v11 = vadd.f32 %v1234_v44, %v1010_v40 }
 0x1fd   : > { %v1236_v35 = vpop.f32.mrf.mxu1  ;;  %v4736_v2 = vpop.f32.mrf.mxu0 }
 0x1fe   : > { %9614 = vst [vmem:[#allocation33_spill] sm:$0xff] %v6936_v11  ;;  %v6940_v28 = vadd.f32 %v4736_v2, %v6861_v59 }
 0x1ff   : > { %v1239_v43 = vpop.f32.mrf.mxu1  ;;  %v6942_v50 = vpop.f32.mrf.mxu0 }
 0x200   : > { %v1240_v42 = vadd.f32 %v1239_v43, %v1015_v47 }
 0x201   : > { %v1241_v38 = vpop.f32.mrf.mxu1  ;;  %v4739_v58 = vpop.f32.mrf.mxu0 }
 0x202   : > { %v6945_v17 = vadd.f32 %v4739_v58, %v6867_v31 }
 0x203   : > { %v1589_v27 = vpop.f32.mrf.mxu1  ;;  %v6947_v1 = vpop.f32.mrf.mxu0 }
 0x205   : > { %v1591_v37 = vpop.f32.mrf.mxu1  ;;  %v4742_v13 = vpop.f32.mrf.mxu0 }
 0x206   : > { %v6950_v57 = vadd.f32 %v4742_v13, %v6872_v23 }
 0x207   : > { %v1594_v41 = vpop.f32.mrf.mxu1  ;;  %v6952_v59 = vpop.f32.mrf.mxu0 }
 0x209   : > { %v1596_v19 = vpop.f32.mrf.mxu1  ;;  %v4745_v52 = vpop.f32.mrf.mxu0 }
 0x20a   : > { %v6955_v62 = vadd.f32 %v4745_v52, %v6878_v25 }
 0x20b   : > { %v1599_v46 = vpop.f32.mrf.mxu1  ;;  %v6957_v53 = vpop.f32.mrf.mxu0 }
 0x20d   : > { %v1601_v31 = vpop.f32.mrf.mxu1  ;;  %v4748_v24 = vpop.f32.mrf.mxu0 }
 0x20e   : > { %v6960_v40 = vadd.f32 %v4748_v24, %v6884_v60 }
 0x20f   : > { %v1604_v44 = vpop.f32.mrf.mxu1  ;;  %v6962_v35 = vpop.f32.mrf.mxu0 }
 0x211   : > { %v1606_v23 = vpop.f32.mrf.mxu1  ;;  %v4751_v2 = vpop.f32.mrf.mxu0 }
 0x212   : > { %v6965_v47 = vadd.f32 %v4751_v2, %v6900_v33 }
 0x213   : > { %v1609_v43 = vpop.f32.mrf.mxu1  ;;  %v6967_v38 = vpop.f32.mrf.mxu0 }
 0x215   : > { %v1611_v25 = vpop.f32.mrf.mxu1  ;;  %v4754_v58 = vpop.f32.mrf.mxu0 }
 0x216   : > { %v6969_v37 = vadd.f32 %v4754_v58, %v1220_v49 }
 0x217   : > { %v1614_v13 = vpop.f32.mrf.mxu1  ;;  %v6971_v19 = vpop.f32.mrf.mxu0 }
 0x218   : > { %9615 = vst [vmem:[#allocation52_spill] sm:$0xff] %v6969_v37 }
 0x219   : > { %v1616_v60 = vpop.f32.mrf.mxu1  ;;  %v4757_v52 = vpop.f32.mrf.mxu0 }
 0x21a   : > { %v6973_v31 = vadd.f32 %v4757_v52, %v1230_v7  ;;  %v1310_v60 = vadd.f32 %v6890_v14, %v6737_v45 }
 0x21b   : > { %v1619_v24 = vpop.f32.mrf.mxu1  ;;  %v6975_v23 = vpop.f32.mrf.mxu0 }
 0x21c   : > { %9616 = vst [vmem:[#allocation24_spill] sm:$0xff] %v6973_v31  ;;  %9617 = vst [vmem:[#allocation51_spill] sm:$0xff] %v6975_v23 }
 0x21d   : > { %v1621_v32 = vpop.f32.mrf.mxu1  ;;  %v4760_v33 = vpop.f32.mrf.mxu0 }
 0x21e   : > { %v6977_v2 = vadd.f32 %v4760_v33, %v1240_v42 }
 0x21f   : > { %v1624_v26 = vpop.f32.mrf.mxu1  ;;  %v6979_v11 = vpop.f32.mrf.mxu0 }
 0x220   : > { %9618 = vst [vmem:[#allocation27_spill] sm:$0xff] %v6977_v2  ;;  %9619 = vst [vmem:[#allocation34_spill] sm:$0xff] %v6979_v11 }
 0x221   : > { %v1626_v25 = vpop.f32.mrf.mxu1  ;;  %v4795_v49 = vpop.f32.mrf.mxu0 }
 0x222   : > { %v1820_v58 = vadd.f32 %v4795_v49, %v1594_v41  ;;  %v1320_v25 = vadd.f32 %v6898_v8, %v6757_v54 }
 0x223   : > { %v1629_v61 = vpop.f32.mrf.mxu1  ;;  %v1814_v37 = vpop.f32.mrf.mxu0 }
 0x224   : > { %v6984_v7 = vadd.f32 %v1820_v58, %v6888_v22  ;;  %v1815_v52 = vadd.f32 %v1814_v37, %v1589_v27 }
 0x225   : > { %v1631_v31 = vpop.f32.mrf.mxu1  ;;  %v4798_v32 = vpop.f32.mrf.mxu0 }
 0x226   : > { %v6986_v23 = vadd.f32 %v1815_v52, %v1310_v60  ;;  %v1830_v42 = vadd.f32 %v4798_v32, %v1604_v44  ;;  %v1330_v44 = vadd.f32 %v6906_v56, %v6781_v16  ;;  %v1340_v32 = vadd.f32 %v6914_v9, %v6803_v36 }
 0x227   : > { %v1634_v33 = vpop.f32.mrf.mxu1  ;;  %v1824_v2 = vpop.f32.mrf.mxu0 }
 0x228   : > { %v6991_v41 = vadd.f32 %v1830_v42, %v6896_v0  ;;  %v1825_v49 = vadd.f32 %v1824_v2, %v1599_v46  ;;  %v2005_v22 = vadd.f32 %v6984_v7, %v6986_v23 }
 0x229   : > { %v1636_v11 = vpop.f32.mrf.mxu1  ;;  %v4801_v45 = vpop.f32.mrf.mxu0 }
 0x22a   : > { %v6995_v14 = vadd.f32 %v1825_v49, %v1320_v25  ;;  %v1840_v27 = vadd.f32 %v4801_v45, %v1614_v13 }
 0x22b   : > { %v1639_v37 = vpop.f32.mrf.mxu1  ;;  %v1834_v31 = vpop.f32.mrf.mxu0 }
 0x22c   : > { %v2006_v58 = vadd.f32 %v2005_v22, %v6995_v14  ;;  %v7001_v54 = vadd.f32 %v1840_v27, %v6904_v6  ;;  %v1835_v0 = vadd.f32 %v1834_v31, %v1609_v43  ;;  %v1350_v27 = vadd.f32 %v6920_v21, %v6820_v3 }
 0x22d   : > { %v1641_v8 = vpop.f32.mrf.mxu1  ;;  %v4804_v11 = vpop.f32.mrf.mxu0 }
 0x22e   : > { %v7003_v46 = vadd.f32 %v1835_v0, %v1330_v44  ;;  %v2007_v2 = vadd.f32 %v2006_v58, %v6991_v41  ;;  %v1850_v60 = vadd.f32 %v4804_v11, %v1624_v26  ;;  %v1360_v11 = vadd.f32 %v6928_v15, %v6831_v48 }
 0x22f   : > { %v1644_v52 = vpop.f32.mrf.mxu1  ;;  %v1844_v13 = vpop.f32.mrf.mxu0 }
 0x230   : > { %v2008_v16 = vadd.f32 %v2007_v2, %v7003_v46  ;;  %v7010_v56 = vadd.f32 %v1850_v60, %v6912_v39  ;;  %v1845_v6 = vadd.f32 %v1844_v13, %v1619_v24 }
 0x231   : > { %v1646_v42 = vpop.f32.mrf.mxu1  ;;  %v4807_v43 = vpop.f32.mrf.mxu0 }
 0x232   : > { %v7012_v25 = vadd.f32 %v1845_v6, %v1340_v32  ;;  %v2009_v49 = vadd.f32 %v2008_v16, %v7001_v54  ;;  %v1860_v45 = vadd.f32 %v4807_v43, %v1634_v33 }
 0x233   : > { %v1649_v22 = vpop.f32.mrf.mxu1  ;;  %v1854_v26 = vpop.f32.mrf.mxu0 }
 0x234   : > { %v2010_v36 = vadd.f32 %v2009_v49, %v7012_v25  ;;  %v7019_v9 = vadd.f32 %v1860_v45, %v6918_v51  ;;  %v1855_v39 = vadd.f32 %v1854_v26, %v1629_v61 }
 0x235   : > { %v1651_v31 = vpop.f32.mrf.mxu1  ;;  %v4810_v24 = vpop.f32.mrf.mxu0 }
 0x236   : > { %v7021_v44 = vadd.f32 %v1855_v39, %v1350_v27  ;;  %v2011_v58 = vadd.f32 %v2010_v36, %v7010_v56  ;;  %v1870_v0 = vadd.f32 %v4810_v24, %v1644_v52  ;;  %v1370_v52 = vadd.f32 %v6934_v10, %v6841_v55 }
 0x237   : > { %v1654_v8 = vpop.f32.mrf.mxu1  ;;  %v1864_v33 = vpop.f32.mrf.mxu0  ;;  %v1380_v55 = vadd.f32 %v6942_v50, %v6856_v4  ;;  %v1390_v4 = vadd.f32 %v6947_v1, %v6864_v12 }
 0x238   : > { %v2012_v3 = vadd.f32 %v2011_v58, %v7021_v44  ;;  %v7028_v21 = vadd.f32 %v1870_v0, %v6926_v34  ;;  %v1865_v51 = vadd.f32 %v1864_v33, %v1639_v37 }
 0x239   : > { %v1656_v2 = vpop.f32.mrf.mxu1  ;;  %v4813_v61 = vpop.f32.mrf.mxu0 }
 0x23a   : > { %v7030_v60 = vadd.f32 %v1865_v51, %v1360_v11  ;;  %v2013_v13 = vadd.f32 %v2012_v3, %v7019_v9  ;;  %v1880_v45 = vadd.f32 %v4813_v61, %v1654_v8 }
 0x23b   : > { %v1659_v32 = vpop.f32.mrf.mxu1  ;;  %v1874_v16 = vpop.f32.mrf.mxu0 }
 0x23c   : > { %v2014_v6 = vadd.f32 %v2013_v13, %v7030_v60  ;;  %v1875_v48 = vadd.f32 %v1874_v16, %v1649_v22  ;;  %v7043_v10 = vadd.f32 %v1880_v45, %v6932_v18 }
 0x23d   : > { %v1661_v15 = vpop.f32.mrf.mxu1  ;;  %v4816_v42 = vpop.f32.mrf.mxu0 }
 0x23e   : > { %v7036_v43 = vadd.f32 %v1875_v48, %v1370_v52  ;;  %v2015_v34 = vadd.f32 %v2014_v6, %v7028_v21 }
 0x23f   : > { %v1664_v37 = vpop.f32.mrf.mxu1  ;;  %v1884_v49 = vpop.f32.mrf.mxu0 }
 0x240   : > { %v2016_v36 = vadd.f32 %v2015_v34, %v7036_v43  ;;  %v1885_v39 = vadd.f32 %v1884_v49, %v1659_v32  ;;  %v1890_v11 = vadd.f32 %v4816_v42, %v1664_v37  ;;  %v1400_v37 = vadd.f32 %v6952_v59, %v6869_v5 }
 0x241   : > { %v1666_v26 = vpop.f32.mrf.mxu1  ;;  %v4819_v27 = vpop.f32.mrf.mxu0 }
 0x242   : > { %v7045_v58 = vadd.f32 %v1885_v39, %v1380_v55  ;;  %v2017_v0 = vadd.f32 %v2016_v36, %v7043_v10  ;;  %v7052_v18 = vadd.f32 %v1890_v11, %v6940_v28 }
 0x243   : > { %v1669_v31 = vpop.f32.mrf.mxu1  ;;  %v1894_v22 = vpop.f32.mrf.mxu0 }
 0x244   : > { %v2018_v51 = vadd.f32 %v2017_v0, %v7045_v58  ;;  %v1895_v2 = vadd.f32 %v1894_v22, %v1669_v31  ;;  %v1410_v31 = vadd.f32 %v6957_v53, %v6875_v30  ;;  %v2478_v22 = vld [vmem:[#allocation7 + $0x1f0] sm:$0xff]  ;;  %v2477_v30 = vld [vmem:[#allocation7 + $0x1e8] sm:$0xff] }
 0x245   : > { %v1671_v24 = vpop.f32.mrf.mxu1  ;;  %v4822_v8 = vpop.f32.mrf.mxu0 }
 0x246   : > { %v7054_v16 = vadd.f32 %v1895_v2, %v1390_v4  ;;  %v2019_v52 = vadd.f32 %v2018_v51, %v7052_v18  ;;  %v2476_v51 = vld [vmem:[#allocation7 + $0x1e0] sm:$0xff]  ;;  %v1420_v2 = vadd.f32 %v6962_v35, %v6881_v29 }
 0x247   : > { %v1674_v33 = vpop.f32.mrf.mxu1  ;;  %v1904_v13 = vpop.f32.mrf.mxu0 }
 0x248   : > { %v1900_v6 = vadd.f32 %v4819_v27, %v1674_v33  ;;  %v2020_v49 = vadd.f32 %v2019_v52, %v7054_v16  ;;  %v2479_v27 = vld [vmem:[#allocation7 + $0x1f8] sm:$0xff] }
 0x249   : > { %v1676_v3 = vpop.f32.mrf.mxu1  ;;  %v4825_v32 = vpop.f32.mrf.mxu0  ;;  %2513 = vmatpush1.msra.mxu0 %v2479_v27 }
 0x24a   : > { %v7061_v12 = vadd.f32 %v1900_v6, %v6945_v17  ;;  %v9620_v17 = vmov 0.0  }
 0x24b   : > { %v1679_v61 = vpop.f32.mrf.mxu1  ;;  %v1914_v34 = vpop.f32.mrf.mxu0  ;;  %2514 = vmatprep.subr.mxu0 %v9620_v17 }
 0x24c   : > { %v1905_v15 = vadd.f32 %v1904_v13, %v1679_v61  ;;  %v2021_v55 = vadd.f32 %v2020_v49, %v7061_v12  ;;  %2515 = vmatpush1.msra.mxu0 %v2478_v22 }
 0x24d   : > { %v1681_v50 = vpop.f32.mrf.mxu1  ;;  %v4828_v39 = vpop.f32.mrf.mxu0  ;;  %2516 = vmatprep.subr.mxu0 %v9620_v17 }
 0x24e   : > { %v7063_v45 = vadd.f32 %v1905_v15, %v1400_v37  ;;  %2517 = vmatpush1.msra.mxu0 %v2477_v30  ;;  %v2468_v30 = vld [vmem:[#allocation7 + $0x1a0] sm:$0xff] }
 0x24f   : > { %v1684_v48 = vpop.f32.mrf.mxu1  ;;  %v1924_v11 = vpop.f32.mrf.mxu0  ;;  %2518 = vmatprep.subr.mxu0 %v9620_v17 }
 0x250   : > { %v1910_v28 = vadd.f32 %v4822_v8, %v1684_v48  ;;  %v2022_v24 = vadd.f32 %v2021_v55, %v7063_v45  ;;  %2519 = vmatpush1.msra.mxu0 %v2476_v51  ;;  %v2474_v48 = vld [vmem:[#allocation7 + $0x1d0] sm:$0xff] }
 0x251   : > { %v1686_v42 = vpop.f32.mrf.mxu1  ;;  %v4831_v50 = vpop.f32.mrf.mxu0  ;;  %2520 = vmatprep.subr.mxu0 %v9620_v17 }
 0x252   : > { %v7069_v5 = vadd.f32 %v1910_v28, %v6950_v57  ;;  %v2472_v28 = vld [vmem:[#allocation7 + $0x1c0] sm:$0xff] }
 0x253   : > { %v1689_v1 = vpop.f32.mrf.mxu1  ;;  %v1934_v42 = vpop.f32.mrf.mxu0 }
 0x254   : > { %v1915_v26 = vadd.f32 %v1914_v34, %v1689_v1  ;;  %v2023_v53 = vadd.f32 %v2022_v24, %v7069_v5  ;;  %v2473_v34 = vld [vmem:[#allocation7 + $0x1c8] sm:$0xff]  ;;  %v1430_v1 = vadd.f32 %v6967_v38, %v6892_v63 }
 0x255   : > { %v1691_v36 = vpop.f32.mrf.mxu1  ;;  %v4834_v27 = vpop.f32.mrf.mxu0 }
 0x256   : > { %v7073_v0 = vadd.f32 %v1915_v26, %v1410_v31  ;;  %v2471_v31 = vld [vmem:[#allocation7 + $0x1b8] sm:$0xff] }
 0x257   : > { %v1694_v59 = vpop.f32.mrf.mxu1  ;;  %v1944_v38 = vpop.f32.mrf.mxu0 }
 0x258   : > { %v1920_v33 = vadd.f32 %v4825_v32, %v1694_v59  ;;  %v2024_v61 = vadd.f32 %v2023_v53, %v7073_v0  ;;  %v2475_v32 = vld [vmem:[#allocation7 + $0x1d8] sm:$0xff]  ;;  %v2470_v59 = vld [vmem:[#allocation7 + $0x1b0] sm:$0xff]  ;;  %v1440_v53 = vadd.f32 %v6971_v19, %v6908_v20 }
 0x259   : > { %v1696_v8 = vpop.f32.mrf.mxu1  ;;  %2521 = vmatpush1.msra.mxu0 %v2475_v32 }
 0x25a   : > { %v7078_v57 = vadd.f32 %v1920_v33, %v6955_v62  ;;  %2522 = vmatprep.subr.mxu0 %v9620_v17  ;;  %v2469_v33 = vld [vmem:[#allocation7 + $0x1a8] sm:$0xff] }
 0x25b   : > { %v1699_v3 = vpop.f32.mrf.mxu1  ;;  %2523 = vmatpush1.msra.mxu0 %v2474_v48  ;;  %v9621_v48 = vld [vmem:[#allocation52_spill] sm:$0xff] }
 0x25c   : > { %v1925_v13 = vadd.f32 %v1924_v11, %v1699_v3  ;;  %v2025_v62 = vadd.f32 %v2024_v61, %v7078_v57  ;;  %2524 = vmatprep.subr.mxu0 %v9620_v17  ;;  %v4837_v61 = vpop.f32.mrf.mxu0 }
 0x25d   : > { %v1701_v4 = vpop.f32.mrf.mxu1  ;;  %2525 = vmatpush1.msra.mxu0 %v2473_v34  ;;  %v9623_v34 = vld [vmem:[#allocation51_spill] sm:$0xff] }
 0x25e   : > { %v7086_v52 = vadd.f32 %v1925_v13, %v1420_v2  ;;  %2526 = vmatprep.subr.mxu0 %v9620_v17  ;;  %v2467_v13 = vld [vmem:[#allocation7 + $0x198] sm:$0xff]  ;;  %v1954_v19 = vpop.f32.mrf.mxu0 }
 0x25f   : > { %v1704_v6 = vpop.f32.mrf.mxu1  ;;  %2527 = vmatpush1.msra.mxu0 %v2472_v28 }
 0x260   : > { %v2026_v29 = vadd.f32 %v2025_v62, %v7086_v52  ;;  %v1930_v35 = vadd.f32 %v4828_v39, %v1704_v6  ;;  %2528 = vmatprep.subr.mxu0 %v9620_v17  ;;  %v2465_v6 = vld [vmem:[#allocation7 + $0x188] sm:$0xff] }
 0x261   : > { %v1706_v15 = vpop.f32.mrf.mxu1  ;;  %2529 = vmatpush1.msra.mxu0 %v2471_v31 }
 0x262   : > { %v7092_v37 = vadd.f32 %v1930_v35, %v6960_v40  ;;  %2530 = vmatprep.subr.mxu0 %v9620_v17  ;;  %v2464_v15 = vld [vmem:[#allocation7 + $0x180] sm:$0xff] }
 0x263   : > { %v1709_v49 = vpop.f32.mrf.mxu1  ;;  %2531 = vmatpush1.msra.mxu0 %v2470_v59 }
 0x264   : > { %v2027_v26 = vadd.f32 %v2026_v29, %v7092_v37  ;;  %v1935_v36 = vadd.f32 %v1934_v42, %v1709_v49  ;;  %2532 = vmatprep.subr.mxu0 %v9620_v17  ;;  %v9622_v42 = vld [vmem:[#allocation26_spill] sm:$0xff] }
 0x265   : > { %v1711_v39 = vpop.f32.mrf.mxu1  ;;  %2533 = vmatpush1.msra.mxu0 %v2469_v33  ;;  %v1450_v49 = vadd.f32 %v9623_v34, %v9622_v42  ;;  %v2490_v42 = vld [vmem:[#allocation7 + $0x250] sm:$0xff] }
 0x266   : > { %v7099_v55 = vadd.f32 %v1935_v36, %v1430_v1  ;;  %2534 = vmatprep.subr.mxu0 %v9620_v17  ;;  %v4840_v39 = vpop.f32.mrf.mxu0 }
 0x267   : > { %v1714_v40 = vpop.f32.mrf.mxu1  ;;  %2535 = vmatpush1.msra.mxu0 %v2468_v30  ;;  %v2493_v30 = vld [vmem:[#allocation7 + $0x268] sm:$0xff] }
 0x268   : > { %v2028_v22 = vadd.f32 %v2027_v26, %v7099_v55  ;;  %v1940_v24 = vadd.f32 %v4831_v50, %v1714_v40  ;;  %2536 = vmatprep.subr.mxu0 %v9620_v17  ;;  %v2466_v50 = vld [vmem:[#allocation7 + $0x190] sm:$0xff]  ;;  %v2511_v26 = vld [vmem:[#allocation7 + $0x2f8] sm:$0xff] }
 0x269   : > { %v1716_v63 = vpop.f32.mrf.mxu1  ;;  %2537 = vmatpush1.msra.mxu0 %v2467_v13  ;;  %4841 = vmatprep.subr.mxu1 %v2511_v26  ;;  %v2510_v40 = vld [vmem:[#allocation7 + $0x2f0] sm:$0xff]  ;;  %v9625_v13 = vld [vmem:[#allocation33_spill] sm:$0xff] }
 0x26a   : > { %v7105_v8 = vadd.f32 %v1940_v24, %v6965_v47  ;;  %2538 = vmatprep.subr.mxu0 %v9620_v17  ;;  %4842 = vmatpush3.msra.mxu1 %v2511_v26  ;;  %v2489_v26 = vld [vmem:[#allocation7 + $0x248] sm:$0xff] }
 0x26b   : > { %v1719_v11 = vpop.f32.mrf.mxu1  ;;  %2539 = vmatpush1.msra.mxu0 %v2466_v50  ;;  %4843 = vmatprep.subr.mxu1 %v2510_v40 }
 0x26c   : > { %v2029_v3 = vadd.f32 %v2028_v22, %v7105_v8  ;;  %v1945_v51 = vadd.f32 %v1944_v38, %v1719_v11  ;;  %2540 = vmatprep.subr.mxu0 %v9620_v17  ;;  %v2494_v22 = vld [vmem:[#allocation7 + $0x270] sm:$0xff]  ;;  %4844 = vmatpush3.msra.mxu1 %v2510_v40  ;;  %v2509_v38 = vld [vmem:[#allocation7 + $0x2e8] sm:$0xff]  ;;  %v1964_v11 = vpop.f32.mrf.mxu0  ;;  %v2504_v40 = vld [vmem:[#allocation7 + $0x2c0] sm:$0xff] }
 0x26d   : > { %v1721_v2 = vpop.f32.mrf.mxu1  ;;  %2541 = vmatpush1.msra.mxu0 %v2465_v6  ;;  %4845 = vmatprep.subr.mxu1 %v2509_v38  ;;  %v2491_v6 = vld [vmem:[#allocation7 + $0x258] sm:$0xff] }
 0x26e   : > { %v7112_v4 = vadd.f32 %v1945_v51, %v1440_v53  ;;  %2542 = vmatprep.subr.mxu0 %v9620_v17  ;;  %v9624_v53 = vld [vmem:[#allocation24_spill] sm:$0xff]  ;;  %4846 = vmatpush3.msra.mxu1 %v2509_v38  ;;  %v2502_v38 = vld [vmem:[#allocation7 + $0x2b0] sm:$0xff] }
 0x26f   : > { %v1724_v47 = vpop.f32.mrf.mxu1  ;;  %2543 = vmatpush1.msra.mxu0 %v2464_v15  ;;  %v2508_v51 = vld [vmem:[#allocation7 + $0x2e0] sm:$0xff] }
 0x270   : > { %v2030_v32 = vadd.f32 %v2029_v3, %v7112_v4  ;;  %v1950_v62 = vadd.f32 %v4834_v27, %v1724_v47  ;;  %2544 = vmatprep.subr.mxu0 %v9620_v17  ;;  %v2495_v27 = vld [vmem:[#allocation7 + $0x278] sm:$0xff]  ;;  %4847 = vmatprep.subr.mxu1 %v2508_v51  ;;  %v9626_v47 = vld [vmem:[#allocation34_spill] sm:$0xff] }
 0x271   : > { %v1726_v20 = vpop.f32.mrf.mxu1  ;;  %2545 = vmatpush2.msra.mxu0 %v2495_v27  ;;  %v1460_v50 = vadd.f32 %v9626_v47, %v9625_v13  ;;  %4848 = vmatpush3.msra.mxu1 %v2508_v51  ;;  %v2499_v47 = vld [vmem:[#allocation7 + $0x298] sm:$0xff] }
 0x272   : > { %v7118_v29 = vadd.f32 %v1950_v62, %v9621_v48  ;;  %2546 = vmatprep.subr.mxu0 %v9620_v17  ;;  %v2507_v20 = vld [vmem:[#allocation7 + $0x2d8] sm:$0xff] }
 0x273   : > { %v1729_v35 = vpop.f32.mrf.mxu1  ;;  %2547 = vmatpush2.msra.mxu0 %v2494_v22  ;;  %4849 = vmatprep.subr.mxu1 %v2507_v20  ;;  %v2503_v22 = vld [vmem:[#allocation7 + $0x2b8] sm:$0xff] }
 0x274   : > { %v2031_v28 = vadd.f32 %v2030_v32, %v7118_v29  ;;  %v1955_v1 = vadd.f32 %v1954_v19, %v1729_v35  ;;  %2548 = vmatprep.subr.mxu0 %v9620_v17  ;;  %4850 = vmatpush3.msra.mxu1 %v2507_v20  ;;  %v2506_v35 = vld [vmem:[#allocation7 + $0x2d0] sm:$0xff] }
 0x275   : > { %v1731_v36 = vpop.f32.mrf.mxu1  ;;  %2549 = vmatpush2.msra.mxu0 %v2493_v30  ;;  %4851 = vmatprep.subr.mxu1 %v2506_v35  ;;  %v2501_v30 = vld [vmem:[#allocation7 + $0x2a8] sm:$0xff]  ;;  %v2482_v20 = vld [vmem:[#allocation7 + $0x210] sm:$0xff] }
 0x276   : > { %v7125_v31 = vadd.f32 %v1955_v1, %v1450_v49  ;;  %2550 = vmatprep.subr.mxu0 %v9620_v17  ;;  %4852 = vmatpush3.msra.mxu1 %v2506_v35  ;;  %v9627_v36 = vld [vmem:[#allocation27_spill] sm:$0xff]  ;;  %v2481_v35 = vld [vmem:[#allocation7 + $0x208] sm:$0xff] }
 0x277   : > { %v1734_v59 = vpop.f32.mrf.mxu1 }
 0x278   : > { %v2032_v24 = vadd.f32 %v2031_v28, %v7125_v31  ;;  %v1960_v63 = vadd.f32 %v4837_v61, %v1734_v59  ;;  %v2492_v61 = vld [vmem:[#allocation7 + $0x260] sm:$0xff]  ;;  %v2505_v28 = vld [vmem:[#allocation7 + $0x2c8] sm:$0xff] }
 0x279   : > { %v1736_v33 = vpop.f32.mrf.mxu1  ;;  %2551 = vmatpush2.msra.mxu0 %v2492_v61  ;;  %4853 = vmatprep.subr.mxu1 %v2505_v28  ;;  %v2488_v59 = vld [vmem:[#allocation7 + $0x240] sm:$0xff] }
 0x27a   : > { %v7131_v3 = vadd.f32 %v1960_v63, %v9624_v53  ;;  %2552 = vmatprep.subr.mxu0 %v9620_v17  ;;  %4854 = vmatpush3.msra.mxu1 %v2505_v28  ;;  %v2486_v33 = vld [vmem:[#allocation7 + $0x230] sm:$0xff]  ;;  %v2485_v53 = vld [vmem:[#allocation7 + $0x228] sm:$0xff]  ;;  %v2484_v61 = vld [vmem:[#allocation7 + $0x220] sm:$0xff] }
 0x27b   : > { %v1739_v2 = vpop.f32.mrf.mxu1  ;;  %2553 = vmatpush2.msra.mxu0 %v2491_v6  ;;  %4855 = vmatprep.subr.mxu1 %v2504_v40  ;;  %v2497_v6 = vld [vmem:[#allocation7 + $0x288] sm:$0xff] }
 0x27c   : > { %v2033_v32 = vadd.f32 %v2032_v24, %v7131_v3  ;;  %v1965_v62 = vadd.f32 %v1964_v11, %v1739_v2  ;;  %2554 = vmatprep.subr.mxu0 %v9620_v17  ;;  %4856 = vmatpush3.msra.mxu1 %v2504_v40  ;;  %v2487_v24 = vld [vmem:[#allocation7 + $0x238] sm:$0xff]  ;;  %v2500_v2 = vld [vmem:[#allocation7 + $0x2a0] sm:$0xff] }
 0x27d   : > { %v1741_v19 = vpop.f32.mrf.mxu1  ;;  %2555 = vmatpush2.msra.mxu0 %v2490_v42  ;;  %4857 = vmatprep.subr.mxu1 %v2503_v22  ;;  %v2480_v42 = vld [vmem:[#allocation7 + $0x200] sm:$0xff] }
 0x27e   : > { %v7138_v48 = vadd.f32 %v1965_v62, %v1460_v50  ;;  %2556 = vmatprep.subr.mxu0 %v9620_v17  ;;  %4858 = vmatpush3.msra.mxu1 %v2503_v22  ;;  %v2483_v50 = vld [vmem:[#allocation7 + $0x218] sm:$0xff]  ;;  %v2498_v62 = vld [vmem:[#allocation7 + $0x290] sm:$0xff] }
 0x27f   : > { %v1744_v15 = vpop.f32.mrf.mxu1  ;;  %2557 = vmatpush2.msra.mxu0 %v2489_v26  ;;  %4859 = vmatprep.subr.mxu1 %v2502_v38 }
 0x280   : > { %v2034_v34 = vadd.f32 %v2033_v32, %v7138_v48  ;;  %v1970_v49 = vadd.f32 %v4840_v39, %v1744_v15  ;;  %2558 = vmatprep.subr.mxu0 %v9620_v17  ;;  %4860 = vmatpush3.msra.mxu1 %v2502_v38  ;;  %v2496_v15 = vld [vmem:[#allocation7 + $0x280] sm:$0xff] }
 0x281   : > { %v1746_v1 = vpop.f32.mrf.mxu1  ;;  %2559 = vmatpush2.msra.mxu0 %v2488_v59  ;;  %4861 = vmatprep.subr.mxu1 %v2501_v30 }
 0x282   : > { %v7144_v27 = vadd.f32 %v1970_v49, %v9627_v36  ;;  %2560 = vmatprep.subr.mxu0 %v9620_v17  ;;  %4862 = vmatpush3.msra.mxu1 %v2501_v30  ;;  %v7158_v49 = vld [vmem:[#allocation7 + $0x178] sm:$0xff] }
 0x283   : > { %2561 = vmatpush2.msra.mxu0 %v2487_v24  ;;  %4863 = vmatprep.subr.mxu1 %v2500_v2 }
 0x284   : > { %v2035_v39 = vadd.f32 %v2034_v34, %v7144_v27  ;;  %2562 = vmatprep.subr.mxu0 %v9620_v17  ;;  %4864 = vmatpush3.msra.mxu1 %v2500_v2 }
 0x285   : > { %2563 = vmatpush2.msra.mxu0 %v2486_v33  ;;  %4865 = vmatprep.subr.mxu1 %v2499_v47 }
 0x286   : > { %v2036_v63 = vrot.slane %v2035_v39, 4  ;;  %2564 = vmatprep.subr.mxu0 %v9620_v17  ;;  %4866 = vmatpush3.msra.mxu1 %v2499_v47 }
 0x287   : > { %2565 = vmatpush2.msra.mxu0 %v2485_v53  ;;  %4867 = vmatprep.subr.mxu1 %v2498_v62 }
 0x288   : > { %v2037_v11 = vadd.f32 %v2036_v63, %v2035_v39  ;;  %2566 = vmatprep.subr.mxu0 %v9620_v17  ;;  %4868 = vmatpush3.msra.mxu1 %v2498_v62 }
 0x289   : > { %2567 = vmatpush2.msra.mxu0 %v2484_v61  ;;  %4869 = vmatprep.subr.mxu1 %v2497_v6 }
 0x28a   : > { %v2038_v51 = vrot.slane %v2037_v11, 2  ;;  %2568 = vmatprep.subr.mxu0 %v9620_v17  ;;  %4870 = vmatpush3.msra.mxu1 %v2497_v6 }
 0x28b   : > { %2569 = vmatpush2.msra.mxu0 %v2483_v50  ;;  %4871 = vmatprep.subr.mxu1 %v2496_v15 }
 0x28c   : > { %v2039_v13 = vadd.f32 %v2038_v51, %v2037_v11  ;;  %2570 = vmatprep.subr.mxu0 %v9620_v17  ;;  %4872 = vmatpush3.msra.mxu1 %v2496_v15 }
 0x28d   : > { %2571 = vmatpush2.msra.mxu0 %v2482_v20  ;;  %2962 = vmatprep.subr.mxu1 %v9620_v17 }
 0x28e   : > { %v2040_v32 = vrot.slane %v2039_v13, 1  ;;  %2572 = vmatprep.subr.mxu0 %v9620_v17 }
 0x28f   : > { %2573 = vmatpush2.msra.mxu0 %v2481_v35 }
 0x290   : > { %v2041_v19 = vadd.f32 %v2040_v32, %v2039_v13  ;;  %2574 = vmatprep.subr.mxu0 %v9620_v17 }
 0x291   : > { %2575 = vmatpush2.msra.mxu0 %v2480_v42 }
 0x292   : > { %v7156_v34 = vmul.f32 0.00390625, %v2041_v19  ;;  %4921 = vmatprep.subr.mxu0 %v7158_v49 }
 0x294   : > { %v7163_v28 = vsub.f32 %v7078_v57, %v7156_v34  ;;  %v7167_v1 = vsub.f32 %v7086_v52, %v7156_v34  ;;  %v7171_v26 = vsub.f32 %v7092_v37, %v7156_v34  ;;  %v7176_v36 = vsub.f32 %v7099_v55, %v7156_v34 }
 0x295   : > { %v7180_v40 = vsub.f32 %v7105_v8, %v7156_v34  ;;  %v7184_v57 = vsub.f32 %v7112_v4, %v7156_v34  ;;  %v7188_v52 = vsub.f32 %v7118_v29, %v7156_v34  ;;  %v7192_v37 = vsub.f32 %v7125_v31, %v7156_v34 }
 0x296   : > { %v7196_v55 = vsub.f32 %v7131_v3, %v7156_v34  ;;  %v7200_v8 = vsub.f32 %v7138_v48, %v7156_v34  ;;  %v7204_v4 = vsub.f32 %v7144_v27, %v7156_v34  ;;  %v7208_v29 = vsub.f32 %v6986_v23, %v7156_v34 }
 0x297   : > { %v7212_v31 = vsub.f32 %v6984_v7, %v7156_v34  ;;  %v7216_v3 = vsub.f32 %v6995_v14, %v7156_v34  ;;  %v7224_v27 = vsub.f32 %v6991_v41, %v7156_v34  ;;  %v7228_v23 = vsub.f32 %v7003_v46, %v7156_v34 }
 0x298   : > { %v2075_v48 = vmul.f32 %v7208_v29, %v7208_v29  ;;  %v7234_v14 = vsub.f32 %v7001_v54, %v7156_v34  ;;  %v7240_v41 = vsub.f32 %v7012_v25, %v7156_v34  ;;  %v7246_v38 = vsub.f32 %v7010_v56, %v7156_v34 }
 0x299   : > { %v2076_v59 = vmul.f32 %v7212_v31, %v7212_v31  ;;  %v2077_v7 = vmul.f32 %v7216_v3, %v7216_v3  ;;  %v2078_v22 = vmul.f32 %v7224_v27, %v7224_v27  ;;  %v2079_v46 = vmul.f32 %v7228_v23, %v7228_v23 }
 0x29a   : > { %v2080_v54 = vmul.f32 %v7234_v14, %v7234_v14  ;;  %v7252_v11 = vsub.f32 %v7021_v44, %v7156_v34  ;;  %v2081_v25 = vmul.f32 %v7240_v41, %v7240_v41  ;;  %v7258_v53 = vsub.f32 %v7019_v9, %v7156_v34 }
 0x29b   : > { %v2107_v39 = vadd.f32 %v2076_v59, %v2075_v48  ;;  %v2082_v56 = vmul.f32 %v7246_v38, %v7246_v38  ;;  %v7264_v2 = vsub.f32 %v7030_v60, %v7156_v34  ;;  %v7270_v13 = vsub.f32 %v7028_v21, %v7156_v34 }
 0x29c   : > { %v2083_v44 = vmul.f32 %v7252_v11, %v7252_v11  ;;  %v2084_v9 = vmul.f32 %v7258_v53, %v7258_v53  ;;  %v7276_v50 = vsub.f32 %v7036_v43, %v7156_v34  ;;  %v7282_v62 = vsub.f32 %v7043_v10, %v7156_v34 }
 0x29d   : > { %v2108_v24 = vadd.f32 %v2107_v39, %v2077_v7  ;;  %v2085_v60 = vmul.f32 %v7264_v2, %v7264_v2  ;;  %v2086_v21 = vmul.f32 %v7270_v13, %v7270_v13  ;;  %v7288_v19 = vsub.f32 %v7045_v58, %v7156_v34 }
 0x29e   : > { %v2087_v43 = vmul.f32 %v7276_v50, %v7276_v50  ;;  %v7294_v35 = vsub.f32 %v7052_v18, %v7156_v34  ;;  %v2088_v10 = vmul.f32 %v7282_v62, %v7282_v62  ;;  %v7300_v42 = vsub.f32 %v7054_v16, %v7156_v34 }
 0x29f   : > { %v2109_v63 = vadd.f32 %v2108_v24, %v2078_v22  ;;  %v2089_v58 = vmul.f32 %v7288_v19, %v7288_v19  ;;  %v7306_v59 = vsub.f32 %v7061_v12, %v7156_v34  ;;  %v7312_v39 = vsub.f32 %v7063_v45, %v7156_v34 }
 0x2a0   : > { %v2090_v18 = vmul.f32 %v7294_v35, %v7294_v35  ;;  %v2091_v16 = vmul.f32 %v7300_v42, %v7300_v42  ;;  %v7318_v24 = vsub.f32 %v7069_v5, %v7156_v34 }
 0x2a1   : > { %v2110_v33 = vadd.f32 %v2109_v63, %v2079_v46  ;;  %v2092_v12 = vmul.f32 %v7306_v59, %v7306_v59  ;;  %v7324_v63 = vsub.f32 %v7073_v0, %v7156_v34  ;;  %v2093_v45 = vmul.f32 %v7312_v39, %v7312_v39 }
 0x2a2   : > { %v2097_v0 = vmul.f32 %v7167_v1, %v7167_v1 }
 0x2a3   : > { %v2111_v30 = vadd.f32 %v2110_v33, %v2080_v54  ;;  %v2094_v33 = vmul.f32 %v7318_v24, %v7318_v24  ;;  %v2095_v5 = vmul.f32 %v7324_v63, %v7324_v63 }
 0x2a5   : > { %v2112_v51 = vadd.f32 %v2111_v30, %v2081_v25 }
 0x2a7   : > { %v2113_v61 = vadd.f32 %v2112_v51, %v2082_v56  ;;  %v2096_v56 = vmul.f32 %v7163_v28, %v7163_v28 }
 0x2a9   : > { %v2114_v47 = vadd.f32 %v2113_v61, %v2083_v44  ;;  %v2098_v44 = vmul.f32 %v7171_v26, %v7171_v26 }
 0x2ab   : > { %v2115_v32 = vadd.f32 %v2114_v47, %v2084_v9  ;;  %v2099_v9 = vmul.f32 %v7176_v36, %v7176_v36 }
 0x2ad   : > { %v2116_v20 = vadd.f32 %v2115_v32, %v2085_v60  ;;  %v2100_v60 = vmul.f32 %v7180_v40, %v7180_v40 }
 0x2af   : > { %v2117_v6 = vadd.f32 %v2116_v20, %v2086_v21  ;;  %v2101_v21 = vmul.f32 %v7184_v57, %v7184_v57 }
 0x2b1   : > { %v2118_v15 = vadd.f32 %v2117_v6, %v2087_v43  ;;  %v2102_v43 = vmul.f32 %v7188_v52, %v7188_v52 }
 0x2b3   : > { %v2119_v48 = vadd.f32 %v2118_v15, %v2088_v10  ;;  %v2103_v10 = vmul.f32 %v7192_v37, %v7192_v37 }
 0x2b5   : > { %v2120_v7 = vadd.f32 %v2119_v48, %v2089_v58  ;;  %v2104_v58 = vmul.f32 %v7196_v55, %v7196_v55 }
 0x2b7   : > { %v2121_v22 = vadd.f32 %v2120_v7, %v2090_v18  ;;  %v2105_v18 = vmul.f32 %v7200_v8, %v7200_v8 }
 0x2b9   : > { %v2122_v46 = vadd.f32 %v2121_v22, %v2091_v16  ;;  %v2106_v16 = vmul.f32 %v7204_v4, %v7204_v4 }
 0x2bb   : > { %v2123_v54 = vadd.f32 %v2122_v46, %v2092_v12 }
 0x2bd   : > { %v2124_v25 = vadd.f32 %v2123_v54, %v2093_v45 }
 0x2bf   : > { %v2125_v30 = vadd.f32 %v2124_v25, %v2094_v33 }
 0x2c1   : > { %v2126_v51 = vadd.f32 %v2125_v30, %v2095_v5 }
 0x2c3   : > { %v2127_v34 = vadd.f32 %v2126_v51, %v2096_v56 }
 0x2c5   : > { %v2128_v61 = vadd.f32 %v2127_v34, %v2097_v0 }
 0x2c7   : > { %v2129_v47 = vadd.f32 %v2128_v61, %v2098_v44 }
 0x2c9   : > { %v2130_v32 = vadd.f32 %v2129_v47, %v2099_v9 }
 0x2cb   : > { %v2131_v20 = vadd.f32 %v2130_v32, %v2100_v60 }
 0x2cd   : > { %v2132_v6 = vadd.f32 %v2131_v20, %v2101_v21 }
 0x2cf   : > { %v2133_v15 = vadd.f32 %v2132_v6, %v2102_v43 }
 0x2d1   : > { %v2134_v48 = vadd.f32 %v2133_v15, %v2103_v10 }
 0x2d3   : > { %v2135_v7 = vadd.f32 %v2134_v48, %v2104_v58  ;;  %v3432_v58 = vld [vmem:[#allocation7 + $0x368] sm:$0xff] }
 0x2d5   : > { %v2136_v22 = vadd.f32 %v2135_v7, %v2105_v18 }
 0x2d7   : > { %v2137_v12 = vadd.f32 %v2136_v22, %v2106_v16 }
 0x2d9   : > { %v2138_v46 = vrot.slane %v2137_v12, 4 }
 0x2db   : > { %v2139_v45 = vadd.f32 %v2138_v46, %v2137_v12 }
 0x2dd   : > { %v2140_v54 = vrot.slane %v2139_v45, 2 }
 0x2df   : > { %v2141_v33 = vadd.f32 %v2140_v54, %v2139_v45 }
 0x2e1   : > { %v2142_v25 = vrot.slane %v2141_v33, 1 }
 0x2e3   : > { %v2143_v5 = vadd.f32 %v2142_v25, %v2141_v33 }
 0x2e5   : > { %v2144_v30 = vmul.f32 0.00390625, %v2143_v5  ;;  %v2412_v5 = vld [vmem:[#allocation7 + $0x78] sm:$0xff] }
 0x2e7   : > { %v2145_v56 = vadd.f32 1e-05, %v2144_v30 }
 0x2e9   : > { %5153 = vrsqrt.f32 %v2145_v56 }
 0x2f6   : > { %v7354_v51 = vpop.eup %5153 }
 0x2f7   : > { %v2148_v0 = vmul.f32 %v7354_v51, %v7212_v31  ;;  %v2178_v34 = vmul.f32 %v7354_v51, %v7204_v4  ;;  %v2149_v44 = vmul.f32 %v7354_v51, %v7216_v3  ;;  %v2150_v61 = vmul.f32 %v7354_v51, %v7224_v27 }
 0x2f8   : > { %v2151_v9 = vmul.f32 %v7354_v51, %v7228_v23  ;;  %v2147_v32 = vmul.f32 %v7354_v51, %v7208_v29  ;;  %v2152_v4 = vmul.f32 %v7354_v51, %v7234_v14  ;;  %v2153_v3 = vmul.f32 %v7354_v51, %v7240_v41 }
 0x2f9   : > { %v7366_v47 = vmax.f32 %v2148_v0, 0.0  ;;  %v7368_v60 = vmax.f32 %v2178_v34, 0.0  ;;  %v7372_v31 = vmax.f32 %v2149_v44, 0.0  ;;  %v7374_v21 = vmax.f32 %v2150_v61, 0.0  ;;  %v2443_v34 = vld [vmem:[#allocation7 + $0x170] sm:$0xff] }
 0x2fa   : > { %v7380_v27 = vmax.f32 %v2151_v9, 0.0  ;;  %v7383_v20 = vmax.f32 %v2147_v32, 0.0  ;;  %v2154_v14 = vmul.f32 %v7354_v51, %v7246_v38  ;;  %v2155_v41 = vmul.f32 %v7354_v51, %v7252_v11 }
 0x2fb   : > { %9628 = vst [vmem:[#allocation25_spill] sm:$0xff] %v7366_v47  ;;  %9629 = vst [vmem:[#allocation35_spill] sm:$0xff] %v7368_v60  ;;  %v2214_v23 = vrot.slane %v7366_v47, 7  ;;  %v2275_v43 = vrot.slane %v7366_v47, 1  ;;  %v7387_v29 = vrot.slane %v7368_v60, 7  ;;  %v7390_v6 = vrot.slane %v7372_v31, 1 }
 0x2fc   : > { %9630 = vst [vmem:[#allocation28_spill] sm:$0xff] %v7372_v31  ;;  %9631 = vst [vmem:[#allocation37_spill] sm:$0xff] %v7374_v21  ;;  %2576 = vmatprep.mubr.f32.mxu0 %v7383_v20  ;;  %v7398_v10 = vrot.slane %v7383_v20, 7  ;;  %v7401_v15 = vrot.slane %v7383_v20, 1  ;;  %v7407_v18 = vrot.slane %v7374_v21, 1  ;;  %v7409_v7 = vmax.f32 %v2152_v4, 0.0 }
 0x2fd   : > { %9632 = vst [vmem:[#allocation55_spill] sm:$0xff] %v7380_v27  ;;  %9633 = vst [vmem:[#allocation56_spill] sm:$0xff] %v7383_v20  ;;  %v2329_v48 = vsel %vm349_vm0, %v2275_v43, %v7390_v6  ;;  %v7412_v38 = vrot.slane %v7372_v31, 7  ;;  %v7415_v11 = vrot.slane %v7374_v21, 7  ;;  %v2276_v16 = vrot.slane %v7380_v27, 1 }
 0x2fe   : > { %9635 = vst [vmem:[#allocation40_spill] sm:$0xff] %v7409_v7  ;;  %v7418_v22 = vmax.f32 %v2153_v3, 0.0  ;;  %v7423_v12 = vsel %vm349_vm0, %v7401_v15, %v2275_v43  ;;  %v2449_v46 = vsel %vm287_vm1, %v7387_v29, %v7398_v10  ;;  %v7432_v45 = vsel %vm287_vm1, %v7398_v10, %v2214_v23 }
 0x2ff   : > { %9637 = vst [vmem:[#allocation49_spill] sm:$0xff] %v7423_v12  ;;  %9638 = vst [vmem:[#allocation15_spill] sm:$0xff] %v7432_v45  ;;  %v2455_v54 = vsel %vm253_vm3, %v7423_v12, %v2449_v46  ;;  %4873 = vmatprep.mubr.f32.mxu1 %v7423_v12  ;;  %v7441_v25 = vsel %vm256_vm2, %v7432_v45, %v2329_v48  ;;  %v2156_v30 = vmul.f32 %v7354_v51, %v7258_v53  ;;  %v2411_v53 = vld [vmem:[#allocation7 + $0x70] sm:$0xff] }
 0x300   : > { %9636 = vst [vmem:[#allocation45_spill] sm:$0xff] %v7418_v22  ;;  %9640 = vst [vmem:[#allocation16_spill] sm:$0xff] %v7441_v25  ;;  %v2157_v56 = vmul.f32 %v7354_v51, %v7264_v2  ;;  %2577 = vmatmul.mubr.f32.vlgmr.msra.gmra.mxu0 %v2455_v54  ;;  %4874 = vmatmul.mubr.f32.vlgmr.msra.gmra.mxu1 %v7441_v25  ;;  %v7452_v0 = vsel %vm349_vm0, %v7390_v6, %v7407_v18  ;;  %v7454_v44 = vmax.f32 %v2154_v14, 0.0 }
 0x301   : > { %2581 = vmatprep.mubr.f32.mxu0 %v7366_v47  ;;  %4876 = vmatprep.mubr.f32.mxu1 %v7452_v0  ;;  %v7462_v2 = vsel %vm287_vm1, %v7412_v38, %v7415_v11  ;;  %v2327_v61 = vsel %vm349_vm0, %v7407_v18, %v2276_v16  ;;  %v2277_v9 = vrot.slane %v7409_v7, 1  ;;  %v7468_v32 = vmax.f32 %v2155_v41, 0.0  ;;  %v2410_v41 = vld [vmem:[#allocation7 + $0x68] sm:$0xff] }
 0x302   : > { %9641 = vst [vmem:[#allocation17_spill] sm:$0xff] %v7454_v44  ;;  %2963 = vmatpush1.msra.mxu1 %v2412_v5  ;;  %4922 = vmatpush3.msra.mxu0 %v7158_v49  ;;  %v2215_v4 = vrot.slane %v7380_v27, 7  ;;  %v9304_v3 = vrot.slane %v7409_v7, 7  ;;  %v2278_v43 = vrot.slane %v7418_v22, 1  ;;  %v2158_v14 = vmul.f32 %v7354_v51, %v7270_v13 }
 0x303   : > { %9642 = vst [vmem:[#allocation18_spill] sm:$0xff] %v7468_v32  ;;  %2964 = vmatprep.subr.mxu1 %v9620_v17  ;;  %4923 = vmatprep.subr.mxu0 %v2443_v34  ;;  %v7477_v48 = vmax.f32 %v2156_v30, 0.0  ;;  %v7483_v49 = vsel %vm256_vm2, %v7462_v2, %v2327_v61  ;;  %v2268_v46 = vsel %vm287_vm1, %v2214_v23, %v7412_v38  ;;  %v7488_v54 = vmax.f32 %v2157_v56, 0.0 }
 0x304   : > { %2965 = vmatpush1.msra.mxu1 %v2411_v53  ;;  %2582 = vmatmul.mubr.f32.gmra.mxu0 %v7432_v45  ;;  %9644 = vst [vmem:[#allocation31_spill] sm:$0xff] %v7483_v49  ;;  %v7494_v13 = vsel %vm349_vm0, %v2276_v16, %v2277_v9  ;;  %v2279_v5 = vrot.slane %v7454_v44, 1  ;;  %v2409_v53 = vld [vmem:[#allocation7 + $0x60] sm:$0xff]  ;;  %v7504_v23 = vsel %vm287_vm1, %v2215_v4, %v9304_v3  ;;  %v9309_v16 = vrot.slane %v7454_v44, 7 }
 0x305   : > { %9643 = vst [vmem:[#allocation21_spill] sm:$0xff] %v7477_v48  ;;  %9645 = vst [vmem:[#allocation38_spill] sm:$0xff] %v7488_v54  ;;  %4877 = vmatmul.mubr.f32.gmra.mxu1 %v7483_v49  ;;  %2966 = vmatprep.subr.mxu1 %v9620_v17  ;;  %v2325_v56 = vsel %vm349_vm0, %v2277_v9, %v2278_v43  ;;  %v2280_v61 = vrot.slane %v7468_v32, 1  ;;  %v2159_v30 = vmul.f32 %v7354_v51, %v7276_v50  ;;  %v2408_v50 = vld [vmem:[#allocation7 + $0x58] sm:$0xff] }
 0x306   : > { %9646 = vst [vmem:[#allocation42_spill] sm:$0xff] %v7494_v13  ;;  %2586 = vmatprep.mubr.f32.mxu0 %v7372_v31  ;;  %4879 = vmatprep.mubr.f32.mxu1 %v7494_v13  ;;  %9647 = vst [vmem:[#allocation46_spill] sm:$0xff] %v7504_v23  ;;  %v7515_v49 = vsel %vm253_vm3, %v7452_v0, %v2268_v46  ;;  %v2160_v3 = vmul.f32 %v7354_v51, %v7282_v62  ;;  %v7521_v25 = vmax.f32 %v2158_v14, 0.0  ;;  %v2407_v14 = vld [vmem:[#allocation7 + $0x50] sm:$0xff] }
 0x307   : > { %2967 = vmatpush1.msra.mxu1 %v2410_v41  ;;  %9648 = vst [vmem:[#allocation48_spill] sm:$0xff] %v7515_v49  ;;  %4924 = vmatpush3.msra.mxu0 %v2443_v34  ;;  %v2161_v9 = vmul.f32 %v7354_v51, %v7288_v19  ;;  %v7528_v41 = vsel %vm256_vm2, %v7504_v23, %v2325_v56  ;;  %v2281_v19 = vrot.slane %v7477_v48, 1  ;;  %v9651_v46 = vrot.slane %v7418_v22, 7 }
 0x308   : > { %2968 = vmatprep.subr.mxu1 %v9620_v17  ;;  %2587 = vmatmul.mubr.f32.gmra.mxu0 %v7515_v49  ;;  %9649 = vst [vmem:[#allocation50_spill] sm:$0xff] %v7528_v41  ;;  %v7533_v62 = vsel %vm349_vm0, %v2278_v43, %v2279_v5  ;;  %v2323_v43 = vsel %vm349_vm0, %v2279_v5, %v2280_v61  ;;  %v2282_v34 = vrot.slane %v7488_v54, 1  ;;  %v7551_v49 = vmax.f32 %v2159_v30, 0.0 }
 0x309   : > { %2969 = vmatpush1.msra.mxu1 %v2409_v53  ;;  %2591 = vmatprep.mubr.f32.mxu0 %v7374_v21  ;;  %9650 = vst [vmem:[#allocation53_spill] sm:$0xff] %v7533_v62  ;;  %v7545_v53 = vsel %vm287_vm1, %v9651_v46, %v9309_v16  ;;  %v2266_v46 = vsel %vm287_vm1, %v7415_v11, %v2215_v4  ;;  %v7561_v16 = vmax.f32 %v2160_v3, 0.0  ;;  %v7563_v56 = vmax.f32 %v2161_v9, 0.0 }
 0x30a   : > { %4880 = vmatmul.mubr.f32.gmra.mxu1 %v7528_v41  ;;  %2970 = vmatprep.subr.mxu1 %v9620_v17  ;;  %9652 = vst [vmem:[#allocation57_spill] sm:$0xff] %v7545_v53  ;;  %9653 = vst [vmem:[#allocation60_spill] sm:$0xff] %v7551_v49  ;;  %v2406_v41 = vld [vmem:[#allocation7 + $0x48] sm:$0xff]  ;;  %v2162_v5 = vmul.f32 %v7354_v51, %v7294_v35  ;;  %v7568_v30 = vsel %vm256_vm2, %v7545_v53, %v2323_v43  ;;  %v2405_v35 = vld [vmem:[#allocation7 + $0x40] sm:$0xff]  ;;  %v9656_v3 = vrot.slane %v7477_v48, 7 }
 0x30b   : > { %4882 = vmatprep.mubr.f32.mxu1 %v7533_v62  ;;  %2971 = vmatpush1.msra.mxu1 %v2408_v50  ;;  %9654 = vst [vmem:[#allocation14_spill] sm:$0xff] %v7568_v30  ;;  %v7575_v4 = vsel %vm349_vm0, %v2280_v61, %v2281_v19  ;;  %v9657_v9 = vrot.slane %v7468_v32, 7  ;;  %v2442_v43 = vld [vmem:[#allocation7 + $0x168] sm:$0xff]  ;;  %v7592_v61 = vsel %vm253_vm3, %v7494_v13, %v2266_v46  ;;  %v9324_v45 = vrot.slane %v7521_v25, 7 }
 0x30c   : > { %2972 = vmatprep.subr.mxu1 %v9620_v17  ;;  %2592 = vmatmul.mubr.f32.gmra.mxu0 %v7462_v2  ;;  %9655 = vst [vmem:[#allocation61_spill] sm:$0xff] %v7575_v4  ;;  %9659 = vst [vmem:[#allocation71_spill] sm:$0xff] %v7592_v61  ;;  %v2166_v12 = vmul.f32 %v7354_v51, %v7318_v24 }
 0x30d   : > { %2973 = vmatpush1.msra.mxu1 %v2407_v14  ;;  %2596 = vmatprep.mubr.f32.mxu0 %v7380_v27  ;;  %v7583_v50 = vsel %vm287_vm1, %v9657_v9, %v9656_v3  ;;  %v2321_v14 = vsel %vm349_vm0, %v2281_v19, %v2282_v34  ;;  %v2284_v3 = vrot.slane %v7551_v49, 1  ;;  %v2163_v19 = vmul.f32 %v7354_v51, %v7300_v42  ;;  %v2404_v9 = vld [vmem:[#allocation7 + $0x38] sm:$0xff] }
 0x30e   : > { %4883 = vmatmul.mubr.f32.gmra.mxu1 %v7568_v30  ;;  %2974 = vmatprep.subr.mxu1 %v9620_v17  ;;  %9658 = vst [vmem:[#allocation64_spill] sm:$0xff] %v7583_v50  ;;  %v2283_v30 = vrot.slane %v7521_v25, 1  ;;  %v7606_v46 = vsel %vm256_vm2, %v7583_v50, %v2321_v14  ;;  %v7608_v27 = vmax.f32 %v2162_v5, 0.0  ;;  %v2403_v14 = vld [vmem:[#allocation7 + $0x30] sm:$0xff]  ;;  %v9662_v5 = vrot.slane %v7488_v54, 7 }
 0x30f   : > { %4885 = vmatprep.mubr.f32.mxu1 %v7575_v4  ;;  %2975 = vmatpush1.msra.mxu1 %v2406_v41  ;;  %v2164_v41 = vmul.f32 %v7354_v51, %v7306_v59  ;;  %9660 = vst [vmem:[#allocation22_spill] sm:$0xff] %v7606_v46  ;;  %v2285_v59 = vrot.slane %v7561_v16, 1  ;;  %v7634_v47 = vmax.f32 %v2163_v19, 0.0 }
 0x310   : > { %2976 = vmatprep.subr.mxu1 %v9620_v17  ;;  %2597 = vmatmul.mubr.f32.gmra.mxu0 %v7592_v61  ;;  %v7614_v42 = vsel %vm349_vm0, %v2282_v34, %v2283_v30  ;;  %v2319_v34 = vsel %vm349_vm0, %v2283_v30, %v2284_v3  ;;  %v2165_v61 = vmul.f32 %v7354_v51, %v7312_v39  ;;  %v9663_v30 = vrot.slane %v7418_v22, 7 }
 0x311   : > { %2977 = vmatpush1.msra.mxu1 %v2405_v35  ;;  %4925 = vmatprep.subr.mxu0 %v2442_v43  ;;  %9661 = vst [vmem:[#allocation67_spill] sm:$0xff] %v7614_v42  ;;  %v2286_v35 = vrot.slane %v7563_v56, 1  ;;  %v7646_v39 = vmax.f32 %v2164_v41, 0.0  ;;  %v7656_v24 = vsel %vm349_vm0, %v2284_v3, %v2285_v59  ;;  %v2287_v19 = vrot.slane %v7608_v27, 1  ;;  %v2441_v3 = vld [vmem:[#allocation7 + $0x160] sm:$0xff] }
 0x312   : > { %4886 = vmatmul.mubr.f32.gmra.mxu1 %v7606_v46  ;;  %2978 = vmatprep.subr.mxu1 %v9620_v17  ;;  %v7626_v46 = vsel %vm287_vm1, %v9662_v5, %v9324_v45  ;;  %v2402_v5 = vld [vmem:[#allocation7 + $0x28] sm:$0xff]  ;;  %v9664_v45 = vrot.slane %v7409_v7, 7  ;;  %9667 = vst [vmem:[#allocation66_spill] sm:$0xff] %v7656_v24  ;;  %v9668_v41 = vrot.slane %v7561_v16, 7 }
 0x313   : > { %2601 = vmatprep.mubr.f32.mxu0 %v7409_v7  ;;  %4888 = vmatprep.mubr.f32.mxu1 %v7614_v42  ;;  %9665 = vst [vmem:[#allocation19_spill] sm:$0xff] %v7646_v39  ;;  %v2170_v7 = vmul.f32 %v7354_v51, %v7171_v26 }
 0x314   : > { %2979 = vmatpush1.msra.mxu1 %v2404_v9  ;;  %4926 = vmatpush3.msra.mxu0 %v2442_v43  ;;  %v2264_v13 = vsel %vm287_vm1, %v9664_v45, %v9663_v30  ;;  %v7651_v43 = vsel %vm256_vm2, %v7626_v46, %v2319_v34  ;;  %v2401_v45 = vld [vmem:[#allocation7 + $0x20] sm:$0xff]  ;;  %v9669_v9 = vrot.slane %v7551_v49, 7  ;;  %v2317_v34 = vsel %vm349_vm0, %v2285_v59, %v2286_v35 }
 0x315   : > { %2980 = vmatprep.subr.mxu1 %v9620_v17  ;;  %2602 = vmatmul.mubr.f32.gmra.mxu0 %v7504_v23  ;;  %9666 = vst [vmem:[#allocation59_spill] sm:$0xff] %v7651_v43  ;;  %v7679_v23 = vsel %vm253_vm3, %v7533_v62, %v2264_v13  ;;  %v2167_v59 = vmul.f32 %v7354_v51, %v7324_v63  ;;  %v2400_v63 = vld [vmem:[#allocation7 + $0x18] sm:$0xff]  ;;  %v7697_v30 = vmax.f32 %v2166_v12, 0.0  ;;  %v2399_v12 = vld [vmem:[#allocation7 + $0x10] sm:$0xff] }
 0x316   : > { %2981 = vmatpush1.msra.mxu1 %v2403_v14  ;;  %2606 = vmatprep.mubr.f32.mxu0 %v7418_v22  ;;  %v7667_v14 = vsel %vm287_vm1, %v9669_v9, %v9668_v41  ;;  %v9335_v22 = vrot.slane %v7608_v27, 7  ;;  %9671 = vst [vmem:[#allocation68_spill] sm:$0xff] %v7679_v23  ;;  %v2288_v41 = vrot.slane %v7634_v47, 1  ;;  %v2176_v9 = vmul.f32 %v7354_v51, %v7196_v55 }
 0x317   : > { %4889 = vmatmul.mubr.f32.gmra.mxu1 %v7651_v43  ;;  %2982 = vmatprep.subr.mxu1 %v9620_v17  ;;  %v7673_v43 = vmax.f32 %v2165_v61, 0.0  ;;  %v2168_v61 = vmul.f32 %v7354_v51, %v7163_v28  ;;  %v7695_v13 = vsel %vm256_vm2, %v7667_v14, %v2317_v34  ;;  %9673 = vst [vmem:[#allocation70_spill] sm:$0xff] %v7697_v30 }
 0x318   : > { %4891 = vmatprep.mubr.f32.mxu1 %v7656_v24  ;;  %2983 = vmatpush1.msra.mxu1 %v2402_v5  ;;  %v2175_v5 = vmul.f32 %v7354_v51, %v7192_v37  ;;  %9672 = vst [vmem:[#allocation23_spill] sm:$0xff] %v7695_v13  ;;  %v7703_v28 = vsel %vm349_vm0, %v2286_v35, %v2287_v19  ;;  %v9675_v37 = vrot.slane %v7563_v56, 7  ;;  %v2398_v35 = vld [vmem:[#allocation7 + $0x8] sm:$0xff] }
 0x319   : > { %9670 = vst [vmem:[#allocation20_spill] sm:$0xff] %v7673_v43  ;;  %2984 = vmatprep.subr.mxu1 %v9620_v17  ;;  %2607 = vmatmul.mubr.f32.gmra.mxu0 %v7679_v23  ;;  %9674 = vst [vmem:[#allocation69_spill] sm:$0xff] %v7703_v28  ;;  %v2315_v34 = vsel %vm349_vm0, %v2287_v19, %v2288_v41  ;;  %v2290_v62 = vrot.slane %v7673_v43, 1  ;;  %v7725_v23 = vmax.f32 %v2176_v9, 0.0  ;;  %v7729_v20 = vmax.f32 %v2168_v61, 0.0 }
 0x31a   : > { %2985 = vmatpush1.msra.mxu1 %v2401_v45  ;;  %4927 = vmatprep.subr.mxu0 %v2441_v3  ;;  %v7711_v55 = vsel %vm287_vm1, %v9675_v37, %v9335_v22  ;;  %v2289_v45 = vrot.slane %v7646_v39, 1  ;;  %v2169_v37 = vmul.f32 %v7354_v51, %v7167_v1  ;;  %v7723_v22 = vmax.f32 %v2167_v59, 0.0 }
 0x31b   : > { %4892 = vmatmul.mubr.f32.gmra.mxu1 %v7695_v13  ;;  %2986 = vmatprep.subr.mxu1 %v9620_v17  ;;  %v9343_v13 = vrot.slane %v7646_v39, 7  ;;  %9677 = vst [vmem:[#allocation44_spill] sm:$0xff] %v7725_v23  ;;  %v7731_v19 = vmax.f32 %v2175_v5, 0.0  ;;  %v9679_v1 = vrot.slane %v7468_v32, 7  ;;  %v9680_v59 = vrot.slane %v7454_v44, 7 }
 0x31c   : > { %2611 = vmatprep.mubr.f32.mxu0 %v7454_v44  ;;  %4894 = vmatprep.mubr.f32.mxu1 %v7703_v28  ;;  %9676 = vst [vmem:[#allocation54_spill] sm:$0xff] %v7723_v22  ;;  %v7744_v26 = vsel %vm256_vm2, %v7711_v55, %v2315_v34  ;;  %v2291_v61 = vrot.slane %v7697_v30, 1  ;;  %v7770_v5 = vsel %vm287_vm1, %v7415_v11, %v7398_v10 }
 0x31d   : > { %2987 = vmatpush1.msra.mxu1 %v2400_v63  ;;  %4928 = vmatpush3.msra.mxu0 %v2441_v3  ;;  %9678 = vst [vmem:[#allocation36_spill] sm:$0xff] %v7731_v19  ;;  %v2262_v9 = vsel %vm287_vm1, %v9680_v59, %v9679_v1  ;;  %9681 = vst [vmem:[#allocation29_spill] sm:$0xff] %v7744_v26  ;;  %v7749_v3 = vsel %vm349_vm0, %v2288_v41, %v2289_v45  ;;  %v2397_v63 = vld [vmem:[#allocation7] sm:$0xff]  ;;  %v2440_v1 = vld [vmem:[#allocation7 + $0x158] sm:$0xff]  ;;  %v7789_v10 = vrot.slane %v7731_v19, 1 }
 0x31e   : > { %2988 = vmatprep.subr.mxu1 %v9620_v17  ;;  %2612 = vmatmul.mubr.f32.gmra.mxu0 %v7545_v53  ;;  %v2313_v41 = vsel %vm349_vm0, %v2289_v45, %v2290_v62  ;;  %v2292_v45 = vrot.slane %v7723_v22, 1  ;;  %v2171_v59 = vmul.f32 %v7354_v51, %v7176_v36  ;;  %v7792_v11 = vrot.slane %v7731_v19, 7 }
 0x31f   : > { %2989 = vmatpush1.msra.mxu1 %v2399_v12  ;;  %2616 = vmatprep.mubr.f32.mxu0 %v7468_v32  ;;  %v9682_v12 = vrot.slane %v7634_v47, 7 }
 0x320   : > { %4895 = vmatmul.mubr.f32.gmra.mxu1 %v7744_v26  ;;  %2990 = vmatprep.subr.mxu1 %v9620_v17  ;;  %v7772_v26 = vmax.f32 %v2169_v37, 0.0  ;;  %v2172_v37 = vmul.f32 %v7354_v51, %v7180_v40  ;;  %v9688_v40 = vrot.slane %v7697_v30, 7  ;;  %v2311_v19 = vsel %vm349_vm0, %v2291_v61, %v2292_v45 }
 0x321   : > { %v7761_v34 = vsel %vm287_vm1, %v9682_v12, %v9343_v13  ;;  %4897 = vmatprep.mubr.f32.mxu1 %v7749_v3  ;;  %2991 = vmatpush1.msra.mxu1 %v2398_v35  ;;  %v7778_v12 = vsel %vm253_vm3, %v7575_v4, %v2262_v9  ;;  %v7782_v13 = vrot.slane %v7725_v23, 1  ;;  %v7795_v35 = vrot.slane %v7368_v60, 1  ;;  %v2428_v4 = vld [vmem:[#allocation7 + $0xf8] sm:$0xff] }
 0x322   : > { %9683 = vst [vmem:[#allocation58_spill] sm:$0xff] %v7761_v34  ;;  %9684 = vst [vmem:[#allocation47_spill] sm:$0xff] %v7772_v26  ;;  %2992 = vmatprep.subr.mxu1 %v9620_v17  ;;  %2617 = vmatmul.mubr.f32.gmra.mxu0 %v7778_v12  ;;  %v7799_v9 = vmax.f32 %v2170_v7, 0.0  ;;  %v7804_v36 = vsel %vm256_vm2, %v7761_v34, %v2313_v41  ;;  %v7811_v60 = vsel %vm349_vm0, %v2290_v62, %v2291_v61  ;;  %v2427_v62 = vld [vmem:[#allocation7 + $0xf0] sm:$0xff] }
 0x323   : > { %9685 = vst [vmem:[#allocation41_spill] sm:$0xff] %v7778_v12  ;;  %2993 = vmatpush1.msra.mxu1 %v2397_v63  ;;  %9687 = vst [vmem:[#allocation32_spill] sm:$0xff] %v7804_v36  ;;  %4929 = vmatprep.subr.mxu0 %v2440_v1  ;;  %v2293_v12 = vrot.slane %v7729_v20, 1  ;;  %v9689_v7 = vrot.slane %v7673_v43, 7  ;;  %v7842_v41 = vmax.f32 %v2171_v59, 0.0  ;;  %v7848_v61 = vsel %vm349_vm0, %v7795_v35, %v7789_v10 }
 0x324   : > { %9686 = vst [vmem:[#allocation62_spill] sm:$0xff] %v7799_v9  ;;  %4898 = vmatmul.mubr.f32.gmra.mxu1 %v7804_v36  ;;  %2994 = vmatprep.subr.mxu1 %v9620_v17  ;;  %v7826_v36 = vsel %vm349_vm0, %v7407_v18, %v7401_v15  ;;  %v2173_v18 = vmul.f32 %v7354_v51, %v7184_v57  ;;  %9694 = vst [vmem:[#allocation43_spill] sm:$0xff] %v7848_v61  ;;  %v2426_v57 = vld [vmem:[#allocation7 + $0xe8] sm:$0xff]  ;;  %v7866_v61 = vmax.f32 %v2172_v37, 0.0  ;;  %v2425_v37 = vld [vmem:[#allocation7 + $0xe0] sm:$0xff] }
 0x325   : > { %v7819_v63 = vsel %vm287_vm1, %v9689_v7, %v9688_v40  ;;  %9691 = vst [vmem:[#allocation65_spill] sm:$0xff] %v7826_v36  ;;  %2621 = vmatprep.mubr.f32.mxu0 %v7477_v48  ;;  %4900 = vmatprep.mubr.f32.mxu1 %v7811_v60  ;;  %v2294_v40 = vrot.slane %v7772_v26, 1  ;;  %v7838_v7 = vsel %vm349_vm0, %v7782_v13, %v7390_v6  ;;  %9693 = vst [vmem:[#allocation63_spill] sm:$0xff] %v7842_v41 }
 0x326   : > { %9690 = vst [vmem:[#allocation30_spill] sm:$0xff] %v7819_v63  ;;  %9692 = vst [vmem:[#allocation39_spill] sm:$0xff] %v7838_v7  ;;  %2995 = vmatpush2.msra.mxu1 %v2428_v4  ;;  %4930 = vmatpush3.msra.mxu0 %v2440_v1  ;;  %v7854_v32 = vsel %vm287_vm1, %v7387_v29, %v7792_v11  ;;  %v2174_v6 = vmul.f32 %v7354_v51, %v7188_v52  ;;  %v9696_v4 = vrot.slane %v7488_v54, 7 }
 0x327   : > { %9695 = vst [vmem:[#allocation52_spill] sm:$0xff] %v7854_v32  ;;  %2996 = vmatprep.subr.mxu1 %v9620_v17  ;;  %2622 = vmatmul.mubr.f32.gmra.mxu0 %v7583_v50  ;;  %v9697_v1 = vrot.slane %v7477_v48, 7  ;;  %9698 = vst [vmem:[#allocation26_spill] sm:$0xff] %v7866_v61  ;;  %v7871_v32 = vsel %vm256_vm2, %v7819_v63, %v2311_v19  ;;  %v7876_v52 = vsel %vm349_vm0, %v2292_v45, %v2293_v12  ;;  %v2439_v45 = vld [vmem:[#allocation7 + $0x150] sm:$0xff] }
 0x328   : > { %2997 = vmatpush2.msra.mxu1 %v2427_v62  ;;  %9699 = vst [vmem:[#allocation51_spill] sm:$0xff] %v7871_v32  ;;  %2626 = vmatprep.mubr.f32.mxu0 %v7488_v54  ;;  %v2295_v7 = vrot.slane %v7799_v9, 1  ;;  %v9700_v62 = vrot.slane %v7729_v20, 7  ;;  %v9367_v36 = vrot.slane %v7772_v26, 7  ;;  %v9366_v54 = vrot.slane %v7799_v9, 7 }
 0x329   : > { %v2260_v59 = vsel %vm287_vm1, %v9697_v1, %v9696_v4  ;;  %4901 = vmatmul.mubr.f32.gmra.mxu1 %v7871_v32  ;;  %2998 = vmatprep.subr.mxu1 %v9620_v17  ;;  %v9701_v4 = vrot.slane %v7723_v22, 7  ;;  %v2309_v1 = vsel %vm349_vm0, %v2293_v12, %v2294_v40  ;;  %v7893_v32 = vmax.f32 %v2173_v18, 0.0  ;;  %v2424_v18 = vld [vmem:[#allocation7 + $0xd8] sm:$0xff] }
 0x32a   : > { %4903 = vmatprep.mubr.f32.mxu1 %v7876_v52  ;;  %2999 = vmatpush2.msra.mxu1 %v2426_v57  ;;  %v7899_v50 = vsel %vm253_vm3, %v7614_v42, %v2260_v59  ;;  %v7909_v57 = vmax.f32 %v2174_v6, 0.0  ;;  %v7915_v59 = vsel %vm349_vm0, %v2294_v40, %v2295_v7  ;;  %v2423_v6 = vld [vmem:[#allocation7 + $0xd0] sm:$0xff] }
 0x32b   : > { %v7887_v19 = vsel %vm287_vm1, %v9701_v4, %v9700_v62  ;;  %9703 = vst [vmem:[#allocation33_spill] sm:$0xff] %v7893_v32  ;;  %9704 = vst [vmem:[#allocation34_spill] sm:$0xff] %v7899_v50  ;;  %v2296_v62 = vrot.slane %v7842_v41, 1  ;;  %3000 = vmatprep.subr.mxu1 %v9620_v17  ;;  %2627 = vmatmul.mubr.f32.gmra.mxu0 %v7899_v50  ;;  %v2297_v4 = vrot.slane %v7866_v61, 1  ;;  %v2298_v42 = vrot.slane %v7893_v32, 1 }
 0x32c   : > { %9702 = vst [vmem:[#allocation24_spill] sm:$0xff] %v7887_v19  ;;  %3001 = vmatpush2.msra.mxu1 %v2425_v37  ;;  %v7907_v12 = vsel %vm256_vm2, %v7887_v19, %v2309_v1  ;;  %4931 = vmatprep.subr.mxu0 %v2439_v45  ;;  %9706 = vst [vmem:[#allocation13_spill] sm:$0xff] %v7909_v57  ;;  %v7923_v37 = vsel %vm287_vm1, %v9367_v36, %v9366_v54  ;;  %v2422_v36 = vld [vmem:[#allocation7 + $0xc8] sm:$0xff]  ;;  %v9708_v50 = vrot.slane %v7551_v49, 7 }
 0x32d   : > { %9705 = vst [vmem:[#allocation27_spill] sm:$0xff] %v7907_v12  ;;  %4904 = vmatmul.mubr.f32.gmra.mxu1 %v7907_v12  ;;  %3002 = vmatprep.subr.mxu1 %v9620_v17  ;;  %9707 = vst [vmem:[#allocation72_spill] sm:$0xff] %v7923_v37  ;;  %v2307_v1 = vsel %vm349_vm0, %v2295_v7, %v2296_v62  ;;  %v2177_v54 = vmul.f32 %v7354_v51, %v7200_v8  ;;  %v9709_v7 = vrot.slane %v7521_v25, 7  ;;  %v2421_v51 = vld [vmem:[#allocation7 + $0xc0] sm:$0xff] }
 0x32e   : > { %2631 = vmatprep.mubr.f32.mxu0 %v7521_v25  ;;  %4906 = vmatprep.mubr.f32.mxu1 %v7915_v59  ;;  %v7946_v12 = vsel %vm256_vm2, %v7923_v37, %v2307_v1  ;;  %v7953_v8 = vsel %vm349_vm0, %v2296_v62, %v2297_v4  ;;  %v2438_v1 = vld [vmem:[#allocation7 + $0x148] sm:$0xff] }
 0x32f   : > { %3003 = vmatpush2.msra.mxu1 %v2424_v18  ;;  %4932 = vmatpush3.msra.mxu0 %v2439_v45  ;;  %v2258_v40 = vsel %vm287_vm1, %v9709_v7, %v9708_v50  ;;  %9710 = vst [vmem:[#allocation73_spill] sm:$0xff] %v7946_v12  ;;  %v9711_v45 = vrot.slane %v7866_v61, 7  ;;  %v9712_v50 = vrot.slane %v7842_v41, 7  ;;  %v2299_v7 = vrot.slane %v7909_v57, 1 }
 0x330   : > { %3004 = vmatprep.subr.mxu1 %v9620_v17  ;;  %2632 = vmatmul.mubr.f32.gmra.mxu0 %v7626_v46  ;;  %v7972_v62 = vsel %vm253_vm3, %v7656_v24, %v2258_v40  ;;  %v2419_v40 = vld [vmem:[#allocation7 + $0xb0] sm:$0xff]  ;;  %v9717_v24 = vrot.slane %v7563_v56, 7 }
 0x331   : > { %3005 = vmatpush2.msra.mxu1 %v2423_v6  ;;  %2636 = vmatprep.mubr.f32.mxu0 %v7551_v49  ;;  %v7961_v18 = vsel %vm287_vm1, %v9712_v50, %v9711_v45  ;;  %v2305_v6 = vsel %vm349_vm0, %v2297_v4, %v2298_v42  ;;  %v9379_v49 = vrot.slane %v7893_v32, 7  ;;  %v9378_v45 = vrot.slane %v7909_v57, 7 }
 0x332   : > { %4907 = vmatmul.mubr.f32.gmra.mxu1 %v7946_v12  ;;  %3006 = vmatprep.subr.mxu1 %v9620_v17  ;;  %9713 = vst [vmem:[#allocation74_spill] sm:$0xff] %v7961_v18  ;;  %v7966_v12 = vmax.f32 %v2177_v54, 0.0  ;;  %v7981_v54 = vsel %vm256_vm2, %v7961_v18, %v2305_v6  ;;  %v7987_v4 = vsel %vm349_vm0, %v2298_v42, %v2299_v7  ;;  %v8003_v42 = vrot.slane %v7725_v23, 7 }
 0x333   : > { %4909 = vmatprep.mubr.f32.mxu1 %v7953_v8  ;;  %3007 = vmatpush2.msra.mxu1 %v2422_v36  ;;  %9715 = vst [vmem:[#allocation76_spill] sm:$0xff] %v7981_v54  ;;  %v2420_v36 = vld [vmem:[#allocation7 + $0xb8] sm:$0xff]  ;;  %v2303_v50 = vsel %vm349_vm0, %v2299_v7, %v7789_v10 }
 0x334   : > { %9714 = vst [vmem:[#allocation75_spill] sm:$0xff] %v7966_v12  ;;  %3008 = vmatprep.subr.mxu1 %v9620_v17  ;;  %2637 = vmatmul.mubr.f32.gmra.mxu0 %v7972_v62  ;;  %v2450_v6 = vrot.slane %v7966_v12, 1 }
 0x335   : > { %3009 = vmatpush2.msra.mxu1 %v2421_v51  ;;  %4933 = vmatprep.subr.mxu0 %v2438_v1  ;;  %v7997_v51 = vsel %vm287_vm1, %v9379_v49, %v9378_v45  ;;  %v9718_v45 = vrot.slane %v7561_v16, 7 }
 0x336   : > { %4910 = vmatmul.mubr.f32.gmra.mxu1 %v7981_v54  ;;  %3010 = vmatprep.subr.mxu1 %v9620_v17  ;;  %9716 = vst [vmem:[#allocation77_spill] sm:$0xff] %v7997_v51  ;;  %v2418_v54 = vld [vmem:[#allocation7 + $0xa8] sm:$0xff]  ;;  %v8017_v7 = vsel %vm256_vm2, %v7997_v51, %v2303_v50  ;;  %v9385_v50 = vrot.slane %v7966_v12, 7 }
 0x337   : > { %2641 = vmatprep.mubr.f32.mxu0 %v7561_v16  ;;  %4912 = vmatprep.mubr.f32.mxu1 %v7987_v4  ;;  %v2256_v49 = vsel %vm287_vm1, %v9718_v45, %v9717_v24  ;;  %9719 = vst [vmem:[#allocation78_spill] sm:$0xff] %v8017_v7  ;;  %v8032_v24 = vsel %vm287_vm1, %v7792_v11, %v8003_v42 }
 0x338   : > { %3011 = vmatpush2.msra.mxu1 %v2420_v36  ;;  %4934 = vmatpush3.msra.mxu0 %v2438_v1  ;;  %v8026_v1 = vsel %vm349_vm0, %v7789_v10, %v7782_v13  ;;  %v2417_v36 = vld [vmem:[#allocation7 + $0xa0] sm:$0xff]  ;;  %v2453_v45 = vsel %vm349_vm0, %v7782_v13, %v2450_v6  ;;  %v8041_v10 = vsel %vm253_vm3, %v7703_v28, %v2256_v49  ;;  %v9722_v28 = vrot.slane %v7608_v27, 7 }
 0x339   : > { %3012 = vmatprep.subr.mxu1 %v9620_v17  ;;  %2642 = vmatmul.mubr.f32.gmra.mxu0 %v7667_v14  ;;  %v8049_v13 = vsel %vm256_vm2, %v8032_v24, %v2453_v45  ;;  %v8056_v49 = vsel %vm349_vm0, %v2450_v6, %v7795_v35  ;;  %v2454_v45 = vsel %vm349_vm0, %v7795_v35, %v7401_v15  ;;  %v2414_v6 = vld [vmem:[#allocation7 + $0x88] sm:$0xff]  ;;  %v2413_v15 = vld [vmem:[#allocation7 + $0x80] sm:$0xff] }
 0x33a   : > { %3013 = vmatpush2.msra.mxu1 %v2419_v40  ;;  %2646 = vmatprep.mubr.f32.mxu0 %v7563_v56  ;;  %v2437_v40 = vld [vmem:[#allocation7 + $0x140] sm:$0xff]  ;;  %9720 = vst [vmem:[#allocation79_spill] sm:$0xff] %v8049_v13  ;;  %v2271_v35 = vsel %vm287_vm1, %v8003_v42, %v7412_v38  ;;  %v2435_v38 = vld [vmem:[#allocation7 + $0x130] sm:$0xff] }
 0x33b   : > { %4913 = vmatmul.mubr.f32.gmra.mxu1 %v8017_v7  ;;  %3014 = vmatprep.subr.mxu1 %v9620_v17  ;;  %v2416_v7 = vld [vmem:[#allocation7 + $0x98] sm:$0xff] }
 0x33c   : > { %4915 = vmatprep.mubr.f32.mxu1 %v8026_v1  ;;  %3015 = vmatpush2.msra.mxu1 %v2418_v54  ;;  %v2415_v54 = vld [vmem:[#allocation7 + $0x90] sm:$0xff] }
 0x33d   : > { %3016 = vmatprep.subr.mxu1 %v9620_v17  ;;  %2647 = vmatmul.mubr.f32.gmra.mxu0 %v8041_v10 }
 0x33e   : > { %3017 = vmatpush2.msra.mxu1 %v2417_v36  ;;  %4935 = vmatprep.subr.mxu0 %v2437_v40  ;;  %v8065_v36 = vsel %vm287_vm1, %v9385_v50, %v7387_v29 }
 0x33f   : > { %4916 = vmatmul.mubr.f32.gmra.mxu1 %v8049_v13  ;;  %3018 = vmatprep.subr.mxu1 %v9620_v17  ;;  %v9721_v13 = vrot.slane %v7634_v47, 7  ;;  %v2462_v50 = vsel %vm256_vm2, %v8065_v36, %v2454_v45 }
 0x340   : > { %2651 = vmatprep.mubr.f32.mxu0 %v7608_v27  ;;  %4918 = vmatprep.mubr.f32.mxu1 %v8056_v49 }
 0x341   : > { %3019 = vmatpush2.msra.mxu1 %v2416_v7  ;;  %4936 = vmatpush3.msra.mxu0 %v2437_v40  ;;  %v2254_v29 = vsel %vm287_vm1, %v9722_v28, %v9721_v13  ;;  %v2436_v7 = vld [vmem:[#allocation7 + $0x138] sm:$0xff]  ;;  %v8099_v40 = vsel %vm253_vm3, %v7452_v0, %v2271_v35  ;;  %v9724_v13 = vrot.slane %v7673_v43, 7 }
 0x342   : > { %3020 = vmatprep.subr.mxu1 %v9620_v17  ;;  %2652 = vmatmul.mubr.f32.gmra.mxu0 %v7711_v55  ;;  %v8092_v28 = vsel %vm253_vm3, %v7749_v3, %v2254_v29  ;;  %9723 = vst [vmem:[#allocation80_spill] sm:$0xff] %v8099_v40  ;;  %v9726_v29 = vld [vmem:[#allocation56_spill] sm:$0xff]  ;;  %v2432_v35 = vld [vmem:[#allocation7 + $0x118] sm:$0xff] }
 0x343   : > { %3021 = vmatpush2.msra.mxu1 %v2415_v54  ;;  %2656 = vmatprep.mubr.f32.mxu0 %v7634_v47  ;;  %v9725_v54 = vrot.slane %v7646_v39, 7 }
 0x344   : > { %4919 = vmatmul.mubr.f32.gmra.mxu1 %v2462_v50  ;;  %3022 = vmatprep.subr.mxu1 %v9620_v17  ;;  %v2434_v50 = vld [vmem:[#allocation7 + $0x128] sm:$0xff] }
 0x345   : > { %3023 = vmatpush2.msra.mxu1 %v2414_v6  ;;  %3026 = vmatprep.mubr.f32.mxu1 %v7372_v31  ;;  %v2252_v45 = vsel %vm287_vm1, %v9725_v54, %v9724_v13  ;;  %v2433_v6 = vld [vmem:[#allocation7 + $0x120] sm:$0xff]  ;;  %v2431_v13 = vld [vmem:[#allocation7 + $0x110] sm:$0xff]  ;;  %v9729_v54 = vld [vmem:[#allocation25_spill] sm:$0xff] }
 0x346   : > { %3024 = vmatprep.subr.mxu1 %v9620_v17  ;;  %2657 = vmatmul.mubr.f32.gmra.mxu0 %v8092_v28 }
 0x347   : > { %3025 = vmatpush2.msra.mxu1 %v2413_v15  ;;  %4937 = vmatprep.subr.mxu0 %v2436_v7  ;;  %v8117_v15 = vsel %vm253_vm3, %v7811_v60, %v2252_v45  ;;  %v2430_v45 = vld [vmem:[#allocation7 + $0x108] sm:$0xff] }
 0x348   : > { %3027 = vmatmul.mubr.f32.vlgmr.msra.gmra.mxu1 %v8099_v40  ;;  %2661 = vmatprep.mubr.f32.mxu0 %v7646_v39  ;;  %9727 = vst [vmem:[#allocation56_spill] sm:$0xff] %v8117_v15 }
 0x349   : > { %3031 = vmatprep.mubr.f32.mxu1 %v7374_v21  ;;  %4938 = vmatpush3.msra.mxu0 %v2436_v7  ;;  %v9728_v7 = vld [vmem:[#allocation49_spill] sm:$0xff] }
 0x34a   : > { %2662 = vmatmul.mubr.f32.gmra.mxu0 %v7761_v34  ;;  %4939 = vmatprep.subr.mxu0 %v2435_v38 }
 0x34b   : > { %2666 = vmatprep.mubr.f32.mxu0 %v7673_v43  ;;  %4940 = vmatpush3.msra.mxu0 %v2435_v38  ;;  %v2335_v38 = vsel %vm253_vm3, %v9728_v7, %v7770_v5  ;;  %v2429_v5 = vld [vmem:[#allocation7 + $0x100] sm:$0xff] }
 0x34c   : > { %3032 = vmatmul.mubr.f32.gmra.mxu1 %v7462_v2  ;;  %4941 = vmatprep.subr.mxu0 %v2434_v50 }
 0x34d   : > { %3036 = vmatprep.mubr.f32.mxu1 %v9726_v29  ;;  %4942 = vmatpush3.msra.mxu0 %v2434_v50  ;;  %v9730_v50 = vrot.slane %v7723_v22, 7  ;;  %v9731_v29 = vrot.slane %v7697_v30, 7 }
 0x34e   : > { %2667 = vmatmul.mubr.f32.gmra.mxu0 %v8117_v15  ;;  %4943 = vmatprep.subr.mxu0 %v2433_v6 }
 0x34f   : > { %2671 = vmatprep.mubr.f32.mxu0 %v7697_v30  ;;  %4944 = vmatpush3.msra.mxu0 %v2433_v6  ;;  %v2250_v40 = vsel %vm287_vm1, %v9731_v29, %v9730_v50  ;;  %v9732_v6 = vld [vmem:[#allocation15_spill] sm:$0xff]  ;;  %v3464_v29 = vld [vmem:[#allocation7 + $0x468] sm:$0xff] }
 0x350   : > { %3037 = vmatmul.mubr.f32.gmra.mxu1 %v2335_v38  ;;  %4945 = vmatprep.subr.mxu0 %v2432_v35  ;;  %v3466_v38 = vld [vmem:[#allocation7 + $0x478] sm:$0xff] }
 0x351   : > { %3041 = vmatprep.mubr.f32.mxu1 %v9729_v54  ;;  %4946 = vmatpush3.msra.mxu0 %v2432_v35  ;;  %v8139_v35 = vsel %vm253_vm3, %v7876_v52, %v2250_v40  ;;  %v3465_v54 = vld [vmem:[#allocation7 + $0x470] sm:$0xff]  ;;  %v9735_v40 = vrot.slane %v7772_v26, 7 }
 0x352   : > { %2672 = vmatmul.mubr.f32.gmra.mxu0 %v7819_v63  ;;  %4947 = vmatprep.subr.mxu0 %v2431_v13  ;;  %9733 = vst [vmem:[#allocation49_spill] sm:$0xff] %v8139_v35 }
 0x353   : > { %2676 = vmatprep.mubr.f32.mxu0 %v7723_v22  ;;  %4948 = vmatpush3.msra.mxu0 %v2431_v13  ;;  %v9734_v13 = vld [vmem:[#allocation48_spill] sm:$0xff] }
 0x354   : > { %3042 = vmatmul.mubr.f32.gmra.mxu1 %v9732_v6  ;;  %4949 = vmatprep.subr.mxu0 %v2430_v45 }
 0x355   : > { %3046 = vmatprep.mubr.f32.mxu1 %v7372_v31  ;;  %4950 = vmatpush3.msra.mxu0 %v2430_v45  ;;  %v9736_v45 = vrot.slane %v7729_v20, 7  ;;  %v3459_v31 = vld [vmem:[#allocation7 + $0x440] sm:$0xff] }
 0x356   : > { %2677 = vmatmul.mubr.f32.gmra.mxu0 %v8139_v35  ;;  %4951 = vmatprep.subr.mxu0 %v2429_v5 }
 0x357   : > { %2681 = vmatprep.mubr.f32.mxu0 %v7729_v20  ;;  %4952 = vmatpush3.msra.mxu0 %v2429_v5  ;;  %v2248_v50 = vsel %vm287_vm1, %v9736_v45, %v9735_v40  ;;  %v9737_v5 = vld [vmem:[#allocation55_spill] sm:$0xff]  ;;  %v9740_v45 = vld [vmem:[#allocation40_spill] sm:$0xff] }
 0x358   : > { %3047 = vmatmul.mubr.f32.gmra.mxu1 %v9734_v13  ;;  %5001 = vmatprep.subr.mxu1 %v3466_v38  ;;  %v8159_v6 = vsel %vm253_vm3, %v7915_v59, %v2248_v50  ;;  %v3462_v13 = vld [vmem:[#allocation7 + $0x458] sm:$0xff]  ;;  %v9741_v50 = vrot.slane %v7842_v41, 7 }
 0x359   : > { %3051 = vmatprep.mubr.f32.mxu1 %v7374_v21  ;;  %5002 = vmatpush3.msra.mxu1 %v3466_v38  ;;  %9738 = vst [vmem:[#allocation25_spill] sm:$0xff] %v8159_v6  ;;  %v3463_v38 = vld [vmem:[#allocation7 + $0x460] sm:$0xff]  ;;  %v9739_v40 = vld [vmem:[#allocation71_spill] sm:$0xff] }
 0x35a   : > { %2682 = vmatmul.mubr.f32.gmra.mxu0 %v7887_v19  ;;  %3467 = vmatprep.subr.mxu0 %v9620_v17 }
 0x35b   : > { %2686 = vmatprep.mubr.f32.mxu0 %v7772_v26  ;;  %5003 = vmatprep.subr.mxu1 %v3465_v54 }
 0x35c   : > { %3052 = vmatmul.mubr.f32.gmra.mxu1 %v7462_v2 }
 0x35d   : > { %3056 = vmatprep.mubr.f32.mxu1 %v9737_v5  ;;  %5004 = vmatpush3.msra.mxu1 %v3465_v54  ;;  %v3461_v5 = vld [vmem:[#allocation7 + $0x450] sm:$0xff]  ;;  %v9742_v54 = vrot.slane %v7799_v9, 7 }
 0x35e   : > { %2687 = vmatmul.mubr.f32.gmra.mxu0 %v8159_v6  ;;  %5005 = vmatprep.subr.mxu1 %v3464_v29 }
 0x35f   : > { %2691 = vmatprep.mubr.f32.mxu0 %v7799_v9  ;;  %5006 = vmatpush3.msra.mxu1 %v3464_v29  ;;  %v2246_v21 = vsel %vm287_vm1, %v9742_v54, %v9741_v50  ;;  %v3460_v29 = vld [vmem:[#allocation7 + $0x448] sm:$0xff]  ;;  %v9746_v50 = vld [vmem:[#allocation68_spill] sm:$0xff]  ;;  %v3457_v54 = vld [vmem:[#allocation7 + $0x430] sm:$0xff] }
 0x360   : > { %3057 = vmatmul.mubr.f32.gmra.mxu1 %v9739_v40  ;;  %5007 = vmatprep.subr.mxu1 %v3463_v38  ;;  %v9743_v40 = vld [vmem:[#allocation46_spill] sm:$0xff] }
 0x361   : > { %3061 = vmatprep.mubr.f32.mxu1 %v9740_v45  ;;  %5008 = vmatpush3.msra.mxu1 %v3463_v38  ;;  %v9744_v45 = vld [vmem:[#allocation45_spill] sm:$0xff]  ;;  %v8178_v38 = vsel %vm253_vm3, %v7953_v8, %v2246_v21  ;;  %v9747_v21 = vrot.slane %v7893_v32, 7 }
 0x362   : > { %2692 = vmatmul.mubr.f32.gmra.mxu0 %v7923_v37  ;;  %5009 = vmatprep.subr.mxu1 %v3462_v13  ;;  %9745 = vst [vmem:[#allocation15_spill] sm:$0xff] %v8178_v38 }
 0x363   : > { %2696 = vmatprep.mubr.f32.mxu0 %v7842_v41  ;;  %5010 = vmatpush3.msra.mxu1 %v3462_v13  ;;  %v3458_v13 = vld [vmem:[#allocation7 + $0x438] sm:$0xff] }
 0x364   : > { %3062 = vmatmul.mubr.f32.gmra.mxu1 %v9743_v40  ;;  %5011 = vmatprep.subr.mxu1 %v3461_v5 }
 0x365   : > { %3066 = vmatprep.mubr.f32.mxu1 %v9744_v45  ;;  %5012 = vmatpush3.msra.mxu1 %v3461_v5  ;;  %v9748_v5 = vrot.slane %v7866_v61, 7 }
 0x366   : > { %2697 = vmatmul.mubr.f32.gmra.mxu0 %v8178_v38  ;;  %5013 = vmatprep.subr.mxu1 %v3460_v29 }
 0x367   : > { %2701 = vmatprep.mubr.f32.mxu0 %v7866_v61  ;;  %5014 = vmatpush3.msra.mxu1 %v3460_v29  ;;  %v2244_v45 = vsel %vm287_vm1, %v9748_v5, %v9747_v21  ;;  %v3456_v29 = vld [vmem:[#allocation7 + $0x428] sm:$0xff]  ;;  %v3453_v5 = vld [vmem:[#allocation7 + $0x410] sm:$0xff] }
 0x368   : > { %3067 = vmatmul.mubr.f32.gmra.mxu1 %v9746_v50  ;;  %5015 = vmatprep.subr.mxu1 %v3459_v31  ;;  %v3455_v50 = vld [vmem:[#allocation7 + $0x420] sm:$0xff]  ;;  %v9751_v21 = vld [vmem:[#allocation41_spill] sm:$0xff] }
 0x369   : > { %3071 = vmatprep.mubr.f32.mxu1 %v7454_v44  ;;  %5016 = vmatpush3.msra.mxu1 %v3459_v31  ;;  %v9749_v44 = vld [vmem:[#allocation18_spill] sm:$0xff]  ;;  %v8197_v31 = vsel %vm253_vm3, %v7987_v4, %v2244_v45  ;;  %v9752_v45 = vrot.slane %v7909_v57, 7 }
 0x36a   : > { %2702 = vmatmul.mubr.f32.gmra.mxu0 %v7961_v18  ;;  %5017 = vmatprep.subr.mxu1 %v3458_v13  ;;  %9750 = vst [vmem:[#allocation48_spill] sm:$0xff] %v8197_v31 }
 0x36b   : > { %2706 = vmatprep.mubr.f32.mxu0 %v7893_v32  ;;  %5018 = vmatpush3.msra.mxu1 %v3458_v13  ;;  %v3454_v13 = vld [vmem:[#allocation7 + $0x418] sm:$0xff] }
 0x36c   : > { %3072 = vmatmul.mubr.f32.gmra.mxu1 %v7545_v53  ;;  %5019 = vmatprep.subr.mxu1 %v3457_v54  ;;  %v9754_v53 = vld [vmem:[#allocation64_spill] sm:$0xff] }
 0x36d   : > { %3076 = vmatprep.mubr.f32.mxu1 %v9749_v44  ;;  %5020 = vmatpush3.msra.mxu1 %v3457_v54  ;;  %v2242_v54 = vsel %vm287_vm1, %v9752_v45, %v7792_v11  ;;  %v9753_v44 = vld [vmem:[#allocation36_spill] sm:$0xff]  ;;  %v9757_v11 = vld [vmem:[#allocation34_spill] sm:$0xff] }
 0x36e   : > { %2707 = vmatmul.mubr.f32.gmra.mxu0 %v8197_v31  ;;  %5021 = vmatprep.subr.mxu1 %v3456_v29  ;;  %v9759_v45 = vld [vmem:[#allocation60_spill] sm:$0xff] }
 0x36f   : > { %2711 = vmatprep.mubr.f32.mxu0 %v7909_v57  ;;  %5022 = vmatpush3.msra.mxu1 %v3456_v29  ;;  %v3452_v29 = vld [vmem:[#allocation7 + $0x408] sm:$0xff] }
 0x370   : > { %3077 = vmatmul.mubr.f32.gmra.mxu1 %v9751_v21  ;;  %5023 = vmatprep.subr.mxu1 %v3455_v50  ;;  %v9755_v21 = vld [vmem:[#allocation38_spill] sm:$0xff] }
 0x371   : > { %3081 = vmatprep.mubr.f32.mxu1 %v7477_v48  ;;  %5024 = vmatpush3.msra.mxu1 %v3455_v50  ;;  %v8215_v50 = vsel %vm253_vm3, %v8026_v1, %v2242_v54  ;;  %v3451_v48 = vld [vmem:[#allocation7 + $0x400] sm:$0xff] }
 0x372   : > { %2712 = vmatmul.mubr.f32.gmra.mxu0 %v7997_v51  ;;  %5025 = vmatprep.subr.mxu1 %v3454_v13  ;;  %9756 = vst [vmem:[#allocation46_spill] sm:$0xff] %v8215_v50 }
 0x373   : > { %2716 = vmatprep.mubr.f32.mxu0 %v9753_v44  ;;  %5026 = vmatpush3.msra.mxu1 %v3454_v13  ;;  %v9758_v13 = vrot.slane %v7966_v12, 7 }
 0x374   : > { %3082 = vmatmul.mubr.f32.gmra.mxu1 %v9754_v53  ;;  %5027 = vmatprep.subr.mxu1 %v3453_v5 }
 0x375   : > { %3086 = vmatprep.mubr.f32.mxu1 %v9755_v21  ;;  %5028 = vmatpush3.msra.mxu1 %v3453_v5  ;;  %v2448_v5 = vsel %vm287_vm1, %v8003_v42, %v9758_v13  ;;  %v3434_v42 = vld [vmem:[#allocation7 + $0x378] sm:$0xff] }
 0x376   : > { %2717 = vmatmul.mubr.f32.gmra.mxu0 %v8215_v50  ;;  %5029 = vmatprep.subr.mxu1 %v3452_v29  ;;  %v8233_v54 = vsel %vm253_vm3, %v8056_v49, %v2448_v5  ;;  %v3433_v5 = vld [vmem:[#allocation7 + $0x370] sm:$0xff] }
 0x377   : > { %2721 = vmatprep.mubr.f32.mxu0 %v7725_v23  ;;  %5030 = vmatpush3.msra.mxu1 %v3452_v29  ;;  %9760 = vst [vmem:[#allocation64_spill] sm:$0xff] %v8233_v54  ;;  %v9762_v29 = vld [vmem:[#allocation65_spill] sm:$0xff] }
 0x378   : > { %3087 = vmatmul.mubr.f32.gmra.mxu1 %v9757_v11  ;;  %5031 = vmatprep.subr.mxu1 %v3451_v48  ;;  %v2366_v13 = vsel %vm256_vm2, %v7462_v2, %v9762_v29  ;;  %v3429_v29 = vld [vmem:[#allocation7 + $0x350] sm:$0xff] }
 0x379   : > { %3091 = vmatprep.mubr.f32.mxu1 %v7521_v25  ;;  %5032 = vmatpush3.msra.mxu1 %v3451_v48  ;;  %v9761_v48 = vld [vmem:[#allocation35_spill] sm:$0xff] }
 0x37a   : > { %2722 = vmatmul.mubr.f32.gmra.mxu0 %v8032_v24 }
 0x37b   : > { %2726 = vmatprep.mubr.f32.mxu0 %v7966_v12  ;;  %v9768_v12 = vld [vmem:[#allocation14_spill] sm:$0xff] }
 0x37c   : > { %3092 = vmatmul.mubr.f32.gmra.mxu1 %v7626_v46 }
 0x37d   : > { %3096 = vmatprep.mubr.f32.mxu1 %v9759_v45 }
 0x37e   : > { %2727 = vmatmul.mubr.f32.gmra.mxu0 %v8233_v54  ;;  %v3431_v54 = vld [vmem:[#allocation7 + $0x360] sm:$0xff] }
 0x37f   : > { %2731 = vmatprep.mubr.f32.mxu0 %v9761_v48  ;;  %v9763_v48 = vld [vmem:[#allocation16_spill] sm:$0xff] }
 0x380   : > { %3097 = vmatmul.mubr.f32.gmra.mxu1 %v7972_v62 }
 0x381   : > { %3101 = vmatprep.mubr.f32.mxu1 %v7561_v16 }
 0x382   : > { %2732 = vmatmul.mubr.f32.gmra.mxu0 %v8065_v36 }
 0x383   : > { %4953 = vmatprep.mubr.f32.mxu0 %v7452_v0 }
 0x384   : > { %3102 = vmatmul.mubr.f32.gmra.mxu1 %v7667_v14 }
 0x385   : > { %3106 = vmatprep.mubr.f32.mxu1 %v7563_v56 }
 0x386   : > { %4954 = vmatmul.mubr.f32.vlgmr.msra.gmra.mxu0 %v2366_v13  ;;  %v9766_v13 = vld [vmem:[#allocation50_spill] sm:$0xff] }
 0x387   : > { %4956 = vmatprep.mubr.f32.mxu0 %v9728_v7  ;;  %3468 = vmatpush1.msra.mxu0 %v3434_v42  ;;  %v3430_v7 = vld [vmem:[#allocation7 + $0x358] sm:$0xff] }
 0x388   : > { %3107 = vmatmul.mubr.f32.gmra.mxu1 %v8041_v10  ;;  %3469 = vmatprep.subr.mxu0 %v9620_v17  ;;  %v9764_v42 = vld [vmem:[#allocation31_spill] sm:$0xff] }
 0x389   : > { %3111 = vmatprep.mubr.f32.mxu1 %v7608_v27  ;;  %3470 = vmatpush1.msra.mxu0 %v3433_v5  ;;  %v9767_v5 = vld [vmem:[#allocation53_spill] sm:$0xff] }
 0x38a   : > { %4957 = vmatmul.mubr.f32.gmra.mxu0 %v9763_v48  ;;  %3471 = vmatprep.subr.mxu0 %v9620_v17  ;;  %v9765_v48 = vld [vmem:[#allocation42_spill] sm:$0xff] }
 0x38b   : > { %4959 = vmatprep.mubr.f32.mxu0 %v7452_v0  ;;  %3472 = vmatpush1.msra.mxu0 %v3432_v58  ;;  %v3428_v58 = vld [vmem:[#allocation7 + $0x348] sm:$0xff] }
 0x38c   : > { %3112 = vmatmul.mubr.f32.gmra.mxu1 %v7711_v55  ;;  %3473 = vmatprep.subr.mxu0 %v9620_v17 }
 0x38d   : > { %3116 = vmatprep.mubr.f32.mxu1 %v7634_v47  ;;  %3474 = vmatpush1.msra.mxu0 %v3431_v54  ;;  %v3427_v54 = vld [vmem:[#allocation7 + $0x340] sm:$0xff] }
 0x38e   : > { %4960 = vmatmul.mubr.f32.gmra.mxu0 %v9764_v42  ;;  %3475 = vmatprep.subr.mxu0 %v9620_v17 }
 0x38f   : > { %4962 = vmatprep.mubr.f32.mxu0 %v9765_v48  ;;  %3476 = vmatpush1.msra.mxu0 %v3430_v7  ;;  %v3426_v7 = vld [vmem:[#allocation7 + $0x338] sm:$0xff] }
 0x390   : > { %3117 = vmatmul.mubr.f32.gmra.mxu1 %v8092_v28  ;;  %3477 = vmatprep.subr.mxu0 %v9620_v17 }
 0x391   : > { %3121 = vmatprep.mubr.f32.mxu1 %v7646_v39  ;;  %3478 = vmatpush1.msra.mxu0 %v3429_v29  ;;  %v3425_v29 = vld [vmem:[#allocation7 + $0x330] sm:$0xff]  ;;  %v9769_v39 = vld [vmem:[#allocation61_spill] sm:$0xff] }
 0x392   : > { %4963 = vmatmul.mubr.f32.gmra.mxu0 %v9766_v13  ;;  %3479 = vmatprep.subr.mxu0 %v9620_v17 }
 0x393   : > { %4965 = vmatprep.mubr.f32.mxu0 %v9767_v5  ;;  %3480 = vmatpush1.msra.mxu0 %v3428_v58  ;;  %v3424_v58 = vld [vmem:[#allocation7 + $0x328] sm:$0xff] }
 0x394   : > { %3122 = vmatmul.mubr.f32.gmra.mxu1 %v7761_v34  ;;  %3481 = vmatprep.subr.mxu0 %v9620_v17  ;;  %v9770_v34 = vld [vmem:[#allocation22_spill] sm:$0xff] }
 0x395   : > { %3126 = vmatprep.mubr.f32.mxu1 %v7673_v43  ;;  %3482 = vmatpush1.msra.mxu0 %v3427_v54  ;;  %v3423_v54 = vld [vmem:[#allocation7 + $0x320] sm:$0xff]  ;;  %v9771_v43 = vld [vmem:[#allocation67_spill] sm:$0xff] }
 0x396   : > { %4966 = vmatmul.mubr.f32.gmra.mxu0 %v9768_v12  ;;  %3483 = vmatprep.subr.mxu0 %v9620_v17 }
 0x397   : > { %4968 = vmatprep.mubr.f32.mxu0 %v9769_v39  ;;  %3484 = vmatpush1.msra.mxu0 %v3426_v7  ;;  %v3422_v7 = vld [vmem:[#allocation7 + $0x318] sm:$0xff] }
 0x398   : > { %3127 = vmatmul.mubr.f32.gmra.mxu1 %v8117_v15  ;;  %3485 = vmatprep.subr.mxu0 %v9620_v17  ;;  %v9772_v15 = vld [vmem:[#allocation59_spill] sm:$0xff] }
 0x399   : > { %3131 = vmatprep.mubr.f32.mxu1 %v7697_v30  ;;  %3486 = vmatpush1.msra.mxu0 %v3425_v29  ;;  %v3421_v29 = vld [vmem:[#allocation7 + $0x310] sm:$0xff] }
 0x39a   : > { %4969 = vmatmul.mubr.f32.gmra.mxu0 %v9770_v34  ;;  %3487 = vmatprep.subr.mxu0 %v9620_v17  ;;  %v9773_v30 = vld [vmem:[#allocation66_spill] sm:$0xff] }
 0x39b   : > { %4971 = vmatprep.mubr.f32.mxu0 %v9771_v43  ;;  %3488 = vmatpush1.msra.mxu0 %v3424_v58  ;;  %v3420_v58 = vld [vmem:[#allocation7 + $0x308] sm:$0xff] }
 0x39c   : > { %3132 = vmatmul.mubr.f32.gmra.mxu1 %v7819_v63  ;;  %3489 = vmatprep.subr.mxu0 %v9620_v17  ;;  %v9774_v63 = vld [vmem:[#allocation23_spill] sm:$0xff] }
 0x39d   : > { %3136 = vmatprep.mubr.f32.mxu1 %v7723_v22  ;;  %3490 = vmatpush1.msra.mxu0 %v3423_v54  ;;  %v3419_v54 = vld [vmem:[#allocation7 + $0x300] sm:$0xff]  ;;  %v9775_v22 = vld [vmem:[#allocation69_spill] sm:$0xff] }
 0x39e   : > { %4972 = vmatmul.mubr.f32.gmra.mxu0 %v9772_v15  ;;  %3491 = vmatprep.subr.mxu0 %v9620_v17 }
 0x39f   : > { %4974 = vmatprep.mubr.f32.mxu0 %v9773_v30  ;;  %3492 = vmatpush1.msra.mxu0 %v3422_v7  ;;  %v3450_v7 = vld [vmem:[#allocation7 + $0x3f8] sm:$0xff] }
 0x3a0   : > { %3137 = vmatmul.mubr.f32.gmra.mxu1 %v8139_v35  ;;  %3493 = vmatprep.subr.mxu0 %v9620_v17  ;;  %v9776_v35 = vld [vmem:[#allocation29_spill] sm:$0xff] }
 0x3a1   : > { %3141 = vmatprep.mubr.f32.mxu1 %v7729_v20  ;;  %3494 = vmatpush1.msra.mxu0 %v3421_v29  ;;  %v3449_v29 = vld [vmem:[#allocation7 + $0x3f0] sm:$0xff] }
 0x3a2   : > { %4975 = vmatmul.mubr.f32.gmra.mxu0 %v9774_v63  ;;  %3495 = vmatprep.subr.mxu0 %v9620_v17 }
 0x3a3   : > { %4977 = vmatprep.mubr.f32.mxu0 %v9775_v22  ;;  %3496 = vmatpush1.msra.mxu0 %v3420_v58  ;;  %v3448_v58 = vld [vmem:[#allocation7 + $0x3e8] sm:$0xff] }
 0x3a4   : > { %3142 = vmatmul.mubr.f32.gmra.mxu1 %v7887_v19  ;;  %3497 = vmatprep.subr.mxu0 %v9620_v17  ;;  %v9777_v19 = vld [vmem:[#allocation32_spill] sm:$0xff] }
 0x3a5   : > { %3146 = vmatprep.mubr.f32.mxu1 %v7772_v26  ;;  %3498 = vmatpush1.msra.mxu0 %v3419_v54  ;;  %v3447_v54 = vld [vmem:[#allocation7 + $0x3e0] sm:$0xff]  ;;  %v9786_v26 = vld [vmem:[#allocation37_spill] sm:$0xff] }
 0x3a6   : > { %4978 = vmatmul.mubr.f32.gmra.mxu0 %v9776_v35  ;;  %3499 = vmatprep.subr.mxu0 %v9620_v17 }
 0x3a7   : > { %4980 = vmatprep.mubr.f32.mxu0 %v7749_v3  ;;  %3500 = vmatpush2.msra.mxu0 %v3450_v7  ;;  %v3446_v7 = vld [vmem:[#allocation7 + $0x3d8] sm:$0xff] }
 0x3a8   : > { %3147 = vmatmul.mubr.f32.gmra.mxu1 %v8159_v6  ;;  %3501 = vmatprep.subr.mxu0 %v9620_v17  ;;  %v9778_v6 = vld [vmem:[#allocation51_spill] sm:$0xff] }
 0x3a9   : > { %3151 = vmatprep.mubr.f32.mxu1 %v7799_v9  ;;  %3502 = vmatpush2.msra.mxu0 %v3449_v29  ;;  %v3445_v29 = vld [vmem:[#allocation7 + $0x3d0] sm:$0xff]  ;;  %v9785_v9 = vld [vmem:[#allocation80_spill] sm:$0xff] }
 0x3aa   : > { %4981 = vmatmul.mubr.f32.gmra.mxu0 %v9777_v19  ;;  %3503 = vmatprep.subr.mxu0 %v9620_v17 }
 0x3ab   : > { %4983 = vmatprep.mubr.f32.mxu0 %v7811_v60  ;;  %3504 = vmatpush2.msra.mxu0 %v3448_v58  ;;  %v3444_v58 = vld [vmem:[#allocation7 + $0x3c8] sm:$0xff] }
 0x3ac   : > { %3152 = vmatmul.mubr.f32.gmra.mxu1 %v7923_v37  ;;  %3505 = vmatprep.subr.mxu0 %v9620_v17  ;;  %v9779_v37 = vld [vmem:[#allocation27_spill] sm:$0xff] }
 0x3ad   : > { %3156 = vmatprep.mubr.f32.mxu1 %v7842_v41  ;;  %3506 = vmatpush2.msra.mxu0 %v3447_v54  ;;  %v3443_v54 = vld [vmem:[#allocation7 + $0x3c0] sm:$0xff] }
 0x3ae   : > { %4984 = vmatmul.mubr.f32.gmra.mxu0 %v9778_v6  ;;  %3507 = vmatprep.subr.mxu0 %v9620_v17 }
 0x3af   : > { %4986 = vmatprep.mubr.f32.mxu0 %v7876_v52  ;;  %3508 = vmatpush2.msra.mxu0 %v3446_v7  ;;  %v3442_v7 = vld [vmem:[#allocation7 + $0x3b8] sm:$0xff] }
 0x3b0   : > { %3157 = vmatmul.mubr.f32.gmra.mxu1 %v8178_v38  ;;  %3509 = vmatprep.subr.mxu0 %v9620_v17  ;;  %v9780_v38 = vld [vmem:[#allocation73_spill] sm:$0xff] }
 0x3b1   : > { %3161 = vmatprep.mubr.f32.mxu1 %v7866_v61  ;;  %3510 = vmatpush2.msra.mxu0 %v3445_v29  ;;  %v3441_v29 = vld [vmem:[#allocation7 + $0x3b0] sm:$0xff]  ;;  %v9784_v61 = vld [vmem:[#allocation28_spill] sm:$0xff] }
 0x3b2   : > { %4987 = vmatmul.mubr.f32.gmra.mxu0 %v9779_v37  ;;  %3511 = vmatprep.subr.mxu0 %v9620_v17 }
 0x3b3   : > { %4989 = vmatprep.mubr.f32.mxu0 %v7915_v59  ;;  %3512 = vmatpush2.msra.mxu0 %v3444_v58  ;;  %v3440_v58 = vld [vmem:[#allocation7 + $0x3a8] sm:$0xff] }
 0x3b4   : > { %3162 = vmatmul.mubr.f32.gmra.mxu1 %v7961_v18  ;;  %3513 = vmatprep.subr.mxu0 %v9620_v17  ;;  %v9781_v18 = vld [vmem:[#allocation76_spill] sm:$0xff] }
 0x3b5   : > { %3166 = vmatprep.mubr.f32.mxu1 %v7893_v32  ;;  %3514 = vmatpush2.msra.mxu0 %v3443_v54  ;;  %v3439_v54 = vld [vmem:[#allocation7 + $0x3a0] sm:$0xff] }
 0x3b6   : > { %4990 = vmatmul.mubr.f32.gmra.mxu0 %v9780_v38  ;;  %3515 = vmatprep.subr.mxu0 %v9620_v17 }
 0x3b7   : > { %4992 = vmatprep.mubr.f32.mxu0 %v7953_v8  ;;  %3516 = vmatpush2.msra.mxu0 %v3442_v7  ;;  %v3438_v7 = vld [vmem:[#allocation7 + $0x398] sm:$0xff] }
 0x3b8   : > { %3167 = vmatmul.mubr.f32.gmra.mxu1 %v8197_v31  ;;  %3517 = vmatprep.subr.mxu0 %v9620_v17  ;;  %v9782_v31 = vld [vmem:[#allocation78_spill] sm:$0xff] }
 0x3b9   : > { %3171 = vmatprep.mubr.f32.mxu1 %v7909_v57  ;;  %3518 = vmatpush2.msra.mxu0 %v3441_v29  ;;  %v3437_v29 = vld [vmem:[#allocation7 + $0x390] sm:$0xff] }
 0x3ba   : > { %4993 = vmatmul.mubr.f32.gmra.mxu0 %v9781_v18  ;;  %3519 = vmatprep.subr.mxu0 %v9620_v17 }
 0x3bb   : > { %4995 = vmatprep.mubr.f32.mxu0 %v7987_v4  ;;  %3520 = vmatpush2.msra.mxu0 %v3440_v58  ;;  %v3436_v58 = vld [vmem:[#allocation7 + $0x388] sm:$0xff] }
 0x3bc   : > { %3172 = vmatmul.mubr.f32.gmra.mxu1 %v7997_v51  ;;  %3521 = vmatprep.subr.mxu0 %v9620_v17 }
 0x3bd   : > { %3176 = vmatprep.mubr.f32.mxu1 %v9753_v44  ;;  %3522 = vmatpush2.msra.mxu0 %v3439_v54  ;;  %v9783_v44 = vld [vmem:[#allocation39_spill] sm:$0xff] }
 0x3be   : > { %4996 = vmatmul.mubr.f32.gmra.mxu0 %v9782_v31  ;;  %3523 = vmatprep.subr.mxu0 %v9620_v17  ;;  %v8339_v54 = vsel %vm256_vm2, %v8032_v24, %v9783_v44 }
 0x3bf   : > { %4998 = vmatprep.mubr.f32.mxu0 %v8026_v1  ;;  %3524 = vmatpush2.msra.mxu0 %v3438_v7  ;;  %v3435_v7 = vld [vmem:[#allocation7 + $0x380] sm:$0xff] }
 0x3c0   : > { %3177 = vmatmul.mubr.f32.gmra.mxu1 %v8215_v50  ;;  %3525 = vmatprep.subr.mxu0 %v9620_v17  ;;  %v2578_v51 = vpop.f32.mrf.mxu0  ;;  %v4875_v57 = vpop.f32.mrf.mxu1 }
 0x3c1   : > { %3181 = vmatprep.mubr.f32.mxu1 %v7725_v23  ;;  %3526 = vmatpush2.msra.mxu0 %v3437_v29 }
 0x3c2   : > { %4999 = vmatmul.mubr.f32.gmra.mxu0 %v8339_v54  ;;  %3527 = vmatprep.subr.mxu0 %v9620_v17  ;;  %v2580_v50 = vpop.f32.mrf.mxu0  ;;  %v2803_v32 = vpop.f32.mrf.mxu1 }
 0x3c3   : > { %3528 = vmatpush2.msra.mxu0 %v3436_v58  ;;  %3531 = vmatprep.mubr.f32.mxu0 %v9784_v61  ;;  %v8344_v41 = vadd.f32 %v2803_v32, %v2578_v51 }
 0x3c4   : > { %3182 = vmatmul.mubr.f32.gmra.mxu1 %v8032_v24  ;;  %3529 = vmatprep.subr.mxu0 %v9620_v17  ;;  %v2583_v29 = vpop.f32.mrf.mxu0 }
 0x3c5   : > { %5033 = vmatprep.mubr.f32.mxu1 %v7452_v0  ;;  %3530 = vmatpush2.msra.mxu0 %v3435_v7  ;;  %v8349_v44 = vadd.f32 %v4875_v57, %v2583_v29  ;;  %v4878_v23 = vpop.f32.mrf.mxu1  ;;  %v9787_v57 = vld [vmem:[#allocation55_spill] sm:$0xff]  ;;  %v9789_v29 = vld [vmem:[#allocation40_spill] sm:$0xff] }
 0x3c6   : > { %3532 = vmatmul.mubr.f32.vlgmr.msra.gmra.mxu0 %v9785_v9  ;;  %v2585_v50 = vpop.f32.mrf.mxu0 }
 0x3c7   : > { %3536 = vmatprep.mubr.f32.mxu0 %v9786_v26  ;;  %v2813_v58 = vpop.f32.mrf.mxu1 }
 0x3c8   : > { %5034 = vmatmul.mubr.f32.vlgmr.msra.gmra.mxu1 %v9764_v42  ;;  %v2588_v32 = vpop.f32.mrf.mxu0  ;;  %v9788_v42 = vld [vmem:[#allocation71_spill] sm:$0xff] }
 0x3c9   : > { %5036 = vmatprep.mubr.f32.mxu1 %v9765_v48  ;;  %v8355_v61 = vadd.f32 %v2813_v58, %v2588_v32 }
 0x3ca   : > { %3537 = vmatmul.mubr.f32.gmra.mxu0 %v7462_v2  ;;  %v4881_v17 = vpop.f32.mrf.mxu1  ;;  %v2590_v0 = vpop.f32.mrf.mxu0 }
 0x3cb   : > { %3541 = vmatprep.mubr.f32.mxu0 %v9787_v57  ;;  %v9791_v57 = vld [vmem:[#allocation68_spill] sm:$0xff] }
 0x3cc   : > { %5037 = vmatmul.mubr.f32.gmra.mxu1 %v9766_v13  ;;  %v2823_v9 = vpop.f32.mrf.mxu1  ;;  %v2593_v51 = vpop.f32.mrf.mxu0 }
 0x3cd   : > { %5039 = vmatprep.mubr.f32.mxu1 %v9767_v5  ;;  %v8361_v26 = vadd.f32 %v4878_v23, %v2593_v51  ;;  %v9790_v23 = vld [vmem:[#allocation45_spill] sm:$0xff] }
 0x3ce   : > { %3542 = vmatmul.mubr.f32.gmra.mxu0 %v9788_v42  ;;  %v4884_v7 = vpop.f32.mrf.mxu1  ;;  %v2595_v48 = vpop.f32.mrf.mxu0  ;;  %v9792_v51 = vld [vmem:[#allocation17_spill] sm:$0xff] }
 0x3cf   : > { %3546 = vmatprep.mubr.f32.mxu0 %v9789_v29  ;;  %v9793_v48 = vld [vmem:[#allocation57_spill] sm:$0xff] }
 0x3d0   : > { %5040 = vmatmul.mubr.f32.gmra.mxu1 %v9768_v12  ;;  %v2833_v2 = vpop.f32.mrf.mxu1  ;;  %v2598_v50 = vpop.f32.mrf.mxu0 }
 0x3d1   : > { %5042 = vmatprep.mubr.f32.mxu1 %v9769_v39  ;;  %v8367_v58 = vadd.f32 %v2823_v9, %v2598_v50 }
 0x3d2   : > { %3547 = vmatmul.mubr.f32.gmra.mxu0 %v9743_v40  ;;  %v4887_v13 = vpop.f32.mrf.mxu1  ;;  %v2600_v5 = vpop.f32.mrf.mxu0 }
 0x3d3   : > { %3551 = vmatprep.mubr.f32.mxu0 %v9790_v23  ;;  %v9795_v5 = vld [vmem:[#allocation41_spill] sm:$0xff] }
 0x3d4   : > { %5043 = vmatmul.mubr.f32.gmra.mxu1 %v9770_v34  ;;  %v2843_v32 = vpop.f32.mrf.mxu1 }
 0x3d5   : > { %5045 = vmatprep.mubr.f32.mxu1 %v9771_v43  ;;  %v2603_v0 = vpop.f32.mrf.mxu0  ;;  %v9794_v43 = vld [vmem:[#allocation18_spill] sm:$0xff] }
 0x3d6   : > { %3552 = vmatmul.mubr.f32.gmra.mxu0 %v9791_v57  ;;  %v8374_v12 = vadd.f32 %v4881_v17, %v2603_v0 }
 0x3d7   : > { %3556 = vmatprep.mubr.f32.mxu0 %v9792_v51  ;;  %v4890_v39 = vpop.f32.mrf.mxu1  ;;  %v2605_v9 = vpop.f32.mrf.mxu0 }
 0x3d8   : > { %5046 = vmatmul.mubr.f32.gmra.mxu1 %v9772_v15 }
 0x3d9   : > { %5048 = vmatprep.mubr.f32.mxu1 %v9773_v30  ;;  %v2853_v40 = vpop.f32.mrf.mxu1  ;;  %v2608_v42 = vpop.f32.mrf.mxu0  ;;  %v9796_v30 = vld [vmem:[#allocation21_spill] sm:$0xff] }
 0x3da   : > { %3557 = vmatmul.mubr.f32.gmra.mxu0 %v9793_v48  ;;  %v8380_v34 = vadd.f32 %v2833_v2, %v2608_v42  ;;  %v9798_v42 = vld [vmem:[#allocation43_spill] sm:$0xff] }
 0x3db   : > { %3561 = vmatprep.mubr.f32.mxu0 %v9794_v43  ;;  %v8383_v29 = vpop.f32.mrf.mxu1  ;;  %v2610_v17 = vpop.f32.mrf.mxu0 }
 0x3dc   : > { %5049 = vmatmul.mubr.f32.gmra.mxu1 %v9774_v63  ;;  %v9801_v17 = vld [vmem:[#allocation20_spill] sm:$0xff] }
 0x3dd   : > { %5051 = vmatprep.mubr.f32.mxu1 %v9775_v22  ;;  %v2863_v50 = vpop.f32.mrf.mxu1 }
 0x3de   : > { %3562 = vmatmul.mubr.f32.gmra.mxu0 %v9795_v5  ;;  %v2613_v15 = vpop.f32.mrf.mxu0 }
 0x3df   : > { %3566 = vmatprep.mubr.f32.mxu0 %v9796_v30  ;;  %v8389_v23 = vadd.f32 %v4884_v7, %v2613_v15  ;;  %v9802_v30 = vld [vmem:[#allocation56_spill] sm:$0xff] }
 0x3e0   : > { %5052 = vmatmul.mubr.f32.gmra.mxu1 %v9776_v35  ;;  %v8392_v2 = vpop.f32.mrf.mxu1  ;;  %v2615_v0 = vpop.f32.mrf.mxu0 }
 0x3e1   : > { %5054 = vmatprep.mubr.f32.mxu1 %v7749_v3 }
 0x3e2   : > { %3567 = vmatmul.mubr.f32.gmra.mxu0 %v9754_v53  ;;  %v2873_v63 = vpop.f32.mrf.mxu1  ;;  %v2618_v57 = vpop.f32.mrf.mxu0 }
 0x3e3   : > { %3571 = vmatprep.mubr.f32.mxu0 %v9755_v21  ;;  %v8397_v22 = vadd.f32 %v2843_v32, %v2618_v57 }
 0x3e4   : > { %5055 = vmatmul.mubr.f32.gmra.mxu1 %v9777_v19  ;;  %v8400_v51 = vpop.f32.mrf.mxu1  ;;  %v2620_v7 = vpop.f32.mrf.mxu0 }
 0x3e5   : > { %5057 = vmatprep.mubr.f32.mxu1 %v7811_v60 }
 0x3e6   : > { %3572 = vmatmul.mubr.f32.gmra.mxu0 %v9757_v11  ;;  %v8404_v35 = vpop.f32.mrf.mxu1 }
 0x3e7   : > { %3576 = vmatprep.mubr.f32.mxu0 %v7521_v25  ;;  %v2623_v53 = vpop.f32.mrf.mxu0 }
 0x3e8   : > { %5058 = vmatmul.mubr.f32.gmra.mxu1 %v9778_v6  ;;  %v8408_v3 = vadd.f32 %v4887_v13, %v2623_v53 }
 0x3e9   : > { %5060 = vmatprep.mubr.f32.mxu1 %v7876_v52  ;;  %v8411_v21 = vpop.f32.mrf.mxu1  ;;  %v2625_v19 = vpop.f32.mrf.mxu0 }
 0x3ea   : > { %3577 = vmatmul.mubr.f32.gmra.mxu0 %v7626_v46 }
 0x3eb   : > { %3581 = vmatprep.mubr.f32.mxu0 %v9759_v45  ;;  %v8415_v60 = vpop.f32.mrf.mxu1  ;;  %v2628_v11 = vpop.f32.mrf.mxu0 }
 0x3ec   : > { %5061 = vmatmul.mubr.f32.gmra.mxu1 %v9779_v37  ;;  %v8418_v25 = vadd.f32 %v2853_v40, %v2628_v11  ;;  %v9804_v11 = vld [vmem:[#allocation30_spill] sm:$0xff] }
 0x3ed   : > { %5063 = vmatprep.mubr.f32.mxu1 %v7915_v59  ;;  %v8421_v6 = vpop.f32.mrf.mxu1  ;;  %v2630_v13 = vpop.f32.mrf.mxu0 }
 0x3ee   : > { %3582 = vmatmul.mubr.f32.gmra.mxu0 %v7972_v62  ;;  %v9805_v13 = vld [vmem:[#allocation54_spill] sm:$0xff] }
 0x3ef   : > { %3586 = vmatprep.mubr.f32.mxu0 %v7561_v16  ;;  %v8425_v52 = vpop.f32.mrf.mxu1 }
 0x3f0   : > { %5064 = vmatmul.mubr.f32.gmra.mxu1 %v9780_v38  ;;  %v2633_v46 = vpop.f32.mrf.mxu0 }
 0x3f1   : > { %5066 = vmatprep.mubr.f32.mxu1 %v7953_v8  ;;  %v8429_v45 = vadd.f32 %v4890_v39, %v2633_v46  ;;  %v9797_v39 = vld [vmem:[#allocation79_spill] sm:$0xff] }
 0x3f2   : > { %v8431_v37 = vpop.f32.mrf.mxu1  ;;  %3587 = vmatmul.mubr.f32.gmra.mxu0 %v7667_v14  ;;  %v2635_v59 = vpop.f32.mrf.mxu0 }
 0x3f3   : > { %3591 = vmatprep.mubr.f32.mxu0 %v7563_v56 }
 0x3f4   : > { %5067 = vmatmul.mubr.f32.gmra.mxu1 %v9781_v18  ;;  %v8436_v62 = vpop.f32.mrf.mxu1  ;;  %v2638_v16 = vpop.f32.mrf.mxu0 }
 0x3f5   : > { %5069 = vmatprep.mubr.f32.mxu1 %v7987_v4  ;;  %v8439_v38 = vadd.f32 %v2863_v50, %v2638_v16 }
 0x3f6   : > { %v8441_v32 = vpop.f32.mrf.mxu1  ;;  %3592 = vmatmul.mubr.f32.gmra.mxu0 %v8041_v10  ;;  %v2640_v8 = vpop.f32.mrf.mxu0 }
 0x3f7   : > { %3596 = vmatprep.mubr.f32.mxu0 %v7608_v27 }
 0x3f8   : > { %5070 = vmatmul.mubr.f32.gmra.mxu1 %v9782_v31  ;;  %v8446_v14 = vpop.f32.mrf.mxu1 }
 0x3f9   : > { %5072 = vmatprep.mubr.f32.mxu1 %v8026_v1  ;;  %v2643_v56 = vpop.f32.mrf.mxu0 }
 0x3fa   : > { %v8450_v18 = vadd.f32 %v8383_v29, %v2643_v56  ;;  %3597 = vmatmul.mubr.f32.gmra.mxu0 %v7711_v55  ;;  %v3416_v55 = vsel %vm256_vm2, %v8065_v36, %v9798_v42  ;;  %v9800_v29 = vld [vmem:[#allocation58_spill] sm:$0xff]  ;;  %v9806_v56 = vld [vmem:[#allocation49_spill] sm:$0xff] }
 0x3fb   : > { %v8453_v4 = vpop.f32.mrf.mxu1  ;;  %3601 = vmatprep.mubr.f32.mxu0 %v7634_v47  ;;  %v2645_v10 = vpop.f32.mrf.mxu0  ;;  %v9799_v47 = vld [vmem:[#allocation19_spill] sm:$0xff] }
 0x3fc   : > { %5073 = vmatmul.mubr.f32.gmra.mxu1 %v9797_v39 }
 0x3fd   : > { %5075 = vmatprep.mubr.f32.mxu1 %v8056_v49  ;;  %v8458_v27 = vpop.f32.mrf.mxu1  ;;  %v2648_v31 = vpop.f32.mrf.mxu0 }
 0x3fe   : > { %v8460_v9 = vadd.f32 %v2873_v63, %v2648_v31  ;;  %3602 = vmatmul.mubr.f32.gmra.mxu0 %v8092_v28  ;;  %v9803_v63 = vld [vmem:[#allocation70_spill] sm:$0xff] }
 0x3ff   : > { %v8463_v40 = vpop.f32.mrf.mxu1  ;;  %3606 = vmatprep.mubr.f32.mxu0 %v9799_v47  ;;  %v2650_v48 = vpop.f32.mrf.mxu0  ;;  %v9808_v47 = vld [vmem:[#allocation47_spill] sm:$0xff] }
 0x400   : > { %5076 = vmatmul.mubr.f32.gmra.mxu1 %v3416_v55  ;;  %v9807_v55 = vld [vmem:[#allocation24_spill] sm:$0xff] }
 0x401   : > { %5078 = vmatprep.mubr.f32.mxu1 %v8026_v1  ;;  %v8471_v49 = vpop.f32.mrf.mxu1 }
 0x402   : > { %v2653_v43 = vpop.f32.mrf.mxu0  ;;  %3607 = vmatmul.mubr.f32.gmra.mxu0 %v9800_v29 }
 0x403   : > { %v8475_v28 = vadd.f32 %v8392_v2, %v2653_v43  ;;  %3611 = vmatprep.mubr.f32.mxu0 %v9801_v17  ;;  %v9809_v17 = vld [vmem:[#allocation25_spill] sm:$0xff] }
 0x404   : > { %v8478_v50 = vpop.f32.mrf.mxu1  ;;  %5079 = vmatmul.mubr.f32.gmra.mxu1 %v8339_v54  ;;  %v2655_v33 = vpop.f32.mrf.mxu0 }
 0x405   : > { %v9810_v33 = vld [vmem:[#allocation62_spill] sm:$0xff] }
 0x406   : > { %v8481_v5 = vpop.f32.mrf.mxu1  ;;  %v2658_v15 = vpop.f32.mrf.mxu0  ;;  %3612 = vmatmul.mubr.f32.gmra.mxu0 %v9802_v30 }
 0x407   : > { %v8485_v0 = vadd.f32 %v8404_v35, %v2658_v15  ;;  %3616 = vmatprep.mubr.f32.mxu0 %v9803_v63 }
 0x408   : > { %v3028_v57 = vpop.f32.mrf.mxu1  ;;  %v2660_v2 = vpop.f32.mrf.mxu0 }
 0x409   : > { %v8489_v7 = vadd.f32 %v3028_v57, %v8344_v41  ;;  %v9811_v2 = vld [vmem:[#allocation72_spill] sm:$0xff] }
 0x40a   : > { %v3030_v53 = vpop.f32.mrf.mxu1  ;;  %v2663_v19 = vpop.f32.mrf.mxu0  ;;  %3617 = vmatmul.mubr.f32.gmra.mxu0 %v9804_v11 }
 0x40b   : > { %v8493_v54 = vadd.f32 %v8400_v51, %v2663_v19  ;;  %3621 = vmatprep.mubr.f32.mxu0 %v9805_v13  ;;  %v9812_v53 = vld [vmem:[#allocation63_spill] sm:$0xff] }
 0x40c   : > { %v3033_v46 = vpop.f32.mrf.mxu1  ;;  %v2665_v59 = vpop.f32.mrf.mxu0 }
 0x40d   : > { %v8497_v35 = vadd.f32 %v3033_v46, %v8349_v44  ;;  %v9813_v59 = vld [vmem:[#allocation15_spill] sm:$0xff] }
 0x40e   : > { %v3035_v16 = vpop.f32.mrf.mxu1  ;;  %v2668_v8 = vpop.f32.mrf.mxu0  ;;  %3622 = vmatmul.mubr.f32.gmra.mxu0 %v9806_v56 }
 0x40f   : > { %v8501_v41 = vadd.f32 %v8415_v60, %v2668_v8  ;;  %3626 = vmatprep.mubr.f32.mxu0 %v7729_v20  ;;  %v9814_v16 = vld [vmem:[#allocation26_spill] sm:$0xff] }
 0x410   : > { %v3038_v10 = vpop.f32.mrf.mxu1  ;;  %v2670_v39 = vpop.f32.mrf.mxu0 }
 0x411   : > { %v8505_v51 = vadd.f32 %v3038_v10, %v8355_v61 }
 0x412   : > { %v3040_v31 = vpop.f32.mrf.mxu1  ;;  %v2673_v42 = vpop.f32.mrf.mxu0  ;;  %3627 = vmatmul.mubr.f32.gmra.mxu0 %v9807_v55 }
 0x413   : > { %v8509_v44 = vadd.f32 %v8411_v21, %v2673_v42  ;;  %3631 = vmatprep.mubr.f32.mxu0 %v9808_v47  ;;  %v9815_v31 = vld [vmem:[#allocation74_spill] sm:$0xff]  ;;  %v9816_v42 = vld [vmem:[#allocation33_spill] sm:$0xff] }
 0x414   : > { %v3043_v48 = vpop.f32.mrf.mxu1  ;;  %v2675_v43 = vpop.f32.mrf.mxu0 }
 0x415   : > { %v8513_v60 = vadd.f32 %v3043_v48, %v8361_v26 }
 0x416   : > { %v3045_v20 = vpop.f32.mrf.mxu1  ;;  %v2678_v29 = vpop.f32.mrf.mxu0  ;;  %3632 = vmatmul.mubr.f32.gmra.mxu0 %v9809_v17 }
 0x417   : > { %v8517_v61 = vadd.f32 %v8425_v52, %v2678_v29  ;;  %3636 = vmatprep.mubr.f32.mxu0 %v9810_v33  ;;  %v9817_v20 = vld [vmem:[#allocation48_spill] sm:$0xff]  ;;  %v9818_v29 = vld [vmem:[#allocation13_spill] sm:$0xff] }
 0x418   : > { %v3048_v15 = vpop.f32.mrf.mxu1  ;;  %v2680_v30 = vpop.f32.mrf.mxu0 }
 0x419   : > { %v8521_v21 = vadd.f32 %v3048_v15, %v8367_v58 }
 0x41a   : > { %v3050_v63 = vpop.f32.mrf.mxu1  ;;  %v2683_v57 = vpop.f32.mrf.mxu0  ;;  %3637 = vmatmul.mubr.f32.gmra.mxu0 %v9811_v2 }
 0x41b   : > { %v8525_v26 = vadd.f32 %v8421_v6, %v2683_v57  ;;  %3641 = vmatprep.mubr.f32.mxu0 %v9812_v53  ;;  %v9819_v63 = vld [vmem:[#allocation77_spill] sm:$0xff]  ;;  %v9820_v57 = vld [vmem:[#allocation36_spill] sm:$0xff] }
 0x41c   : > { %v3053_v19 = vpop.f32.mrf.mxu1  ;;  %v2685_v11 = vpop.f32.mrf.mxu0 }
 0x41d   : > { %v8529_v52 = vadd.f32 %v3053_v19, %v8374_v12 }
 0x41e   : > { %v3055_v13 = vpop.f32.mrf.mxu1  ;;  %v2688_v46 = vpop.f32.mrf.mxu0  ;;  %3642 = vmatmul.mubr.f32.gmra.mxu0 %v9813_v59 }
 0x41f   : > { %v8533_v58 = vadd.f32 %v8436_v62, %v2688_v46  ;;  %3646 = vmatprep.mubr.f32.mxu0 %v9814_v16  ;;  %v9821_v13 = vld [vmem:[#allocation46_spill] sm:$0xff]  ;;  %v9822_v46 = vld [vmem:[#allocation44_spill] sm:$0xff] }
 0x420   : > { %v3058_v8 = vpop.f32.mrf.mxu1  ;;  %v2690_v56 = vpop.f32.mrf.mxu0 }
 0x421   : > { %v8537_v6 = vadd.f32 %v3058_v8, %v8380_v34 }
 0x422   : > { %v3060_v10 = vpop.f32.mrf.mxu1  ;;  %v2693_v39 = vpop.f32.mrf.mxu0  ;;  %3647 = vmatmul.mubr.f32.gmra.mxu0 %v9815_v31 }
 0x423   : > { %v8541_v12 = vadd.f32 %v8431_v37, %v2693_v39  ;;  %3651 = vmatprep.mubr.f32.mxu0 %v9816_v42  ;;  %v9823_v10 = vld [vmem:[#allocation75_spill] sm:$0xff] }
 0x424   : > { %v3063_v55 = vpop.f32.mrf.mxu1  ;;  %v2695_v47 = vpop.f32.mrf.mxu0 }
 0x425   : > { %v8545_v62 = vadd.f32 %v3063_v55, %v8389_v23  ;;  %v9824_v47 = vld [vmem:[#allocation64_spill] sm:$0xff] }
 0x426   : > { %v3065_v48 = vpop.f32.mrf.mxu1  ;;  %v2698_v43 = vpop.f32.mrf.mxu0  ;;  %3652 = vmatmul.mubr.f32.gmra.mxu0 %v9817_v20 }
 0x427   : > { %v8549_v34 = vadd.f32 %v8446_v14, %v2698_v43  ;;  %3656 = vmatprep.mubr.f32.mxu0 %v9818_v29  ;;  %v9825_v48 = vld [vmem:[#allocation35_spill] sm:$0xff] }
 0x428   : > { %v3068_v17 = vpop.f32.mrf.mxu1  ;;  %v2700_v33 = vpop.f32.mrf.mxu0 }
 0x429   : > { %v8553_v37 = vadd.f32 %v3068_v17, %v8397_v22 }
 0x42a   : > { %v3070_v15 = vpop.f32.mrf.mxu1  ;;  %v2703_v30 = vpop.f32.mrf.mxu0  ;;  %3657 = vmatmul.mubr.f32.gmra.mxu0 %v9819_v63 }
 0x42b   : > { %v8557_v23 = vadd.f32 %v8441_v32, %v2703_v30  ;;  %3661 = vmatprep.mubr.f32.mxu0 %v9820_v57  ;;  %v9826_v30 = vld [vmem:[#allocation52_spill] sm:$0xff] }
 0x42c   : > { %v3073_v2 = vpop.f32.mrf.mxu1  ;;  %v2705_v53 = vpop.f32.mrf.mxu0 }
 0x42d   : > { %v8561_v14 = vadd.f32 %v3073_v2, %v8408_v3  ;;  %v3415_v2 = vsel %vm253_vm3, %v8026_v1, %v9826_v30 }
 0x42e   : > { %v3075_v19 = vpop.f32.mrf.mxu1  ;;  %v2708_v11 = vpop.f32.mrf.mxu0  ;;  %3662 = vmatmul.mubr.f32.gmra.mxu0 %v9821_v13 }
 0x42f   : > { %v8565_v22 = vadd.f32 %v8458_v27, %v2708_v11  ;;  %3666 = vmatprep.mubr.f32.mxu0 %v9822_v46 }
 0x430   : > { %v3078_v59 = vpop.f32.mrf.mxu1  ;;  %v2710_v16 = vpop.f32.mrf.mxu0 }
 0x431   : > { %v8569_v32 = vadd.f32 %v3078_v59, %v8418_v25 }
 0x432   : > { %v3080_v8 = vpop.f32.mrf.mxu1  ;;  %v2713_v56 = vpop.f32.mrf.mxu0  ;;  %3667 = vmatmul.mubr.f32.gmra.mxu0 %v8032_v24 }
 0x433   : > { %v8573_v3 = vadd.f32 %v8453_v4, %v2713_v56  ;;  %3671 = vmatprep.mubr.f32.mxu0 %v9823_v10 }
 0x434   : > { %v3083_v39 = vpop.f32.mrf.mxu1  ;;  %v2715_v31 = vpop.f32.mrf.mxu0 }
 0x435   : > { %v8577_v27 = vadd.f32 %v3083_v39, %v8429_v45 }
 0x436   : > { %v3085_v42 = vpop.f32.mrf.mxu1  ;;  %v2718_v55 = vpop.f32.mrf.mxu0  ;;  %3672 = vmatmul.mubr.f32.gmra.mxu0 %v9824_v47 }
 0x437   : > { %v8581_v25 = vadd.f32 %v8471_v49, %v2718_v55  ;;  %3676 = vmatprep.mubr.f32.mxu0 %v9825_v48 }
 0x438   : > { %v3088_v43 = vpop.f32.mrf.mxu1  ;;  %v2720_v20 = vpop.f32.mrf.mxu0 }
 0x439   : > { %v8585_v4 = vadd.f32 %v3088_v43, %v8439_v38 }
 0x43a   : > { %v3090_v29 = vpop.f32.mrf.mxu1  ;;  %v2723_v17 = vpop.f32.mrf.mxu0  ;;  %3677 = vmatmul.mubr.f32.gmra.mxu0 %v8065_v36 }
 0x43b   : > { %v8589_v45 = vadd.f32 %v8463_v40, %v2723_v17  ;;  %3681 = vmatprep.mubr.f32.mxu0 %v9820_v57 }
 0x43c   : > { %v3093_v33 = vpop.f32.mrf.mxu1  ;;  %v2725_v15 = vpop.f32.mrf.mxu0 }
 0x43d   : > { %v3094_v49 = vadd.f32 %v3093_v33, %v8450_v18 }
 0x43e   : > { %v3095_v38 = vpop.f32.mrf.mxu1  ;;  %v2728_v53 = vpop.f32.mrf.mxu0  ;;  %3682 = vmatmul.mubr.f32.gmra.mxu0 %v3415_v2 }
 0x43f   : > { %v8598_v19 = vadd.f32 %v8481_v5, %v2728_v53  ;;  %3686 = vmatprep.mubr.f32.mxu0 %v9822_v46 }
 0x440   : > { %v3098_v36 = vpop.f32.mrf.mxu1  ;;  %v2730_v40 = vpop.f32.mrf.mxu0 }
 0x441   : > { %v8602_v57 = vadd.f32 %v3098_v36, %v8460_v9 }
 0x442   : > { %v3100_v11 = vpop.f32.mrf.mxu1  ;;  %v2733_v18 = vpop.f32.mrf.mxu0  ;;  %3687 = vmatmul.mubr.f32.gmra.mxu0 %v8032_v24 }
 0x443   : > { %v8606_v13 = vadd.f32 %v8478_v50, %v2733_v18 }
 0x444   : > { %v3103_v1 = vpop.f32.mrf.mxu1  ;;  %v2735_v59 = vpop.f32.mrf.mxu0 }
 0x445   : > { %v3104_v16 = vadd.f32 %v3103_v1, %v8475_v28 }
 0x446   : > { %v3105_v5 = vpop.f32.mrf.mxu1  ;;  %v4955_v8 = vpop.f32.mrf.mxu0 }
 0x447   : > { %v8610_v46 = vadd.f32 %v4955_v8, %v8497_v35 }
 0x448   : > { %v3108_v56 = vpop.f32.mrf.mxu1  ;;  %v3253_v10 = vpop.f32.mrf.mxu0 }
 0x449   : > { %v3109_v9 = vadd.f32 %v3108_v56, %v8485_v0  ;;  %v8614_v39 = vadd.f32 %v3253_v10, %v8489_v7 }
 0x44a   : > { %v3110_v24 = vpop.f32.mrf.mxu1  ;;  %v4958_v31 = vpop.f32.mrf.mxu0 }
 0x44b   : > { %v8617_v50 = vadd.f32 %v4958_v31, %v8513_v60 }
 0x44c   : > { %v3113_v42 = vpop.f32.mrf.mxu1  ;;  %v3263_v55 = vpop.f32.mrf.mxu0 }
 0x44d   : > { %v3114_v28 = vadd.f32 %v3113_v42, %v8493_v54  ;;  %v8621_v47 = vadd.f32 %v3263_v55, %v8505_v51 }
 0x44e   : > { %v3115_v35 = vpop.f32.mrf.mxu1  ;;  %v4961_v48 = vpop.f32.mrf.mxu0 }
 0x44f   : > { %v8624_v43 = vadd.f32 %v4961_v48, %v8529_v52 }
 0x450   : > { %v3118_v0 = vpop.f32.mrf.mxu1  ;;  %v3273_v7 = vpop.f32.mrf.mxu0 }
 0x451   : > { %v3119_v20 = vadd.f32 %v3118_v0, %v8501_v41  ;;  %v8628_v29 = vadd.f32 %v3273_v7, %v8521_v21 }
 0x452   : > { %v3120_v60 = vpop.f32.mrf.mxu1  ;;  %v4964_v17 = vpop.f32.mrf.mxu0 }
 0x453   : > { %v8631_v33 = vadd.f32 %v4964_v17, %v8545_v62 }
 0x454   : > { %v3123_v54 = vpop.f32.mrf.mxu1  ;;  %v3283_v51 = vpop.f32.mrf.mxu0 }
 0x455   : > { %v3124_v15 = vadd.f32 %v3123_v54, %v8509_v44  ;;  %v8635_v30 = vadd.f32 %v3283_v51, %v8537_v6 }
 0x456   : > { %v3125_v52 = vpop.f32.mrf.mxu1  ;;  %v4967_v63 = vpop.f32.mrf.mxu0 }
 0x457   : > { %v8638_v2 = vadd.f32 %v4967_v63, %v8561_v14 }
 0x458   : > { %v3128_v41 = vpop.f32.mrf.mxu1  ;;  %v3293_v21 = vpop.f32.mrf.mxu0 }
 0x459   : > { %v3129_v38 = vadd.f32 %v3128_v41, %v8517_v61  ;;  %v8642_v53 = vadd.f32 %v3293_v21, %v8553_v37 }
 0x45a   : > { %v3130_v62 = vpop.f32.mrf.mxu1  ;;  %v4970_v36 = vpop.f32.mrf.mxu0 }
 0x45b   : > { %v8645_v40 = vadd.f32 %v4970_v36, %v8577_v27 }
 0x45c   : > { %v3133_v44 = vpop.f32.mrf.mxu1  ;;  %v3303_v6 = vpop.f32.mrf.mxu0 }
 0x45d   : > { %v3134_v11 = vadd.f32 %v3133_v44, %v8525_v26  ;;  %v8649_v18 = vadd.f32 %v3303_v6, %v8569_v32 }
 0x45e   : > { %v3135_v14 = vpop.f32.mrf.mxu1  ;;  %v4973_v1 = vpop.f32.mrf.mxu0 }
 0x45f   : > { %v8651_v59 = vadd.f32 %v4973_v1, %v3094_v49 }
 0x460   : > { %v3138_v61 = vpop.f32.mrf.mxu1  ;;  %v3313_v5 = vpop.f32.mrf.mxu0 }
 0x461   : > { %v3139_v37 = vadd.f32 %v3138_v61, %v8533_v58  ;;  %v8655_v8 = vadd.f32 %v3313_v5, %v8585_v4 }
 0x462   : > { %v3140_v27 = vpop.f32.mrf.mxu1  ;;  %v4976_v56 = vpop.f32.mrf.mxu0 }
 0x463   : > { %v8657_v10 = vadd.f32 %v4976_v56, %v3104_v16 }
 0x464   : > { %v3143_v24 = vpop.f32.mrf.mxu1  ;;  %v3323_v26 = vpop.f32.mrf.mxu0 }
 0x465   : > { %v3144_v32 = vadd.f32 %v3143_v24, %v8541_v12  ;;  %v8661_v31 = vadd.f32 %v3323_v26, %v8602_v57 }
 0x466   : > { %v3145_v49 = vpop.f32.mrf.mxu1  ;;  %v4979_v42 = vpop.f32.mrf.mxu0 }
 0x467   : > { %v8663_v55 = vadd.f32 %v4979_v42, %v3114_v28 }
 0x468   : > { %v3148_v35 = vpop.f32.mrf.mxu1  ;;  %v3333_v58 = vpop.f32.mrf.mxu0 }
 0x469   : > { %v3149_v4 = vadd.f32 %v3148_v35, %v8549_v34  ;;  %v8666_v48 = vadd.f32 %v3333_v58, %v3109_v9 }
 0x46a   : > { %v3150_v0 = vpop.f32.mrf.mxu1  ;;  %v4982_v16 = vpop.f32.mrf.mxu0 }
 0x46b   : > { %v8668_v7 = vadd.f32 %v4982_v16, %v3124_v15 }
 0x46c   : > { %v3153_v60 = vpop.f32.mrf.mxu1  ;;  %v3343_v17 = vpop.f32.mrf.mxu0 }
 0x46d   : > { %v3154_v12 = vadd.f32 %v3153_v60, %v8557_v23  ;;  %v8671_v57 = vadd.f32 %v3343_v17, %v3119_v20 }
 0x46e   : > { %v3155_v54 = vpop.f32.mrf.mxu1  ;;  %v4985_v51 = vpop.f32.mrf.mxu0 }
 0x46f   : > { %v8673_v28 = vadd.f32 %v4985_v51, %v3134_v11 }
 0x470   : > { %v3158_v52 = vpop.f32.mrf.mxu1  ;;  %v3353_v63 = vpop.f32.mrf.mxu0 }
 0x471   : > { %v3159_v34 = vadd.f32 %v3158_v52, %v8565_v22  ;;  %v8676_v9 = vadd.f32 %v3353_v63, %v3129_v38 }
 0x472   : > { %v3160_v41 = vpop.f32.mrf.mxu1  ;;  %v4988_v21 = vpop.f32.mrf.mxu0 }
 0x473   : > { %v8678_v15 = vadd.f32 %v4988_v21, %v3144_v32 }
 0x474   : > { %v3163_v62 = vpop.f32.mrf.mxu1  ;;  %v3363_v36 = vpop.f32.mrf.mxu0 }
 0x475   : > { %v3164_v23 = vadd.f32 %v3163_v62, %v8573_v3  ;;  %v8681_v20 = vadd.f32 %v3363_v36, %v3139_v37 }
 0x476   : > { %v3165_v44 = vpop.f32.mrf.mxu1  ;;  %v4991_v6 = vpop.f32.mrf.mxu0 }
 0x477   : > { %v8683_v11 = vadd.f32 %v4991_v6, %v3154_v12 }
 0x478   : > { %v3168_v14 = vpop.f32.mrf.mxu1  ;;  %v3373_v1 = vpop.f32.mrf.mxu0 }
 0x479   : > { %v3169_v22 = vadd.f32 %v3168_v14, %v8581_v25  ;;  %v8686_v38 = vadd.f32 %v3373_v1, %v3149_v4 }
 0x47a   : > { %v3170_v61 = vpop.f32.mrf.mxu1  ;;  %v4994_v5 = vpop.f32.mrf.mxu0 }
 0x47b   : > { %v8688_v27 = vadd.f32 %v4994_v5, %v3164_v23 }
 0x47c   : > { %v3173_v56 = vpop.f32.mrf.mxu1  ;;  %v3383_v24 = vpop.f32.mrf.mxu0 }
 0x47d   : > { %v3174_v3 = vadd.f32 %v3173_v56, %v8589_v45  ;;  %v8691_v37 = vadd.f32 %v3383_v24, %v3159_v34 }
 0x47e   : > { %v3175_v26 = vpop.f32.mrf.mxu1  ;;  %v4997_v32 = vpop.f32.mrf.mxu0 }
 0x47f   : > { %v8693_v49 = vadd.f32 %v4997_v32, %v3174_v3 }
 0x480   : > { %v3178_v42 = vpop.f32.mrf.mxu1  ;;  %v3393_v35 = vpop.f32.mrf.mxu0 }
 0x481   : > { %v3179_v25 = vadd.f32 %v3178_v42, %v8598_v19  ;;  %v8696_v58 = vadd.f32 %v3393_v35, %v3169_v22 }
 0x482   : > { %v3180_v4 = vpop.f32.mrf.mxu1  ;;  %v5000_v0 = vpop.f32.mrf.mxu0 }
 0x484   : > { %v3183_v16 = vpop.f32.mrf.mxu1  ;;  %v3403_v60 = vpop.f32.mrf.mxu0 }
 0x485   : > { %v3184_v17 = vadd.f32 %v3183_v16, %v8606_v13  ;;  %v8699_v12 = vadd.f32 %v3403_v60, %v3179_v25 }
 0x486   : > { %v3185_v45 = vpop.f32.mrf.mxu1  ;;  %v3533_v54 = vpop.f32.mrf.mxu0 }
 0x487   : > { %v8701_v51 = vadd.f32 %v5000_v0, %v3184_v17 }
 0x488   : > { %v5035_v52 = vpop.f32.mrf.mxu1  ;;  %v3535_v63 = vpop.f32.mrf.mxu0 }
 0x48a   : > { %v3758_v34 = vpop.f32.mrf.mxu1  ;;  %v3538_v41 = vpop.f32.mrf.mxu0 }
 0x48b   : > { %v3759_v21 = vadd.f32 %v3758_v34, %v3533_v54  ;;  %v3764_v19 = vadd.f32 %v5035_v52, %v3538_v41 }
 0x48c   : > { %v5038_v62 = vpop.f32.mrf.mxu1  ;;  %v3540_v36 = vpop.f32.mrf.mxu0 }
 0x48d   : > { %v8704_v23 = vadd.f32 %v3759_v21, %v8614_v39  ;;  %v8707_v44 = vadd.f32 %v3764_v19, %v8610_v46 }
 0x48e   : > { %v3768_v13 = vpop.f32.mrf.mxu1  ;;  %v3543_v6 = vpop.f32.mrf.mxu0 }
 0x48f   : > { %v3769_v14 = vadd.f32 %v3768_v13, %v3543_v6 }
 0x490   : > { %v3545_v1 = vpop.f32.mrf.mxu0  ;;  %v5041_v61 = vpop.f32.mrf.mxu1 }
 0x491   : > { %v8710_v22 = vadd.f32 %v3769_v14, %v8621_v47 }
 0x492   : > { %v3548_v5 = vpop.f32.mrf.mxu0  ;;  %v3778_v26 = vpop.f32.mrf.mxu1 }
 0x493   : > { %v3774_v56 = vadd.f32 %v5038_v62, %v3548_v5  ;;  %v3949_v5 = vadd.f32 %v8707_v44, %v8704_v23 }
 0x494   : > { %v3550_v24 = vpop.f32.mrf.mxu0  ;;  %v5044_v35 = vpop.f32.mrf.mxu1 }
 0x495   : > { %v8713_v3 = vadd.f32 %v3774_v56, %v8617_v50 }
 0x496   : > { %v3553_v39 = vpop.f32.mrf.mxu0  ;;  %v3788_v16 = vpop.f32.mrf.mxu1 }
 0x497   : > { %v3779_v32 = vadd.f32 %v3778_v26, %v3553_v39  ;;  %v3950_v26 = vadd.f32 %v3949_v5, %v8710_v22 }
 0x498   : > { %v3555_v42 = vpop.f32.mrf.mxu0  ;;  %v5047_v45 = vpop.f32.mrf.mxu1 }
 0x499   : > { %v8716_v46 = vadd.f32 %v3779_v32, %v8628_v29  ;;  %v3951_v42 = vadd.f32 %v3950_v26, %v8713_v3 }
 0x49a   : > { %v3558_v25 = vpop.f32.mrf.mxu0  ;;  %v3798_v52 = vpop.f32.mrf.mxu1 }
 0x49b   : > { %v3784_v4 = vadd.f32 %v5041_v61, %v3558_v25 }
 0x49c   : > { %v3560_v0 = vpop.f32.mrf.mxu0  ;;  %v5050_v41 = vpop.f32.mrf.mxu1 }
 0x49d   : > { %v8719_v47 = vadd.f32 %v3784_v4, %v8624_v43 }
 0x49e   : > { %v3563_v60 = vpop.f32.mrf.mxu0  ;;  %v3808_v19 = vpop.f32.mrf.mxu1 }
 0x49f   : > { %v3789_v39 = vadd.f32 %v3788_v16, %v3563_v60 }
 0x4a0   : > { %v3565_v17 = vpop.f32.mrf.mxu0  ;;  %v5053_v13 = vpop.f32.mrf.mxu1 }
 0x4a1   : > { %v3952_v17 = vadd.f32 %v3951_v42, %v8716_v46 }
 0x4a2   : > { %v3568_v50 = vpop.f32.mrf.mxu0  ;;  %v3818_v43 = vpop.f32.mrf.mxu1 }
 0x4a3   : > { %v3794_v25 = vadd.f32 %v5044_v35, %v3568_v50 }
 0x4a4   : > { %v3570_v54 = vpop.f32.mrf.mxu0  ;;  %v5056_v56 = vpop.f32.mrf.mxu1 }
 0x4a5   : > { %v8727_v54 = vadd.f32 %v3789_v39, %v8635_v30 }
 0x4a6   : > { %v3573_v63 = vpop.f32.mrf.mxu0  ;;  %v3828_v4 = vpop.f32.mrf.mxu1 }
 0x4a8   : > { %v3575_v34 = vpop.f32.mrf.mxu0  ;;  %v5059_v16 = vpop.f32.mrf.mxu1 }
 0x4a9   : > { %v3799_v34 = vadd.f32 %v3798_v52, %v3573_v63 }
 0x4aa   : > { %v3578_v21 = vpop.f32.mrf.mxu0  ;;  %v3838_v39 = vpop.f32.mrf.mxu1 }
 0x4ab   : > { %v8735_v35 = vadd.f32 %v3799_v34, %v8642_v53 }
 0x4ac   : > { %v3580_v29 = vpop.f32.mrf.mxu0 }
 0x4ae   : > { %v3583_v62 = vpop.f32.mrf.mxu0 }
 0x4af   : > { %v3809_v50 = vadd.f32 %v3808_v19, %v3583_v62 }
 0x4b0   : > { %v3585_v36 = vpop.f32.mrf.mxu0 }
 0x4b1   : > { %v3953_v36 = vadd.f32 %v3952_v17, %v8719_v47 }
 0x4b2   : > { %v3588_v6 = vpop.f32.mrf.mxu0 }
 0x4b3   : > { %v3954_v5 = vadd.f32 %v3953_v36, %v8727_v54  ;;  %v3814_v63 = vadd.f32 %v5050_v41, %v3588_v6 }
 0x4b4   : > { %v3590_v14 = vpop.f32.mrf.mxu0 }
 0x4b5   : > { %v8731_v14 = vadd.f32 %v3794_v25, %v8631_v33  ;;  %v8747_v19 = vadd.f32 %v3814_v63, %v8645_v40  ;;  %v5062_v25 = vpop.f32.mrf.mxu1 }
 0x4b6   : > { %v3593_v1 = vpop.f32.mrf.mxu0 }
 0x4b7   : > { %v3955_v30 = vadd.f32 %v3954_v5, %v8731_v14 }
 0x4b8   : > { %v3595_v61 = vpop.f32.mrf.mxu0 }
 0x4b9   : > { %v3804_v61 = vadd.f32 %v5047_v45, %v3578_v21  ;;  %v3956_v33 = vadd.f32 %v3955_v30, %v8735_v35  ;;  %v8743_v45 = vadd.f32 %v3809_v50, %v8649_v18  ;;  %v3819_v21 = vadd.f32 %v3818_v43, %v3593_v1 }
 0x4ba   : > { %v3598_v24 = vpop.f32.mrf.mxu0 }
 0x4bb   : > { %v8739_v52 = vadd.f32 %v3804_v61, %v8638_v2  ;;  %v3824_v62 = vadd.f32 %v5053_v13, %v3598_v24  ;;  %v8751_v41 = vadd.f32 %v3819_v21, %v8655_v8 }
 0x4bc   : > { %v3600_v32 = vpop.f32.mrf.mxu0 }
 0x4bd   : > { %v3957_v53 = vadd.f32 %v3956_v33, %v8739_v52  ;;  %v8755_v43 = vadd.f32 %v3824_v62, %v8651_v59 }
 0x4be   : > { %v3603_v0 = vpop.f32.mrf.mxu0 }
 0x4bf   : > { %v3958_v2 = vadd.f32 %v3957_v53, %v8743_v45  ;;  %v3829_v6 = vadd.f32 %v3828_v4, %v3603_v0 }
 0x4c0   : > { %v3605_v29 = vpop.f32.mrf.mxu0 }
 0x4c1   : > { %v3959_v18 = vadd.f32 %v3958_v2, %v8747_v19  ;;  %v3848_v29 = vpop.f32.mrf.mxu1  ;;  %v8759_v13 = vadd.f32 %v3829_v6, %v8661_v31 }
 0x4c2   : > { %v3608_v60 = vpop.f32.mrf.mxu0 }
 0x4c3   : > { %v3834_v1 = vadd.f32 %v5056_v56, %v3608_v60  ;;  %v3960_v40 = vadd.f32 %v3959_v18, %v8751_v41  ;;  %v5065_v5 = vpop.f32.mrf.mxu1 }
 0x4c4   : > { %v3610_v26 = vpop.f32.mrf.mxu0 }
 0x4c5   : > { %v3961_v8 = vadd.f32 %v3960_v40, %v8755_v43  ;;  %v8763_v4 = vadd.f32 %v3834_v1, %v8657_v10 }
 0x4c6   : > { %v3613_v32 = vpop.f32.mrf.mxu0 }
 0x4c7   : > { %v3839_v24 = vadd.f32 %v3838_v39, %v3613_v32  ;;  %v3962_v59 = vadd.f32 %v3961_v8, %v8759_v13  ;;  %v3858_v39 = vpop.f32.mrf.mxu1 }
 0x4c8   : > { %v3615_v42 = vpop.f32.mrf.mxu0 }
 0x4c9   : > { %v8767_v56 = vadd.f32 %v3839_v24, %v8666_v48  ;;  %v3963_v31 = vadd.f32 %v3962_v59, %v8763_v4  ;;  %v5068_v53 = vpop.f32.mrf.mxu1 }
 0x4ca   : > { %v3618_v17 = vpop.f32.mrf.mxu0 }
 0x4cb   : > { %v3844_v0 = vadd.f32 %v5059_v16, %v3618_v17  ;;  %v3964_v10 = vadd.f32 %v3963_v31, %v8767_v56 }
 0x4cc   : > { %v3620_v34 = vpop.f32.mrf.mxu0 }
 0x4cd   : > { %v8771_v30 = vadd.f32 %v3844_v0, %v8663_v55  ;;  %v3868_v34 = vpop.f32.mrf.mxu1 }
 0x4ce   : > { %v3623_v36 = vpop.f32.mrf.mxu0 }
 0x4cf   : > { %v3849_v60 = vadd.f32 %v3848_v29, %v3623_v36  ;;  %v3965_v48 = vadd.f32 %v3964_v10, %v8771_v30 }
 0x4d0   : > { %v3625_v61 = vpop.f32.mrf.mxu0 }
 0x4d1   : > { %v8775_v16 = vadd.f32 %v3849_v60, %v8671_v57 }
 0x4d2   : > { %v3628_v50 = vpop.f32.mrf.mxu0 }
 0x4d3   : > { %v3854_v63 = vadd.f32 %v5062_v25, %v3628_v50  ;;  %v3966_v55 = vadd.f32 %v3965_v48, %v8775_v16 }
 0x4d4   : > { %v3630_v26 = vpop.f32.mrf.mxu0 }
 0x4d5   : > { %v8779_v42 = vadd.f32 %v3854_v63, %v8668_v7 }
 0x4d6   : > { %v3633_v32 = vpop.f32.mrf.mxu0 }
 0x4d7   : > { %v3859_v33 = vadd.f32 %v3858_v39, %v3633_v32  ;;  %v3967_v6 = vadd.f32 %v3966_v55, %v8779_v42 }
 0x4d8   : > { %v3635_v21 = vpop.f32.mrf.mxu0 }
 0x4d9   : > { %v8783_v25 = vadd.f32 %v3859_v33, %v8676_v9  ;;  %v5071_v9 = vpop.f32.mrf.mxu1 }
 0x4da   : > { %v3638_v62 = vpop.f32.mrf.mxu0 }
 0x4db   : > { %v3864_v17 = vadd.f32 %v5065_v5, %v3638_v62  ;;  %v3968_v1 = vadd.f32 %v3967_v6, %v8783_v25  ;;  %v3878_v5 = vpop.f32.mrf.mxu1 }
 0x4dc   : > { %v3640_v2 = vpop.f32.mrf.mxu0 }
 0x4dd   : > { %v8787_v57 = vadd.f32 %v3864_v17, %v8673_v28  ;;  %v5074_v63 = vpop.f32.mrf.mxu1 }
 0x4de   : > { %v3643_v18 = vpop.f32.mrf.mxu0 }
 0x4df   : > { %v3869_v7 = vadd.f32 %v3868_v34, %v3643_v18  ;;  %v3969_v36 = vadd.f32 %v3968_v1, %v8787_v57  ;;  %v3888_v21 = vpop.f32.mrf.mxu1 }
 0x4e0   : > { %v3645_v29 = vpop.f32.mrf.mxu0 }
 0x4e1   : > { %v8792_v40 = vadd.f32 %v3869_v7, %v8681_v20  ;;  %v5077_v17 = vpop.f32.mrf.mxu1 }
 0x4e2   : > { %v3648_v24 = vpop.f32.mrf.mxu0 }
 0x4e3   : > { %v3970_v61 = vadd.f32 %v3969_v36, %v8792_v40  ;;  %v3874_v8 = vadd.f32 %v5068_v53, %v3648_v24  ;;  %v3898_v1 = vpop.f32.mrf.mxu1 }
 0x4e4   : > { %v3650_v0 = vpop.f32.mrf.mxu0 }
 0x4e5   : > { %v3940_v28 = vadd.f32 %v3874_v8, %v8678_v15  ;;  %v5080_v24 = vpop.f32.mrf.mxu1 }
 0x4e6   : > { %v3653_v50 = vpop.f32.mrf.mxu0 }
 0x4e7   : > { %v3971_v59 = vadd.f32 %v3970_v61, %v3940_v28  ;;  %v3879_v60 = vadd.f32 %v3878_v5, %v3653_v50  ;;  %v3908_v50 = vpop.f32.mrf.mxu1 }
 0x4e8   : > { %v3655_v26 = vpop.f32.mrf.mxu0 }
 0x4e9   : > { %v3941_v31 = vadd.f32 %v3879_v60, %v8686_v38 }
 0x4ea   : > { %v3658_v39 = vpop.f32.mrf.mxu0 }
 0x4eb   : > { %v3972_v32 = vadd.f32 %v3971_v59, %v3941_v31  ;;  %v3884_v20 = vadd.f32 %v5071_v9, %v3658_v39 }
 0x4ec   : > { %v3660_v10 = vpop.f32.mrf.mxu0 }
 0x4ed   : > { %v3942_v33 = vadd.f32 %v3884_v20, %v8683_v11 }
 0x4ee   : > { %v3663_v48 = vpop.f32.mrf.mxu0 }
 0x4ef   : > { %v3973_v53 = vadd.f32 %v3972_v32, %v3942_v33  ;;  %v3889_v62 = vadd.f32 %v3888_v21, %v3663_v48 }
 0x4f0   : > { %v3665_v55 = vpop.f32.mrf.mxu0 }
 0x4f1   : > { %v3943_v15 = vadd.f32 %v3889_v62, %v8691_v37 }
 0x4f2   : > { %v3668_v2 = vpop.f32.mrf.mxu0 }
 0x4f3   : > { %v3974_v6 = vadd.f32 %v3973_v53, %v3943_v15  ;;  %v3894_v34 = vadd.f32 %v5074_v63, %v3668_v2 }
 0x4f4   : > { %v3670_v18 = vpop.f32.mrf.mxu0 }
 0x4f5   : > { %v3944_v38 = vadd.f32 %v3894_v34, %v8688_v27 }
 0x4f6   : > { %v3673_v7 = vpop.f32.mrf.mxu0 }
 0x4f7   : > { %v3975_v29 = vadd.f32 %v3974_v6, %v3944_v38  ;;  %v3899_v36 = vadd.f32 %v3898_v1, %v3673_v7 }
 0x4f8   : > { %v3675_v9 = vpop.f32.mrf.mxu0 }
 0x4f9   : > { %v3945_v11 = vadd.f32 %v3899_v36, %v8696_v58 }
 0x4fa   : > { %v3678_v61 = vpop.f32.mrf.mxu0 }
 0x4fb   : > { %v3976_v8 = vadd.f32 %v3975_v29, %v3945_v11  ;;  %v3904_v0 = vadd.f32 %v5077_v17, %v3678_v61 }
 0x4fc   : > { %v3680_v5 = vpop.f32.mrf.mxu0 }
 0x4fd   : > { %v3946_v37 = vadd.f32 %v3904_v0, %v8693_v49 }
 0x4fe   : > { %v3683_v59 = vpop.f32.mrf.mxu0 }
 0x4ff   : > { %v3977_v60 = vadd.f32 %v3976_v8, %v3946_v37  ;;  %v3909_v26 = vadd.f32 %v3908_v50, %v3683_v59 }
 0x500   : > { %v3685_v63 = vpop.f32.mrf.mxu0 }
 0x501   : > { %v3947_v27 = vadd.f32 %v3909_v26, %v8699_v12 }
 0x502   : > { %v3688_v39 = vpop.f32.mrf.mxu0 }
 0x503   : > { %v3978_v32 = vadd.f32 %v3977_v60, %v3947_v27  ;;  %v3914_v20 = vadd.f32 %v5080_v24, %v3688_v39 }
 0x504   : > { %v3690_v10 = vpop.f32.mrf.mxu0 }
 0x505   : > { %v3948_v58 = vadd.f32 %v3914_v20, %v8701_v51 }
 0x507   : > { %v3979_v21 = vadd.f32 %v3978_v32, %v3948_v58 }
 0x509   : > { %v3980_v48 = vrot.slane %v3979_v21, 4 }
 0x50b   : > { %v3981_v53 = vadd.f32 %v3980_v48, %v3979_v21 }
 0x50d   : > { %v3982_v62 = vrot.slane %v3981_v53, 2 }
 0x50f   : > { %v3983_v55 = vadd.f32 %v3982_v62, %v3981_v53 }
 0x511   : > { %v3984_v17 = vrot.slane %v3983_v55, 1 }
 0x513   : > { %v3985_v49 = vadd.f32 %v3984_v17, %v3983_v55 }
 0x515   : > { %v8804_v2 = vmul.f32 0.00390625, %v3985_v49 }
 0x517   : > { %v8808_v6 = vsub.f32 %v8787_v57, %v8804_v2  ;;  %v8812_v12 = vsub.f32 %v8792_v40, %v8804_v2  ;;  %v8815_v34 = vsub.f32 %v3940_v28, %v8804_v2  ;;  %v8818_v51 = vsub.f32 %v3941_v31, %v8804_v2 }
 0x518   : > { %v8821_v18 = vsub.f32 %v3942_v33, %v8804_v2  ;;  %v8824_v1 = vsub.f32 %v3943_v15, %v8804_v2  ;;  %v8827_v7 = vsub.f32 %v3944_v38, %v8804_v2  ;;  %v8830_v57 = vsub.f32 %v3945_v11, %v8804_v2 }
 0x519   : > { %v8833_v40 = vsub.f32 %v3946_v37, %v8804_v2  ;;  %v8836_v28 = vsub.f32 %v3947_v27, %v8804_v2  ;;  %v8839_v31 = vsub.f32 %v3948_v58, %v8804_v2  ;;  %v8843_v33 = vsub.f32 %v8704_v23, %v8804_v2 }
 0x51a   : > { %v8847_v15 = vsub.f32 %v8707_v44, %v8804_v2  ;;  %v8851_v38 = vsub.f32 %v8710_v22, %v8804_v2  ;;  %v8859_v9 = vsub.f32 %v8713_v3, %v8804_v2  ;;  %v8863_v23 = vsub.f32 %v8716_v46, %v8804_v2 }
 0x51b   : > { %v4019_v29 = vmul.f32 %v8843_v33, %v8843_v33  ;;  %v8869_v22 = vsub.f32 %v8719_v47, %v8804_v2  ;;  %v8875_v3 = vsub.f32 %v8727_v54, %v8804_v2  ;;  %v8881_v0 = vsub.f32 %v8731_v14, %v8804_v2 }
 0x51c   : > { %v4020_v36 = vmul.f32 %v8847_v15, %v8847_v15  ;;  %v4021_v44 = vmul.f32 %v8851_v38, %v8851_v38  ;;  %v4022_v24 = vmul.f32 %v8859_v9, %v8859_v9  ;;  %v4023_v46 = vmul.f32 %v8863_v23, %v8863_v23 }
 0x51d   : > { %v4024_v47 = vmul.f32 %v8869_v22, %v8869_v22  ;;  %v8887_v37 = vsub.f32 %v8735_v35, %v8804_v2  ;;  %v4025_v54 = vmul.f32 %v8875_v3, %v8875_v3  ;;  %v8893_v59 = vsub.f32 %v8739_v52, %v8804_v2 }
 0x51e   : > { %v4051_v11 = vadd.f32 %v4020_v36, %v4019_v29  ;;  %v4026_v14 = vmul.f32 %v8881_v0, %v8881_v0  ;;  %v8899_v26 = vsub.f32 %v8743_v45, %v8804_v2  ;;  %v8905_v27 = vsub.f32 %v8747_v19, %v8804_v2 }
 0x51f   : > { %v4027_v35 = vmul.f32 %v8887_v37, %v8887_v37  ;;  %v4028_v52 = vmul.f32 %v8893_v59, %v8893_v59  ;;  %v8911_v32 = vsub.f32 %v8751_v41, %v8804_v2  ;;  %v8917_v10 = vsub.f32 %v8755_v43, %v8804_v2 }
 0x520   : > { %v4052_v61 = vadd.f32 %v4051_v11, %v4021_v44  ;;  %v4029_v45 = vmul.f32 %v8899_v26, %v8899_v26  ;;  %v4030_v19 = vmul.f32 %v8905_v27, %v8905_v27  ;;  %v8923_v21 = vsub.f32 %v8759_v13, %v8804_v2 }
 0x521   : > { %v4031_v41 = vmul.f32 %v8911_v32, %v8911_v32  ;;  %v8929_v53 = vsub.f32 %v8763_v4, %v8804_v2  ;;  %v4032_v43 = vmul.f32 %v8917_v10, %v8917_v10  ;;  %v8935_v55 = vsub.f32 %v8767_v56, %v8804_v2 }
 0x522   : > { %v4053_v8 = vadd.f32 %v4052_v61, %v4022_v24  ;;  %v4033_v13 = vmul.f32 %v8923_v21, %v8923_v21  ;;  %v8941_v49 = vsub.f32 %v8771_v30, %v8804_v2  ;;  %v8947_v36 = vsub.f32 %v8775_v16, %v8804_v2 }
 0x523   : > { %v4034_v4 = vmul.f32 %v8929_v53, %v8929_v53  ;;  %v4035_v56 = vmul.f32 %v8935_v55, %v8935_v55  ;;  %v8953_v11 = vsub.f32 %v8779_v42, %v8804_v2  ;;  %v8959_v61 = vsub.f32 %v8783_v25, %v8804_v2 }
 0x524   : > { %v4054_v5 = vadd.f32 %v4053_v8, %v4023_v46  ;;  %v4036_v30 = vmul.f32 %v8941_v49, %v8941_v49  ;;  %v4037_v16 = vmul.f32 %v8947_v36, %v8947_v36  ;;  %v4041_v25 = vmul.f32 %v8812_v12, %v8812_v12 }
 0x525   : > { %v4038_v8 = vmul.f32 %v8953_v11, %v8953_v11  ;;  %v4039_v42 = vmul.f32 %v8959_v61, %v8959_v61 }
 0x526   : > { %v4055_v50 = vadd.f32 %v4054_v5, %v4024_v47 }
 0x528   : > { %v4056_v60 = vadd.f32 %v4055_v50, %v4025_v54  ;;  %v4040_v54 = vmul.f32 %v8808_v6, %v8808_v6 }
 0x52a   : > { %v4057_v63 = vadd.f32 %v4056_v60, %v4026_v14  ;;  %v4042_v14 = vmul.f32 %v8815_v34, %v8815_v34 }
 0x52c   : > { %v4058_v39 = vadd.f32 %v4057_v63, %v4027_v35  ;;  %v4043_v35 = vmul.f32 %v8818_v51, %v8818_v51 }
 0x52e   : > { %v4059_v20 = vadd.f32 %v4058_v39, %v4028_v52  ;;  %v4044_v52 = vmul.f32 %v8821_v18, %v8821_v18 }
 0x530   : > { %v4060_v58 = vadd.f32 %v4059_v20, %v4029_v45  ;;  %v4045_v45 = vmul.f32 %v8824_v1, %v8824_v1 }
 0x532   : > { %v4061_v48 = vadd.f32 %v4060_v58, %v4030_v19  ;;  %v4046_v19 = vmul.f32 %v8827_v7, %v8827_v7 }
 0x534   : > { %v4062_v62 = vadd.f32 %v4061_v48, %v4031_v41  ;;  %v4047_v41 = vmul.f32 %v8830_v57, %v8830_v57 }
 0x536   : > { %v4063_v17 = vadd.f32 %v4062_v62, %v4032_v43  ;;  %v4048_v43 = vmul.f32 %v8833_v40, %v8833_v40 }
 0x538   : > { %v4064_v29 = vadd.f32 %v4063_v17, %v4033_v13  ;;  %v4049_v13 = vmul.f32 %v8836_v28, %v8836_v28 }
 0x53a   : > { %v4065_v44 = vadd.f32 %v4064_v29, %v4034_v4  ;;  %v4050_v4 = vmul.f32 %v8839_v31, %v8839_v31 }
 0x53c   : > { %v4066_v24 = vadd.f32 %v4065_v44, %v4035_v56 }
 0x53e   : > { %v4067_v46 = vadd.f32 %v4066_v24, %v4036_v30 }
 0x540   : > { %v4068_v47 = vadd.f32 %v4067_v46, %v4037_v16 }
 0x542   : > { %v4069_v5 = vadd.f32 %v4068_v47, %v4038_v8 }
 0x544   : > { %v4070_v50 = vadd.f32 %v4069_v5, %v4039_v42 }
 0x546   : > { %v4071_v2 = vadd.f32 %v4070_v50, %v4040_v54 }
 0x548   : > { %v4072_v60 = vadd.f32 %v4071_v2, %v4041_v25 }
 0x54a   : > { %v4073_v63 = vadd.f32 %v4072_v60, %v4042_v14 }
 0x54c   : > { %v4074_v39 = vadd.f32 %v4073_v63, %v4043_v35 }
 0x54e   : > { %v4075_v20 = vadd.f32 %v4074_v39, %v4044_v52  ;;  %v5187_v52 = vld [vmem:[%s5540_s30 + $0xf8] sm:$0xff] }
 0x550   : > { %v4076_v58 = vadd.f32 %v4075_v20, %v4045_v45  ;;  %v5191_v20 = vld [vmem:[%s5540_s30 + $0x18] sm:$0xff] }
 0x552   : > { %v4077_v48 = vadd.f32 %v4076_v58, %v4046_v19  ;;  %v5192_v19 = vld [vmem:[%s5540_s30 + $0x20] sm:$0xff]  ;;  %v5193_v58 = vld [vmem:[%s5540_s30 + $0x28] sm:$0xff] }
 0x554   : > { %v4078_v62 = vadd.f32 %v4077_v48, %v4047_v41  ;;  %v5194_v41 = vld [vmem:[%s5540_s30 + $0x30] sm:$0xff] }
 0x556   : > { %v4079_v17 = vadd.f32 %v4078_v62, %v4048_v43  ;;  %v5195_v43 = vld [vmem:[%s5540_s30 + $0x38] sm:$0xff] }
 0x558   : > { %v4080_v29 = vadd.f32 %v4079_v17, %v4049_v13  ;;  %v5196_v13 = vld [vmem:[%s5540_s30 + $0x40] sm:$0xff] }
 0x55a   : > { %v4081_v56 = vadd.f32 %v4080_v29, %v4050_v4  ;;  %v5197_v4 = vld [vmem:[%s5540_s30 + $0x48] sm:$0xff] }
 0x55c   : > { %v4082_v44 = vrot.slane %v4081_v56, 4 }
 0x55e   : > { %v4083_v30 = vadd.f32 %v4082_v44, %v4081_v56  ;;  %v5198_v56 = vld [vmem:[%s5540_s30 + $0x50] sm:$0xff] }
 0x560   : > { %v4084_v24 = vrot.slane %v4083_v30, 2 }
 0x562   : > { %v4085_v16 = vadd.f32 %v4084_v24, %v4083_v30  ;;  %v5199_v30 = vld [vmem:[%s5540_s30 + $0x58] sm:$0xff] }
 0x564   : > { %v4086_v46 = vrot.slane %v4085_v16, 1 }
 0x566   : > { %v4087_v8 = vadd.f32 %v4086_v46, %v4085_v16  ;;  %v5200_v16 = vld [vmem:[%s5540_s30 + $0x60] sm:$0xff] }
 0x568   : > { %v4088_v47 = vmul.f32 0.00390625, %v4087_v8  ;;  %v5201_v8 = vld [vmem:[%s5540_s30 + $0x68] sm:$0xff] }
 0x56a   : > { %v4089_v42 = vadd.f32 1e-05, %v4088_v47 }
 0x56c   : > { %5155 = vrsqrt.f32 %v4089_v42  ;;  %v5202_v42 = vld [vmem:[%s5540_s30 + $0x70] sm:$0xff] }
 0x579   : > { %v5156_v5 = vpop.eup %5155 }
 0x57a   : > { %v4122_v54 = vmul.f32 %v5156_v5, %v8839_v31  ;;  %v4091_v50 = vmul.f32 %v5156_v5, %v8843_v33  ;;  %v4092_v25 = vmul.f32 %v5156_v5, %v8847_v15  ;;  %v4093_v2 = vmul.f32 %v5156_v5, %v8851_v38 }
 0x57b   : > { %v4094_v14 = vmul.f32 %v5156_v5, %v8859_v9  ;;  %v4095_v60 = vmul.f32 %v5156_v5, %v8863_v23  ;;  %v4096_v35 = vmul.f32 %v5156_v5, %v8869_v22  ;;  %v4097_v63 = vmul.f32 %v5156_v5, %v8875_v3 }
 0x57c   : > { %v4154_v39 = vadd.f32 %v5187_v52, %v4122_v54  ;;  %v4098_v45 = vmul.f32 %v5156_v5, %v8881_v0  ;;  %v4099_v31 = vmul.f32 %v5156_v5, %v8887_v37  ;;  %v4100_v33 = vmul.f32 %v5156_v5, %v8893_v59  ;;  %v5203_v54 = vld [vmem:[%s5540_s30 + $0x78] sm:$0xff] }
 0x57d   : > { %v4101_v15 = vmul.f32 %v5156_v5, %v8899_v26  ;;  %v4102_v38 = vmul.f32 %v5156_v5, %v8905_v27  ;;  %v4103_v9 = vmul.f32 %v5156_v5, %v8911_v32  ;;  %v4104_v23 = vmul.f32 %v5156_v5, %v8917_v10  ;;  %v5207_v52 = vld [vmem:[%s5540_s30 + $0x98] sm:$0xff] }
 0x57e   : > { %4186 = vst [vmem:[%s9007_s18 + $0xf8] sm:$0xff] %v4154_v39  ;;  %v4105_v22 = vmul.f32 %v5156_v5, %v8923_v21  ;;  %v4106_v3 = vmul.f32 %v5156_v5, %v8929_v53  ;;  %v4107_v0 = vmul.f32 %v5156_v5, %v8935_v55  ;;  %v4108_v37 = vmul.f32 %v5156_v5, %v8941_v49 }
 0x57f   : > { %v4109_v59 = vmul.f32 %v5156_v5, %v8947_v36  ;;  %v9016_v26 = vmul.f32 %v5156_v5, %v8953_v11  ;;  %v9019_v27 = vmul.f32 %v5156_v5, %v8959_v61  ;;  %v9022_v32 = vmul.f32 %v5156_v5, %v8808_v6  ;;  %v5189_v11 = vld [vmem:[%s5540_s30 + $0x8] sm:$0xff]  ;;  %v5190_v61 = vld [vmem:[%s5540_s30 + $0x10] sm:$0xff] }
 0x580   : > { %v9025_v10 = vmul.f32 %v5156_v5, %v8812_v12  ;;  %v9028_v21 = vmul.f32 %v5156_v5, %v8815_v34  ;;  %v9031_v53 = vmul.f32 %v5156_v5, %v8818_v51  ;;  %v9034_v55 = vmul.f32 %v5156_v5, %v8821_v18  ;;  %v5188_v18 = vld [vmem:[%s5540_s30] sm:$0xff] }
 0x581   : > { %v9037_v49 = vmul.f32 %v5156_v5, %v8824_v1  ;;  %v9040_v6 = vmul.f32 %v5156_v5, %v8827_v7  ;;  %v9043_v12 = vmul.f32 %v5156_v5, %v8830_v57  ;;  %v9046_v34 = vmul.f32 %v5156_v5, %v8833_v40 }
 0x582   : > { %v9049_v51 = vmul.f32 %v5156_v5, %v8836_v28  ;;  %v4123_v36 = vadd.f32 %v5188_v18, %v4091_v50  ;;  %v4124_v1 = vadd.f32 %v5189_v11, %v4092_v25  ;;  %v4125_v7 = vadd.f32 %v5190_v61, %v4093_v2  ;;  %v5204_v25 = vld [vmem:[%s5540_s30 + $0x80] sm:$0xff]  ;;  %v5218_v18 = vld [vmem:[%s5540_s30 + $0xf0] sm:$0xff] }
 0x583   : > { %v4126_v57 = vadd.f32 %v5191_v20, %v4094_v14  ;;  %v4127_v40 = vadd.f32 %v5192_v19, %v4095_v60  ;;  %v4128_v28 = vadd.f32 %v5193_v58, %v4096_v35  ;;  %v4129_v48 = vadd.f32 %v5194_v41, %v4097_v63  ;;  %v5205_v14 = vld [vmem:[%s5540_s30 + $0x88] sm:$0xff]  ;;  %v5206_v35 = vld [vmem:[%s5540_s30 + $0x90] sm:$0xff] }
 0x584   : > { %v4130_v62 = vadd.f32 %v5195_v43, %v4098_v45  ;;  %v4131_v17 = vadd.f32 %v5196_v13, %v4099_v31  ;;  %v4132_v29 = vadd.f32 %v5197_v4, %v4100_v33  ;;  %v4133_v44 = vadd.f32 %v5198_v56, %v4101_v15  ;;  %4155 = vst [vmem:[%s9007_s18] sm:$0xff] %v4123_v36  ;;  %v5208_v45 = vld [vmem:[%s5540_s30 + $0xa0] sm:$0xff]  ;;  %v5209_v33 = vld [vmem:[%s5540_s30 + $0xa8] sm:$0xff] }
 0x585   : > { %4156 = vst [vmem:[%s9007_s18 + $0x8] sm:$0xff] %v4124_v1  ;;  %4157 = vst [vmem:[%s9007_s18 + $0x10] sm:$0xff] %v4125_v7  ;;  %v4134_v24 = vadd.f32 %v5199_v30, %v4102_v38  ;;  %v4135_v46 = vadd.f32 %v5200_v16, %v4103_v9  ;;  %v4136_v47 = vadd.f32 %v5201_v8, %v4104_v23  ;;  %v5210_v38 = vld [vmem:[%s5540_s30 + $0xb0] sm:$0xff]  ;;  %v5211_v23 = vld [vmem:[%s5540_s30 + $0xb8] sm:$0xff] }
 0x586   : > { %v4137_v5 = vadd.f32 %v5202_v42, %v4105_v22  ;;  %4158 = vst [vmem:[%s9007_s18 + $0x18] sm:$0xff] %v4126_v57  ;;  %4159 = vst [vmem:[%s9007_s18 + $0x20] sm:$0xff] %v4127_v40  ;;  %v4138_v50 = vadd.f32 %v5203_v54, %v4106_v3  ;;  %v4139_v2 = vadd.f32 %v5204_v25, %v4107_v0  ;;  %v5212_v3 = vld [vmem:[%s5540_s30 + $0xc0] sm:$0xff] }
 0x587   : > { %4160 = vst [vmem:[%s9007_s18 + $0x28] sm:$0xff] %v4128_v28  ;;  %4161 = vst [vmem:[%s9007_s18 + $0x30] sm:$0xff] %v4129_v48  ;;  %v4140_v60 = vadd.f32 %v5205_v14, %v4108_v37  ;;  %v4141_v63 = vadd.f32 %v5206_v35, %v4109_v59  ;;  %v4142_v39 = vadd.f32 %v5207_v52, %v9016_v26  ;;  %v5213_v37 = vld [vmem:[%s5540_s30 + $0xc8] sm:$0xff]  ;;  %v5214_v26 = vld [vmem:[%s5540_s30 + $0xd0] sm:$0xff] }
 0x588   : > { %4162 = vst [vmem:[%s9007_s18 + $0x38] sm:$0xff] %v4130_v62  ;;  %4163 = vst [vmem:[%s9007_s18 + $0x40] sm:$0xff] %v4131_v17  ;;  %v4143_v31 = vadd.f32 %v5208_v45, %v9019_v27  ;;  %v4144_v15 = vadd.f32 %v5209_v33, %v9022_v32  ;;  %v4145_v9 = vadd.f32 %v5210_v38, %v9025_v10  ;;  %v5215_v32 = vld [vmem:[%s5540_s30 + $0xd8] sm:$0xff] }
 0x589   : > { %4164 = vst [vmem:[%s9007_s18 + $0x48] sm:$0xff] %v4132_v29  ;;  %4165 = vst [vmem:[%s9007_s18 + $0x50] sm:$0xff] %v4133_v44  ;;  %v4146_v22 = vadd.f32 %v5211_v23, %v9028_v21  ;;  %v4147_v0 = vadd.f32 %v5212_v3, %v9031_v53  ;;  %v4148_v59 = vadd.f32 %v5213_v37, %v9034_v55  ;;  %v5216_v21 = vld [vmem:[%s5540_s30 + $0xe0] sm:$0xff]  ;;  %v5217_v55 = vld [vmem:[%s5540_s30 + $0xe8] sm:$0xff] }
 0x58a   : > { %4166 = vst [vmem:[%s9007_s18 + $0x58] sm:$0xff] %v4134_v24  ;;  %4167 = vst [vmem:[%s9007_s18 + $0x60] sm:$0xff] %v4135_v46  ;;  %v4149_v27 = vadd.f32 %v5214_v26, %v9037_v49  ;;  %v4150_v10 = vadd.f32 %v5215_v32, %v9040_v6  ;;  %v4151_v53 = vadd.f32 %v5216_v21, %v9043_v12 }
 0x58b   : > { %4168 = vst [vmem:[%s9007_s18 + $0x68] sm:$0xff] %v4136_v47  ;;  %4169 = vst [vmem:[%s9007_s18 + $0x70] sm:$0xff] %v4137_v5  ;;  %v4152_v49 = vadd.f32 %v5217_v55, %v9046_v34  ;;  %v4153_v36 = vadd.f32 %v5218_v18, %v9049_v51 }
 0x58c   : > { %4170 = vst [vmem:[%s9007_s18 + $0x78] sm:$0xff] %v4138_v50  ;;  %4171 = vst [vmem:[%s9007_s18 + $0x80] sm:$0xff] %v4139_v2 }
 0x58d   : > { %4172 = vst [vmem:[%s9007_s18 + $0x88] sm:$0xff] %v4140_v60  ;;  %4173 = vst [vmem:[%s9007_s18 + $0x90] sm:$0xff] %v4141_v63 }
 0x58e   : > { %4174 = vst [vmem:[%s9007_s18 + $0x98] sm:$0xff] %v4142_v39  ;;  %4175 = vst [vmem:[%s9007_s18 + $0xa0] sm:$0xff] %v4143_v31 }
 0x58f   : > { %4176 = vst [vmem:[%s9007_s18 + $0xa8] sm:$0xff] %v4144_v15  ;;  %4177 = vst [vmem:[%s9007_s18 + $0xb0] sm:$0xff] %v4145_v9 }
 0x590   : > { %4178 = vst [vmem:[%s9007_s18 + $0xb8] sm:$0xff] %v4146_v22  ;;  %4179 = vst [vmem:[%s9007_s18 + $0xc0] sm:$0xff] %v4147_v0 }
 0x591   : > { %4180 = vst [vmem:[%s9007_s18 + $0xc8] sm:$0xff] %v4148_v59  ;;  %4181 = vst [vmem:[%s9007_s18 + $0xd0] sm:$0xff] %v4149_v27 }
 0x592   : > { %4182 = vst [vmem:[%s9007_s18 + $0xd8] sm:$0xff] %v4150_v10  ;;  %4183 = vst [vmem:[%s9007_s18 + $0xe0] sm:$0xff] %v4151_v53 }
 0x593   : > { %4184 = vst [vmem:[%s9007_s18 + $0xe8] sm:$0xff] %v4152_v49  ;;  %4185 = vst [vmem:[%s9007_s18 + $0xf0] sm:$0xff] %v4153_v36 }
 0x594   : > { %5312 = shalt.err (!%p5309_p3)
}
 0x595   : > { %s5313_s17 = scalar_lea.hbm %s9112_s29, 4096  ;;  %s5317_s26 = scalar_lea.hbm %s9182_s3, 8192 }
 0x596   : > { %p5314_p11 = scmp.ne.s32.totalorder %s9112_s29, %s5313_s17  ;;  %p5318_p4 = scmp.lt.s32.totalorder %s9112_s29, %s9182_s3 }
 0x597   : > { %p5319_p6 = scmp.lt.s32.totalorder %s5317_s26, %s5313_s17 }
 0x598   : > { %p5315_p9 = pnand %p5314_p11, %p9828_p2 }
 0x599   : > { %p5320_p8 = por %p5319_p6, %p5318_p4 }
 0x59a   : > { %p5316_p1 = pneg %p5315_p9 }
 0x59c   : > { %p5321_p5 = pnand %p5320_p8, %p5316_p1 }
 0x59e   : > { %5324 = shalt.err (!%p5321_p5)
}
 0x59f   : > { %s5376_s30 = smov 128   ;;  %s5377_s18 = smov 8  }
 0x5a0   : > { %5091 = dma.vmem_to_hbm [thread:$0]  (%p9828_p2), %s9116_s27, 4096, %s9112_s29, %s4188_s16, %s5376_s30, %s5376_s30, %s5377_s18  }
 0x5a1 PF: > { %s4216_s20 = sand.u32 1, %s5355_s12   ;;  %p9829_p7 = scmp.ne.s32.totalorder %s9421_s19, 0 }
 0x5a2   : > { %p9830_p12 = scmp.ge.s32.totalorder %s5367_s15, 2  ;;  %s4217_s28 = scalar_lea.sflag [#allocation4], %s4216_s20 }
 0x5a4   : > { %p5105_p13 = pnand %p9830_p12, %p9829_p7 }
 0x5a6   : > { %p5106_p0 = pneg %p5105_p13 }
 0x5a8   : > { %5350 = dma.done.wait (%p5106_p0), %s4217_s28, 4096  }
 0x5a9   : > { %5352 = vsyncadd (%p5106_p0), %s4217_s28, 4294963200  ;;  %p17_p10 = scmp.ge.s32.totalorder %s5476_s7, 4   ;;  %s9831_s12 = smov %s5359_s13 }
 0x5aa   : > { %s9832_s13 = smov %s5363_s14  ;;  %s9833_s14 = smov %s5492_s11 }
 0x5ab   : > { %s9834_s15 = smov %s5476_s7  ;;  %19 = sbr.rel (!%p17_p10) target bundleno = 6 (0x6), region = 89 }
 0x5b0   :  { %4222 = vsyncpa [#allocation3], 1 }
 0x5b1   :  { %4224 = vsyncpa [#allocation3 + $0x1], 1 }
 0x5b2   :  { %4225 = vsyncpa [#allocation6], 1 }
 0x5b3   :  { %4226 = vsyncpa [#allocation4], 1 }
 0x5b4   :  { %4228 = vsyncpa [#allocation4 + $0x1], 1 }

</bundles_post_ra>
